<compile_context>
chip_gen: v7x
topology: tpu7x:2x2x1
jax: 0.10.0
libtpu: 0.0.40
codegen_flags: <defaults>
</compile_context>

<pallas_src>
import functools

import jax
import jax.numpy as jnp
from jax.experimental import pallas as pl
from jax.experimental.pallas import tpu as pltpu


# ----------------------------------------------------------------------------
# Stage 1 kernel: fused 1x1 projections (MXU, bf16->f32), phase modulation,
# depthwise 7-tap convs along W and H (VPU + lane rolls), global avg pool.
# One grid step per batch element; whole (C, HW) image resident in VMEM.
# ----------------------------------------------------------------------------
def _stage1_kernel(x_ref, wbig_ref, b_th_ref, b_tw_ref,
                   wa_h_ref, wb_h_ref, wa_w_ref, wb_w_ref,
                   mh_ref, mw_ref,
                   hwc_ref, pool_ref, *, width):
    f32 = jnp.float32
    C = b_th_ref.shape[0]
    Ch = C // 2
    HW = x_ref.shape[2]

    xt = x_ref[0]                                              # (C, HW) bf16

    # One fused (5C, C) @ (C, HW) projection on the MXU (bf16 in, f32 accum).
    # Row blocks: [theta_h | theta_w | fc_h | fc_w | fc_c]; the first four are
    # row-permuted to even-first channel order (see host-side prep).
    xp = jnp.dot(wbig_ref[...], xt, preferred_element_type=f32)   # (5C, HW) f32

    theta_h = jnp.maximum(xp[0:C] + b_th_ref[...], 0.0)        # BN folded, ReLU
    theta_w = jnp.maximum(xp[C:2 * C] + b_tw_ref[...], 0.0)
    x_h = xp[2 * C:3 * C]
    x_w = xp[3 * C:4 * C]
    c_b = xp[4 * C:5 * C]                                      # fc_c (natural order)

    def depthwise7(xv, theta, wa_ref, wb_ref, m_ref, step):
        # xv/theta channels are in even-first permuted order, so the PyTorch
        # grouped-conv input pairs (concat channels 2g, 2g+1) become the
        # contiguous halves of the cos/sin slabs below.
        cosm = xv * jnp.cos(theta)                             # f32 (C, HW)
        sinm = xv * jnp.sin(theta)
        a_s = jnp.concatenate([cosm[:Ch], sinm[:Ch]], axis=0)  # concat ch 2g
        b_s = jnp.concatenate([cosm[Ch:], sinm[Ch:]], axis=0)  # concat ch 2g+1
        acc = jnp.zeros((C, HW), f32)
        for k in range(7):
            d = (k - 3) * step                 # spatial offset, flattened index
            if d == 0:
                acc = acc + a_s * wa_ref[k] + b_s * wb_ref[k]
            else:
                sh = (-d) % HW                 # pltpu.roll follows jnp.roll
                ra = pltpu.roll(a_s, sh, axis=1)
                rb = pltpu.roll(b_s, sh, axis=1)
                acc = acc + (ra * wa_ref[k] + rb * wb_ref[k]) * m_ref[k]
        return acc

    h_acc = depthwise7(x_h, theta_h, wa_h_ref, wb_h_ref, mh_ref, 1)      # (1,7) along W
    w_acc = depthwise7(x_w, theta_w, wa_w_ref, wb_w_ref, mw_ref, width)  # (7,1) along H

    # adaptive_avg_pool2d(h + w + c, 1): per-channel spatial mean (f32)
    total = h_acc + w_acc + c_b
    pool_ref[0] = jnp.sum(total, axis=1, keepdims=True) * (1.0 / HW)

    # single lane-dense bf16 handoff tensor [h | w | c] along channels
    hwc_ref[0] = jnp.concatenate([h_acc, w_acc, c_b], axis=0).astype(hwc_ref.dtype)


# ----------------------------------------------------------------------------
# Stage 2 kernel: gated combine h*a0 + w*a1 + c*a2 and final 1x1 projection.
# ----------------------------------------------------------------------------
def _stage2_kernel(hwc_ref, gate_ref, wproj_ref, bproj_ref, out_ref):
    f32 = jnp.float32
    C = bproj_ref.shape[0]

    hwc = hwc_ref[0].astype(f32)                               # (3C, HW)
    g = gate_ref[0]                                            # (3C, 1) f32
    y = (hwc[0:C] * g[0:C]
         + hwc[C:2 * C] * g[C:2 * C]
         + hwc[2 * C:3 * C] * g[2 * C:3 * C])

    out = jnp.dot(wproj_ref[...], y.astype(wproj_ref.dtype),
                  preferred_element_type=f32) + bproj_ref[...]
    out_ref[0] = out.astype(out_ref.dtype)


# ----------------------------------------------------------------------------
# pallas_call wrappers
# ----------------------------------------------------------------------------
def _full_spec(shape):
    return pl.BlockSpec(shape, lambda b: (0,) * len(shape))


def _stage1_call(x_bf16, w_big, b_th, b_tw, wa_h, wb_h, wa_w, wb_w,
                 mask_h, mask_w, *, width):
    B, C, HW = x_bf16.shape
    kern = functools.partial(_stage1_kernel, width=width)
    return pl.pallas_call(
        kern,
        out_shape=(jax.ShapeDtypeStruct((B, 3 * C, HW), jnp.bfloat16),  # [h|w|c]
                   jax.ShapeDtypeStruct((B, C, 1), jnp.float32)),       # pooled mean
        grid=(B,),
        in_specs=[pl.BlockSpec((1, C, HW), lambda b: (b, 0, 0)),
                  _full_spec((5 * C, C)),
                  _full_spec((C, 1)), _full_spec((C, 1)),
                  _full_spec((7, C, 1)), _full_spec((7, C, 1)),
                  _full_spec((7, C, 1)), _full_spec((7, C, 1)),
                  _full_spec((7, 1, HW)), _full_spec((7, 1, HW))],
        out_specs=(pl.BlockSpec((1, 3 * C, HW), lambda b: (b, 0, 0)),
                   pl.BlockSpec((1, C, 1), lambda b: (b, 0, 0))),
        compiler_params=pltpu.CompilerParams(
            dimension_semantics=("parallel",),
            vmem_limit_bytes=32 * 1024 * 1024),
    )(x_bf16, w_big, b_th, b_tw, wa_h, wb_h, wa_w, wb_w, mask_h, mask_w)


def _stage2_call(hwc, gate, w_proj, b_proj):
    B, C3, HW = hwc.shape
    C = C3 // 3
    return pl.pallas_call(
        _stage2_kernel,
        out_shape=jax.ShapeDtypeStruct((B, C, HW), jnp.float32),
        grid=(B,),
        in_specs=[pl.BlockSpec((1, 3 * C, HW), lambda b: (b, 0, 0)),
                  pl.BlockSpec((1, 3 * C, 1), lambda b: (b, 0, 0)),
                  _full_spec((C, C)),
                  _full_spec((C, 1))],
        out_specs=pl.BlockSpec((1, C, HW), lambda b: (b, 0, 0)),
        compiler_params=pltpu.CompilerParams(
            dimension_semantics=("parallel",),
            vmem_limit_bytes=32 * 1024 * 1024),
    )(hwc, gate, w_proj, b_proj)


# ----------------------------------------------------------------------------
# Host-side parameter preparation (weight fusion / permutation / tap layout)
# ----------------------------------------------------------------------------
def _prep_stage1_weights(p, C, H, W, bn_eps):
    Ch = C // 2
    perm = jnp.concatenate([jnp.arange(0, C, 2), jnp.arange(1, C, 2)])  # even|odd

    def m1x1(w):                     # (Cout, Cin, 1, 1) -> (Cout, Cin)
        return w[:, :, 0, 0]

    def fold_bn(conv_w, conv_b, gamma, beta, mean, var):
        scale = gamma / jnp.sqrt(var + bn_eps)
        wm = m1x1(conv_w) * scale[:, None]
        bm = (conv_b - mean) * scale + beta
        return wm, bm

    w_th, b_th = fold_bn(p['theta_h_conv_w'], p['theta_h_conv_b'],
                         p['theta_h_bn_gamma'], p['theta_h_bn_beta'],
                         p['theta_h_bn_mean'], p['theta_h_bn_var'])
    w_tw, b_tw = fold_bn(p['theta_w_conv_w'], p['theta_w_conv_b'],
                         p['theta_w_bn_gamma'], p['theta_w_bn_beta'],
                         p['theta_w_bn_mean'], p['theta_w_bn_var'])

    # fused projection weight (bf16 MXU operand); fc_c stays in natural order
    w_big = jnp.concatenate(
        [w_th[perm], w_tw[perm],
         m1x1(p['fc_h_w'])[perm], m1x1(p['fc_w_w'])[perm],
         m1x1(p['fc_c_w'])], axis=0).astype(jnp.bfloat16)        # (5C, C)
    b_th_p = b_th[perm].reshape(C, 1).astype(jnp.float32)
    b_tw_p = b_tw[perm].reshape(C, 1).astype(jnp.float32)

    # grouped-conv tap weights indexed by natural output channel g:
    #   wa[k, g] multiplies concat channel 2g, wb[k, g] multiplies 2g+1
    wh = p['tfc_h_w'][:, :, 0, :]            # (C, 2, 7)  -- (1,7) kernel
    ww = p['tfc_w_w'][:, :, :, 0]            # (C, 2, 7)  -- (7,1) kernel
    wa_h = wh[:, 0, :].T.reshape(7, C, 1).astype(jnp.float32)
    wb_h = wh[:, 1, :].T.reshape(7, C, 1).astype(jnp.float32)
    wa_w = ww[:, 0, :].T.reshape(7, C, 1).astype(jnp.float32)
    wb_w = ww[:, 1, :].T.reshape(7, C, 1).astype(jnp.float32)

    # per-tap zero-padding masks over the flattened spatial index r = y*W + x
    r = jnp.arange(H * W)
    xpos = r % W
    ypos = r // W
    mask_h = jnp.stack(
        [((xpos + (k - 3) >= 0) & (xpos + (k - 3) < W)) for k in range(7)])
    mask_w = jnp.stack(
        [((ypos + (k - 3) >= 0) & (ypos + (k - 3) < H)) for k in range(7)])
    mask_h = mask_h.astype(jnp.float32).reshape(7, 1, H * W)
    mask_w = mask_w.astype(jnp.float32).reshape(7, 1, H * W)

    return (w_big, b_th_p, b_tw_p, wa_h, wb_h, wa_w, wb_w, mask_h, mask_w)


# ----------------------------------------------------------------------------
# Parameter construction (deterministic, synthetic) and full forward pass
# ----------------------------------------------------------------------------
def init_patm_params(key, dim):
    C = dim
    ks = jax.random.split(key, 23)

    def nrm(k, shape, scale=0.1):
        return scale * jax.random.normal(k, shape, jnp.float32)

    return {
        'fc_h_w': nrm(ks[0], (C, C, 1, 1)),
        'fc_w_w': nrm(ks[1], (C, C, 1, 1)),
        'fc_c_w': nrm(ks[2], (C, C, 1, 1)),
        'tfc_h_w': nrm(ks[3], (C, 2, 1, 7)),
        'tfc_w_w': nrm(ks[4], (C, 2, 7, 1)),
        'theta_h_conv_w': nrm(ks[5], (C, C, 1, 1)),
        'theta_h_conv_b': nrm(ks[6], (C,)),
        'theta_h_bn_gamma': 1.0 + nrm(ks[7], (C,)),
        'theta_h_bn_beta': nrm(ks[8], (C,)),
        'theta_h_bn_mean': nrm(ks[9], (C,)),
        'theta_h_bn_var': 1.0 + jnp.abs(nrm(ks[10], (C,))),
        'theta_w_conv_w': nrm(ks[11], (C, C, 1, 1)),
        'theta_w_conv_b': nrm(ks[12], (C,)),
        'theta_w_bn_gamma': 1.0 + nrm(ks[13], (C,)),
        'theta_w_bn_beta': nrm(ks[14], (C,)),
        'theta_w_bn_mean': nrm(ks[15], (C,)),
        'theta_w_bn_var': 1.0 + jnp.abs(nrm(ks[16], (C,))),
        'rw_fc1_w': nrm(ks[17], (C // 4, C, 1, 1)),
        'rw_fc1_b': nrm(ks[18], (C // 4,)),
        'rw_fc2_w': nrm(ks[19], (3 * C, C // 4, 1, 1)),
        'rw_fc2_b': nrm(ks[20], (3 * C,)),
        'proj_w': nrm(ks[21], (C, C, 1, 1)),
        'proj_b': nrm(ks[22], (C,)),
    }


def patm_forward(x_nchw, p, bn_eps=1e-5):
    B, C, H, W = x_nchw.shape
    assert C % 16 == 0, "this kernel expects the channel dim to be a multiple of 16"
    HW = H * W

    stage1_w = _prep_stage1_weights(p, C, H, W, bn_eps)
    # matmul operands in bf16 (f32 accumulation in-kernel); halves input DMA.
    x = x_nchw.reshape(B, C, HW).astype(jnp.bfloat16)

    # --- stage 1: fused projections + phase modulation + depthwise 7-tap convs ---
    hwc, pooled = _stage1_call(x, *stage1_w, width=W)

    # --- reweight MLP + 3-way softmax on pooled (B, C) vectors (tiny; JAX glue
    #     in the same jit).  TODO(synk): could be fused into the stage-2 kernel.
    a = pooled[:, :, 0]                                            # (B, C) f32
    z = jnp.dot(a, p['rw_fc1_w'][:, :, 0, 0].T) + p['rw_fc1_b']
    z = jax.nn.gelu(z, approximate=False)                          # exact (erf) GELU
    z = jnp.dot(z, p['rw_fc2_w'][:, :, 0, 0].T) + p['rw_fc2_b']    # (B, 3C)
    gate = jax.nn.softmax(z.reshape(B, C, 3), axis=-1)             # softmax over the 3
    gate = jnp.transpose(gate, (0, 2, 1)).reshape(B, 3 * C, 1)     # [a0|a1|a2] blocks
    gate = gate.astype(jnp.float32)

    # --- stage 2: gated combine + final 1x1 projection ---
    out = _stage2_call(hwc, gate,
                       p['proj_w'][:, :, 0, 0].astype(jnp.bfloat16),
                       p['proj_b'].reshape(C, 1).astype(jnp.float32))
    return out.reshape(B, C, H, W)                                 # NCHW, f32


if __name__ == "__main__":
    B, C, H, W = 2, 32, 16, 16
    key = jax.random.PRNGKey(0)
    kx, kp = jax.random.split(key)
    x = jax.random.normal(kx, (B, C, H, W), jnp.float32)
    params = init_patm_params(kp, C)

    out = jax.jit(patm_forward)(x, params)
    out = jax.block_until_ready(out)
    assert out.shape == (B, C, H, W)
    assert jnp.all(jnp.isfinite(out))
    print("KERNEL_OK")
</pallas_src>

<mosaic_0001>
module attributes {stable_mosaic.version = 11 : i64} {
  func.func @_stage1_kernel(%arg0: i32, %arg1: memref<1x32x256xbf16, #tpu.memory_space<vmem>>, %arg2: memref<160x32xbf16, #tpu.memory_space<vmem>>, %arg3: memref<32x1xf32, #tpu.memory_space<vmem>>, %arg4: memref<32x1xf32, #tpu.memory_space<vmem>>, %arg5: memref<7x32x1xf32, #tpu.memory_space<vmem>>, %arg6: memref<7x32x1xf32, #tpu.memory_space<vmem>>, %arg7: memref<7x32x1xf32, #tpu.memory_space<vmem>>, %arg8: memref<7x32x1xf32, #tpu.memory_space<vmem>>, %arg9: memref<7x1x256xf32, #tpu.memory_space<vmem>>, %arg10: memref<7x1x256xf32, #tpu.memory_space<vmem>>, %arg11: memref<1x96x256xbf16, #tpu.memory_space<vmem>>, %arg12: memref<1x32x1xf32, #tpu.memory_space<vmem>>) attributes {dimension_semantics = [#tpu.dimension_semantics<parallel>], iteration_bounds = array<i64: 2>, scalar_prefetch = 0 : i64, scratch_operands = 0 : i64, tpu.core_type = #tpu.core_type<tc>, window_params = [{transform_indices = @transform_0, window_bounds = array<i64: 1, 32, 256>}, {pipeline_mode = #tpu.pipeline_mode<synchronous>, transform_indices = @transform_1, window_bounds = array<i64: 160, 32>}, {pipeline_mode = #tpu.pipeline_mode<synchronous>, transform_indices = @transform_2, window_bounds = array<i64: 32, 1>}, {pipeline_mode = #tpu.pipeline_mode<synchronous>, transform_indices = @transform_3, window_bounds = array<i64: 32, 1>}, {pipeline_mode = #tpu.pipeline_mode<synchronous>, transform_indices = @transform_4, window_bounds = array<i64: 7, 32, 1>}, {pipeline_mode = #tpu.pipeline_mode<synchronous>, transform_indices = @transform_5, window_bounds = array<i64: 7, 32, 1>}, {pipeline_mode = #tpu.pipeline_mode<synchronous>, transform_indices = @transform_6, window_bounds = array<i64: 7, 32, 1>}, {pipeline_mode = #tpu.pipeline_mode<synchronous>, transform_indices = @transform_7, window_bounds = array<i64: 7, 32, 1>}, {pipeline_mode = #tpu.pipeline_mode<synchronous>, transform_indices = @transform_8, window_bounds = array<i64: 7, 1, 256>}, {pipeline_mode = #tpu.pipeline_mode<synchronous>, transform_indices = @transform_9, window_bounds = array<i64: 7, 1, 256>}, {transform_indices = @transform_10, window_bounds = array<i64: 1, 96, 256>}, {transform_indices = @transform_11, window_bounds = array<i64: 1, 32, 1>}]} {
    %c0 = arith.constant 0 : index
    %c0_0 = arith.constant 0 : index
    %c0_1 = arith.constant 0 : index
    %0 = vector.load %arg1[%c0, %c0_0, %c0_1] : memref<1x32x256xbf16, #tpu.memory_space<vmem>>, vector<1x32x256xbf16>
    %1 = vector.shape_cast %0 : vector<1x32x256xbf16> to vector<32x256xbf16>
    %c0_2 = arith.constant 0 : index
    %c0_3 = arith.constant 0 : index
    %2 = vector.load %arg2[%c0_2, %c0_3] : memref<160x32xbf16, #tpu.memory_space<vmem>>, vector<160x32xbf16>
    %cst = arith.constant dense<0.000000e+00> : vector<160x256xf32>
    %3 = tpu.matmul %2, %1, %cst {dimension_numbers = #tpu.dot_dimension_numbers<[1], [0], [0], [1], [0, 0, 1, 1], [], []>} : vector<160x32xbf16>, vector<32x256xbf16>, vector<160x256xf32> -> vector<160x256xf32>
    %4 = vector.extract_strided_slice %3 {offsets = [0, 0], sizes = [32, 256], strides = [1, 1]} : vector<160x256xf32> to vector<32x256xf32>
    %c0_4 = arith.constant 0 : index
    %c0_5 = arith.constant 0 : index
    %5 = vector.load %arg3[%c0_4, %c0_5] : memref<32x1xf32, #tpu.memory_space<vmem>>, vector<32x1xf32>
    %6 = vector.broadcast %5 : vector<32x1xf32> to vector<32x256xf32>
    %7 = arith.addf %4, %6 : vector<32x256xf32>
    %cst_6 = arith.constant 0.000000e+00 : f32
    %8 = vector.broadcast %cst_6 : f32 to vector<32x256xf32>
    %9 = arith.maximumf %7, %8 : vector<32x256xf32>
    %10 = vector.extract_strided_slice %3 {offsets = [32, 0], sizes = [32, 256], strides = [1, 1]} : vector<160x256xf32> to vector<32x256xf32>
    %c0_7 = arith.constant 0 : index
    %c0_8 = arith.constant 0 : index
    %11 = vector.load %arg4[%c0_7, %c0_8] : memref<32x1xf32, #tpu.memory_space<vmem>>, vector<32x1xf32>
    %12 = vector.broadcast %11 : vector<32x1xf32> to vector<32x256xf32>
    %13 = arith.addf %10, %12 : vector<32x256xf32>
    %cst_9 = arith.constant 0.000000e+00 : f32
    %14 = vector.broadcast %cst_9 : f32 to vector<32x256xf32>
    %15 = arith.maximumf %13, %14 : vector<32x256xf32>
    %16 = vector.extract_strided_slice %3 {offsets = [64, 0], sizes = [32, 256], strides = [1, 1]} : vector<160x256xf32> to vector<32x256xf32>
    %17 = vector.extract_strided_slice %3 {offsets = [96, 0], sizes = [32, 256], strides = [1, 1]} : vector<160x256xf32> to vector<32x256xf32>
    %18 = vector.extract_strided_slice %3 {offsets = [128, 0], sizes = [32, 256], strides = [1, 1]} : vector<160x256xf32> to vector<32x256xf32>
    %19 = math.cos %9 : vector<32x256xf32>
    %20 = arith.mulf %16, %19 : vector<32x256xf32>
    %21 = math.sin %9 : vector<32x256xf32>
    %22 = arith.mulf %16, %21 : vector<32x256xf32>
    %23 = vector.extract_strided_slice %20 {offsets = [0, 0], sizes = [16, 256], strides = [1, 1]} : vector<32x256xf32> to vector<16x256xf32>
    %24 = vector.extract_strided_slice %22 {offsets = [0, 0], sizes = [16, 256], strides = [1, 1]} : vector<32x256xf32> to vector<16x256xf32>
    %25 = tpu.concatenate %23, %24 in 0 : vector<16x256xf32>, vector<16x256xf32> -> vector<32x256xf32>
    %26 = vector.extract_strided_slice %20 {offsets = [16, 0], sizes = [16, 256], strides = [1, 1]} : vector<32x256xf32> to vector<16x256xf32>
    %27 = vector.extract_strided_slice %22 {offsets = [16, 0], sizes = [16, 256], strides = [1, 1]} : vector<32x256xf32> to vector<16x256xf32>
    %28 = tpu.concatenate %26, %27 in 0 : vector<16x256xf32>, vector<16x256xf32> -> vector<32x256xf32>
    %cst_10 = arith.constant 0.000000e+00 : f32
    %29 = vector.broadcast %cst_10 : f32 to vector<32x256xf32>
    %c3_i32 = arith.constant 3 : i32
    %30 = tpu.dynamic_rotate %25 by %c3_i32 dim 1 : vector<32x256xf32>, i32 -> vector<32x256xf32>
    %c3_i32_11 = arith.constant 3 : i32
    %31 = tpu.dynamic_rotate %28 by %c3_i32_11 dim 1 : vector<32x256xf32>, i32 -> vector<32x256xf32>
    %c0_12 = arith.constant 0 : index
    %c0_13 = arith.constant 0 : index
    %c0_14 = arith.constant 0 : index
    %32 = vector.load %arg5[%c0_12, %c0_13, %c0_14] : memref<7x32x1xf32, #tpu.memory_space<vmem>>, vector<1x32x1xf32>
    %33 = vector.shape_cast %32 : vector<1x32x1xf32> to vector<32x1xf32>
    %34 = vector.broadcast %33 : vector<32x1xf32> to vector<32x256xf32>
    %35 = arith.mulf %30, %34 : vector<32x256xf32>
    %c0_15 = arith.constant 0 : index
    %c0_16 = arith.constant 0 : index
    %c0_17 = arith.constant 0 : index
    %36 = vector.load %arg6[%c0_15, %c0_16, %c0_17] : memref<7x32x1xf32, #tpu.memory_space<vmem>>, vector<1x32x1xf32>
    %37 = vector.shape_cast %36 : vector<1x32x1xf32> to vector<32x1xf32>
    %38 = vector.broadcast %37 : vector<32x1xf32> to vector<32x256xf32>
    %39 = arith.mulf %31, %38 : vector<32x256xf32>
    %40 = arith.addf %35, %39 : vector<32x256xf32>
    %c0_18 = arith.constant 0 : index
    %c0_19 = arith.constant 0 : index
    %c0_20 = arith.constant 0 : index
    %41 = vector.load %arg9[%c0_18, %c0_19, %c0_20] : memref<7x1x256xf32, #tpu.memory_space<vmem>>, vector<1x1x256xf32>
    %42 = vector.shape_cast %41 : vector<1x1x256xf32> to vector<1x256xf32>
    %43 = vector.broadcast %42 : vector<1x256xf32> to vector<32x256xf32>
    %44 = arith.mulf %40, %43 : vector<32x256xf32>
    %45 = arith.addf %29, %44 : vector<32x256xf32>
    %c2_i32 = arith.constant 2 : i32
    %46 = tpu.dynamic_rotate %25 by %c2_i32 dim 1 : vector<32x256xf32>, i32 -> vector<32x256xf32>
    %c2_i32_21 = arith.constant 2 : i32
    %47 = tpu.dynamic_rotate %28 by %c2_i32_21 dim 1 : vector<32x256xf32>, i32 -> vector<32x256xf32>
    %c1 = arith.constant 1 : index
    %c0_22 = arith.constant 0 : index
    %c0_23 = arith.constant 0 : index
    %48 = vector.load %arg5[%c1, %c0_22, %c0_23] : memref<7x32x1xf32, #tpu.memory_space<vmem>>, vector<1x32x1xf32>
    %49 = vector.shape_cast %48 : vector<1x32x1xf32> to vector<32x1xf32>
    %50 = vector.broadcast %49 : vector<32x1xf32> to vector<32x256xf32>
    %51 = arith.mulf %46, %50 : vector<32x256xf32>
    %c1_24 = arith.constant 1 : index
    %c0_25 = arith.constant 0 : index
    %c0_26 = arith.constant 0 : index
    %52 = vector.load %arg6[%c1_24, %c0_25, %c0_26] : memref<7x32x1xf32, #tpu.memory_space<vmem>>, vector<1x32x1xf32>
    %53 = vector.shape_cast %52 : vector<1x32x1xf32> to vector<32x1xf32>
    %54 = vector.broadcast %53 : vector<32x1xf32> to vector<32x256xf32>
    %55 = arith.mulf %47, %54 : vector<32x256xf32>
    %56 = arith.addf %51, %55 : vector<32x256xf32>
    %c1_27 = arith.constant 1 : index
    %c0_28 = arith.constant 0 : index
    %c0_29 = arith.constant 0 : index
    %57 = vector.load %arg9[%c1_27, %c0_28, %c0_29] : memref<7x1x256xf32, #tpu.memory_space<vmem>>, vector<1x1x256xf32>
    %58 = vector.shape_cast %57 : vector<1x1x256xf32> to vector<1x256xf32>
    %59 = vector.broadcast %58 : vector<1x256xf32> to vector<32x256xf32>
    %60 = arith.mulf %56, %59 : vector<32x256xf32>
    %61 = arith.addf %45, %60 : vector<32x256xf32>
    %c1_i32 = arith.constant 1 : i32
    %62 = tpu.dynamic_rotate %25 by %c1_i32 dim 1 : vector<32x256xf32>, i32 -> vector<32x256xf32>
    %c1_i32_30 = arith.constant 1 : i32
    %63 = tpu.dynamic_rotate %28 by %c1_i32_30 dim 1 : vector<32x256xf32>, i32 -> vector<32x256xf32>
    %c2 = arith.constant 2 : index
    %c0_31 = arith.constant 0 : index
    %c0_32 = arith.constant 0 : index
    %64 = vector.load %arg5[%c2, %c0_31, %c0_32] : memref<7x32x1xf32, #tpu.memory_space<vmem>>, vector<1x32x1xf32>
    %65 = vector.shape_cast %64 : vector<1x32x1xf32> to vector<32x1xf32>
    %66 = vector.broadcast %65 : vector<32x1xf32> to vector<32x256xf32>
    %67 = arith.mulf %62, %66 : vector<32x256xf32>
    %c2_33 = arith.constant 2 : index
    %c0_34 = arith.constant 0 : index
    %c0_35 = arith.constant 0 : index
    %68 = vector.load %arg6[%c2_33, %c0_34, %c0_35] : memref<7x32x1xf32, #tpu.memory_space<vmem>>, vector<1x32x1xf32>
    %69 = vector.shape_cast %68 : vector<1x32x1xf32> to vector<32x1xf32>
    %70 = vector.broadcast %69 : vector<32x1xf32> to vector<32x256xf32>
    %71 = arith.mulf %63, %70 : vector<32x256xf32>
    %72 = arith.addf %67, %71 : vector<32x256xf32>
    %c2_36 = arith.constant 2 : index
    %c0_37 = arith.constant 0 : index
    %c0_38 = arith.constant 0 : index
    %73 = vector.load %arg9[%c2_36, %c0_37, %c0_38] : memref<7x1x256xf32, #tpu.memory_space<vmem>>, vector<1x1x256xf32>
    %74 = vector.shape_cast %73 : vector<1x1x256xf32> to vector<1x256xf32>
    %75 = vector.broadcast %74 : vector<1x256xf32> to vector<32x256xf32>
    %76 = arith.mulf %72, %75 : vector<32x256xf32>
    %77 = arith.addf %61, %76 : vector<32x256xf32>
    %c3 = arith.constant 3 : index
    %c0_39 = arith.constant 0 : index
    %c0_40 = arith.constant 0 : index
    %78 = vector.load %arg5[%c3, %c0_39, %c0_40] : memref<7x32x1xf32, #tpu.memory_space<vmem>>, vector<1x32x1xf32>
    %79 = vector.shape_cast %78 : vector<1x32x1xf32> to vector<32x1xf32>
    %80 = vector.broadcast %79 : vector<32x1xf32> to vector<32x256xf32>
    %81 = arith.mulf %25, %80 : vector<32x256xf32>
    %82 = arith.addf %77, %81 : vector<32x256xf32>
    %c3_41 = arith.constant 3 : index
    %c0_42 = arith.constant 0 : index
    %c0_43 = arith.constant 0 : index
    %83 = vector.load %arg6[%c3_41, %c0_42, %c0_43] : memref<7x32x1xf32, #tpu.memory_space<vmem>>, vector<1x32x1xf32>
    %84 = vector.shape_cast %83 : vector<1x32x1xf32> to vector<32x1xf32>
    %85 = vector.broadcast %84 : vector<32x1xf32> to vector<32x256xf32>
    %86 = arith.mulf %28, %85 : vector<32x256xf32>
    %87 = arith.addf %82, %86 : vector<32x256xf32>
    %c255_i32 = arith.constant 255 : i32
    %88 = tpu.dynamic_rotate %25 by %c255_i32 dim 1 : vector<32x256xf32>, i32 -> vector<32x256xf32>
    %c255_i32_44 = arith.constant 255 : i32
    %89 = tpu.dynamic_rotate %28 by %c255_i32_44 dim 1 : vector<32x256xf32>, i32 -> vector<32x256xf32>
    %c4 = arith.constant 4 : index
    %c0_45 = arith.constant 0 : index
    %c0_46 = arith.constant 0 : index
    %90 = vector.load %arg5[%c4, %c0_45, %c0_46] : memref<7x32x1xf32, #tpu.memory_space<vmem>>, vector<1x32x1xf32>
    %91 = vector.shape_cast %90 : vector<1x32x1xf32> to vector<32x1xf32>
    %92 = vector.broadcast %91 : vector<32x1xf32> to vector<32x256xf32>
    %93 = arith.mulf %88, %92 : vector<32x256xf32>
    %c4_47 = arith.constant 4 : index
    %c0_48 = arith.constant 0 : index
    %c0_49 = arith.constant 0 : index
    %94 = vector.load %arg6[%c4_47, %c0_48, %c0_49] : memref<7x32x1xf32, #tpu.memory_space<vmem>>, vector<1x32x1xf32>
    %95 = vector.shape_cast %94 : vector<1x32x1xf32> to vector<32x1xf32>
    %96 = vector.broadcast %95 : vector<32x1xf32> to vector<32x256xf32>
    %97 = arith.mulf %89, %96 : vector<32x256xf32>
    %98 = arith.addf %93, %97 : vector<32x256xf32>
    %c4_50 = arith.constant 4 : index
    %c0_51 = arith.constant 0 : index
    %c0_52 = arith.constant 0 : index
    %99 = vector.load %arg9[%c4_50, %c0_51, %c0_52] : memref<7x1x256xf32, #tpu.memory_space<vmem>>, vector<1x1x256xf32>
    %100 = vector.shape_cast %99 : vector<1x1x256xf32> to vector<1x256xf32>
    %101 = vector.broadcast %100 : vector<1x256xf32> to vector<32x256xf32>
    %102 = arith.mulf %98, %101 : vector<32x256xf32>
    %103 = arith.addf %87, %102 : vector<32x256xf32>
    %c254_i32 = arith.constant 254 : i32
    %104 = tpu.dynamic_rotate %25 by %c254_i32 dim 1 : vector<32x256xf32>, i32 -> vector<32x256xf32>
    %c254_i32_53 = arith.constant 254 : i32
    %105 = tpu.dynamic_rotate %28 by %c254_i32_53 dim 1 : vector<32x256xf32>, i32 -> vector<32x256xf32>
    %c5 = arith.constant 5 : index
    %c0_54 = arith.constant 0 : index
    %c0_55 = arith.constant 0 : index
    %106 = vector.load %arg5[%c5, %c0_54, %c0_55] : memref<7x32x1xf32, #tpu.memory_space<vmem>>, vector<1x32x1xf32>
    %107 = vector.shape_cast %106 : vector<1x32x1xf32> to vector<32x1xf32>
    %108 = vector.broadcast %107 : vector<32x1xf32> to vector<32x256xf32>
    %109 = arith.mulf %104, %108 : vector<32x256xf32>
    %c5_56 = arith.constant 5 : index
    %c0_57 = arith.constant 0 : index
    %c0_58 = arith.constant 0 : index
    %110 = vector.load %arg6[%c5_56, %c0_57, %c0_58] : memref<7x32x1xf32, #tpu.memory_space<vmem>>, vector<1x32x1xf32>
    %111 = vector.shape_cast %110 : vector<1x32x1xf32> to vector<32x1xf32>
    %112 = vector.broadcast %111 : vector<32x1xf32> to vector<32x256xf32>
    %113 = arith.mulf %105, %112 : vector<32x256xf32>
    %114 = arith.addf %109, %113 : vector<32x256xf32>
    %c5_59 = arith.constant 5 : index
    %c0_60 = arith.constant 0 : index
    %c0_61 = arith.constant 0 : index
    %115 = vector.load %arg9[%c5_59, %c0_60, %c0_61] : memref<7x1x256xf32, #tpu.memory_space<vmem>>, vector<1x1x256xf32>
    %116 = vector.shape_cast %115 : vector<1x1x256xf32> to vector<1x256xf32>
    %117 = vector.broadcast %116 : vector<1x256xf32> to vector<32x256xf32>
    %118 = arith.mulf %114, %117 : vector<32x256xf32>
    %119 = arith.addf %103, %118 : vector<32x256xf32>
    %c253_i32 = arith.constant 253 : i32
    %120 = tpu.dynamic_rotate %25 by %c253_i32 dim 1 : vector<32x256xf32>, i32 -> vector<32x256xf32>
    %c253_i32_62 = arith.constant 253 : i32
    %121 = tpu.dynamic_rotate %28 by %c253_i32_62 dim 1 : vector<32x256xf32>, i32 -> vector<32x256xf32>
    %c6 = arith.constant 6 : index
    %c0_63 = arith.constant 0 : index
    %c0_64 = arith.constant 0 : index
    %122 = vector.load %arg5[%c6, %c0_63, %c0_64] : memref<7x32x1xf32, #tpu.memory_space<vmem>>, vector<1x32x1xf32>
    %123 = vector.shape_cast %122 : vector<1x32x1xf32> to vector<32x1xf32>
    %124 = vector.broadcast %123 : vector<32x1xf32> to vector<32x256xf32>
    %125 = arith.mulf %120, %124 : vector<32x256xf32>
    %c6_65 = arith.constant 6 : index
    %c0_66 = arith.constant 0 : index
    %c0_67 = arith.constant 0 : index
    %126 = vector.load %arg6[%c6_65, %c0_66, %c0_67] : memref<7x32x1xf32, #tpu.memory_space<vmem>>, vector<1x32x1xf32>
    %127 = vector.shape_cast %126 : vector<1x32x1xf32> to vector<32x1xf32>
    %128 = vector.broadcast %127 : vector<32x1xf32> to vector<32x256xf32>
    %129 = arith.mulf %121, %128 : vector<32x256xf32>
    %130 = arith.addf %125, %129 : vector<32x256xf32>
    %c6_68 = arith.constant 6 : index
    %c0_69 = arith.constant 0 : index
    %c0_70 = arith.constant 0 : index
    %131 = vector.load %arg9[%c6_68, %c0_69, %c0_70] : memref<7x1x256xf32, #tpu.memory_space<vmem>>, vector<1x1x256xf32>
    %132 = vector.shape_cast %131 : vector<1x1x256xf32> to vector<1x256xf32>
    %133 = vector.broadcast %132 : vector<1x256xf32> to vector<32x256xf32>
    %134 = arith.mulf %130, %133 : vector<32x256xf32>
    %135 = arith.addf %119, %134 : vector<32x256xf32>
    %136 = math.cos %15 : vector<32x256xf32>
    %137 = arith.mulf %17, %136 : vector<32x256xf32>
    %138 = math.sin %15 : vector<32x256xf32>
    %139 = arith.mulf %17, %138 : vector<32x256xf32>
    %140 = vector.extract_strided_slice %137 {offsets = [0, 0], sizes = [16, 256], strides = [1, 1]} : vector<32x256xf32> to vector<16x256xf32>
    %141 = vector.extract_strided_slice %139 {offsets = [0, 0], sizes = [16, 256], strides = [1, 1]} : vector<32x256xf32> to vector<16x256xf32>
    %142 = tpu.concatenate %140, %141 in 0 : vector<16x256xf32>, vector<16x256xf32> -> vector<32x256xf32>
    %143 = vector.extract_strided_slice %137 {offsets = [16, 0], sizes = [16, 256], strides = [1, 1]} : vector<32x256xf32> to vector<16x256xf32>
    %144 = vector.extract_strided_slice %139 {offsets = [16, 0], sizes = [16, 256], strides = [1, 1]} : vector<32x256xf32> to vector<16x256xf32>
    %145 = tpu.concatenate %143, %144 in 0 : vector<16x256xf32>, vector<16x256xf32> -> vector<32x256xf32>
    %cst_71 = arith.constant 0.000000e+00 : f32
    %146 = vector.broadcast %cst_71 : f32 to vector<32x256xf32>
    %c48_i32 = arith.constant 48 : i32
    %147 = tpu.dynamic_rotate %142 by %c48_i32 dim 1 : vector<32x256xf32>, i32 -> vector<32x256xf32>
    %c48_i32_72 = arith.constant 48 : i32
    %148 = tpu.dynamic_rotate %145 by %c48_i32_72 dim 1 : vector<32x256xf32>, i32 -> vector<32x256xf32>
    %c0_73 = arith.constant 0 : index
    %c0_74 = arith.constant 0 : index
    %c0_75 = arith.constant 0 : index
    %149 = vector.load %arg7[%c0_73, %c0_74, %c0_75] : memref<7x32x1xf32, #tpu.memory_space<vmem>>, vector<1x32x1xf32>
    %150 = vector.shape_cast %149 : vector<1x32x1xf32> to vector<32x1xf32>
    %151 = vector.broadcast %150 : vector<32x1xf32> to vector<32x256xf32>
    %152 = arith.mulf %147, %151 : vector<32x256xf32>
    %c0_76 = arith.constant 0 : index
    %c0_77 = arith.constant 0 : index
    %c0_78 = arith.constant 0 : index
    %153 = vector.load %arg8[%c0_76, %c0_77, %c0_78] : memref<7x32x1xf32, #tpu.memory_space<vmem>>, vector<1x32x1xf32>
    %154 = vector.shape_cast %153 : vector<1x32x1xf32> to vector<32x1xf32>
    %155 = vector.broadcast %154 : vector<32x1xf32> to vector<32x256xf32>
    %156 = arith.mulf %148, %155 : vector<32x256xf32>
    %157 = arith.addf %152, %156 : vector<32x256xf32>
    %c0_79 = arith.constant 0 : index
    %c0_80 = arith.constant 0 : index
    %c0_81 = arith.constant 0 : index
    %158 = vector.load %arg10[%c0_79, %c0_80, %c0_81] : memref<7x1x256xf32, #tpu.memory_space<vmem>>, vector<1x1x256xf32>
    %159 = vector.shape_cast %158 : vector<1x1x256xf32> to vector<1x256xf32>
    %160 = vector.broadcast %159 : vector<1x256xf32> to vector<32x256xf32>
    %161 = arith.mulf %157, %160 : vector<32x256xf32>
    %162 = arith.addf %146, %161 : vector<32x256xf32>
    %c32_i32 = arith.constant 32 : i32
    %163 = tpu.dynamic_rotate %142 by %c32_i32 dim 1 : vector<32x256xf32>, i32 -> vector<32x256xf32>
    %c32_i32_82 = arith.constant 32 : i32
    %164 = tpu.dynamic_rotate %145 by %c32_i32_82 dim 1 : vector<32x256xf32>, i32 -> vector<32x256xf32>
    %c1_83 = arith.constant 1 : index
    %c0_84 = arith.constant 0 : index
    %c0_85 = arith.constant 0 : index
    %165 = vector.load %arg7[%c1_83, %c0_84, %c0_85] : memref<7x32x1xf32, #tpu.memory_space<vmem>>, vector<1x32x1xf32>
    %166 = vector.shape_cast %165 : vector<1x32x1xf32> to vector<32x1xf32>
    %167 = vector.broadcast %166 : vector<32x1xf32> to vector<32x256xf32>
    %168 = arith.mulf %163, %167 : vector<32x256xf32>
    %c1_86 = arith.constant 1 : index
    %c0_87 = arith.constant 0 : index
    %c0_88 = arith.constant 0 : index
    %169 = vector.load %arg8[%c1_86, %c0_87, %c0_88] : memref<7x32x1xf32, #tpu.memory_space<vmem>>, vector<1x32x1xf32>
    %170 = vector.shape_cast %169 : vector<1x32x1xf32> to vector<32x1xf32>
    %171 = vector.broadcast %170 : vector<32x1xf32> to vector<32x256xf32>
    %172 = arith.mulf %164, %171 : vector<32x256xf32>
    %173 = arith.addf %168, %172 : vector<32x256xf32>
    %c1_89 = arith.constant 1 : index
    %c0_90 = arith.constant 0 : index
    %c0_91 = arith.constant 0 : index
    %174 = vector.load %arg10[%c1_89, %c0_90, %c0_91] : memref<7x1x256xf32, #tpu.memory_space<vmem>>, vector<1x1x256xf32>
    %175 = vector.shape_cast %174 : vector<1x1x256xf32> to vector<1x256xf32>
    %176 = vector.broadcast %175 : vector<1x256xf32> to vector<32x256xf32>
    %177 = arith.mulf %173, %176 : vector<32x256xf32>
    %178 = arith.addf %162, %177 : vector<32x256xf32>
    %c16_i32 = arith.constant 16 : i32
    %179 = tpu.dynamic_rotate %142 by %c16_i32 dim 1 : vector<32x256xf32>, i32 -> vector<32x256xf32>
    %c16_i32_92 = arith.constant 16 : i32
    %180 = tpu.dynamic_rotate %145 by %c16_i32_92 dim 1 : vector<32x256xf32>, i32 -> vector<32x256xf32>
    %c2_93 = arith.constant 2 : index
    %c0_94 = arith.constant 0 : index
    %c0_95 = arith.constant 0 : index
    %181 = vector.load %arg7[%c2_93, %c0_94, %c0_95] : memref<7x32x1xf32, #tpu.memory_space<vmem>>, vector<1x32x1xf32>
    %182 = vector.shape_cast %181 : vector<1x32x1xf32> to vector<32x1xf32>
    %183 = vector.broadcast %182 : vector<32x1xf32> to vector<32x256xf32>
    %184 = arith.mulf %179, %183 : vector<32x256xf32>
    %c2_96 = arith.constant 2 : index
    %c0_97 = arith.constant 0 : index
    %c0_98 = arith.constant 0 : index
    %185 = vector.load %arg8[%c2_96, %c0_97, %c0_98] : memref<7x32x1xf32, #tpu.memory_space<vmem>>, vector<1x32x1xf32>
    %186 = vector.shape_cast %185 : vector<1x32x1xf32> to vector<32x1xf32>
    %187 = vector.broadcast %186 : vector<32x1xf32> to vector<32x256xf32>
    %188 = arith.mulf %180, %187 : vector<32x256xf32>
    %189 = arith.addf %184, %188 : vector<32x256xf32>
    %c2_99 = arith.constant 2 : index
    %c0_100 = arith.constant 0 : index
    %c0_101 = arith.constant 0 : index
    %190 = vector.load %arg10[%c2_99, %c0_100, %c0_101] : memref<7x1x256xf32, #tpu.memory_space<vmem>>, vector<1x1x256xf32>
    %191 = vector.shape_cast %190 : vector<1x1x256xf32> to vector<1x256xf32>
    %192 = vector.broadcast %191 : vector<1x256xf32> to vector<32x256xf32>
    %193 = arith.mulf %189, %192 : vector<32x256xf32>
    %194 = arith.addf %178, %193 : vector<32x256xf32>
    %c3_102 = arith.constant 3 : index
    %c0_103 = arith.constant 0 : index
    %c0_104 = arith.constant 0 : index
    %195 = vector.load %arg7[%c3_102, %c0_103, %c0_104] : memref<7x32x1xf32, #tpu.memory_space<vmem>>, vector<1x32x1xf32>
    %196 = vector.shape_cast %195 : vector<1x32x1xf32> to vector<32x1xf32>
    %197 = vector.broadcast %196 : vector<32x1xf32> to vector<32x256xf32>
    %198 = arith.mulf %142, %197 : vector<32x256xf32>
    %199 = arith.addf %194, %198 : vector<32x256xf32>
    %c3_105 = arith.constant 3 : index
    %c0_106 = arith.constant 0 : index
    %c0_107 = arith.constant 0 : index
    %200 = vector.load %arg8[%c3_105, %c0_106, %c0_107] : memref<7x32x1xf32, #tpu.memory_space<vmem>>, vector<1x32x1xf32>
    %201 = vector.shape_cast %200 : vector<1x32x1xf32> to vector<32x1xf32>
    %202 = vector.broadcast %201 : vector<32x1xf32> to vector<32x256xf32>
    %203 = arith.mulf %145, %202 : vector<32x256xf32>
    %204 = arith.addf %199, %203 : vector<32x256xf32>
    %c240_i32 = arith.constant 240 : i32
    %205 = tpu.dynamic_rotate %142 by %c240_i32 dim 1 : vector<32x256xf32>, i32 -> vector<32x256xf32>
    %c240_i32_108 = arith.constant 240 : i32
    %206 = tpu.dynamic_rotate %145 by %c240_i32_108 dim 1 : vector<32x256xf32>, i32 -> vector<32x256xf32>
    %c4_109 = arith.constant 4 : index
    %c0_110 = arith.constant 0 : index
    %c0_111 = arith.constant 0 : index
    %207 = vector.load %arg7[%c4_109, %c0_110, %c0_111] : memref<7x32x1xf32, #tpu.memory_space<vmem>>, vector<1x32x1xf32>
    %208 = vector.shape_cast %207 : vector<1x32x1xf32> to vector<32x1xf32>
    %209 = vector.broadcast %208 : vector<32x1xf32> to vector<32x256xf32>
    %210 = arith.mulf %205, %209 : vector<32x256xf32>
    %c4_112 = arith.constant 4 : index
    %c0_113 = arith.constant 0 : index
    %c0_114 = arith.constant 0 : index
    %211 = vector.load %arg8[%c4_112, %c0_113, %c0_114] : memref<7x32x1xf32, #tpu.memory_space<vmem>>, vector<1x32x1xf32>
    %212 = vector.shape_cast %211 : vector<1x32x1xf32> to vector<32x1xf32>
    %213 = vector.broadcast %212 : vector<32x1xf32> to vector<32x256xf32>
    %214 = arith.mulf %206, %213 : vector<32x256xf32>
    %215 = arith.addf %210, %214 : vector<32x256xf32>
    %c4_115 = arith.constant 4 : index
    %c0_116 = arith.constant 0 : index
    %c0_117 = arith.constant 0 : index
    %216 = vector.load %arg10[%c4_115, %c0_116, %c0_117] : memref<7x1x256xf32, #tpu.memory_space<vmem>>, vector<1x1x256xf32>
    %217 = vector.shape_cast %216 : vector<1x1x256xf32> to vector<1x256xf32>
    %218 = vector.broadcast %217 : vector<1x256xf32> to vector<32x256xf32>
    %219 = arith.mulf %215, %218 : vector<32x256xf32>
    %220 = arith.addf %204, %219 : vector<32x256xf32>
    %c224_i32 = arith.constant 224 : i32
    %221 = tpu.dynamic_rotate %142 by %c224_i32 dim 1 : vector<32x256xf32>, i32 -> vector<32x256xf32>
    %c224_i32_118 = arith.constant 224 : i32
    %222 = tpu.dynamic_rotate %145 by %c224_i32_118 dim 1 : vector<32x256xf32>, i32 -> vector<32x256xf32>
    %c5_119 = arith.constant 5 : index
    %c0_120 = arith.constant 0 : index
    %c0_121 = arith.constant 0 : index
    %223 = vector.load %arg7[%c5_119, %c0_120, %c0_121] : memref<7x32x1xf32, #tpu.memory_space<vmem>>, vector<1x32x1xf32>
    %224 = vector.shape_cast %223 : vector<1x32x1xf32> to vector<32x1xf32>
    %225 = vector.broadcast %224 : vector<32x1xf32> to vector<32x256xf32>
    %226 = arith.mulf %221, %225 : vector<32x256xf32>
    %c5_122 = arith.constant 5 : index
    %c0_123 = arith.constant 0 : index
    %c0_124 = arith.constant 0 : index
    %227 = vector.load %arg8[%c5_122, %c0_123, %c0_124] : memref<7x32x1xf32, #tpu.memory_space<vmem>>, vector<1x32x1xf32>
    %228 = vector.shape_cast %227 : vector<1x32x1xf32> to vector<32x1xf32>
    %229 = vector.broadcast %228 : vector<32x1xf32> to vector<32x256xf32>
    %230 = arith.mulf %222, %229 : vector<32x256xf32>
    %231 = arith.addf %226, %230 : vector<32x256xf32>
    %c5_125 = arith.constant 5 : index
    %c0_126 = arith.constant 0 : index
    %c0_127 = arith.constant 0 : index
    %232 = vector.load %arg10[%c5_125, %c0_126, %c0_127] : memref<7x1x256xf32, #tpu.memory_space<vmem>>, vector<1x1x256xf32>
    %233 = vector.shape_cast %232 : vector<1x1x256xf32> to vector<1x256xf32>
    %234 = vector.broadcast %233 : vector<1x256xf32> to vector<32x256xf32>
    %235 = arith.mulf %231, %234 : vector<32x256xf32>
    %236 = arith.addf %220, %235 : vector<32x256xf32>
    %c208_i32 = arith.constant 208 : i32
    %237 = tpu.dynamic_rotate %142 by %c208_i32 dim 1 : vector<32x256xf32>, i32 -> vector<32x256xf32>
    %c208_i32_128 = arith.constant 208 : i32
    %238 = tpu.dynamic_rotate %145 by %c208_i32_128 dim 1 : vector<32x256xf32>, i32 -> vector<32x256xf32>
    %c6_129 = arith.constant 6 : index
    %c0_130 = arith.constant 0 : index
    %c0_131 = arith.constant 0 : index
    %239 = vector.load %arg7[%c6_129, %c0_130, %c0_131] : memref<7x32x1xf32, #tpu.memory_space<vmem>>, vector<1x32x1xf32>
    %240 = vector.shape_cast %239 : vector<1x32x1xf32> to vector<32x1xf32>
    %241 = vector.broadcast %240 : vector<32x1xf32> to vector<32x256xf32>
    %242 = arith.mulf %237, %241 : vector<32x256xf32>
    %c6_132 = arith.constant 6 : index
    %c0_133 = arith.constant 0 : index
    %c0_134 = arith.constant 0 : index
    %243 = vector.load %arg8[%c6_132, %c0_133, %c0_134] : memref<7x32x1xf32, #tpu.memory_space<vmem>>, vector<1x32x1xf32>
    %244 = vector.shape_cast %243 : vector<1x32x1xf32> to vector<32x1xf32>
    %245 = vector.broadcast %244 : vector<32x1xf32> to vector<32x256xf32>
    %246 = arith.mulf %238, %245 : vector<32x256xf32>
    %247 = arith.addf %242, %246 : vector<32x256xf32>
    %c6_135 = arith.constant 6 : index
    %c0_136 = arith.constant 0 : index
    %c0_137 = arith.constant 0 : index
    %248 = vector.load %arg10[%c6_135, %c0_136, %c0_137] : memref<7x1x256xf32, #tpu.memory_space<vmem>>, vector<1x1x256xf32>
    %249 = vector.shape_cast %248 : vector<1x1x256xf32> to vector<1x256xf32>
    %250 = vector.broadcast %249 : vector<1x256xf32> to vector<32x256xf32>
    %251 = arith.mulf %247, %250 : vector<32x256xf32>
    %252 = arith.addf %236, %251 : vector<32x256xf32>
    %253 = arith.addf %135, %252 : vector<32x256xf32>
    %254 = arith.addf %253, %18 : vector<32x256xf32>
    %cst_138 = arith.constant dense<0.000000e+00> : vector<32xf32>
    %255 = vector.multi_reduction <add>, %254, %cst_138 [1] : vector<32x256xf32> to vector<32xf32>
    %256 = vector.shape_cast %255 : vector<32xf32> to vector<32x1xf32>
    %cst_139 = arith.constant 3.906250e-03 : f32
    %257 = vector.broadcast %cst_139 : f32 to vector<32x1xf32>
    %258 = arith.mulf %256, %257 : vector<32x1xf32>
    %c0_140 = arith.constant 0 : index
    %c0_141 = arith.constant 0 : index
    %c0_142 = arith.constant 0 : index
    %259 = vector.load %arg12[%c0_140, %c0_141, %c0_142] : memref<1x32x1xf32, #tpu.memory_space<vmem>>, vector<1x32x1xf32>
    %260 = vector.shape_cast %259 : vector<1x32x1xf32> to vector<32x1xf32>
    %261 = vector.shape_cast %258 : vector<32x1xf32> to vector<1x32x1xf32>
    tpu.vector_store %arg12[%c0_140, %c0_141, %c0_142], %261 {strides = array<i32>} : memref<1x32x1xf32, #tpu.memory_space<vmem>>, vector<1x32x1xf32>,
    %262 = tpu.concatenate %135, %252, %18 in 0 : vector<32x256xf32>, vector<32x256xf32>, vector<32x256xf32> -> vector<96x256xf32>
    %263 = arith.truncf %262 : vector<96x256xf32> to vector<96x256xbf16>
    %c0_143 = arith.constant 0 : index
    %c0_144 = arith.constant 0 : index
    %c0_145 = arith.constant 0 : index
    %264 = vector.load %arg11[%c0_143, %c0_144, %c0_145] : memref<1x96x256xbf16, #tpu.memory_space<vmem>>, vector<1x96x256xbf16>
    %265 = vector.shape_cast %264 : vector<1x96x256xbf16> to vector<96x256xbf16>
    %266 = vector.shape_cast %263 : vector<96x256xbf16> to vector<1x96x256xbf16>
    tpu.vector_store %arg11[%c0_143, %c0_144, %c0_145], %266 {strides = array<i32>} : memref<1x96x256xbf16, #tpu.memory_space<vmem>>, vector<1x96x256xbf16>,
    return
  }
  func.func @transform_0(%arg0: i32) -> (i32, i32, i32) {
    %c0_i32 = arith.constant 0 : i32
    %c0_i32_0 = arith.constant 0 : i32
    %c0_i32_1 = arith.constant 0 : i32
    return %arg0, %c0_i32, %c0_i32_0 : i32, i32, i32
  }
  func.func @transform_1(%arg0: i32) -> (i32, i32) {
    %c0_i32 = arith.constant 0 : i32
    %c0_i32_0 = arith.constant 0 : i32
    %c0_i32_1 = arith.constant 0 : i32
    return %c0_i32, %c0_i32_0 : i32, i32
  }
  func.func @transform_2(%arg0: i32) -> (i32, i32) {
    %c0_i32 = arith.constant 0 : i32
    %c0_i32_0 = arith.constant 0 : i32
    %c0_i32_1 = arith.constant 0 : i32
    return %c0_i32, %c0_i32_0 : i32, i32
  }
  func.func @transform_3(%arg0: i32) -> (i32, i32) {
    %c0_i32 = arith.constant 0 : i32
    %c0_i32_0 = arith.constant 0 : i32
    %c0_i32_1 = arith.constant 0 : i32
    return %c0_i32, %c0_i32_0 : i32, i32
  }
  func.func @transform_4(%arg0: i32) -> (i32, i32, i32) {
    %c0_i32 = arith.constant 0 : i32
    %c0_i32_0 = arith.constant 0 : i32
    %c0_i32_1 = arith.constant 0 : i32
    %c0_i32_2 = arith.constant 0 : i32
    return %c0_i32, %c0_i32_0, %c0_i32_1 : i32, i32, i32
  }
  func.func @transform_5(%arg0: i32) -> (i32, i32, i32) {
    %c0_i32 = arith.constant 0 : i32
    %c0_i32_0 = arith.constant 0 : i32
    %c0_i32_1 = arith.constant 0 : i32
    %c0_i32_2 = arith.constant 0 : i32
    return %c0_i32, %c0_i32_0, %c0_i32_1 : i32, i32, i32
  }
  func.func @transform_6(%arg0: i32) -> (i32, i32, i32) {
    %c0_i32 = arith.constant 0 : i32
    %c0_i32_0 = arith.constant 0 : i32
    %c0_i32_1 = arith.constant 0 : i32
    %c0_i32_2 = arith.constant 0 : i32
    return %c0_i32, %c0_i32_0, %c0_i32_1 : i32, i32, i32
  }
  func.func @transform_7(%arg0: i32) -> (i32, i32, i32) {
    %c0_i32 = arith.constant 0 : i32
    %c0_i32_0 = arith.constant 0 : i32
    %c0_i32_1 = arith.constant 0 : i32
    %c0_i32_2 = arith.constant 0 : i32
    return %c0_i32, %c0_i32_0, %c0_i32_1 : i32, i32, i32
  }
  func.func @transform_8(%arg0: i32) -> (i32, i32, i32) {
    %c0_i32 = arith.constant 0 : i32
    %c0_i32_0 = arith.constant 0 : i32
    %c0_i32_1 = arith.constant 0 : i32
    %c0_i32_2 = arith.constant 0 : i32
    return %c0_i32, %c0_i32_0, %c0_i32_1 : i32, i32, i32
  }
  func.func @transform_9(%arg0: i32) -> (i32, i32, i32) {
    %c0_i32 = arith.constant 0 : i32
    %c0_i32_0 = arith.constant 0 : i32
    %c0_i32_1 = arith.constant 0 : i32
    %c0_i32_2 = arith.constant 0 : i32
    return %c0_i32, %c0_i32_0, %c0_i32_1 : i32, i32, i32
  }
  func.func @transform_10(%arg0: i32) -> (i32, i32, i32) {
    %c0_i32 = arith.constant 0 : i32
    %c0_i32_0 = arith.constant 0 : i32
    %c0_i32_1 = arith.constant 0 : i32
    return %arg0, %c0_i32, %c0_i32_0 : i32, i32, i32
  }
  func.func @transform_11(%arg0: i32) -> (i32, i32, i32) {
    %c0_i32 = arith.constant 0 : i32
    %c0_i32_0 = arith.constant 0 : i32
    %c0_i32_1 = arith.constant 0 : i32
    return %arg0, %c0_i32, %c0_i32_0 : i32, i32, i32
  }
}

module attributes {stable_mosaic.version = 11 : i64} {
  func.func @_stage2_kernel(%arg0: i32, %arg1: memref<1x96x256xbf16, #tpu.memory_space<vmem>>, %arg2: memref<1x96x1xf32, #tpu.memory_space<vmem>>, %arg3: memref<32x32xbf16, #tpu.memory_space<vmem>>, %arg4: memref<32x1xf32, #tpu.memory_space<vmem>>, %arg5: memref<1x32x256xf32, #tpu.memory_space<vmem>>) attributes {dimension_semantics = [#tpu.dimension_semantics<parallel>], iteration_bounds = array<i64: 2>, scalar_prefetch = 0 : i64, scratch_operands = 0 : i64, tpu.core_type = #tpu.core_type<tc>, window_params = [{transform_indices = @transform_0, window_bounds = array<i64: 1, 96, 256>}, {transform_indices = @transform_1, window_bounds = array<i64: 1, 96, 1>}, {pipeline_mode = #tpu.pipeline_mode<synchronous>, transform_indices = @transform_2, window_bounds = array<i64: 32, 32>}, {pipeline_mode = #tpu.pipeline_mode<synchronous>, transform_indices = @transform_3, window_bounds = array<i64: 32, 1>}, {transform_indices = @transform_4, window_bounds = array<i64: 1, 32, 256>}]} {
    %c0 = arith.constant 0 : index
    %c0_0 = arith.constant 0 : index
    %c0_1 = arith.constant 0 : index
    %0 = vector.load %arg1[%c0, %c0_0, %c0_1] : memref<1x96x256xbf16, #tpu.memory_space<vmem>>, vector<1x96x256xbf16>
    %1 = vector.shape_cast %0 : vector<1x96x256xbf16> to vector<96x256xbf16>
    %2 = arith.extf %1 : vector<96x256xbf16> to vector<96x256xf32>
    %c0_2 = arith.constant 0 : index
    %c0_3 = arith.constant 0 : index
    %c0_4 = arith.constant 0 : index
    %3 = vector.load %arg2[%c0_2, %c0_3, %c0_4] : memref<1x96x1xf32, #tpu.memory_space<vmem>>, vector<1x96x1xf32>
    %4 = vector.shape_cast %3 : vector<1x96x1xf32> to vector<96x1xf32>
    %5 = vector.extract_strided_slice %2 {offsets = [0, 0], sizes = [32, 256], strides = [1, 1]} : vector<96x256xf32> to vector<32x256xf32>
    %6 = vector.extract_strided_slice %4 {offsets = [0, 0], sizes = [32, 1], strides = [1, 1]} : vector<96x1xf32> to vector<32x1xf32>
    %7 = vector.broadcast %6 : vector<32x1xf32> to vector<32x256xf32>
    %8 = arith.mulf %5, %7 : vector<32x256xf32>
    %9 = vector.extract_strided_slice %2 {offsets = [32, 0], sizes = [32, 256], strides = [1, 1]} : vector<96x256xf32> to vector<32x256xf32>
    %10 = vector.extract_strided_slice %4 {offsets = [32, 0], sizes = [32, 1], strides = [1, 1]} : vector<96x1xf32> to vector<32x1xf32>
    %11 = vector.broadcast %10 : vector<32x1xf32> to vector<32x256xf32>
    %12 = arith.mulf %9, %11 : vector<32x256xf32>
    %13 = arith.addf %8, %12 : vector<32x256xf32>
    %14 = vector.extract_strided_slice %2 {offsets = [64, 0], sizes = [32, 256], strides = [1, 1]} : vector<96x256xf32> to vector<32x256xf32>
    %15 = vector.extract_strided_slice %4 {offsets = [64, 0], sizes = [32, 1], strides = [1, 1]} : vector<96x1xf32> to vector<32x1xf32>
    %16 = vector.broadcast %15 : vector<32x1xf32> to vector<32x256xf32>
    %17 = arith.mulf %14, %16 : vector<32x256xf32>
    %18 = arith.addf %13, %17 : vector<32x256xf32>
    %c0_5 = arith.constant 0 : index
    %c0_6 = arith.constant 0 : index
    %19 = vector.load %arg3[%c0_5, %c0_6] : memref<32x32xbf16, #tpu.memory_space<vmem>>, vector<32x32xbf16>
    %20 = arith.truncf %18 : vector<32x256xf32> to vector<32x256xbf16>
    %cst = arith.constant dense<0.000000e+00> : vector<32x256xf32>
    %21 = tpu.matmul %19, %20, %cst {dimension_numbers = #tpu.dot_dimension_numbers<[1], [0], [0], [1], [0, 0, 1, 1], [], []>} : vector<32x32xbf16>, vector<32x256xbf16>, vector<32x256xf32> -> vector<32x256xf32>
    %c0_7 = arith.constant 0 : index
    %c0_8 = arith.constant 0 : index
    %22 = vector.load %arg4[%c0_7, %c0_8] : memref<32x1xf32, #tpu.memory_space<vmem>>, vector<32x1xf32>
    %23 = vector.broadcast %22 : vector<32x1xf32> to vector<32x256xf32>
    %24 = arith.addf %21, %23 : vector<32x256xf32>
    %c0_9 = arith.constant 0 : index
    %c0_10 = arith.constant 0 : index
    %c0_11 = arith.constant 0 : index
    %25 = vector.load %arg5[%c0_9, %c0_10, %c0_11] : memref<1x32x256xf32, #tpu.memory_space<vmem>>, vector<1x32x256xf32>
    %26 = vector.shape_cast %25 : vector<1x32x256xf32> to vector<32x256xf32>
    %27 = vector.shape_cast %24 : vector<32x256xf32> to vector<1x32x256xf32>
    tpu.vector_store %arg5[%c0_9, %c0_10, %c0_11], %27 {strides = array<i32>} : memref<1x32x256xf32, #tpu.memory_space<vmem>>, vector<1x32x256xf32>,
    return
  }
  func.func @transform_0(%arg0: i32) -> (i32, i32, i32) {
    %c0_i32 = arith.constant 0 : i32
    %c0_i32_0 = arith.constant 0 : i32
    %c0_i32_1 = arith.constant 0 : i32
    return %arg0, %c0_i32, %c0_i32_0 : i32, i32, i32
  }
  func.func @transform_1(%arg0: i32) -> (i32, i32, i32) {
    %c0_i32 = arith.constant 0 : i32
    %c0_i32_0 = arith.constant 0 : i32
    %c0_i32_1 = arith.constant 0 : i32
    return %arg0, %c0_i32, %c0_i32_0 : i32, i32, i32
  }
  func.func @transform_2(%arg0: i32) -> (i32, i32) {
    %c0_i32 = arith.constant 0 : i32
    %c0_i32_0 = arith.constant 0 : i32
    %c0_i32_1 = arith.constant 0 : i32
    return %c0_i32, %c0_i32_0 : i32, i32
  }
  func.func @transform_3(%arg0: i32) -> (i32, i32) {
    %c0_i32 = arith.constant 0 : i32
    %c0_i32_0 = arith.constant 0 : i32
    %c0_i32_1 = arith.constant 0 : i32
    return %c0_i32, %c0_i32_0 : i32, i32
  }
  func.func @transform_4(%arg0: i32) -> (i32, i32, i32) {
    %c0_i32 = arith.constant 0 : i32
    %c0_i32_0 = arith.constant 0 : i32
    %c0_i32_1 = arith.constant 0 : i32
    return %arg0, %c0_i32, %c0_i32_0 : i32, i32, i32
  }
}

</mosaic_0001>

<bundles_post_ra>
// kernel: patm_forward.3
= control target key start
LH: loop header
LB: loop body
LE: loop exit
PB: predicated region body
PF: predicated region fallthrough
CT: control target
= control target key end

     0   :  { %s612_s15 = smov 0   ;;  %s672_s0 = inlined_call_operand.vmem [shape: bf16[2,96,256], index: 0, kind: input, shape index: {}]   ;;  %s673_s1 = inlined_call_operand.vmem [shape: f32[2,96,1], index: 1, kind: input, shape index: {}]   ;;  %s674_s2 = inlined_call_operand.vmem [shape: bf16[32,32], index: 2, kind: input, shape index: {}]   ;;  %s675_s3 = inlined_call_operand.vmem [shape: f32[32,1], index: 3, kind: input, shape index: {}]   ;;  %s676_s4 = inlined_call_operand.vmem [shape: f32[2,32,256], index: 4, kind: output, shape index: {}]  }
   0x1 LB: > { %s544_s16 = sadd.s32 4294967295, %s584_s15   ;;  %p548_p0 = scmp.ge.s32.totalorder %s584_s15, 1  ;;  %s584_s15 = sphi %s612_s15, %s14_s15  }
   0x2   : > { %p172_p1 = scmp.lt.s32.totalorder %s584_s15, 3 }
   0x4   : > { %p173_p2 = pnand %p548_p0, %p172_p1 }
   0x5   : > { %p203_p3 = scmp.lt.s32.totalorder (!%p173_p2), %s544_s16, 1  ;;  %v586_v0 = vmov (!%p173_p2), 0   ;;  %v376_v13 = vld [vmem:[%s675_s3 + $0x8] sm:$0xff] (!%p173_p2)  ;;  %v375_v14 = vld [vmem:[%s675_s3] sm:$0xff] (!%p173_p2)  ;;  %v378_v15 = vld [vmem:[%s675_s3 + $0x18] sm:$0xff] (!%p173_p2)  ;;  %vm409_vm0 = vcmask (!%p173_p2), 261120  }
   0x6   : > { %176 = sbr.rel (%p173_p2) target bundleno = 395 (0x18b), region = 36  ;;  %575 = vset.pattern.permute.xlu1 (!%p173_p2), %v586_v0  ;;  %574 = vset.pattern.permute.xlu0 (!%p173_p2), %v586_v0  ;;  %v377_v16 = vld [vmem:[%s675_s3 + $0x10] sm:$0xff] (!%p173_p2) }
   0x7   : > { %448 = vmatprep.mubr.bf16.mxu0 (!%p173_p2), %v586_v0  ;;  %458 = vmatprep.mubr.bf16.mxu1 (!%p173_p2), %v586_v0 }
   0xd   : > { %s678_s16 = smov (!%p203_p3, %s544_s16), 1 }
   0xe   : > { %s564_s17 = smul.u32 96, %s678_s16  ;;  %s559_s10 = sshll.u32 %s678_s16, 6 }
   0xf   : > { %s217_s13 = scalar_lea.vmem %s676_s4, %s559_s10 }
  0x10   : > { %s212_s20 = scalar_lea.vmem %s673_s1, %s564_s17  ;;  %s645_s5 = scalar_lea.vmem %s672_s0, %s564_s17 }
  0x11   : > { %v259_v1 = vld [vmem:[%s212_s20 + $0x20] sm:$0xff]  ;;  %v260_v3 = vld [vmem:[%s212_s20 + $0x28] sm:$0xff]  ;;  %v258_v7 = vld [vmem:[%s212_s20 + $0x18] sm:$0xff] }
  0x12   : > { %v255_v2 = vld [vmem:[%s212_s20] sm:$0xff]  ;;  %297 = vperm.xlu1 %575, %v259_v1   ;;  %v256_v4 = vld [vmem:[%s212_s20 + $0x8] sm:$0xff]  ;;  %v257_v8 = vld [vmem:[%s212_s20 + $0x10] sm:$0xff] }
  0x13   : > { %269 = vperm.xlu0 %574, %v255_v2   ;;  %v264_v5 = vld [vmem:[%s212_s20 + $0x48] sm:$0xff]  ;;  %v263_v6 = vld [vmem:[%s212_s20 + $0x40] sm:$0xff]  ;;  %v262_v9 = vld [vmem:[%s212_s20 + $0x38] sm:$0xff] }
  0x14   : > { %v261_v10 = vld [vmem:[%s212_s20 + $0x30] sm:$0xff]  ;;  %v266_v11 = vld [vmem:[%s212_s20 + $0x58] sm:$0xff]  ;;  %v223_v17 = vld [vmem:[%s645_s5 + $0x20] sm:$0xff] }
  0x15   : > { %v265_v12 = vld [vmem:[%s212_s20 + $0x50] sm:$0xff]  ;;  %v219_v18 = vld [vmem:[%s645_s5] sm:$0xff]  ;;  %v224_v19 = vld [vmem:[%s645_s5 + $0x28] sm:$0xff]  ;;  %v239_v22 = vunpack.c.l.bf16 %v223_v17  ;;  %v240_v23 = vunpack.c.h.bf16 %v223_v17 }
  0x16   : > { %302 = vperm.xlu1 %575, %v260_v3   ;;  %v220_v20 = vld [vmem:[%s645_s5 + $0x8] sm:$0xff]  ;;  %v231_v25 = vunpack.c.l.bf16 %v219_v18  ;;  %v232_v26 = vunpack.c.h.bf16 %v219_v18  ;;  %v227_v28 = vld [vmem:[%s645_s5 + $0x40] sm:$0xff]  ;;  %v241_v29 = vunpack.c.l.bf16 %v224_v19  ;;  %v242_v30 = vunpack.c.h.bf16 %v224_v19  ;;  %v222_v57 = vld [vmem:[%s645_s5 + $0x18] sm:$0xff] }
  0x17   : > { %274 = vperm.xlu0 %574, %v256_v4   ;;  %v228_v27 = vld [vmem:[%s645_s5 + $0x48] sm:$0xff]  ;;  %v233_v31 = vunpack.c.l.bf16 %v220_v20  ;;  %v234_v32 = vunpack.c.h.bf16 %v220_v20  ;;  %v247_v35 = vunpack.c.l.bf16 %v227_v28  ;;  %v248_v36 = vunpack.c.h.bf16 %v227_v28  ;;  %v226_v58 = vld [vmem:[%s645_s5 + $0x38] sm:$0xff]  ;;  %v225_v59 = vld [vmem:[%s645_s5 + $0x30] sm:$0xff] }
  0x18   : > { %v249_v33 = vunpack.c.l.bf16 %v228_v27  ;;  %v250_v34 = vunpack.c.h.bf16 %v228_v27  ;;  %v221_v60 = vld [vmem:[%s645_s5 + $0x10] sm:$0xff]  ;;  %v237_v2 = vunpack.c.l.bf16 %v222_v57  ;;  %v238_v3 = vunpack.c.h.bf16 %v222_v57 }
  0x1a   : > { %338 = vperm.xlu1 %575, %v264_v5   ;;  %v245_v5 = vunpack.c.l.bf16 %v226_v58 }
  0x1b   : > { %333 = vperm.xlu0 %574, %v263_v6   ;;  %v246_v6 = vunpack.c.h.bf16 %v226_v58 }
  0x1e   : > { %284 = vperm.xlu1 %575, %v258_v7   ;;  %v243_v7 = vunpack.c.l.bf16 %v225_v59 }
  0x1f   : > { %279 = vperm.xlu0 %574, %v257_v8   ;;  %v244_v8 = vunpack.c.h.bf16 %v225_v59 }
  0x22   : > { %312 = vperm.xlu1 %575, %v262_v9   ;;  %v230_v9 = vld [vmem:[%s645_s5 + $0x58] sm:$0xff] }
  0x23   : > { %307 = vperm.xlu0 %574, %v261_v10   ;;  %v229_v10 = vld [vmem:[%s645_s5 + $0x50] sm:$0xff]  ;;  %v253_v17 = vunpack.c.l.bf16 %v230_v9  ;;  %v254_v18 = vunpack.c.h.bf16 %v230_v9 }
  0x24   : > { %v251_v19 = vunpack.c.l.bf16 %v229_v10  ;;  %v252_v20 = vunpack.c.h.bf16 %v229_v10 }
  0x26   : > { %348 = vperm.xlu1 %575, %v266_v11   ;;  %v235_v11 = vunpack.c.l.bf16 %v221_v60 }
  0x27   : > { %343 = vperm.xlu0 %574, %v265_v12   ;;  %v236_v12 = vunpack.c.h.bf16 %v221_v60 }
  0x2a   : > { %386 = vperm.xlu1 %575, %v376_v13  }
  0x2b   : > { %381 = vperm.xlu0 %574, %v375_v14  }
  0x2e   : > { %396 = vperm.xlu1 %575, %v378_v15  }
  0x2f   : > { %391 = vperm.xlu0 %574, %v377_v16  }
  0x91   : > { %v298_v21 = vpop.permute.xlu1 %297 }
  0x92   : > { %v270_v24 = vpop.permute.xlu0 %269  ;;  %v315_v37 = vmul.f32 %v298_v21, %v239_v22  ;;  %v316_v38 = vmul.f32 %v298_v21, %v240_v23 }
  0x93   : > { %v287_v39 = vmul.f32 %v270_v24, %v231_v25  ;;  %v288_v40 = vmul.f32 %v270_v24, %v232_v26 }
  0x95   : > { %v303_v41 = vpop.permute.xlu1 %302  ;;  %v323_v47 = vadd.f32 %v315_v37, %v287_v39  ;;  %v324_v48 = vadd.f32 %v316_v38, %v288_v40 }
  0x96   : > { %v275_v42 = vpop.permute.xlu0 %274  ;;  %v317_v43 = vmul.f32 %v303_v41, %v241_v29  ;;  %v318_v44 = vmul.f32 %v303_v41, %v242_v30 }
  0x97   : > { %v289_v45 = vmul.f32 %v275_v42, %v233_v31  ;;  %v290_v46 = vmul.f32 %v275_v42, %v234_v32 }
  0x99   : > { %v325_v49 = vadd.f32 %v317_v43, %v289_v45  ;;  %v326_v50 = vadd.f32 %v318_v44, %v290_v46  ;;  %v339_v51 = vpop.permute.xlu1 %338  ;;  %v576_v45 = vld [vmem:[%s674_s2] sm:$0xff]   ;;  %v577_v46 = vld [vmem:[%s674_s2 + $0x8] sm:$0xff]  }
  0x9a   : > { %v334_v52 = vpop.permute.xlu0 %333  ;;  %v353_v53 = vmul.f32 %v339_v51, %v249_v33  ;;  %v354_v54 = vmul.f32 %v339_v51, %v250_v34 }
  0x9b   : > { %v351_v55 = vmul.f32 %v334_v52, %v247_v35  ;;  %v352_v56 = vmul.f32 %v334_v52, %v248_v36 }
  0x9c   : > { %v362_v62 = vadd.f32 %v354_v54, %v326_v50  ;;  %v361_v0 = vadd.f32 %v353_v53, %v325_v49 }
  0x9d   : > { %v360_v61 = vadd.f32 %v352_v56, %v324_v48  ;;  %v359_v63 = vadd.f32 %v351_v55, %v323_v47  ;;  %v285_v1 = vpop.permute.xlu1 %284 }
  0x9e   : > { %v280_v4 = vpop.permute.xlu0 %279  ;;  %v293_v25 = vmul.f32 %v285_v1, %v237_v2  ;;  %v294_v26 = vmul.f32 %v285_v1, %v238_v3 }
  0x9f   : > { %v372_v13 = vpack.c.bf16 %v362_v62, %v360_v61  ;;  %v371_v14 = vpack.c.bf16 %v361_v0, %v359_v63  ;;  %v291_v27 = vmul.f32 %v280_v4, %v235_v11  ;;  %v292_v28 = vmul.f32 %v280_v4, %v236_v12 }
  0xa1   : > { %416 = vmatprep.subr.bf16.mxu0 %v372_v13  ;;  %560 = vmatprep.subr.bf16.mxu1 %v372_v13  ;;  %v313_v15 = vpop.permute.xlu1 %312 }
  0xa2   : > { %v308_v16 = vpop.permute.xlu0 %307  ;;  %v321_v21 = vmul.f32 %v313_v15, %v245_v5  ;;  %v322_v22 = vmul.f32 %v313_v15, %v246_v6  ;;  %417 = vmatpush1.bf16.msra.mxu0 %v371_v14  ;;  %562 = vmatpush1.bf16.msra.mxu1 %v371_v14 }
  0xa3   : > { %v319_v23 = vmul.f32 %v308_v16, %v243_v7  ;;  %v320_v24 = vmul.f32 %v308_v16, %v244_v8 }
  0xa4   : > { %v329_v29 = vadd.f32 %v321_v21, %v293_v25  ;;  %v330_v30 = vadd.f32 %v322_v22, %v294_v26 }
  0xa5   : > { %v327_v31 = vadd.f32 %v319_v23, %v291_v27  ;;  %v328_v32 = vadd.f32 %v320_v24, %v292_v28  ;;  %v349_v33 = vpop.permute.xlu1 %348 }
  0xa6   : > { %v344_v34 = vpop.permute.xlu0 %343  ;;  %v357_v35 = vmul.f32 %v349_v33, %v253_v17  ;;  %v358_v36 = vmul.f32 %v349_v33, %v254_v18 }
  0xa7   : > { %v355_v37 = vmul.f32 %v344_v34, %v251_v19  ;;  %v356_v38 = vmul.f32 %v344_v34, %v252_v20 }
  0xa8   : > { %v365_v39 = vadd.f32 %v357_v35, %v329_v29  ;;  %v366_v40 = vadd.f32 %v358_v36, %v330_v30 }
  0xa9   : > { %v363_v41 = vadd.f32 %v355_v37, %v327_v31  ;;  %v364_v42 = vadd.f32 %v356_v38, %v328_v32  ;;  %v387_v47 = vpop.permute.xlu1 %386 }
  0xaa   : > { %v382_v48 = vpop.permute.xlu0 %381 }
  0xab   : > { %v374_v43 = vpack.c.bf16 %v366_v40, %v364_v42  ;;  %v373_v44 = vpack.c.bf16 %v365_v39, %v363_v41 }
  0xad   : > { %418 = vmatprep.subr.bf16.mxu0 %v374_v43  ;;  %561 = vmatprep.subr.bf16.mxu1 %v374_v43  ;;  %v397_v49 = vpop.permute.xlu1 %396 }
  0xae   : > { %419 = vmatpush1.bf16.msra.mxu0 %v373_v44  ;;  %563 = vmatpush1.bf16.msra.mxu1 %v373_v44  ;;  %v392_v50 = vpop.permute.xlu0 %391 }
  0xb1   : > { %555 = vmatmul.mubr.msk.bf16.vlgmr.msra.gmra.mrb[0].mxu0 %vm409_vm0, %v576_v45  ;;  %556 = vmatmul.mubr.msk.bf16.vlgmr.msra.gmra.mrb[0].mxu1 %vm409_vm0, %v577_v46 }
 0x184   : > { %v450_v51 = vpop.f32.mrb[0].mxu0  ;;  %v460_v52 = vpop.f32.mrb[0].mxu1 }
 0x185   : > { %v451_v53 = vadd.f32 %v450_v51, %v382_v48  ;;  %v461_v54 = vadd.f32 %v460_v52, %v392_v50  ;;  %v452_v55 = vpop.f32.mrb[1].mxu0  ;;  %v462_v56 = vpop.f32.mrb[1].mxu1 }
 0x186   : > { %v453_v57 = vadd.f32 %v452_v55, %v382_v48  ;;  %v463_v58 = vadd.f32 %v462_v56, %v392_v50  ;;  %v454_v59 = vpop.f32.mrb[2].mxu0  ;;  %v464_v60 = vpop.f32.mrb[2].mxu1 }
 0x187   : > { %469 = vst [vmem:[%s217_s13] sm:$0xff] %v451_v53  ;;  %473 = vst [vmem:[%s217_s13 + $0x20] sm:$0xff] %v461_v54  ;;  %v455_v61 = vadd.f32 %v454_v59, %v387_v47  ;;  %v465_v62 = vadd.f32 %v464_v60, %v397_v49  ;;  %v456_v63 = vpop.f32.mrb[3].mxu0  ;;  %v466_v0 = vpop.f32.mrb[3].mxu1 }
 0x188   : > { %470 = vst [vmem:[%s217_s13 + $0x8] sm:$0xff] %v453_v57  ;;  %474 = vst [vmem:[%s217_s13 + $0x28] sm:$0xff] %v463_v58  ;;  %v457_v1 = vadd.f32 %v456_v63, %v387_v47  ;;  %v467_v2 = vadd.f32 %v466_v0, %v397_v49 }
 0x189   : > { %471 = vst [vmem:[%s217_s13 + $0x10] sm:$0xff] %v455_v61  ;;  %475 = vst [vmem:[%s217_s13 + $0x30] sm:$0xff] %v465_v62 }
 0x18a   : > { %472 = vst [vmem:[%s217_s13 + $0x18] sm:$0xff] %v457_v1  ;;  %476 = vst [vmem:[%s217_s13 + $0x38] sm:$0xff] %v467_v2 }
 0x18b PF: > { %s14_s15 = sadd.s32 1, %s584_s15  }
 0x18c   : > { %p11_p4 = scmp.ge.s32.totalorder %s14_s15, 4  }
 0x18e   :  { %13 = sbr.rel (!%p11_p4) target bundleno = 1 (0x1), region = 69 }

// kernel: patm_forward.2
= control target key start
LH: loop header
LB: loop body
LE: loop exit
PB: predicated region body
PF: predicated region fallthrough
CT: control target
= control target key end

     0   :  { %s6837_s17 = smov 0   ;;  %s12016_s0 = inlined_call_operand.vmem [shape: bf16[2,32,256], index: 0, kind: input, shape index: {}]   ;;  %s12017_s1 = inlined_call_operand.vmem [shape: bf16[160,32], index: 1, kind: input, shape index: {}]   ;;  %s12018_s2 = inlined_call_operand.vmem [shape: f32[32,1], index: 2, kind: input, shape index: {}]   ;;  %s12019_s3 = inlined_call_operand.vmem [shape: f32[32,1], index: 3, kind: input, shape index: {}]   ;;  %s12020_s4 = inlined_call_operand.vmem [shape: f32[7,32,1], index: 4, kind: input, shape index: {}]   ;;  %s12021_s5 = inlined_call_operand.vmem [shape: f32[7,32,1], index: 5, kind: input, shape index: {}]   ;;  %s12022_s6 = inlined_call_operand.vmem [shape: f32[7,32,1], index: 6, kind: input, shape index: {}]   ;;  %s12023_s7 = inlined_call_operand.vmem [shape: f32[7,32,1], index: 7, kind: input, shape index: {}]   ;;  %s12024_s8 = inlined_call_operand.vmem [shape: f32[7,1,256], index: 8, kind: input, shape index: {}]   ;;  %s12025_s9 = inlined_call_operand.vmem [shape: f32[7,1,256], index: 9, kind: input, shape index: {}]   ;;  %s12026_s10 = inlined_call_operand.vmem [shape: bf16[2,96,256], index: 10, kind: output, shape index: {0}]   ;;  %s12027_s11 = inlined_call_operand.vmem [shape: f32[2,32,1], index: 11, kind: output, shape index: {1}]  }
   0x1 LB: > { %s6276_s18 = sadd.s32 4294967295, %s6756_s17   ;;  %p6280_p0 = scmp.ge.s32.totalorder %s6756_s17, 1  ;;  %s6756_s17 = sphi %s6837_s17, %s22_s17  }
   0x2   : > { %p340_p1 = scmp.lt.s32.totalorder %s6756_s17, 3 }
   0x4   : > { %p341_p2 = pnand %p6280_p0, %p340_p1 }
   0x6   : > { %344 = sbr.rel (%p341_p2) target bundleno = 1281 (0x501), region = 60 }
   0xd   : > { %v659_v0 = vld [vmem:[%s12018_s2] sm:$0xff]  ;;  %p385_p3 = scmp.lt.s32.totalorder %s6276_s18, 1  ;;  %v12028_v1 = vmov 0   ;;  %v660_v2 = vld [vmem:[%s12018_s2 + $0x8] sm:$0xff]  ;;  %v701_v8 = vld [vmem:[%s12019_s3 + $0x10] sm:$0xff]  ;;  %vm495_vm0 = vcmask 261120  }
   0xe   : > { %6668 = vset.pattern.permute.xlu0 %v12028_v1  ;;  %558 = vmatprep.mubr.bf16.mxu0 %v12028_v1  ;;  %v699_v3 = vld [vmem:[%s12019_s3] sm:$0xff]  ;;  %v661_v10 = vld [vmem:[%s12018_s2 + $0x10] sm:$0xff]  ;;  %v662_v11 = vld [vmem:[%s12018_s2 + $0x18] sm:$0xff]  ;;  %s6765_s22 = smov 3   ;;  %s6766_s24 = smov 2  }
   0xf   : > { %665 = vperm.xlu0 %6668, %v659_v0   ;;  %s12949_s18 = smov (!%p385_p3, %s6276_s18), 1  ;;  %6669 = vset.pattern.permute.xlu1 %v12028_v1  ;;  %v6676_v9 = vld [vmem:[%s12017_s1] sm:$0xff]   ;;  %v700_v13 = vld [vmem:[%s12019_s3 + $0x8] sm:$0xff]  ;;  %v2464_v14 = vld [vmem:[%s12020_s4 + $0x10] sm:$0xff]  ;;  %s6767_s25 = smov 1  }
  0x10   : > { %608 = vmatprep.mubr.bf16.mxu1 %v12028_v1  ;;  %s6558_s23 = sshll.u32 %s12949_s18, 5  ;;  %675 = vperm.xlu1 %6669, %v661_v10   ;;  %v2462_v12 = vld [vmem:[%s12020_s4] sm:$0xff]  ;;  %v6677_v15 = vld [vmem:[%s12017_s1 + $0x8] sm:$0xff]   ;;  %v702_v17 = vld [vmem:[%s12019_s3 + $0x18] sm:$0xff]  ;;  %s6769_s27 = smov 126  }
  0x11   : > { %s389_s26 = scalar_lea.vmem %s12016_s0, %s6558_s23  ;;  %v6681_v16 = vld [vmem:[%s12017_s1 + $0x28] sm:$0xff]   ;;  %v2494_v18 = vld [vmem:[%s12021_s5] sm:$0xff]  ;;  %v2496_v20 = vld [vmem:[%s12021_s5 + $0x10] sm:$0xff]  ;;  %s6770_s28 = smov 125  }
  0x12   : > { %v6670_v4 = vld [vmem:[%s389_s26 + $0x4] ss:$8 sps:$4 sm:$0xff]   ;;  %v6672_v5 = vld [vmem:[%s389_s26] ss:$8 sps:$4 sm:$0xff]   ;;  %v6673_v6 = vld [vmem:[%s389_s26 + $0x14] ss:$8 sps:$4 sm:$0xff]   ;;  %s399_s12 = scalar_lea.vmem %s12027_s11, %s6558_s23 }
  0x13   : > { %670 = vperm.xlu0 %6668, %v660_v2   ;;  %526 = vmatprep.subr.bf16.mxu0 %v6670_v4  ;;  %v6675_v7 = vld [vmem:[%s389_s26 + $0x10] ss:$8 sps:$4 sm:$0xff]   ;;  %v2463_v19 = vld [vmem:[%s12020_s4 + $0x8] sm:$0xff]  ;;  %v6374_v24 = vld [vmem:[%s12020_s4 + $0x20] sm:$0xff]  ;;  %s6768_s26 = smov 127   ;;  %s6771_s29 = smov 48  }
  0x14   : > { %6572 = vmatprep.subr.bf16.mxu1 %v6670_v4  ;;  %527 = vmatpush1.bf16.msra.mxu0 %v6672_v5  ;;  %v6682_v21 = vld [vmem:[%s12017_s1 + $0x30] sm:$0xff]   ;;  %v2465_v23 = vld [vmem:[%s12020_s4 + $0x18] sm:$0xff]  ;;  %v2495_v25 = vld [vmem:[%s12021_s5 + $0x8] sm:$0xff]  ;;  %s6772_s21 = smov 32   ;;  %s6773_s15 = smov 16  }
  0x15   : > { %6574 = vmatpush1.bf16.msra.mxu1 %v6672_v5  ;;  %528 = vmatprep.subr.bf16.mxu0 %v6673_v6  ;;  %v6678_v22 = vld [vmem:[%s12017_s1 + $0x10] sm:$0xff]   ;;  %v6683_v27 = vld [vmem:[%s12017_s1 + $0x38] sm:$0xff]   ;;  %v6378_v30 = vld [vmem:[%s12021_s5 + $0x20] sm:$0xff] }
  0x16   : > { %6573 = vmatprep.subr.bf16.mxu1 %v6673_v6  ;;  %680 = vperm.xlu1 %6669, %v662_v11   ;;  %v6376_v26 = vld [vmem:[%s12020_s4 + $0x30] sm:$0xff]  ;;  %v6679_v28 = vld [vmem:[%s12017_s1 + $0x18] sm:$0xff]   ;;  %v6375_v31 = vld [vmem:[%s12020_s4 + $0x28] sm:$0xff] }
  0x17   : > { %705 = vperm.xlu0 %6668, %v699_v3   ;;  %v2497_v29 = vld [vmem:[%s12021_s5 + $0x18] sm:$0xff]  ;;  %v6380_v32 = vld [vmem:[%s12021_s5 + $0x30] sm:$0xff]  ;;  %v6680_v33 = vld [vmem:[%s12017_s1 + $0x20] sm:$0xff]  }
  0x18   : > { %529 = vmatpush1.bf16.msra.mxu0 %v6675_v7  ;;  %v6377_v34 = vld [vmem:[%s12020_s4 + $0x38] sm:$0xff]  ;;  %v6383_v35 = vld [vmem:[%s12020_s4 + $0x40] sm:$0xff]  ;;  %v6379_v36 = vld [vmem:[%s12021_s5 + $0x28] sm:$0xff] }
  0x19   : > { %6575 = vmatpush1.bf16.msra.mxu1 %v6675_v7  ;;  %v6385_v37 = vld [vmem:[%s12020_s4 + $0x50] sm:$0xff]  ;;  %v6381_v38 = vld [vmem:[%s12021_s5 + $0x38] sm:$0xff]  ;;  %v6387_v39 = vld [vmem:[%s12021_s5 + $0x40] sm:$0xff] }
  0x1a   : > { %710 = vperm.xlu1 %6669, %v700_v13   ;;  %v6384_v40 = vld [vmem:[%s12020_s4 + $0x48] sm:$0xff]  ;;  %v6389_v41 = vld [vmem:[%s12021_s5 + $0x50] sm:$0xff]  ;;  %v6386_v42 = vld [vmem:[%s12020_s4 + $0x58] sm:$0xff] }
  0x1b   : > { %715 = vperm.xlu0 %6668, %v701_v8   ;;  %6300 = vmatmul.mubr.msk.bf16.vlgmr.msra.gmra.mrb[0].mxu0 %vm495_vm0, %v6676_v9  ;;  %v6392_v43 = vld [vmem:[%s12020_s4 + $0x60] sm:$0xff]  ;;  %v6388_v44 = vld [vmem:[%s12021_s5 + $0x48] sm:$0xff]  ;;  %v6394_v45 = vld [vmem:[%s12020_s4 + $0x70] sm:$0xff] }
  0x1c   : > { %568 = vmatprep.mubr.bf16.mxu0 %v12028_v1  ;;  %6305 = vmatmul.mubr.msk.bf16.vlgmr.msra.gmra.mrb[0].mxu1 %vm495_vm0, %v6681_v16  ;;  %v6390_v46 = vld [vmem:[%s12021_s5 + $0x58] sm:$0xff]  ;;  %v6396_v47 = vld [vmem:[%s12021_s5 + $0x60] sm:$0xff]  ;;  %v6393_v48 = vld [vmem:[%s12020_s4 + $0x68] sm:$0xff] }
  0x1d   : > { %618 = vmatprep.mubr.bf16.mxu1 %v12028_v1  ;;  %v6398_v49 = vld [vmem:[%s12021_s5 + $0x70] sm:$0xff]  ;;  %v6395_v50 = vld [vmem:[%s12020_s4 + $0x78] sm:$0xff]  ;;  %v6400_v51 = vld [vmem:[%s12020_s4 + $0x80] sm:$0xff] }
  0x1e   : > { %720 = vperm.xlu1 %6669, %v702_v17   ;;  %v6397_v52 = vld [vmem:[%s12021_s5 + $0x68] sm:$0xff]  ;;  %v6402_v53 = vld [vmem:[%s12020_s4 + $0x90] sm:$0xff]  ;;  %v6399_v54 = vld [vmem:[%s12021_s5 + $0x78] sm:$0xff] }
  0x1f   : > { %2468 = vperm.xlu0 %6668, %v2462_v12   ;;  %v6404_v55 = vld [vmem:[%s12021_s5 + $0x80] sm:$0xff]  ;;  %v6401_v56 = vld [vmem:[%s12020_s4 + $0x88] sm:$0xff]  ;;  %v6406_v57 = vld [vmem:[%s12021_s5 + $0x90] sm:$0xff] }
  0x20   : > { %v6403_v58 = vld [vmem:[%s12020_s4 + $0x98] sm:$0xff]  ;;  %v6409_v59 = vld [vmem:[%s12020_s4 + $0xa0] sm:$0xff]  ;;  %v6405_v60 = vld [vmem:[%s12021_s5 + $0x88] sm:$0xff] }
  0x21   : > { %v6411_v61 = vld [vmem:[%s12020_s4 + $0xb0] sm:$0xff]  ;;  %v6407_v62 = vld [vmem:[%s12021_s5 + $0x98] sm:$0xff]  ;;  %v6413_v63 = vld [vmem:[%s12021_s5 + $0xa0] sm:$0xff] }
  0x22   : > { %2473 = vperm.xlu1 %6669, %v2463_v19   ;;  %v6410_v0 = vld [vmem:[%s12020_s4 + $0xa8] sm:$0xff]  ;;  %v6415_v2 = vld [vmem:[%s12021_s5 + $0xb0] sm:$0xff]  ;;  %v6412_v3 = vld [vmem:[%s12020_s4 + $0xb8] sm:$0xff] }
  0x23   : > { %2478 = vperm.xlu0 %6668, %v2464_v14   ;;  %6301 = vmatmul.mubr.msk.bf16.gmra.mrb[4].mxu0 %vm495_vm0, %v6677_v15  ;;  %v6418_v4 = vld [vmem:[%s12020_s4 + $0xc0] sm:$0xff]  ;;  %v6414_v5 = vld [vmem:[%s12021_s5 + $0xa8] sm:$0xff]  ;;  %v6420_v6 = vld [vmem:[%s12020_s4 + $0xd0] sm:$0xff] }
  0x24   : > { %578 = vmatprep.mubr.bf16.mxu0 %v12028_v1  ;;  %6306 = vmatmul.mubr.msk.bf16.gmra.mrb[4].mxu1 %vm495_vm0, %v6682_v21  ;;  %v6416_v7 = vld [vmem:[%s12021_s5 + $0xb8] sm:$0xff]  ;;  %v6422_v8 = vld [vmem:[%s12021_s5 + $0xc0] sm:$0xff]  ;;  %v6419_v9 = vld [vmem:[%s12020_s4 + $0xc8] sm:$0xff] }
  0x25   : > { %628 = vmatprep.mubr.bf16.mxu1 %v12028_v1  ;;  %v6424_v10 = vld [vmem:[%s12021_s5 + $0xd0] sm:$0xff]  ;;  %v6421_v11 = vld [vmem:[%s12020_s4 + $0xd8] sm:$0xff]  ;;  %v6423_v12 = vld [vmem:[%s12021_s5 + $0xc8] sm:$0xff] }
  0x26   : > { %2483 = vperm.xlu1 %6669, %v2465_v23   ;;  %v6425_v13 = vld [vmem:[%s12021_s5 + $0xd8] sm:$0xff] }
  0x27   : > { %2500 = vperm.xlu0 %6668, %v2494_v18  }
  0x2a   : > { %2505 = vperm.xlu1 %6669, %v2495_v25  }
  0x2b   : > { %2510 = vperm.xlu0 %6668, %v2496_v20   ;;  %6302 = vmatmul.mubr.msk.bf16.gmra.mrb[8].mxu0 %vm495_vm0, %v6678_v22 }
  0x2c   : > { %588 = vmatprep.mubr.bf16.mxu0 %v12028_v1  ;;  %6307 = vmatmul.mubr.msk.bf16.gmra.mrb[8].mxu1 %vm495_vm0, %v6683_v27 }
  0x2d   : > { %638 = vmatprep.mubr.bf16.mxu1 %v12028_v1 }
  0x2e   : > { %2515 = vperm.xlu1 %6669, %v2497_v29  }
  0x2f   : > { %2618 = vperm.xlu0 %6668, %v6374_v24  }
  0x32   : > { %2623 = vperm.xlu1 %6669, %v6375_v31  }
  0x33   : > { %2628 = vperm.xlu0 %6668, %v6376_v26   ;;  %6303 = vmatmul.mubr.msk.bf16.gmra.mrb[12].mxu0 %vm495_vm0, %v6679_v28 }
  0x34   : > { %598 = vmatprep.mubr.bf16.mxu0 %v12028_v1 }
  0x36   : > { %2633 = vperm.xlu1 %6669, %v6377_v34  }
  0x37   : > { %2651 = vperm.xlu0 %6668, %v6378_v30  }
  0x3a   : > { %2656 = vperm.xlu1 %6669, %v6379_v36  }
  0x3b   : > { %2661 = vperm.xlu0 %6668, %v6380_v32   ;;  %6304 = vmatmul.mubr.msk.bf16.gmra.mrb[16].mxu0 %vm495_vm0, %v6680_v33 }
  0x3e   : > { %2666 = vperm.xlu1 %6669, %v6381_v38  }
  0x3f   : > { %2770 = vperm.xlu0 %6668, %v6383_v35  }
  0x42   : > { %2775 = vperm.xlu1 %6669, %v6384_v40  }
  0x43   : > { %2780 = vperm.xlu0 %6668, %v6385_v37  }
  0x46   : > { %2785 = vperm.xlu1 %6669, %v6386_v42  }
  0x47   : > { %2803 = vperm.xlu0 %6668, %v6387_v39  }
  0x4a   : > { %2808 = vperm.xlu1 %6669, %v6388_v44  }
  0x4b   : > { %2813 = vperm.xlu0 %6668, %v6389_v41  }
  0x4e   : > { %2818 = vperm.xlu1 %6669, %v6390_v46  }
  0x4f   : > { %2873 = vperm.xlu0 %6668, %v6392_v43  }
  0x52   : > { %2878 = vperm.xlu1 %6669, %v6393_v48  }
  0x53   : > { %2883 = vperm.xlu0 %6668, %v6394_v45   ;;  %v12039_v45 = vmov 920167782  }
  0x56   : > { %2888 = vperm.xlu1 %6669, %v6395_v50  }
  0x57   : > { %2914 = vperm.xlu0 %6668, %v6396_v47   ;;  %v12035_v47 = vmov 1326507024  }
  0x5a   : > { %2919 = vperm.xlu1 %6669, %v6397_v52   ;;  %v12043_v52 = vmov 2102212464  }
  0x5b   : > { %2924 = vperm.xlu0 %6668, %v6398_v49  }
  0x5e   : > { %2929 = vperm.xlu1 %6669, %v6399_v54   ;;  %v12037_v54 = vmov 2475754826  }
  0x5f   : > { %3004 = vperm.xlu0 %6668, %v6400_v51  }
  0x62   : > { %3009 = vperm.xlu1 %6669, %v6401_v56   ;;  %v12032_v56 = vmov 2131351028  }
  0x63   : > { %3014 = vperm.xlu0 %6668, %v6402_v53  }
  0x66   : > { %3019 = vperm.xlu1 %6669, %v6403_v58  }
  0x67   : > { %3037 = vperm.xlu0 %6668, %v6404_v55  }
  0x6a   : > { %3042 = vperm.xlu1 %6669, %v6405_v60  }
  0x6b   : > { %3047 = vperm.xlu0 %6668, %v6406_v57  }
  0x6e   : > { %3052 = vperm.xlu1 %6669, %v6407_v62  }
  0x6f   : > { %3156 = vperm.xlu0 %6668, %v6409_v59  }
  0x72   : > { %3161 = vperm.xlu1 %6669, %v6410_v0  }
  0x73   : > { %3166 = vperm.xlu0 %6668, %v6411_v61   ;;  %v12041_v61 = vmov 683565275  }
  0x76   : > { %3171 = vperm.xlu1 %6669, %v6412_v3  }
  0x77   : > { %3189 = vperm.xlu0 %6668, %v6413_v63  }
  0x7a   : > { %3194 = vperm.xlu1 %6669, %v6414_v5  }
  0x7b   : > { %3199 = vperm.xlu0 %6668, %v6415_v2  }
  0x7e   : > { %3204 = vperm.xlu1 %6669, %v6416_v7  }
  0x7f   : > { %3308 = vperm.xlu0 %6668, %v6418_v4  }
  0x82   : > { %3313 = vperm.xlu1 %6669, %v6419_v9  }
  0x83   : > { %3318 = vperm.xlu0 %6668, %v6420_v6  }
  0x86   : > { %3323 = vperm.xlu1 %6669, %v6421_v11  }
  0x87   : > { %3341 = vperm.xlu0 %6668, %v6422_v8  }
  0x8a   : > { %3346 = vperm.xlu1 %6669, %v6423_v12  }
  0x8b   : > { %3351 = vperm.xlu0 %6668, %v6424_v10  }
  0x8e   : > { %3356 = vperm.xlu1 %6669, %v6425_v13   ;;  %v666_v26 = vpop.permute.xlu0 %665 }
  0x92   : > { %v7118_v44 = vpop.permute.xlu0 %670 }
  0xee   : > { %v560_v14 = vpop.f32.mrb[0].mxu0 }
  0xef   : > { %v562_v15 = vpop.f32.mrb[1].mxu0  ;;  %v683_v27 = vadd.f32 %v666_v26, %v560_v14 }
  0xf0   : > { %v564_v16 = vpop.f32.mrb[2].mxu0  ;;  %v684_v33 = vadd.f32 %v666_v26, %v562_v15 }
  0xf1   : > { %v7088_v17 = vpop.f32.mrb[3].mxu0  ;;  %v7106_v28 = vmax.f32 %v683_v27, 0.0  ;;  %v685_v49 = vadd.f32 %v7118_v44, %v564_v16 }
  0xf2   : > { %v7111_v35 = vmax.f32 %v684_v33, 0.0 }
  0xf3   : > { %12319 = vst [vmem:[#allocation4_spill] sm:$0xff] %v7106_v28  ;;  %v742_v29 = vand.u32 2139095040, %v7106_v28  ;;  %v12031_v50 = vand.u32 2147483647, %v7106_v28  ;;  %v7141_v5 = vmax.f32 %v685_v49, 0.0 }
  0xf4   : > { %12321 = vst [vmem:[#allocation6_spill] sm:$0xff] %v7111_v35  ;;  %v845_v36 = vand.u32 2139095040, %v7111_v35 }
  0xf5   : > { %v743_v31 = vshrl.u32 %v742_v29, 23  ;;  %v746_v3 = vand.u32 8388607, %v12031_v50  ;;  %12323 = vst [vmem:[#allocation8_spill] sm:$0xff] %v7141_v5  ;;  %v948_v16 = vand.u32 2139095040, %v7141_v5 }
  0xf6   : > { %v7090_v18 = vpop.f32.mrb[4].mxu0  ;;  %v846_v38 = vshrl.u32 %v845_v36, 23 }
  0xf7   : > { %v7092_v19 = vpop.f32.mrb[5].mxu0  ;;  %v6310_v32 = vadd.s32 4294967169, %v743_v31  ;;  %v747_v13 = vor.u32 8388608, %v746_v3 }
  0xf8   : > { %v7094_v20 = vpop.f32.mrb[6].mxu0  ;;  %v6314_v41 = vadd.s32 4294967169, %v846_v38 }
  0xf9   : > { %v7096_v21 = vpop.f32.mrb[7].mxu0  ;;  %v749_v34 = vadd.s32 1, %v6310_v32  ;;  %v787_v33 = vshll.u32 %v747_v13, 8 }
  0xfa   : > { %v852_v43 = vadd.s32 1, %v6314_v41 }
  0xfb   : > { %vm750_vm1 = vcmp.gt.s32.totalorder %v749_v34, 0 }
  0xfc   : > { %v751_v37 = vsel %vm750_vm1, %v749_v34, 0  ;;  %vm853_vm2 = vcmp.gt.s32.totalorder %v852_v43, 0  ;;  %v949_v34 = vshrl.u32 %v948_v16, 23 }
  0xfd   : > { %v753_v40 = vand.u32 31, %v751_v37  ;;  %v7126_v51 = vshrl.u32 %v751_v37, 5  ;;  %v854_v4 = vsel %vm853_vm2, %v852_v43, 0  ;;  %v12029_v43 = vand.u32 2147483647, %v7111_v35 }
  0xfe   : > { %v7098_v22 = vpop.f32.mrb[8].mxu0  ;;  %v856_v11 = vand.u32 31, %v854_v4  ;;  %v7182_v49 = vshrl.u32 %v854_v4, 5 }
  0xff   : > { %v7100_v23 = vpop.f32.mrb[9].mxu0  ;;  %v7116_v42 = vsub.s32 32, %v753_v40  ;;  %v765_v53 = vshll.u32 %v12043_v52, %v753_v40  ;;  %v768_v59 = vshll.u32 %v12039_v45, %v753_v40  ;;  %v756_v62 = vshll.u32 %v12041_v61, %v753_v40 }
 0x100   : > { %v7102_v24 = vpop.f32.mrb[10].mxu0  ;;  %v759_v63 = vshll.u32 %v12037_v54, %v753_v40  ;;  %v762_v0 = vshll.u32 %v12032_v56, %v753_v40  ;;  %vm774_vm3 = vcmp.lt.s32.totalorder %v7126_v51, 4  ;;  %vm771_vm4 = vcmp.lt.s32.totalorder %v7126_v51, 1 }
 0x101   : > { %12317 = vst [vmem:[#allocation2_spill] sm:$0xff] %v7102_v24  ;;  %v7104_v25 = vpop.f32.mrb[11].mxu0  ;;  %v766_v46 = vshrl.u32 %v12039_v45, %v7116_v42  ;;  %v769_v48 = vshrl.u32 %v12035_v47, %v7116_v42  ;;  %v757_v55 = vshrl.u32 %v12037_v54, %v7116_v42  ;;  %v760_v57 = vshrl.u32 %v12032_v56, %v7116_v42 }
 0x102   : > { %12318 = vst [vmem:[#allocation3_spill] sm:$0xff] %v7104_v25  ;;  %v763_v58 = vshrl.u32 %v12043_v52, %v7116_v42  ;;  %vm773_vm5 = vcmp.lt.s32.totalorder %v7126_v51, 3  ;;  %vm772_vm6 = vcmp.lt.s32.totalorder %v7126_v51, 2  ;;  %v7162_v29 = vsub.s32 32, %v856_v11 }
 0x103   : > { %v767_v60 = vor.u32 %v766_v46, %v765_v53  ;;  %v770_v2 = vor.u32 %v769_v48, %v768_v59  ;;  %v758_v6 = vor.u32 %v757_v55, %v756_v62  ;;  %v761_v7 = vor.u32 %v760_v57, %v759_v63  ;;  %v676_v57 = vpop.permute.xlu1 %675 }
 0x104   : > { %v764_v8 = vor.u32 %v763_v58, %v762_v0  ;;  %v869_v38 = vshrl.u32 %v12039_v45, %v7162_v29  ;;  %v872_v46 = vshrl.u32 %v12035_v47, %v7162_v29  ;;  %v868_v53 = vshll.u32 %v12043_v52, %v856_v11 }
 0x105   : > { %v780_v9 = vsel %vm774_vm3, %v767_v60, 920167782  ;;  %v784_v10 = vsel %vm774_vm3, %v770_v2, 1326507024  ;;  %v779_v14 = vsel %vm771_vm4, %v758_v6, %v761_v7  ;;  %v6318_v55 = vadd.s32 4294967169, %v949_v34 }
 0x106   : > { %v7109_v30 = vpop.f32.mrb[12].mxu0  ;;  %v781_v15 = vsel %vm773_vm5, %v764_v8, %v780_v9  ;;  %v783_v26 = vsel %vm771_vm4, %v761_v7, %v764_v8  ;;  %v785_v27 = vsel %vm773_vm5, %v767_v60, %v784_v10  ;;  %v776_v48 = vsel %vm774_vm3, %v764_v8, 2102212464 }
 0x107   : > { %12320 = vst [vmem:[#allocation5_spill] sm:$0xff] %v7109_v30  ;;  %v7114_v39 = vpop.f32.mrb[13].mxu0  ;;  %v782_v31 = vsel %vm772_vm6, %v779_v14, %v781_v15  ;;  %v786_v32 = vsel %vm772_vm6, %v783_v26, %v785_v27  ;;  %v860_v58 = vshrl.u32 %v12037_v54, %v7162_v29  ;;  %v863_v59 = vshrl.u32 %v12032_v56, %v7162_v29 }
 0x108   : > { %12322 = vst [vmem:[#allocation7_spill] sm:$0xff] %v7114_v39  ;;  %v7150_v12 = vpop.f32.mrb[14].mxu0  ;;  %v7168_v36 = vmul.u32.u64.low %v787_v33, %v782_v31  ;;  %v7169_v37 = vmul.u32.u64.high %v787_v33, %v782_v31, %v7168_v36  ;;  %v7174_v40 = vmul.u32.u64.low %v787_v33, %v786_v32  ;;  %v7175_v41 = vmul.u32.u64.high %v787_v33, %v786_v32, %v7174_v40 }
 0x109   : > { %12324 = vst [vmem:[#allocation9_spill] sm:$0xff] %v7150_v12  ;;  %v866_v60 = vshrl.u32 %v12043_v52, %v7162_v29  ;;  %v871_v62 = vshll.u32 %v12039_v45, %v856_v11  ;;  %v755_v63 = vshrl.u32 %v12041_v61, %v7116_v42  ;;  %v870_v0 = vor.u32 %v869_v38, %v868_v53  ;;  %v7229_v53 = vpop.f32.mrb[15].mxu0 }
 0x10a   : > { %v687_v2 = vadd.f32 %v676_v57, %v7090_v18  ;;  %v859_v3 = vshll.u32 %v12041_v61, %v856_v11  ;;  %v862_v4 = vshll.u32 %v12037_v54, %v856_v11  ;;  %v865_v8 = vshll.u32 %v12032_v56, %v856_v11  ;;  %12326 = vst [vmem:[#allocation11_spill] sm:$0xff] %v7229_v53 }
 0x10b   : > { %v873_v9 = vor.u32 %v872_v46, %v871_v62  ;;  %v775_v10 = vsel %vm771_vm4, %v755_v63, %v758_v6  ;;  %v777_v13 = vsel %vm773_vm5, %v761_v7, %v776_v48  ;;  %v849_v14 = vand.u32 8388607, %v12029_v43 }
 0x10c   : > { %v955_v42 = vadd.s32 1, %v6318_v55  ;;  %v861_v15 = vor.u32 %v860_v58, %v859_v3  ;;  %v864_v16 = vor.u32 %v863_v59, %v862_v4  ;;  %v867_v18 = vor.u32 %v866_v60, %v865_v8 }
 0x10d   : > { %vm877_vm7 = vcmp.lt.s32.totalorder %v7182_v49, 4  ;;  %v797_v26 = vadd.s32 1, %v7169_v37  ;;  %v7208_v27 = vmax.f32 %v687_v2, 0.0  ;;  %vm796_vm8 = vc.u32 %v7175_v41, %v7168_v36 }
 0x10e   : > { %v883_v11 = vsel %vm877_vm7, %v870_v0, 920167782  ;;  %v887_v6 = vsel %vm877_vm7, %v873_v9, 1326507024  ;;  %v778_v7 = vsel %vm772_vm6, %v775_v10, %v777_v13  ;;  %vm874_vm9 = vcmp.lt.s32.totalorder %v7182_v49, 1 }
 0x10f   : > { %12325 = vst [vmem:[#allocation10_spill] sm:$0xff] %v7208_v27  ;;  %vm876_vm10 = vcmp.lt.s32.totalorder %v7182_v49, 3  ;;  %v850_v31 = vor.u32 8388608, %v849_v14  ;;  %v882_v32 = vsel %vm874_vm9, %v861_v15, %v864_v16  ;;  %vm956_vm11 = vcmp.gt.s32.totalorder %v955_v42, 0 }
 0x110   : > { %v884_v34 = vsel %vm876_vm10, %v867_v18, %v883_v11  ;;  %v798_v38 = vsel %vm796_vm8, %v797_v26, %v7169_v37  ;;  %v886_v40 = vsel %vm874_vm9, %v864_v16, %v867_v18  ;;  %v888_v51 = vsel %vm876_vm10, %v870_v0, %v887_v6 }
 0x111   : > { %v1154_v46 = vand.u32 2139095040, %v7208_v27  ;;  %v794_v48 = vmul.u32 %v787_v33, %v778_v7  ;;  %vm875_vm12 = vcmp.lt.s32.totalorder %v7182_v49, 2  ;;  %v957_v58 = vsel %vm956_vm11, %v955_v42, 0 }
 0x112   : > { %v885_v55 = vsel %vm875_vm12, %v882_v32, %v884_v34  ;;  %v889_v37 = vsel %vm875_vm12, %v886_v40, %v888_v51  ;;  %v890_v60 = vshll.u32 %v850_v31, 8  ;;  %v959_v0 = vand.u32 31, %v957_v58 }
 0x113   : > { %v799_v59 = vadd.s32 %v798_v38, %v794_v48  ;;  %v1155_v62 = vshrl.u32 %v1154_v46, 23  ;;  %v686_v33 = vadd.f32 %v7118_v44, %v7088_v17  ;;  %v879_v9 = vsel %vm877_vm7, %v867_v18, 2102212464 }
 0x114   : > { %v7235_v63 = vmul.u32.u64.low %v890_v60, %v885_v55  ;;  %v7236_v2 = vmul.u32.u64.high %v890_v60, %v885_v55, %v7235_v63  ;;  %v7241_v3 = vmul.u32.u64.low %v890_v60, %v889_v37  ;;  %v7242_v4 = vmul.u32.u64.high %v890_v60, %v889_v37, %v7241_v3 }
 0x115   : > { %v800_v8 = vadd.s32 536870912, %v799_v59  ;;  %v6326_v10 = vadd.s32 4294967169, %v1155_v62  ;;  %v858_v13 = vshrl.u32 %v12041_v61, %v7162_v29  ;;  %v7248_v14 = vsub.s32 32, %v959_v0 }
 0x116   : > { %v7250_v42 = vmax.f32 %v686_v33, 0.0  ;;  %v688_v26 = vadd.f32 %v676_v57, %v7092_v19  ;;  %v12030_v11 = vand.u32 2147483647, %v7141_v5  ;;  %v880_v18 = vsel %vm876_vm10, %v864_v16, %v879_v9 }
 0x117   : > { %v7254_v17 = vshrl.u32 %v800_v8, 30  ;;  %v878_v44 = vsel %vm874_vm9, %v858_v13, %v861_v15  ;;  %v1161_v6 = vadd.s32 1, %v6326_v10  ;;  %v900_v7 = vadd.s32 1, %v7236_v2 }
 0x118   : > { %12327 = vst [vmem:[#allocation12_spill] sm:$0xff] %v7250_v42  ;;  %v972_v29 = vshrl.u32 %v12039_v45, %v7248_v14  ;;  %v1051_v31 = vand.u32 2139095040, %v7250_v42  ;;  %v7264_v32 = vmax.f32 %v688_v26, 0.0  ;;  %v881_v19 = vsel %vm875_vm12, %v878_v44, %v880_v18 }
 0x119   : > { %12328 = vst [vmem:[#allocation13_spill] sm:$0xff] %v7254_v17  ;;  %vm899_vm13 = vc.u32 %v7242_v4, %v7235_v63  ;;  %v952_v57 = vand.u32 8388607, %v12030_v11  ;;  %v975_v15 = vshrl.u32 %v12035_v47, %v7248_v14  ;;  %v802_v16 = vshll.u32 %v7254_v17, 30 }
 0x11a   : > { %12329 = vst [vmem:[#allocation14_spill] sm:$0xff] %v7264_v32  ;;  %v7275_v34 = vshrl.u32 %v957_v58, 5  ;;  %v963_v38 = vshrl.u32 %v12037_v54, %v7248_v14  ;;  %v971_v40 = vshll.u32 %v12043_v52, %v959_v0  ;;  %v966_v49 = vshrl.u32 %v12032_v56, %v7248_v14 }
 0x11b   : > { %v969_v51 = vshrl.u32 %v12043_v52, %v7248_v14  ;;  %v974_v46 = vshll.u32 %v12039_v45, %v959_v0  ;;  %vm1162_vm14 = vcmp.gt.s32.totalorder %v1161_v6, 0  ;;  %v897_v48 = vmul.u32 %v890_v60, %v881_v19 }
 0x11c   : > { %v901_v55 = vsel %vm899_vm13, %v900_v7, %v7236_v2  ;;  %v973_v37 = vor.u32 %v972_v29, %v971_v40  ;;  %v1257_v58 = vand.u32 2139095040, %v7264_v32  ;;  %v962_v62 = vshll.u32 %v12041_v61, %v959_v0 }
 0x11d   : > { %v965_v33 = vshll.u32 %v12037_v54, %v959_v0  ;;  %v968_v3 = vshll.u32 %v12032_v56, %v959_v0  ;;  %v976_v8 = vor.u32 %v975_v15, %v974_v46  ;;  %v7290_v9 = vsub.s32 %v799_v59, %v802_v16 }
 0x11e   : > { %vm980_vm15 = vcmp.lt.s32.totalorder %v7275_v34, 4  ;;  %v1052_v10 = vshrl.u32 %v1051_v31, 23  ;;  %v1163_v13 = vsel %vm1162_vm14, %v1161_v6, 0  ;;  %v7293_v26 = vadd.s32 %v901_v55, %v897_v48  ;;  %v7302_v6 = vpop.permute.xlu1 %680 }
 0x11f   : > { %v964_v60 = vor.u32 %v963_v38, %v962_v62  ;;  %v967_v2 = vor.u32 %v966_v49, %v965_v33  ;;  %v970_v44 = vor.u32 %v969_v51, %v968_v3  ;;  %v986_v18 = vsel %vm980_vm15, %v973_v37, 920167782 }
 0x120   : > { %v1258_v7 = vshrl.u32 %v1257_v58, 23  ;;  %v990_v29 = vsel %vm980_vm15, %v976_v8, 1326507024  ;;  %v1165_v0 = vand.u32 31, %v1163_v13  ;;  %v805_v59 = vsub.s32 0, %v7290_v9 }
 0x121   : > { %v953_v19 = vor.u32 8388608, %v952_v57  ;;  %vm977_vm1 = vcmp.lt.s32.totalorder %v7275_v34, 1  ;;  %vm979_vm2 = vcmp.lt.s32.totalorder %v7275_v34, 3  ;;  %v903_v31 = vadd.s32 536870912, %v7293_v26 }
 0x122   : > { %v985_v15 = vsel %vm977_vm1, %v964_v60, %v967_v2  ;;  %v987_v16 = vsel %vm979_vm2, %v970_v44, %v986_v18  ;;  %v6322_v38 = vadd.s32 4294967169, %v1052_v10  ;;  %v989_v40 = vsel %vm977_vm1, %v967_v2, %v970_v44 }
 0x123   : > { %v991_v57 = vsel %vm979_vm2, %v973_v37, %v990_v29  ;;  %v6330_v49 = vadd.s32 4294967169, %v1258_v7  ;;  %v689_v51 = vadd.f32 %v7302_v6, %v7094_v20  ;;  %vm978_vm3 = vcmp.lt.s32.totalorder %v7275_v34, 2 }
 0x124   : > { %v7316_v46 = vsub.s32 32, %v1165_v0  ;;  %v6311_v48 = vmin.u32 %v805_v59, %v7290_v9  ;;  %v988_v55 = vsel %vm978_vm3, %v985_v15, %v987_v16  ;;  %v7321_v58 = vshll.u32 %v953_v19, 8 }
 0x125   : > { %v961_v62 = vshrl.u32 %v12041_v61, %v7248_v14  ;;  %v992_v37 = vsel %vm978_vm3, %v989_v40, %v991_v57  ;;  %v1058_v33 = vadd.s32 1, %v6322_v38  ;;  %v12034_v20 = vand.u32 2147483647, %v7208_v27 }
 0x126   : > { %v7328_v3 = vshrl.u32 %v903_v31, 30  ;;  %v982_v8 = vsel %vm980_vm15, %v970_v44, 2102212464  ;;  %v1264_v10 = vadd.s32 1, %v6330_v49  ;;  %v7332_v18 = vmax.f32 %v689_v51, 0.0 }
 0x127   : > { %v7335_v7 = vmul.u32.u64.low %v7321_v58, %v988_v55  ;;  %v7336_v29 = vmul.u32.u64.high %v7321_v58, %v988_v55, %v7335_v7  ;;  %v1180_v14 = vshll.u32 %v12039_v45, %v1165_v0  ;;  %v1181_v59 = vshrl.u32 %v12035_v47, %v7316_v46 }
 0x128   : > { %12330 = vst [vmem:[#allocation15_spill] sm:$0xff] %v7328_v3  ;;  %12331 = vst [vmem:[#allocation16_spill] sm:$0xff] %v7332_v18  ;;  %v807_v19 = vclz %v6311_v48  ;;  %v7343_v31 = vmul.u32.u64.low %v7321_v58, %v992_v37  ;;  %v7344_v15 = vmul.u32.u64.high %v7321_v58, %v992_v37, %v7343_v31  ;;  %v7346_v16 = vshrl.u32 %v1163_v13, 5 }
 0x129   : > { %v1171_v44 = vshll.u32 %v12037_v54, %v1165_v0  ;;  %v1174_v38 = vshll.u32 %v12032_v56, %v1165_v0  ;;  %v1177_v40 = vshll.u32 %v12043_v52, %v1165_v0  ;;  %v1178_v57 = vshrl.u32 %v12039_v45, %v7316_v46 }
 0x12a   : > { %v1172_v49 = vshrl.u32 %v12032_v56, %v7316_v46  ;;  %v1175_v51 = vshrl.u32 %v12043_v52, %v7316_v46  ;;  %vm1265_vm4 = vcmp.gt.s32.totalorder %v1264_v10, 0  ;;  %v1360_v48 = vand.u32 2139095040, %v7332_v18 }
 0x12b   : > { %v981_v13 = vsel %vm977_vm1, %v961_v62, %v964_v60  ;;  %vm1059_vm5 = vcmp.gt.s32.totalorder %v1058_v33, 0  ;;  %v1182_v55 = vor.u32 %v1181_v59, %v1180_v14  ;;  %v1158_v37 = vand.u32 8388607, %v12034_v20 }
 0x12c   : > { %v1168_v31 = vshll.u32 %v12041_v61, %v1165_v0  ;;  %v1169_v1 = vshrl.u32 %v12037_v54, %v7316_v46  ;;  %vm1186_vm6 = vcmp.lt.s32.totalorder %v7346_v16, 4  ;;  %v905_v43 = vshll.u32 %v7328_v3, 30 }
 0x12d   : > { %v983_v11 = vsel %vm979_vm2, %v967_v2, %v982_v8  ;;  %v1179_v50 = vor.u32 %v1178_v57, %v1177_v40  ;;  %v1266_v56 = vsel %vm1265_vm4, %v1264_v10, 0  ;;  %v6312_v60 = vadd.s32 4294967294, %v807_v19 }
 0x12e   : > { %v7369_v62 = vor.u32 %v1172_v49, %v1171_v44  ;;  %v1176_v14 = vor.u32 %v1175_v51, %v1174_v38  ;;  %v1361_v59 = vshrl.u32 %v1360_v48, 23  ;;  %v1003_v20 = vadd.s32 1, %v7336_v29 }
 0x12f   : > { %vm1183_vm7 = vcmp.lt.s32.totalorder %v7346_v16, 1  ;;  %vm1185_vm8 = vcmp.lt.s32.totalorder %v7346_v16, 3  ;;  %v1196_v0 = vsel %vm1186_vm6, %v1182_v55, 1326507024  ;;  %vm1002_vm9 = vc.u32 %v7344_v15, %v7335_v7 }
 0x130   : > { %v1159_v2 = vor.u32 8388608, %v1158_v37  ;;  %v1170_v8 = vor.u32 %v1169_v1, %v1168_v31  ;;  %v1268_v10 = vand.u32 31, %v1266_v56  ;;  %v984_v19 = vsel %vm978_vm3, %v981_v13, %v983_v11 }
 0x131   : > { %vm1184_vm10 = vcmp.lt.s32.totalorder %v7346_v16, 2  ;;  %v1192_v44 = vsel %vm1186_vm6, %v1179_v50, 920167782  ;;  %v1195_v38 = vsel %vm1183_vm7, %v7369_v62, %v1176_v14  ;;  %v1197_v40 = vsel %vm1185_vm8, %v1179_v50, %v1196_v0 }
 0x132   : > { %v6334_v57 = vadd.s32 4294967169, %v1361_v59  ;;  %v690_v1 = vadd.f32 %v7302_v6, %v7096_v21  ;;  %vm6313_vm11 = vcmp.lt.s32.totalorder %v6312_v60, 0  ;;  %v7391_v34 = vsub.s32 %v7293_v26, %v905_v43 }
 0x133   : > { %v1004_v11 = vsel %vm1002_vm9, %v1003_v20, %v7336_v29  ;;  %v1060_v49 = vsel %vm1059_vm5, %v1058_v33, 0  ;;  %v1191_v51 = vsel %vm1183_vm7, %v1170_v8, %v7369_v62  ;;  %v1193_v48 = vsel %vm1185_vm8, %v1176_v14, %v1192_v44 }
 0x134   : > { %v7400_v50 = vshll.u32 %v1159_v2, 8  ;;  %v7402_v13 = vsub.s32 32, %v1268_v10  ;;  %v7406_v21 = vadd.s32 %v7168_v36, %v7175_v41  ;;  %v1000_v43 = vmul.u32 %v7321_v58, %v984_v19 }
 0x135   : > { %v1198_v26 = vsel %vm1184_vm10, %v1195_v38, %v1197_v40  ;;  %v7411_v6 = vshrl.u32 %v1060_v49, 5  ;;  %v7413_v33 = vand.u32 31, %v1060_v49  ;;  %v1367_v20 = vadd.s32 1, %v6334_v57 }
 0x136   : > { %v7415_v29 = vmax.f32 %v690_v1, 0.0  ;;  %v7417_v55 = vsel %vm6313_vm11, 0, %v6312_v60  ;;  %v908_v37 = vsub.s32 0, %v7391_v34  ;;  %v7420_v31 = vadd.s32 %v1004_v11, %v1000_v43 }
 0x137   : > { %12332 = vst [vmem:[#allocation17_spill] sm:$0xff] %v7413_v33  ;;  %v1194_v36 = vsel %vm1184_vm10, %v1191_v51, %v1193_v48  ;;  %v7425_v41 = vmul.u32.u64.low %v7400_v50, %v1198_v26  ;;  %v7426_v58 = vmul.u32.u64.high %v7400_v50, %v1198_v26, %v7425_v41  ;;  %v1280_v59 = vshll.u32 %v12043_v52, %v1268_v10 }
 0x138   : > { %12333 = vst [vmem:[#allocation18_spill] sm:$0xff] %v7415_v29  ;;  %v1281_v0 = vshrl.u32 %v12039_v45, %v7402_v13  ;;  %v12047_v2 = vand.u32 2147483647, %v7264_v32  ;;  %v7432_v60 = vshrl.u32 %v1266_v56, 5  ;;  %v1283_v19 = vshll.u32 %v12039_v45, %v1268_v10 }
 0x139   : > { %12334 = vst [vmem:[#allocation19_spill] sm:$0xff] %v7426_v58  ;;  %v1284_v44 = vshrl.u32 %v12035_v47, %v7402_v13  ;;  %v1271_v38 = vshll.u32 %v12041_v61, %v1268_v10  ;;  %v1274_v40 = vshll.u32 %v12037_v54, %v1268_v10  ;;  %vm1368_vm12 = vcmp.gt.s32.totalorder %v1367_v20, 0 }
 0x13a   : > { %v1463_v57 = vand.u32 2139095040, %v7415_v29  ;;  %v1272_v1 = vshrl.u32 %v12037_v54, %v7402_v13  ;;  %v12335_v11 = vmov 2131351028   ;;  %v1278_v51 = vshrl.u32 %v12043_v52, %v7402_v13 }
 0x13b   : > { %v1275_v49 = vshrl.u32 %v12335_v11, %v7402_v13  ;;  %v1277_v56 = vshll.u32 %v12335_v11, %v1268_v10  ;;  %v1167_v48 = vshrl.u32 %v12041_v61, %v7316_v46  ;;  %v1282_v41 = vor.u32 %v1281_v0, %v1280_v59 }
 0x13c   : > { %v7450_v43 = vmul.u32.u64.low %v7400_v50, %v1194_v36  ;;  %v7451_v26 = vmul.u32.u64.high %v7400_v50, %v1194_v36, %v7450_v43  ;;  %v811_v47 = vsub.s32 32, %v7417_v55  ;;  %v1261_v54 = vand.u32 8388607, %v12047_v2 }
 0x13d   : > { %v1285_v45 = vor.u32 %v1284_v44, %v1283_v19  ;;  %vm1289_vm13 = vcmp.lt.s32.totalorder %v7432_v60, 4  ;;  %v1188_v46 = vsel %vm1186_vm6, %v1176_v14, 2102212464  ;;  %v1369_v61 = vsel %vm1368_vm12, %v1367_v20, 0 }
 0x13e   : > { %12336 = vst [vmem:[#allocation20_spill] sm:$0xff] %v7450_v43  ;;  %v1464_v52 = vshrl.u32 %v1463_v57, 23  ;;  %v1006_v36 = vadd.s32 536870912, %v7420_v31  ;;  %v7463_v42 = vor.u32 %v1272_v1, %v1271_v38  ;;  %v7465_v59 = vor.u32 %v1275_v49, %v1274_v40 }
 0x13f   : > { %v1279_v0 = vor.u32 %v1278_v51, %v1277_v56  ;;  %v1187_v19 = vsel %vm1183_vm7, %v1167_v48, %v1170_v8  ;;  %vm1286_vm14 = vcmp.lt.s32.totalorder %v7432_v60, 1  ;;  %vm1288_vm15 = vcmp.lt.s32.totalorder %v7432_v60, 3 }
 0x140   : > { %v1295_v44 = vsel %vm1289_vm13, %v1282_v41, 920167782  ;;  %v1189_v14 = vsel %vm1185_vm8, %v7369_v62, %v1188_v46  ;;  %v1262_v20 = vor.u32 8388608, %v1261_v54  ;;  %v1299_v38 = vsel %vm1289_vm13, %v1285_v45, 1326507024 }
 0x141   : > { %v1371_v40 = vand.u32 31, %v1369_v61  ;;  %v815_v57 = vsub.s32 4294967266, %v7417_v55  ;;  %v7480_v8 = vmin.u32 %v908_v37, %v7391_v34  ;;  %v7483_v1 = vsub.s32 32, %v7413_v33 }
 0x142   : > { %v6338_v49 = vadd.s32 4294967169, %v1464_v52  ;;  %v7485_v56 = vshrl.u32 %v1006_v36, 30  ;;  %vm1287_vm1 = vcmp.lt.s32.totalorder %v7432_v60, 2  ;;  %v1294_v54 = vsel %vm1286_vm14, %v7463_v42, %v7465_v59 }
 0x143   : > { %v1296_v45 = vsel %vm1288_vm15, %v1279_v0, %v1295_v44  ;;  %v1190_v62 = vsel %vm1184_vm10, %v1187_v19, %v1189_v14  ;;  %v1209_v37 = vadd.s32 1, %v7451_v26  ;;  %v1298_v52 = vsel %vm1286_vm14, %v7465_v59, %v1279_v0  ;;  %v7512_v19 = vpop.permute.xlu0 %705 }
 0x144   : > { %12337 = vst [vmem:[#allocation21_spill] sm:$0xff] %v7485_v56  ;;  %v1300_v51 = vsel %vm1288_vm15, %v1282_v41, %v1299_v38  ;;  %v12338_v48 = vmov 2102212464   ;;  %vm1208_vm2 = vc.u32 %v7426_v58, %v7450_v43  ;;  %v7508_v36 = vshll.u32 %v1262_v20, 8 }
 0x145   : > { %v7504_v46 = vshll.u32 %v12338_v48, %v7413_v33  ;;  %v7510_v16 = vsub.s32 32, %v1371_v40  ;;  %v7515_v44 = vshrl.u32 %v7406_v21, %v811_v47  ;;  %v12339_v14 = vmov 920167782  }
 0x146   : > { %v7519_v2 = vshll.u32 %v12339_v14, %v7413_v33  ;;  %v1297_v41 = vsel %vm1287_vm1, %v1294_v54, %v1296_v45  ;;  %v1470_v38 = vadd.s32 1, %v6338_v49  ;;  %v1008_v10 = vshll.u32 %v7485_v56, 30 }
 0x147   : > { %v1206_v20 = vmul.u32 %v7400_v50, %v1190_v62  ;;  %v1301_v3 = vsel %vm1287_vm1, %v1298_v52, %v1300_v51  ;;  %v723_v53 = vadd.f32 %v7512_v19, %v7098_v22  ;;  %v1210_v47 = vsel %vm1208_vm2, %v1209_v37, %v7451_v26 }
 0x148   : > { %v12340_v21 = vmov 683565275   ;;  %v7533_v39 = vshrl.u32 %v1369_v61, 5  ;;  %v7536_v49 = vmul.u32.u64.low %v7508_v36, %v1297_v41  ;;  %v7537_v54 = vmul.u32.u64.high %v7508_v36, %v1297_v41, %v7536_v49 }
 0x149   : > { %v1270_v33 = vshrl.u32 %v12340_v21, %v7402_v13  ;;  %v1383_v50 = vshll.u32 %v12338_v48, %v1371_v40  ;;  %v1384_v45 = vshrl.u32 %v12339_v14, %v7510_v16  ;;  %v1291_v22 = vsel %vm1289_vm13, %v1279_v0, 2102212464 }
 0x14a   : > { %12341 = vst [vmem:[#allocation22_spill] sm:$0xff] %v7536_v49  ;;  %v7546_v26 = vmul.u32.u64.low %v7508_v36, %v1301_v3  ;;  %v7547_v13 = vmul.u32.u64.high %v7508_v36, %v1301_v3, %v7546_v26  ;;  %vm1471_vm3 = vcmp.gt.s32.totalorder %v1470_v38, 0  ;;  %v1374_v61 = vshll.u32 %v12340_v21, %v1371_v40 }
 0x14b   : > { %v12343_v62 = vmov 2475754826   ;;  %v1386_v52 = vshll.u32 %v12339_v14, %v1371_v40  ;;  %v12344_v51 = vmov 1326507024   ;;  %v1378_v0 = vshrl.u32 %v12335_v11, %v7510_v16 }
 0x14c   : > { %12342 = vst [vmem:[#allocation23_spill] sm:$0xff] %v7547_v13  ;;  %v1377_v37 = vshll.u32 %v12343_v62, %v1371_v40  ;;  %v1387_v41 = vshrl.u32 %v12344_v51, %v7510_v16  ;;  %v1375_v12 = vshrl.u32 %v12343_v62, %v7510_v16  ;;  %v1380_v56 = vshll.u32 %v12335_v11, %v1371_v40 }
 0x14d   : > { %v1381_v3 = vshrl.u32 %v12338_v48, %v7510_v16  ;;  %v7561_v26 = vadd.s32 127, %v815_v57  ;;  %v7564_v30 = vsub.s32 %v7420_v31, %v1008_v10  ;;  %v1385_v32 = vor.u32 %v1384_v45, %v1383_v50 }
 0x14e   : > { %v1472_v17 = vsel %vm1471_vm3, %v1470_v38, 0  ;;  %v910_v25 = vclz %v7480_v8  ;;  %v7567_v27 = vadd.s32 %v1210_v47, %v1206_v20  ;;  %v12346_v5 = vand.u32 2147483647, %v7332_v18  ;;  %v7580_v38 = vpop.f32.mrb[16].mxu0 }
 0x14f   : > { %12345 = vst [vmem:[#allocation24_spill] sm:$0xff] %v7564_v30  ;;  %vm1392_vm4 = vcmp.lt.s32.totalorder %v7533_v39, 4  ;;  %v1290_v40 = vsel %vm1286_vm14, %v1270_v33, %v7463_v42  ;;  %v1292_v31 = vsel %vm1288_vm15, %v7465_v59, %v1291_v22  ;;  %v1388_v10 = vor.u32 %v1387_v41, %v1386_v52  ;;  %12348 = vst [vmem:[#allocation26_spill] sm:$0xff] %v7580_v38 }
 0x150   : > { %v1364_v35 = vand.u32 8388607, %v12346_v5  ;;  %v7578_v57 = vmax.f32 %v723_v53, 0.0  ;;  %v1376_v8 = vor.u32 %v1375_v12, %v1374_v61  ;;  %v1379_v20 = vor.u32 %v1378_v0, %v1377_v37 }
 0x151   : > { %v1382_v47 = vor.u32 %v1381_v3, %v1380_v56  ;;  %v1474_v50 = vand.u32 31, %v1472_v17  ;;  %v1011_v5 = vsub.s32 0, %v7564_v30  ;;  %vm1389_vm5 = vcmp.lt.s32.totalorder %v7533_v39, 1 }
 0x152   : > { %12347 = vst [vmem:[#allocation25_spill] sm:$0xff] %v7578_v57  ;;  %vm1391_vm6 = vcmp.lt.s32.totalorder %v7533_v39, 3  ;;  %v1398_v42 = vsel %vm1392_vm4, %v1385_v32, 920167782  ;;  %v7589_v33 = vshrl.u32 %v12339_v14, %v7483_v1  ;;  %v1212_v53 = vadd.s32 536870912, %v7567_v27 }
 0x153   : > { %v1293_v12 = vsel %vm1287_vm1, %v1290_v40, %v1292_v31  ;;  %v1365_v59 = vor.u32 8388608, %v1364_v35  ;;  %vm1311_vm7 = vc.u32 %v7547_v13, %v7536_v49  ;;  %v1312_v56 = vadd.s32 1, %v7537_v54  ;;  %v7659_v49 = vpop.f32.mrb[17].mxu0 }
 0x154   : > { %vm1390_vm8 = vcmp.lt.s32.totalorder %v7533_v39, 2  ;;  %v1402_v45 = vsel %vm1392_vm4, %v1388_v10, 1326507024  ;;  %v1397_v22 = vsel %vm1389_vm5, %v1376_v8, %v1379_v20  ;;  %v1399_v61 = vsel %vm1391_vm6, %v1382_v47, %v1398_v42  ;;  %12350 = vst [vmem:[#allocation28_spill] sm:$0xff] %v7659_v49 }
 0x155   : > { %v7604_v37 = vsub.s32 32, %v1474_v50  ;;  %v3407_v35 = vand.u32 2139095040, %v7578_v57  ;;  %v817_v60 = vshll.u32 %v7561_v26, 23  ;;  %v7608_v52 = vadd.s32 4294967294, %v910_v25 }
 0x156   : > { %v6319_v41 = vmin.u32 %v1011_v5, %v7564_v30  ;;  %v7612_v3 = vshrl.u32 %v1212_v53, 30  ;;  %v1401_v40 = vsel %vm1389_vm5, %v1379_v20, %v1382_v47  ;;  %v1403_v31 = vsel %vm1391_vm6, %v1385_v32, %v1402_v45 }
 0x157   : > { %v7618_v10 = vshll.u32 %v1365_v59, 8  ;;  %v1309_v42 = vmul.u32 %v7508_v36, %v1293_v12  ;;  %v1313_v25 = vsel %vm1311_vm7, %v1312_v56, %v7537_v54  ;;  %v1373_v26 = vshrl.u32 %v12340_v21, %v7510_v16 }
 0x158   : > { %12349 = vst [vmem:[#allocation27_spill] sm:$0xff] %v7612_v3  ;;  %v1400_v5 = vsel %vm1390_vm8, %v1397_v22, %v1399_v61  ;;  %v1394_v53 = vsel %vm1392_vm4, %v1382_v47, 2102212464  ;;  %v1486_v32 = vshll.u32 %v12338_v48, %v1474_v50  ;;  %v1487_v59 = vshrl.u32 %v12339_v14, %v7604_v37 }
 0x159   : > { %v3408_v36 = vshrl.u32 %v3407_v35, 23  ;;  %v1404_v12 = vsel %vm1390_vm8, %v1401_v40, %v1403_v31  ;;  %v7636_v45 = vshrl.u32 %v1472_v17, 5  ;;  %v1489_v54 = vshll.u32 %v12339_v14, %v1474_v50 }
 0x15a   : > { %v1490_v16 = vshrl.u32 %v12344_v51, %v7604_v37  ;;  %v7642_v56 = vmul.u32.u64.low %v7618_v10, %v1400_v5  ;;  %v7643_v22 = vmul.u32.u64.high %v7618_v10, %v1400_v5, %v7642_v56  ;;  %v1477_v47 = vshll.u32 %v12340_v21, %v1474_v50 }
 0x15b   : > { %v1480_v61 = vshll.u32 %v12343_v62, %v1474_v50  ;;  %v1478_v35 = vshrl.u32 %v12343_v62, %v7604_v37  ;;  %v1481_v17 = vshrl.u32 %v12335_v11, %v7604_v37  ;;  %v1483_v40 = vshll.u32 %v12335_v11, %v1474_v50  ;;  %v7666_v50 = vpop.f32.mrb[18].mxu0 }
 0x15c   : > { %v1484_v31 = vshrl.u32 %v12338_v48, %v7604_v37  ;;  %v7656_v0 = vmul.u32.u64.low %v7618_v10, %v1404_v12  ;;  %v7657_v5 = vmul.u32.u64.high %v7618_v10, %v1404_v12, %v7656_v0  ;;  %v1488_v38 = vor.u32 %v1487_v59, %v1486_v32  ;;  %v7673_v59 = vpop.f32.mrb[19].mxu0 }
 0x15d   : > { %v6427_v18 = vadd.s32 4294967169, %v3408_v36  ;;  %v7661_v13 = vadd.s32 %v1313_v25, %v1309_v42  ;;  %v12351_v28 = vand.u32 2147483647, %v7415_v29  ;;  %v1491_v58 = vor.u32 %v1490_v16, %v1489_v54  ;;  %12352 = vst [vmem:[#allocation29_spill] sm:$0xff] %v7673_v59 }
 0x15e   : > { %vm1495_vm9 = vcmp.lt.s32.totalorder %v7636_v45, 4  ;;  %v1013_v24 = vclz %v6319_v41  ;;  %v1214_v30 = vshll.u32 %v7612_v3, 30  ;;  %v1393_v0 = vsel %vm1389_vm5, %v1373_v26, %v1376_v8 }
 0x15f   : > { %v1467_v43 = vand.u32 8388607, %v12351_v28  ;;  %v724_v32 = vadd.f32 %v7512_v19, %v7100_v23  ;;  %v1395_v42 = vsel %vm1391_vm6, %v1379_v20, %v1394_v53  ;;  %v1479_v28 = vor.u32 %v1478_v35, %v1477_v47 }
 0x160   : > { %v1482_v25 = vor.u32 %v1481_v17, %v1480_v61  ;;  %v1485_v36 = vor.u32 %v1484_v31, %v1483_v40  ;;  %vm1492_vm10 = vcmp.lt.s32.totalorder %v7636_v45, 1  ;;  %vm1494_vm11 = vcmp.lt.s32.totalorder %v7636_v45, 3 }
 0x161   : > { %v1501_v41 = vsel %vm1495_vm9, %v1488_v38, 920167782  ;;  %v3414_v12 = vadd.s32 1, %v6427_v18  ;;  %v818_v8 = vor.u32 4788187, %v817_v60  ;;  %v1315_v26 = vadd.s32 536870912, %v7661_v13 }
 0x162   : > { %v1468_v23 = vor.u32 8388608, %v1467_v43  ;;  %v1505_v19 = vsel %vm1495_vm9, %v1491_v58, 1326507024  ;;  %v6320_v54 = vadd.s32 4294967294, %v1013_v24  ;;  %v7685_v20 = vsub.s32 %v7567_v27, %v1214_v30 }
 0x163   : > { %v1396_v53 = vsel %vm1390_vm8, %v1393_v0, %v1395_v42  ;;  %v7689_v16 = vmax.f32 %v724_v32, 0.0  ;;  %v1415_v47 = vadd.s32 1, %v7643_v22  ;;  %vm1493_vm12 = vcmp.lt.s32.totalorder %v7636_v45, 2 }
 0x164   : > { %v1500_v18 = vsel %vm1492_vm10, %v1479_v28, %v1482_v25  ;;  %v1502_v43 = vsel %vm1494_vm11, %v1485_v36, %v1501_v41  ;;  %vm1414_vm13 = vc.u32 %v7657_v5, %v7642_v56  ;;  %v1504_v24 = vsel %vm1492_vm10, %v1482_v25, %v1485_v36 }
 0x165   : > { %12353 = vst [vmem:[#allocation30_spill] sm:$0xff] %v7689_v16  ;;  %v1506_v30 = vsel %vm1494_vm11, %v1488_v38, %v1505_v19  ;;  %vm3415_vm14 = vcmp.gt.s32.totalorder %v3414_v12, 0  ;;  %vm6317_vm15 = vcmp.lt.s32.totalorder %v7608_v52, 0  ;;  %v1078_v39 = vshrl.u32 %v12344_v51, %v7483_v1 }
 0x166   : > { %v7706_v27 = vshrl.u32 %v1315_v26, 30  ;;  %v7708_v58 = vshll.u32 %v1468_v23, 8  ;;  %v12355_v60 = vshll.u32 %v7290_v9, %v7417_v55  ;;  %v1217_v35 = vsub.s32 0, %v7685_v20 }
 0x167   : > { %v1412_v17 = vmul.u32 %v7618_v10, %v1396_v53  ;;  %v1503_v38 = vsel %vm1493_vm12, %v1500_v18, %v1502_v43  ;;  %v1416_v40 = vsel %vm1414_vm13, %v1415_v47, %v7643_v22  ;;  %v1507_v31 = vsel %vm1493_vm12, %v1504_v24, %v1506_v30 }
 0x168   : > { %12354 = vst [vmem:[#allocation31_spill] sm:$0xff] %v7706_v27  ;;  %v814_v61 = vor.u32 %v7515_v44, %v12355_v60  ;;  %v3416_v0 = vsel %vm3415_vm14, %v3414_v12, 0  ;;  %v3510_v32 = vand.u32 2139095040, %v7689_v16  ;;  %v819_v42 = vand.u32 2147483647, %v818_v8 }
 0x169   : > { %v7723_v9 = vsel %vm6317_vm15, 0, %v7608_v52  ;;  %vm6321_vm1 = vcmp.lt.s32.totalorder %v6320_v54, 0  ;;  %v7727_v55 = vor.u32 %v7589_v33, %v7504_v46  ;;  %v1317_v44 = vshll.u32 %v7706_v27, 30 }
 0x16a   : > { %v1476_v10 = vshrl.u32 %v12340_v21, %v7604_v37  ;;  %v7733_v22 = vmul.u32.u64.low %v7708_v58, %v1503_v38  ;;  %v7734_v41 = vmul.u32.u64.high %v7708_v58, %v1503_v38, %v7733_v22  ;;  %v7737_v12 = vadd.s32 %v1416_v40, %v1412_v17 }
 0x16b   : > { %v7740_v52 = vmul.u32.u64.low %v7708_v58, %v1507_v31  ;;  %v7741_v8 = vmul.u32.u64.high %v7708_v58, %v1507_v31, %v7740_v52  ;;  %v3418_v26 = vand.u32 31, %v3416_v0  ;;  %v821_v23 = vcvt.s32.f32 %v814_v61 }
 0x16c   : > { %v6327_v46 = vmin.u32 %v1217_v35, %v7685_v20  ;;  %v1497_v33 = vsel %vm1495_vm9, %v1485_v36, 2102212464  ;;  %v3511_v19 = vshrl.u32 %v3510_v32, 23  ;;  %v898_v37 = vadd.s32 %v7235_v63, %v7242_v4 }
 0x16d   : > { %v914_v53 = vsub.s32 32, %v7723_v9  ;;  %v918_v47 = vsub.s32 4294967266, %v7723_v9  ;;  %v1079_v18 = vor.u32 %v1078_v39, %v7519_v2  ;;  %v7751_v43 = vmul.f32 %v821_v23, %v819_v42 }
 0x16e   : > { %v7754_v24 = vsel %vm6321_vm1, 0, %v6320_v54  ;;  %vm1083_vm2 = vcmp.lt.s32.totalorder %v7411_v6, 4  ;;  %v7758_v30 = vsub.s32 %v7661_v13, %v1317_v44  ;;  %v1418_v36 = vadd.s32 536870912, %v7737_v12 }
 0x16f   : > { %v1496_v63 = vsel %vm1492_vm10, %v1476_v10, %v1479_v28  ;;  %v1498_v4 = vsel %vm1494_vm11, %v1482_v25, %v1497_v33  ;;  %v7765_v60 = vsub.s32 32, %v3418_v26  ;;  %v1001_v2 = vadd.s32 %v7335_v7, %v7344_v15 }
 0x170   : > { %v7772_v54 = vsel %vm1083_vm2, %v7727_v55, 920167782  ;;  %v1219_v13 = vclz %v6327_v46  ;;  %v6431_v39 = vadd.s32 4294967169, %v3511_v19  ;;  %v915_v61 = vshll.u32 %v7391_v34, %v7723_v9 }
 0x171   : > { %v916_v35 = vshrl.u32 %v898_v37, %v914_v53  ;;  %v919_v28 = vadd.s32 127, %v918_v47  ;;  %v7778_v25 = vsel %vm1083_vm2, %v1079_v18, 1326507024  ;;  %v1017_v7 = vsub.s32 32, %v7754_v24 }
 0x172   : > { %v1499_v15 = vsel %vm1493_vm12, %v1496_v63, %v1498_v4  ;;  %v1518_v38 = vadd.s32 1, %v7734_v41  ;;  %v1320_v40 = vsub.s32 0, %v7758_v30  ;;  %v7786_v31 = vshrl.u32 %v1418_v36, 30 }
 0x173   : > { %vm1517_vm3 = vc.u32 %v7741_v8, %v7733_v22  ;;  %v3431_v34 = vshrl.u32 %v12339_v14, %v7765_v60  ;;  %v1021_v32 = vsub.s32 4294967266, %v7754_v24  ;;  %v6328_v42 = vadd.s32 4294967294, %v1219_v13 }
 0x174   : > { %12356 = vst [vmem:[#allocation32_spill] sm:$0xff] %v7786_v31  ;;  %v12074_v9 = vand.u32 2147483647, %v7578_v57  ;;  %v3517_v44 = vadd.s32 1, %v6431_v39  ;;  %v1515_v45 = vmul.u32 %v7708_v58, %v1499_v15  ;;  %v7795_v10 = vshrl.u32 %v3416_v0, 5 }
 0x175   : > { %v3430_v52 = vshll.u32 %v12338_v48, %v3418_v26  ;;  %v3434_v23 = vshrl.u32 %v12344_v51, %v7765_v60  ;;  %v1519_v46 = vsel %vm1517_vm3, %v1518_v38, %v7734_v41  ;;  %v3422_v33 = vshrl.u32 %v12343_v62, %v7765_v60 }
 0x176   : > { %v3425_v19 = vshrl.u32 %v12335_v11, %v7765_v60  ;;  %v3428_v37 = vshrl.u32 %v12338_v48, %v7765_v60  ;;  %v6331_v58 = vmin.u32 %v1320_v40, %v7758_v30  ;;  %v1420_v0 = vshll.u32 %v7786_v31, 30 }
 0x177   : > { %v3432_v53 = vor.u32 %v3431_v34, %v3430_v52  ;;  %v3433_v47 = vshll.u32 %v12339_v14, %v3418_v26  ;;  %v3421_v18 = vshll.u32 %v12340_v21, %v3418_v26  ;;  %v3424_v41 = vshll.u32 %v12343_v62, %v3418_v26 }
 0x178   : > { %v3427_v36 = vshll.u32 %v12335_v11, %v3418_v26  ;;  %vm3518_vm4 = vcmp.gt.s32.totalorder %v3517_v44, 0  ;;  %v7813_v63 = vor.u32 %v916_v35, %v915_v61  ;;  %v7815_v4 = vadd.s32 %v1519_v46, %v1515_v45 }
 0x179   : > { %v3411_v13 = vand.u32 8388607, %v12074_v9  ;;  %v3435_v39 = vor.u32 %v3434_v23, %v3433_v47  ;;  %v7819_v15 = vor.u32 %v3422_v33, %v3421_v18  ;;  %v7821_v38 = vor.u32 %v3425_v19, %v3424_v41  ;;  %v7868_v9 = vpop.permute.xlu0 %715 }
 0x17a   : > { %v3429_v40 = vor.u32 %v3428_v37, %v3427_v36  ;;  %vm3439_vm5 = vcmp.lt.s32.totalorder %v7795_v10, 4  ;;  %v920_v34 = vshll.u32 %v919_v28, 23  ;;  %v1322_v52 = vclz %v6331_v58 }
 0x17b   : > { %v3445_v26 = vsel %vm3439_vm5, %v3432_v53, 920167782  ;;  %v3519_v61 = vsel %vm3518_vm4, %v3517_v44, 0  ;;  %v1019_v35 = vshrl.u32 %v1001_v2, %v1017_v7  ;;  %v1022_v45 = vadd.s32 127, %v1021_v32  ;;  %v12357_v44 = vld [vmem:[#allocation24_spill] sm:$0xff] }
 0x17c   : > { %vm6329_vm6 = vcmp.lt.s32.totalorder %v6328_v42, 0  ;;  %v7827_v46 = vsub.s32 %v7737_v12, %v1420_v0  ;;  %v3412_v23 = vor.u32 8388608, %v3411_v13  ;;  %vm3436_vm7 = vcmp.lt.s32.totalorder %v7795_v10, 1  ;;  %v7846_v0 = vpop.permute.xlu1 %710 }
 0x17d   : > { %vm3438_vm8 = vcmp.lt.s32.totalorder %v7795_v10, 3  ;;  %v3449_v33 = vsel %vm3439_vm5, %v3435_v39, 1326507024  ;;  %v1521_v28 = vadd.s32 536870912, %v7815_v4  ;;  %v3444_v2 = vsel %vm3436_vm7, %v7819_v15, %v7821_v38 }
 0x17e   : > { %v3446_v7 = vsel %vm3438_vm8, %v3429_v40, %v3445_v26  ;;  %v3521_v12 = vand.u32 31, %v3519_v61  ;;  %v7840_v32 = vor.u32 4788187, %v920_v34  ;;  %v1018_v19 = vshll.u32 %v12357_v44, %v7754_v24 }
 0x17f   : > { %v7844_v37 = vsel %vm6329_vm6, 0, %v6328_v42  ;;  %v6332_v58 = vadd.s32 4294967294, %v1322_v52  ;;  %v1423_v47 = vsub.s32 0, %v7827_v46  ;;  %vm3437_vm9 = vcmp.lt.s32.totalorder %v7795_v10, 2  ;;  %v12358_v42 = vld [vmem:[#allocation2_spill] sm:$0xff] }
 0x180   : > { %v3448_v18 = vsel %vm3436_vm7, %v7821_v38, %v3429_v40  ;;  %v3450_v41 = vsel %vm3438_vm8, %v3432_v53, %v3449_v33  ;;  %v1023_v13 = vshll.u32 %v1022_v45, 23  ;;  %v3447_v24 = vsel %vm3437_vm9, %v3444_v2, %v3446_v7  ;;  %v12360_v53 = vld [vmem:[#allocation19_spill] sm:$0xff]  ;;  %v12361_v33 = vld [vmem:[#allocation20_spill] sm:$0xff] }
 0x181   : > { %v725_v39 = vadd.f32 %v7846_v0, %v12358_v42  ;;  %v7860_v34 = vor.u32 %v1019_v35, %v1018_v19  ;;  %v7862_v52 = vshrl.u32 %v1521_v28, 30  ;;  %v7864_v26 = vshll.u32 %v3412_v23, 8 }
 0x182   : > { %v7866_v44 = vsub.s32 32, %v3521_v12  ;;  %v1207_v17 = vadd.s32 %v12361_v33, %v12360_v53  ;;  %v1227_v45 = vsub.s32 4294967266, %v7844_v37  ;;  %v3451_v2 = vsel %vm3437_vm9, %v3448_v18, %v3450_v41 }
 0x183   : > { %12359 = vst [vmem:[#allocation24_spill] sm:$0xff] %v7862_v52  ;;  %vm6333_vm10 = vcmp.lt.s32.totalorder %v6332_v58, 0  ;;  %v6335_v35 = vmin.u32 %v1423_v47, %v7827_v46  ;;  %v7878_v23 = vmul.u32.u64.low %v7864_v26, %v3447_v24  ;;  %v7879_v28 = vmul.u32.u64.high %v7864_v26, %v3447_v24, %v7878_v23 }
 0x184   : > { %v7882_v19 = vor.u32 4788187, %v1023_v13  ;;  %v1223_v42 = vsub.s32 32, %v7844_v37  ;;  %v1224_v53 = vshll.u32 %v7685_v20, %v7844_v37  ;;  %v7887_v33 = vmax.f32 %v725_v39, 0.0 }
 0x185   : > { %v1523_v18 = vshll.u32 %v7862_v52, 30  ;;  %v7891_v41 = vmul.u32.u64.low %v7864_v26, %v3451_v2  ;;  %v7892_v36 = vmul.u32.u64.high %v7864_v26, %v3451_v2, %v7891_v41  ;;  %v3534_v47 = vshrl.u32 %v12339_v14, %v7866_v44 }
 0x186   : > { %12362 = vst [vmem:[#allocation2_spill] sm:$0xff] %v7887_v33  ;;  %v1228_v24 = vadd.s32 127, %v1227_v45  ;;  %v7896_v7 = vsel %vm6333_vm10, 0, %v6332_v58  ;;  %v12363_v13 = vand.u32 2147483647, %v7689_v16  ;;  %v3537_v20 = vshrl.u32 %v12344_v51, %v7866_v44  ;;  %v7909_v41 = vpop.permute.xlu0 %2468 }
 0x187   : > { %v1425_v37 = vclz %v6335_v35  ;;  %v3441_v39 = vsel %vm3439_vm5, %v3429_v40, 2102212464  ;;  %v7906_v52 = vshrl.u32 %v3519_v61, 5  ;;  %v3533_v2 = vshll.u32 %v12338_v48, %v3521_v12  ;;  %12364 = vst [vmem:[#allocation19_spill] sm:$0xff] %v7909_v41 }
 0x188   : > { %v7900_v57 = vand.u32 8388607, %v12363_v13  ;;  %v3525_v58 = vshrl.u32 %v12343_v62, %v7866_v44  ;;  %v3528_v45 = vshrl.u32 %v12335_v11, %v7866_v44  ;;  %v3531_v13 = vshrl.u32 %v12338_v48, %v7866_v44 }
 0x189   : > { %v3536_v35 = vshll.u32 %v12339_v14, %v3521_v12  ;;  %v7919_v16 = vsub.s32 %v7815_v4, %v1523_v18  ;;  %v3420_v40 = vshrl.u32 %v12340_v21, %v7765_v60  ;;  %v3535_v61 = vor.u32 %v3534_v47, %v3533_v2 }
 0x18a   : > { %v3613_v41 = vand.u32 2139095040, %v7887_v33  ;;  %v3524_v29 = vshll.u32 %v12340_v21, %v3521_v12  ;;  %v3527_v27 = vshll.u32 %v12343_v62, %v3521_v12  ;;  %v3530_v31 = vshll.u32 %v12335_v11, %v3521_v12 }
 0x18b   : > { %v3538_v59 = vor.u32 %v3537_v20, %v3536_v35  ;;  %v6336_v3 = vadd.s32 4294967294, %v1425_v37  ;;  %v3440_v49 = vsel %vm3436_vm7, %v3420_v40, %v7819_v15  ;;  %v3442_v4 = vsel %vm3438_vm8, %v7821_v38, %v3441_v39  ;;  %v7945_v37 = vpop.permute.xlu0 %2478  ;;  %v12368_v40 = vld [vmem:[#allocation22_spill] sm:$0xff] }
 0x18c   : > { %v3462_v60 = vadd.s32 1, %v7879_v28  ;;  %v7934_v18 = vor.u32 %v3525_v58, %v3524_v29  ;;  %v7936_v47 = vor.u32 %v3528_v45, %v3527_v27  ;;  %v7938_v2 = vor.u32 %v3531_v13, %v3530_v31  ;;  %12365 = vst [vmem:[#allocation20_spill] sm:$0xff] %v7945_v37 }
 0x18d   : > { %vm3542_vm11 = vcmp.lt.s32.totalorder %v7906_v52, 4  ;;  %v1225_v12 = vshrl.u32 %v1207_v17, %v1223_v42  ;;  %vm3461_vm12 = vc.u32 %v7892_v36, %v7878_v23  ;;  %v3614_v20 = vshrl.u32 %v3613_v41, 23  ;;  %v12366_v41 = vld [vmem:[#allocation4_spill] sm:$0xff] }
 0x18e   : > { %v3548_v15 = vsel %vm3542_vm11, %v3535_v61, 920167782  ;;  %v1229_v38 = vshll.u32 %v1228_v24, 23  ;;  %v1526_v29 = vsub.s32 0, %v7919_v16  ;;  %v3443_v27 = vsel %vm3437_vm9, %v3440_v49, %v3442_v4 }
 0x18f   : > { %v3552_v31 = vsel %vm3542_vm11, %v3538_v59, 1326507024  ;;  %v1330_v17 = vsub.s32 4294967266, %v7896_v7  ;;  %vm6337_vm13 = vcmp.lt.s32.totalorder %v6336_v3, 0  ;;  %vm3539_vm14 = vcmp.lt.s32.totalorder %v7906_v52, 1 }
 0x190   : > { %vm3541_vm15 = vcmp.lt.s32.totalorder %v7906_v52, 3  ;;  %v3463_v42 = vsel %vm3461_vm12, %v3462_v60, %v7879_v28  ;;  %v3515_v39 = vor.u32 8388608, %v7900_v57  ;;  %v3547_v10 = vsel %vm3539_vm14, %v7934_v18, %v7936_v47 }
 0x191   : > { %v3549_v49 = vsel %vm3541_vm15, %v7938_v2, %v3548_v15  ;;  %v3459_v59 = vmul.u32 %v7864_v26, %v3443_v27  ;;  %v3551_v24 = vsel %vm3539_vm14, %v7936_v47, %v7938_v2  ;;  %v3553_v28 = vsel %vm3541_vm15, %v3535_v61, %v3552_v31  ;;  %v12367_v26 = vld [vmem:[#allocation23_spill] sm:$0xff]  ;;  %v7982_v61 = vpop.permute.xlu0 %2500 }
 0x192   : > { %v6435_v57 = vadd.s32 4294967169, %v3614_v20  ;;  %vm741_vm1 = vcmp.lt.s32.totalorder %v12366_v41, 0  ;;  %v1226_v58 = vor.u32 %v1225_v12, %v1224_v53  ;;  %v7972_v45 = vsel %vm6337_vm13, 0, %v6336_v3  ;;  %12369 = vst [vmem:[#allocation4_spill] sm:$0xff] %v7982_v61 }
 0x193   : > { %v6339_v13 = vmin.u32 %v1526_v29, %v7919_v16  ;;  %vm3540_vm3 = vcmp.lt.s32.totalorder %v7906_v52, 2  ;;  %v1230_v35 = vor.u32 4788187, %v1229_v38  ;;  %v1310_v4 = vadd.s32 %v12368_v40, %v12367_v26  ;;  %v12374_v40 = vld [vmem:[#allocation6_spill] sm:$0xff] }
 0x194   : > { %v7978_v60 = vadd.s32 %v3463_v42, %v3459_v59  ;;  %v3550_v15 = vsel %vm3540_vm3, %v3547_v10, %v3549_v49  ;;  %v1326_v20 = vsub.s32 32, %v7896_v7  ;;  %v1331_v53 = vadd.s32 127, %v1330_v17 }
 0x195   : > { %v3554_v3 = vsel %vm3540_vm3, %v3551_v24, %v3553_v28  ;;  %v7987_v12 = vshll.u32 %v3515_v39, 8  ;;  %v922_v38 = vand.u32 2147483647, %v7840_v32  ;;  %v1025_v29 = vand.u32 2147483647, %v7882_v19  ;;  %v8002_v32 = vpop.f32.mrb[0].mxu1  ;;  %v8015_v61 = vpop.permute.xlu0 %2510 }
 0x196   : > { %v1433_v27 = vsub.s32 4294967266, %v7972_v45  ;;  %v3620_v31 = vadd.s32 1, %v6435_v57  ;;  %v1233_v42 = vcvt.s32.f32 %v1226_v58  ;;  %v1528_v59 = vclz %v6339_v13  ;;  %12372 = vst [vmem:[#allocation33_spill] sm:$0xff] %v8002_v32  ;;  %v8007_v13 = vpop.f32.mrb[1].mxu1  ;;  %12376 = vst [vmem:[#allocation35_spill] sm:$0xff] %v8015_v61  ;;  %v12381_v61 = vld [vmem:[#allocation10_spill] sm:$0xff] }
 0x197   : > { %v7993_v10 = vmul.u32.u64.low %v7987_v12, %v3550_v15  ;;  %v7994_v49 = vmul.u32.u64.high %v7987_v12, %v3550_v15, %v7993_v10  ;;  %v1231_v17 = vand.u32 2147483647, %v1230_v35  ;;  %v3465_v26 = vadd.s32 536870912, %v7978_v60  ;;  %12373 = vst [vmem:[#allocation34_spill] sm:$0xff] %v8007_v13 }
 0x198   : > { %v7999_v39 = vmul.u32.u64.low %v7987_v12, %v3554_v3  ;;  %v8000_v24 = vmul.u32.u64.high %v7987_v12, %v3554_v3, %v7999_v39  ;;  %v1027_v19 = vcvt.s32.f32 %v7860_v34  ;;  %v1327_v28 = vshll.u32 %v7758_v30, %v7896_v7 }
 0x199   : > { %12370 = vst [vmem:[#allocation23_spill] sm:$0xff] %v7993_v10  ;;  %v1328_v57 = vshrl.u32 %v1310_v4, %v1326_v20  ;;  %v1332_v58 = vshll.u32 %v1331_v53, 23  ;;  %vm844_vm4 = vcmp.lt.s32.totalorder %v12374_v40, 0  ;;  %v1413_v35 = vadd.s32 %v7642_v56, %v7657_v5  ;;  %v8013_v39 = vpop.f32.mrb[2].mxu1 }
 0x19a   : > { %12371 = vst [vmem:[#allocation22_spill] sm:$0xff] %v8000_v24  ;;  %v1429_v15 = vsub.s32 32, %v7972_v45  ;;  %v1434_v3 = vadd.s32 127, %v1433_v27  ;;  %vm3621_vm5 = vcmp.gt.s32.totalorder %v3620_v31, 0  ;;  %12375 = vst [vmem:[#allocation6_spill] sm:$0xff] %v8013_v39  ;;  %v12377_v34 = vcvt.s32.f32 %v7813_v63  ;;  %v8022_v53 = vpop.f32.mrb[3].mxu1 }
 0x19b   : > { %v1028_v7 = vmul.f32 %v1027_v19, %v1025_v29  ;;  %v6340_v4 = vadd.s32 4294967294, %v1528_v59  ;;  %v3544_v20 = vsel %vm3542_vm11, %v7938_v2, 2102212464  ;;  %12378 = vst [vmem:[#allocation36_spill] sm:$0xff] %v8022_v53  ;;  %v12379_v56 = vxor.u32 2147483648, %v7751_v43  ;;  %v12380_v27 = vld [vmem:[#allocation8_spill] sm:$0xff] }
 0x19c   : > { %v925_v30 = vmul.f32 %v12377_v34, %v922_v38  ;;  %vm947_vm6 = vcmp.lt.s32.totalorder %v12380_v27, 0  ;;  %vm1153_vm7 = vcmp.lt.s32.totalorder %v12381_v61, 0  ;;  %v1234_v63 = vmul.f32 %v1233_v42, %v1231_v17  ;;  %v8035_v59 = vpop.f32.mrb[4].mxu1 }
 0x19d   : > { %v824_v5 = vsel %vm741_vm1, %v12379_v56, %v7751_v43  ;;  %v8031_v38 = vshrl.u32 %v3465_v26, 30  ;;  %v3523_v29 = vshrl.u32 %v12340_v21, %v7866_v44  ;;  %12383 = vst [vmem:[#allocation10_spill] sm:$0xff] %v8035_v59  ;;  %v1329_v2 = vor.u32 %v1328_v57, %v1327_v28  ;;  %v8040_v43 = vpop.f32.mrb[5].mxu1 }
 0x19e   : > { %v1333_v19 = vor.u32 4788187, %v1332_v58  ;;  %v1430_v34 = vshll.u32 %v7827_v46, %v7972_v45  ;;  %v3622_v37 = vsel %vm3621_vm5, %v3620_v31, 0  ;;  %12384 = vst [vmem:[#allocation37_spill] sm:$0xff] %v8040_v43  ;;  %v1431_v56 = vshrl.u32 %v1413_v35, %v1429_v15  ;;  %v8048_v17 = vpop.f32.mrb[6].mxu1  ;;  %v8051_v45 = vpop.permute.xlu1 %720 }
 0x19f   : > { %12382 = vst [vmem:[#allocation8_spill] sm:$0xff] %v8031_v38  ;;  %v1435_v53 = vshll.u32 %v1434_v3, 23  ;;  %v3543_v42 = vsel %vm3539_vm14, %v3523_v29, %v7934_v18  ;;  %v3545_v44 = vsel %vm3541_vm15, %v7936_v47, %v3544_v20  ;;  %12385 = vst [vmem:[#allocation38_spill] sm:$0xff] %v8048_v17  ;;  %v926_v26 = vxor.u32 2147483648, %v925_v30  ;;  %v12386_v18 = vld [vmem:[#allocation3_spill] sm:$0xff]  ;;  %v8058_v35 = vpop.permute.xlu0 %2618 }
 0x1a0   : > { %v1029_v28 = vxor.u32 2147483648, %v1028_v7  ;;  %vm6341_vm8 = vcmp.lt.s32.totalorder %v6340_v4, 0  ;;  %v3565_v46 = vadd.s32 1, %v7994_v49  ;;  %v3467_v31 = vshll.u32 %v8031_v38, 30  ;;  %12387 = vst [vmem:[#allocation3_spill] sm:$0xff] %v8058_v35 }
 0x1a1   : > { %vm3564_vm9 = vc.u32 %v8000_v24, %v7993_v10  ;;  %v3624_v57 = vand.u32 31, %v3622_v37  ;;  %v726_v58 = vadd.f32 %v7846_v0, %v12386_v18  ;;  %v1235_v47 = vxor.u32 2147483648, %v1234_v63 }
 0x1a2   : > { %v1336_v15 = vcvt.s32.f32 %v1329_v2  ;;  %v3546_v3 = vsel %vm3540_vm3, %v3543_v42, %v3545_v44  ;;  %v12388_v20 = vand.u32 2147483647, %v12366_v41  ;;  %v1334_v17 = vand.u32 2147483647, %v1333_v19 }
 0x1a3   : > { %v1432_v43 = vor.u32 %v1431_v56, %v1430_v34  ;;  %v1436_v59 = vor.u32 4788187, %v1435_v53  ;;  %v8073_v18 = vsel %vm844_vm4, %v926_v26, %v925_v30  ;;  %v8076_v52 = vsel %vm6341_vm8, 0, %v6340_v4 }
 0x1a4   : > { %vm8064_vm10 = vcmp.le.f32.partialorder %v12388_v20, 0.7853982  ;;  %v3566_v2 = vsel %vm3564_vm9, %v3565_v46, %v7994_v49  ;;  %v12099_v42 = vand.u32 2147483647, %v7887_v33  ;;  %v8081_v44 = vsub.s32 %v7978_v60, %v3467_v31  ;;  %v8098_v60 = vpop.permute.xlu1 %2473  ;;  %v8102_v46 = vpop.f32.mrb[7].mxu1 }
 0x1a5   : > { %v827_v0 = vsel %vm8064_vm10, %v12366_v41, %v824_v5  ;;  %v3562_v53 = vmul.u32 %v7987_v12, %v3546_v3  ;;  %v8084_v19 = vsub.s32 32, %v3624_v57  ;;  %v8086_v34 = vmax.f32 %v726_v58, 0.0  ;;  %12394 = vst [vmem:[#allocation42_spill] sm:$0xff] %v8098_v60  ;;  %12395 = vst [vmem:[#allocation43_spill] sm:$0xff] %v8102_v46  ;;  %v8104_v31 = vpop.permute.xlu0 %2628 }
 0x1a6   : > { %12391 = vst [vmem:[#allocation39_spill] sm:$0xff] %v8081_v44  ;;  %v8090_v30 = vsel %vm947_vm6, %v1029_v28, %v1028_v7  ;;  %v8094_v4 = vsel %vm1153_vm7, %v1235_v47, %v1234_v63  ;;  %v1516_v49 = vadd.s32 %v7733_v22, %v7741_v8  ;;  %6686 = vsinq.f32 %v827_v0  ;;  %12396 = vst [vmem:[#allocation44_spill] sm:$0xff] %v8104_v31  ;;  %v12397_v22 = vld [vmem:[#allocation13_spill] sm:$0xff]  ;;  %v12398_v47 = vld [vmem:[#allocation14_spill] sm:$0xff] }
 0x1a7   : > { %12392 = vst [vmem:[#allocation40_spill] sm:$0xff] %v8086_v34  ;;  %12393 = vst [vmem:[#allocation41_spill] sm:$0xff] %v8094_v4  ;;  %v1337_v5 = vmul.f32 %v1336_v15, %v1334_v17  ;;  %v1437_v12 = vand.u32 2147483647, %v1436_v59  ;;  %v1439_v56 = vcvt.s32.f32 %v1432_v43  ;;  %v8100_v26 = vadd.s32 %v3566_v2, %v3562_v53  ;;  %v8147_v4 = vpop.f32.mrb[8].mxu1 }
 0x1a8   : > { %v1532_v7 = vsub.s32 32, %v8076_v52  ;;  %v1536_v63 = vsub.s32 4294967266, %v8076_v52  ;;  %v8110_v28 = vand.u32 8388607, %v12099_v42  ;;  %v825_v8 = vsub.s32 4, %v12397_v22  ;;  %v8137_v46 = vpop.permute.xlu1 %2483  ;;  %12401 = vst [vmem:[#allocation46_spill] sm:$0xff] %v8147_v4 }
 0x1a9   : > { %v3470_v17 = vsub.s32 0, %v8081_v44  ;;  %v3636_v59 = vshll.u32 %v12338_v48, %v3624_v57  ;;  %v3637_v43 = vshrl.u32 %v12339_v14, %v8084_v19  ;;  %v3716_v58 = vand.u32 2139095040, %v8086_v34  ;;  %12399 = vst [vmem:[#allocation13_spill] sm:$0xff] %v8137_v46  ;;  %v8141_v39 = vpop.permute.xlu0 %2651 }
 0x1aa   : > { %vm1256_vm11 = vcmp.lt.s32.totalorder %v12398_v47, 0  ;;  %v8119_v15 = vshrl.u32 %v3622_v37, 5  ;;  %v3639_v3 = vshll.u32 %v12339_v14, %v3624_v57  ;;  %v3640_v20 = vshrl.u32 %v12344_v51, %v8084_v19  ;;  %12400 = vst [vmem:[#allocation45_spill] sm:$0xff] %v8141_v39 }
 0x1ab   : > { %6688 = vcosq.f32 %v827_v0  ;;  %v3568_v2 = vadd.s32 536870912, %v8100_v26  ;;  %v3627_v53 = vshll.u32 %v12340_v21, %v3624_v57  ;;  %v3630_v42 = vshll.u32 %v12343_v62, %v3624_v57 }
 0x1ac   : > { %v3633_v60 = vshll.u32 %v12335_v11, %v3624_v57  ;;  %v3628_v31 = vshrl.u32 %v12343_v62, %v8084_v19  ;;  %v3631_v37 = vshrl.u32 %v12335_v11, %v8084_v19  ;;  %v3634_v35 = vshrl.u32 %v12338_v48, %v8084_v19 }
 0x1ad   : > { %v826_v0 = vsel %vm741_vm1, %v825_v8, %v12397_v22  ;;  %v1338_v33 = vxor.u32 2147483648, %v1337_v5  ;;  %v8139_v38 = vmul.f32 %v1439_v56, %v1437_v12  ;;  %v3638_v13 = vor.u32 %v3637_v43, %v3636_v59 }
 0x1ae   : > { %v3717_v57 = vshrl.u32 %v3716_v58, 23  ;;  %v1533_v10 = vshll.u32 %v7919_v16, %v8076_v52  ;;  %v6428_v24 = vmin.u32 %v3470_v17, %v8081_v44  ;;  %v3641_v32 = vor.u32 %v3640_v20, %v3639_v3  ;;  %v8170_v3 = vpop.f32.mrb[9].mxu1 }
 0x1af   : > { %vm3645_vm12 = vcmp.lt.s32.totalorder %v8119_v15, 4  ;;  %v1534_v22 = vshrl.u32 %v1516_v49, %v1532_v7  ;;  %v8149_v8 = vadd.s32 127, %v1536_v63  ;;  %v3618_v12 = vor.u32 8388608, %v8110_v28  ;;  %v12403_v28 = vld [vmem:[#allocation5_spill] sm:$0xff] }
 0x1b0   : > { %v828_v56 = vsel %vm8064_vm10, 0, %v826_v0  ;;  %v8154_v59 = vpop.eup %6686  ;;  %v8156_v43 = vshrl.u32 %v3568_v2, 30  ;;  %v8158_v16 = vor.u32 %v3628_v31, %v3627_v53  ;;  %v8160_v52 = vor.u32 %v3631_v37, %v3630_v42  ;;  %12404 = vst [vmem:[#allocation5_spill] sm:$0xff] %v8170_v3  ;;  %v8172_v42 = vpop.permute.xlu1 %2505  ;;  %v12409_v53 = vld [vmem:[#allocation16_spill] sm:$0xff] }
 0x1b1   : > { %v3635_v17 = vor.u32 %v3634_v35, %v3633_v60  ;;  %vm3642_vm13 = vcmp.lt.s32.totalorder %v8119_v15, 1  ;;  %vm3644_vm14 = vcmp.lt.s32.totalorder %v8119_v15, 3  ;;  %v3651_v49 = vsel %vm3645_vm12, %v3638_v13, 920167782  ;;  %12405 = vst [vmem:[#allocation48_spill] sm:$0xff] %v8172_v42  ;;  %v8205_v3 = vpop.f32.mrb[10].mxu1 }
 0x1b2   : > { %12402 = vst [vmem:[#allocation47_spill] sm:$0xff] %v8156_v43  ;;  %v6439_v7 = vadd.s32 4294967169, %v3717_v57  ;;  %v3472_v63 = vclz %v6428_v24  ;;  %v3655_v29 = vsel %vm3645_vm12, %v3641_v32, 1326507024  ;;  %v727_v58 = vadd.f32 %v7868_v9, %v12403_v28  ;;  %v8182_v32 = vpop.permute.xlu0 %2661  ;;  %12411 = vst [vmem:[#allocation53_spill] sm:$0xff] %v8205_v3 }
 0x1b3   : > { %v832_v31 = vand.u32 3, %v828_v56  ;;  %v8176_v35 = vsel %vm1256_vm11, %v1338_v33, %v1337_v5  ;;  %v1441_v60 = vxor.u32 2147483648, %v8139_v38  ;;  %v8179_v20 = vor.u32 %v1534_v22, %v1533_v10  ;;  %12408 = vst [vmem:[#allocation51_spill] sm:$0xff] %v8182_v32 }
 0x1b4   : > { %12406 = vst [vmem:[#allocation49_spill] sm:$0xff] %v8176_v35  ;;  %v835_v24 = vxor.u32 2147483648, %v8154_v59  ;;  %vm1359_vm15 = vcmp.lt.s32.totalorder %v12409_v53, 0  ;;  %v3570_v37 = vshll.u32 %v8156_v43, 30  ;;  %vm3643_vm1 = vcmp.lt.s32.totalorder %v8119_v15, 2 }
 0x1b5   : > { %12407 = vst [vmem:[#allocation50_spill] sm:$0xff] %v8179_v20  ;;  %v6689_v2 = vpop.eup %6688  ;;  %v3650_v33 = vsel %vm3642_vm13, %v8158_v16, %v8160_v52  ;;  %v3652_v10 = vsel %vm3644_vm14, %v3635_v17, %v3651_v49  ;;  %v1538_v5 = vshll.u32 %v8149_v8, 23  ;;  %v3654_v0 = vsel %vm3642_vm13, %v8160_v52, %v3635_v17 }
 0x1b6   : > { %v3656_v57 = vsel %vm3644_vm14, %v3638_v13, %v3655_v29  ;;  %v3723_v22 = vadd.s32 1, %v6439_v7  ;;  %v6429_v28 = vadd.s32 4294967294, %v3472_v63  ;;  %v8199_v42 = vshll.u32 %v3618_v12, 8  ;;  %v8214_v7 = vpop.permute.xlu1 %2515 }
 0x1b7   : > { %v8201_v32 = vmax.f32 %v727_v58, 0.0  ;;  %vm834_vm3 = vcmp.eq.s32.totalorder %v832_v31, 0  ;;  %v3653_v39 = vsel %vm3643_vm1, %v3650_v33, %v3652_v10  ;;  %v838_v46 = vxor.u32 2147483648, %v6689_v2  ;;  %12413 = vst [vmem:[#allocation55_spill] sm:$0xff] %v8214_v7 }
 0x1b8   : > { %v836_v49 = vsel %vm834_vm3, %v6689_v2, %v835_v24  ;;  %v1664_v8 = vadd.s32 3, %v828_v56  ;;  %v8208_v4 = vsub.s32 %v8100_v26, %v3570_v37  ;;  %v3626_v13 = vshrl.u32 %v12340_v21, %v8084_v19  ;;  %v8217_v56 = vpop.permute.xlu0 %2770 }
 0x1b9   : > { %12410 = vst [vmem:[#allocation52_spill] sm:$0xff] %v8201_v32  ;;  %v3657_v12 = vsel %vm3643_vm1, %v3654_v0, %v3656_v57  ;;  %vm837_vm5 = vcmp.eq.s32.totalorder %v832_v31, 2  ;;  %vm3724_vm8 = vcmp.gt.s32.totalorder %v3723_v22, 0  ;;  %vm833_vm9 = vcmp.lt.s32.totalorder %v832_v31, 2  ;;  %12414 = vst [vmem:[#allocation56_spill] sm:$0xff] %v8217_v56  ;;  %v12417_v57 = vld [vmem:[#allocation26_spill] sm:$0xff] }
 0x1ba   : > { %12412 = vst [vmem:[#allocation54_spill] sm:$0xff] %v8208_v4  ;;  %v839_v63 = vsel %vm837_vm5, %v838_v46, %v8154_v59  ;;  %v1665_v29 = vand.u32 3, %v1664_v8  ;;  %v8220_v58 = vmul.u32.u64.low %v8199_v42, %v3653_v39  ;;  %v8221_v26 = vmul.u32.u64.high %v8199_v42, %v3653_v39, %v8220_v58 }
 0x1bb   : > { %vm831_vm10 = vweird.f32 %v12366_v41  ;;  %v840_v19 = vsel %vm833_vm9, %v836_v49, %v839_v63  ;;  %v8226_v37 = vmul.u32.u64.low %v8199_v42, %v3657_v12  ;;  %v8227_v33 = vmul.u32.u64.high %v8199_v42, %v3657_v12, %v8226_v37 }
 0x1bc   : > { %12415 = vst [vmem:[#allocation57_spill] sm:$0xff] %v8220_v58  ;;  %v841_v31 = vsel %vm831_vm10, nan, %v840_v19  ;;  %vm1667_vm3 = vcmp.eq.s32.totalorder %v1665_v29, 0  ;;  %v3647_v10 = vsel %vm3645_vm12, %v3635_v17, 2102212464  ;;  %v3725_v0 = vsel %vm3724_vm8, %v3723_v22, 0 }
 0x1bd   : > { %12416 = vst [vmem:[#allocation58_spill] sm:$0xff] %v8227_v33  ;;  %v8234_v8 = vmul.f32 %v841_v31, %v12417_v57  ;;  %v1669_v39 = vsel %vm1667_vm3, %v6689_v2, %v835_v24  ;;  %v8239_v49 = vsel %vm1359_vm15, %v1441_v60, %v8139_v38  ;;  %v8241_v63 = vor.u32 4788187, %v1538_v5  ;;  %v8251_v24 = vpop.permute.xlu1 %2623  ;;  %v8261_v2 = vpop.permute.xlu0 %2780  ;;  %v12424_v22 = vld [vmem:[#allocation7_spill] sm:$0xff]  ;;  %v12425_v37 = vld [vmem:[#allocation9_spill] sm:$0xff] }
 0x1be   : > { %12419 = vst [vmem:[#allocation59_spill] sm:$0xff] %v8239_v49  ;;  %v3819_v12 = vand.u32 2139095040, %v8201_v32  ;;  %vm1670_vm5 = vcmp.eq.s32.totalorder %v1665_v29, 2  ;;  %v8246_v19 = vadd.s32 %v7878_v23, %v7892_v36  ;;  %vm6430_vm12 = vcmp.lt.s32.totalorder %v6429_v28, 0  ;;  %12422 = vst [vmem:[#allocation62_spill] sm:$0xff] %v8251_v24 }
 0x1bf   : > { %12418 = vst [vmem:[#allocation26_spill] sm:$0xff] %v8234_v8  ;;  %12420 = vst [vmem:[#allocation60_spill] sm:$0xff] %v8241_v63  ;;  %vm1666_vm8 = vcmp.lt.s32.totalorder %v1665_v29, 2  ;;  %v1672_v17 = vsel %vm1670_vm5, %v838_v46, %v8154_v59  ;;  %2411 = vrot.lane.b32.xlu0 %v8234_v8, %s6765_s22  ;;  %v3646_v38 = vsel %vm3642_vm13, %v3626_v13, %v8158_v16  ;;  %v8259_v36 = vand.u32 31, %v3725_v0  ;;  %v12435_v46 = vld [vmem:[#allocation11_spill] sm:$0xff] }
 0x1c0   : > { %12421 = vst [vmem:[#allocation61_spill] sm:$0xff] %v8246_v19  ;;  %v3648_v60 = vsel %vm3644_vm14, %v8160_v52, %v3647_v10  ;;  %v1673_v23 = vsel %vm1666_vm8, %v1669_v39, %v1672_v17  ;;  %12423 = vst [vmem:[#allocation63_spill] sm:$0xff] %v8261_v2  ;;  %v3573_v59 = vsub.s32 0, %v8208_v4  ;;  %v12119_v5 = vand.u32 2147483647, %v8086_v34 }
 0x1c1   : > { %v728_v29 = vadd.f32 %v7868_v9, %v12424_v22  ;;  %v3820_v13 = vshrl.u32 %v3819_v12, 23  ;;  %v8271_v52 = vadd.f32 %v8051_v45, %v12425_v37  ;;  %v1674_v31 = vsel %vm831_vm10, nan, %v1673_v23  ;;  %v8311_v37 = vpop.f32.mrb[11].mxu1  ;;  %v8321_v16 = vpop.permute.xlu0 %2803 }
 0x1c2   : > { %v8276_v10 = vsel %vm6430_vm12, 0, %v6429_v28  ;;  %v3649_v39 = vsel %vm3643_vm1, %v3646_v38, %v3648_v60  ;;  %v3668_v17 = vadd.s32 1, %v8221_v26  ;;  %v8282_v9 = vmul.f32 %v1674_v31, %v12417_v57  ;;  %v12431_v28 = vld [vmem:[#allocation21_spill] sm:$0xff]  ;;  %12433 = vst [vmem:[#allocation64_spill] sm:$0xff] %v8311_v37  ;;  %v8313_v31 = vpop.permute.xlu1 %2633  ;;  %12436 = vst [vmem:[#allocation11_spill] sm:$0xff] %v8321_v16  ;;  %v12443_v37 = vld [vmem:[#allocation12_spill] sm:$0xff] }
 0x1c3   : > { %12426 = vst [vmem:[#allocation7_spill] sm:$0xff] %v8276_v10  ;;  %vm3667_vm13 = vc.u32 %v8227_v33, %v8220_v58  ;;  %v8287_v12 = vsub.s32 32, %v8259_v36  ;;  %v12428_v41 = vand.u32 2147483647, %v12380_v27  ;;  %v1031_v15 = vsub.s32 4, %v12431_v28  ;;  %12434 = vst [vmem:[#allocation65_spill] sm:$0xff] %v8313_v31 }
 0x1c4   : > { %12427 = vst [vmem:[#allocation9_spill] sm:$0xff] %v8282_v9  ;;  %v8297_v38 = vmin.u32 %v3573_v59, %v8208_v4  ;;  %v8301_v57 = vand.u32 8388607, %v12119_v5  ;;  %v8303_v60 = vmax.f32 %v728_v29, 0.0  ;;  %2415 = vrot.lane.b32.xlu0 %v8282_v9, %s6765_s22  ;;  %v3665_v59 = vmul.u32 %v8199_v42, %v3649_v39  ;;  %v12446_v4 = vld [vmem:[#allocation17_spill] sm:$0xff] }
 0x1c5   : > { %vm8291_vm14 = vcmp.le.f32.partialorder %v12428_v41, 0.7853982  ;;  %v12123_v41 = vand.u32 2147483647, %v8201_v32  ;;  %v6443_v5 = vadd.s32 4294967169, %v3820_v13  ;;  %v8319_v29 = vadd.f32 %v8051_v45, %v12435_v46 }
 0x1c6   : > { %12432 = vst [vmem:[#allocation21_spill] sm:$0xff] %v8297_v38  ;;  %v1033_v22 = vsel %vm8291_vm14, %v12380_v27, %v8090_v30  ;;  %v3669_v31 = vsel %vm3667_vm13, %v3668_v17, %v8221_v26  ;;  %v1032_v42 = vsel %vm947_vm6, %v1031_v15, %v12431_v28  ;;  %v3739_v45 = vshll.u32 %v12338_v48, %v8259_v36 }
 0x1c7   : > { %v3740_v46 = vshrl.u32 %v12339_v14, %v8287_v12  ;;  %6690 = vcosq.f32 %v1033_v22  ;;  %v8340_v30 = vshrl.u32 %v3725_v0, 5  ;;  %v3922_v26 = vand.u32 2139095040, %v8303_v60 }
 0x1c8   : > { %2562 = vrot.lane.b32.xlu0 %v8234_v8, %s6766_s24  ;;  %v8345_v17 = vadd.s32 %v3669_v31, %v3665_v59  ;;  %v3826_v28 = vadd.s32 1, %v6443_v5  ;;  %v1034_v15 = vsel %vm8291_vm14, 0, %v1032_v42  ;;  %6692 = vsinq.f32 %v1033_v22  ;;  %v8359_v31 = vpop.permute.xlu1 %2656  ;;  %v8369_v42 = vpop.permute.xlu0 %2813 }
 0x1c9   : > { %v3730_v39 = vshll.u32 %v12340_v21, %v8259_v36  ;;  %v3731_v0 = vshrl.u32 %v12343_v62, %v8287_v12  ;;  %v3733_v13 = vshll.u32 %v12343_v62, %v8259_v36  ;;  %v8357_v7 = vand.u32 8388607, %v12123_v41  ;;  %12437 = vst [vmem:[#allocation66_spill] sm:$0xff] %v8359_v31  ;;  %12438 = vst [vmem:[#allocation67_spill] sm:$0xff] %v8369_v42 }
 0x1ca   : > { %v3734_v5 = vshrl.u32 %v12335_v11, %v8287_v12  ;;  %v3736_v23 = vshll.u32 %v12335_v11, %v8259_v36  ;;  %v3737_v22 = vshrl.u32 %v12338_v48, %v8287_v12  ;;  %v8367_v59 = vor.u32 %v3740_v46, %v3739_v45  ;;  %v12442_v45 = vld [vmem:[#allocation15_spill] sm:$0xff] }
 0x1cb   : > { %vm3748_vm6 = vcmp.lt.s32.totalorder %v8340_v30, 4  ;;  %v3923_v16 = vshrl.u32 %v3922_v26, 23  ;;  %v12439_v41 = vand.u32 2147483647, %v12374_v40  ;;  %v1872_v24 = vadd.s32 3, %v1034_v15 }
 0x1cc   : > { %2566 = vrot.lane.b32.xlu0 %v8282_v9, %s6766_s24  ;;  %v8381_v2 = vadd.s32 536870912, %v8345_v17  ;;  %vm3827_vm9 = vcmp.gt.s32.totalorder %v3826_v28, 0  ;;  %v928_v46 = vsub.s32 4, %v12442_v45  ;;  %v8388_v42 = vor.u32 %v3731_v0, %v3730_v39  ;;  %v8414_v0 = vpop.permute.xlu1 %2666 }
 0x1cd   : > { %vm8374_vm1 = vcmp.le.f32.partialorder %v12439_v41, 0.7853982  ;;  %v8392_v41 = vshll.u32 %v12339_v14, %v8259_v36  ;;  %v1038_v56 = vand.u32 3, %v1034_v15  ;;  %v12142_v3 = vand.u32 2147483647, %v12443_v37  ;;  %12444 = vst [vmem:[#allocation15_spill] sm:$0xff] %v8414_v0 }
 0x1ce   : > { %v930_v26 = vsel %vm8374_vm1, %v12374_v40, %v8073_v18  ;;  %v8395_v34 = vor.u32 %v3734_v5, %v3733_v13  ;;  %v8397_v43 = vor.u32 %v3737_v22, %v3736_v23  ;;  %v8401_v32 = vshrl.u32 %v12344_v51, %v8287_v12  ;;  %v8423_v23 = vpop.permute.xlu0 %2873 }
 0x1cf   : > { %v8406_v18 = vsel %vm3748_vm6, %v8367_v59, 920167782  ;;  %v8408_v39 = vsel %vm3827_vm9, %v3826_v28, 0  ;;  %v8410_v36 = vadd.s32 4294967169, %v3923_v16  ;;  %6694 = vcosq.f32 %v930_v26  ;;  %12445 = vst [vmem:[#allocation12_spill] sm:$0xff] %v8423_v23 }
 0x1d0   : > { %v1873_v15 = vand.u32 3, %v1872_v24  ;;  %2714 = vrot.lane.b32.xlu0 %v8234_v8, %s6767_s25  ;;  %v929_v5 = vsel %vm844_vm4, %v928_v46, %v12442_v45  ;;  %6696 = vsinq.f32 %v930_v26  ;;  %v1066_v28 = vshrl.u32 %v12343_v62, %v7483_v1  ;;  %v8440_v44 = vpop.permute.xlu1 %2775 }
 0x1d1   : > { %v6691_v13 = vpop.eup %6690  ;;  %v1069_v16 = vshrl.u32 %v12335_v11, %v7483_v1  ;;  %vm1040_vm10 = vcmp.eq.s32.totalorder %v1038_v56, 0  ;;  %vm1043_vm3 = vcmp.eq.s32.totalorder %v1038_v56, 2  ;;  %v1055_v22 = vand.u32 8388607, %v12142_v3  ;;  %12447 = vst [vmem:[#allocation17_spill] sm:$0xff] %v8440_v44 }
 0x1d2   : > { %v1044_v24 = vxor.u32 2147483648, %v6691_v13  ;;  %v6693_v0 = vpop.eup %6692  ;;  %v1065_v58 = vshll.u32 %v12340_v21, %v12446_v4  ;;  %v1068_v45 = vshll.u32 %v12343_v62, %v12446_v4  ;;  %v1071_v46 = vshll.u32 %v12335_v11, %v12446_v4  ;;  %v8443_v38 = vpop.permute.xlu0 %2883 }
 0x1d3   : > { %v1072_v26 = vshrl.u32 %v12338_v48, %v7483_v1  ;;  %v1041_v23 = vxor.u32 2147483648, %v6693_v0  ;;  %vm1875_vm4 = vcmp.eq.s32.totalorder %v1873_v15, 0  ;;  %vm1878_vm5 = vcmp.eq.s32.totalorder %v1873_v15, 2  ;;  %12448 = vst [vmem:[#allocation68_spill] sm:$0xff] %v8443_v38 }
 0x1d4   : > { %v1045_v33 = vsel %vm1043_vm3, %v1044_v24, %v6693_v0  ;;  %2718 = vrot.lane.b32.xlu0 %v8282_v9, %s6767_s25  ;;  %vm3745_vm12 = vcmp.lt.s32.totalorder %v8340_v30, 1  ;;  %vm3747_vm8 = vcmp.lt.s32.totalorder %v8340_v30, 3  ;;  %v1880_v3 = vsel %vm1878_vm5, %v1044_v24, %v6693_v0 }
 0x1d5   : > { %v1067_v35 = vor.u32 %v1066_v28, %v1065_v58  ;;  %v1070_v47 = vor.u32 %v1069_v16, %v1068_v45  ;;  %v1073_v49 = vor.u32 %v1072_v26, %v1071_v46  ;;  %vm1039_vm13 = vcmp.lt.s32.totalorder %v1038_v56, 2  ;;  %v8492_v16 = vpop.permute.xlu1 %2785 }
 0x1d6   : > { %v1042_v4 = vsel %vm1040_vm10, %v6691_v13, %v1041_v23  ;;  %vm1874_vm14 = vcmp.lt.s32.totalorder %v1873_v15, 2  ;;  %v1877_v53 = vsel %vm1875_vm4, %v6691_v13, %v1041_v23  ;;  %vm1037_vm9 = vweird.f32 %v12380_v27  ;;  %12451 = vst [vmem:[#allocation71_spill] sm:$0xff] %v8492_v16 }
 0x1d7   : > { %v1046_v20 = vsel %vm1039_vm13, %v1042_v4, %v1045_v33  ;;  %v1881_v63 = vsel %vm1874_vm14, %v1877_v53, %v1880_v3  ;;  %v1056_v19 = vor.u32 8388608, %v1055_v22  ;;  %v1064_v58 = vshrl.u32 %v12340_v21, %v7483_v1 }
 0x1d8   : > { %v1047_v10 = vsel %vm1037_vm9, nan, %v1046_v20  ;;  %vm1080_vm3 = vcmp.lt.s32.totalorder %v7411_v6, 1  ;;  %vm1082_vm5 = vcmp.lt.s32.totalorder %v7411_v6, 3  ;;  %2948 = vrot.lane.b32.xlu0 %v8234_v8, %s6768_s26  ;;  %v1882_v27 = vsel %vm1037_vm9, nan, %v1881_v63 }
 0x1d9   : > { %v8452_v56 = vmul.f32 %v1047_v10, %v7666_v50  ;;  %v1085_v3 = vsel %vm1083_vm2, %v1073_v49, 2102212464  ;;  %v1088_v20 = vsel %vm1080_vm3, %v1067_v35, %v1070_v47  ;;  %v8458_v53 = vpop.eup %6694  ;;  %vm1081_vm10 = vcmp.lt.s32.totalorder %v7411_v6, 2 }
 0x1da   : > { %v1090_v1 = vsel %vm1082_vm5, %v1073_v49, %v7772_v54  ;;  %v1092_v33 = vsel %vm1080_vm3, %v1070_v47, %v1073_v49  ;;  %v1094_v63 = vsel %vm1082_vm5, %v7727_v55, %v7778_v25  ;;  %v8470_v10 = vpop.eup %6696  ;;  %v8473_v15 = vand.u32 31, %v8408_v39 }
 0x1db   : > { %12449 = vst [vmem:[#allocation69_spill] sm:$0xff] %v8452_v56  ;;  %v1091_v13 = vsel %vm1081_vm10, %v1088_v20, %v1090_v1  ;;  %v1095_v0 = vsel %vm1081_vm10, %v1092_v33, %v1094_v63  ;;  %v1096_v54 = vshll.u32 %v1056_v19, 8  ;;  %2413 = vrot.lane.b32.xlu1 %v8452_v56, %s6765_s22  ;;  %v931_v49 = vsel %vm8374_vm1, 0, %v929_v5  ;;  %v8549_v33 = vpop.permute.xlu1 %2808 }
 0x1dc   : > { %v8484_v55 = vmul.f32 %v1882_v27, %v7666_v50  ;;  %v1084_v25 = vsel %vm1080_vm3, %v1064_v58, %v1067_v35  ;;  %v1086_v28 = vsel %vm1082_vm5, %v1070_v47, %v1085_v3  ;;  %2952 = vrot.lane.b32.xlu0 %v8282_v9, %s6768_s26  ;;  %v8501_v50 = vpop.permute.xlu0 %2914  ;;  %v3744_v35 = vor.u32 %v8401_v32, %v8392_v41 }
 0x1dd   : > { %v8494_v19 = vmul.u32.u64.low %v1096_v54, %v1095_v0  ;;  %v8495_v23 = vmul.u32.u64.high %v1096_v54, %v1095_v0, %v8494_v19  ;;  %v8497_v24 = vmul.u32.u64.low %v1096_v54, %v1091_v13  ;;  %v8498_v31 = vmul.u32.u64.high %v1096_v54, %v1091_v13, %v8497_v24  ;;  %12452 = vst [vmem:[#allocation72_spill] sm:$0xff] %v8501_v50  ;;  %12455 = vst [vmem:[#allocation74_spill] sm:$0xff] %v8549_v33 }
 0x1de   : > { %12450 = vst [vmem:[#allocation70_spill] sm:$0xff] %v8484_v55  ;;  %v12453_v5 = vor.u32 8388608, %v8301_v57  ;;  %v8512_v46 = vshrl.u32 %v8381_v2, 30  ;;  %v8515_v26 = vsub.s32 32, %v8473_v15  ;;  %v3929_v4 = vadd.s32 1, %v8410_v36 }
 0x1df   : > { %v1087_v58 = vsel %vm1081_vm10, %v1084_v25, %v1086_v28  ;;  %2417 = vrot.lane.b32.xlu1 %v8484_v55, %s6765_s22  ;;  %v8526_v32 = vsel %vm3745_vm12, %v8388_v42, %v8395_v34  ;;  %v8532_v2 = vsel %vm3747_vm8, %v8397_v43, %v8406_v18  ;;  %v935_v57 = vand.u32 3, %v931_v49 }
 0x1e0   : > { %v8507_v47 = vshll.u32 %v12453_v5, 8  ;;  %12454 = vst [vmem:[#allocation73_spill] sm:$0xff] %v8512_v46  ;;  %v1768_v41 = vadd.s32 3, %v931_v49  ;;  %3100 = vrot.lane.b32.xlu0 %v8234_v8, %s6769_s27  ;;  %v938_v6 = vxor.u32 2147483648, %v8470_v10  ;;  %v941_v36 = vxor.u32 2147483648, %v8458_v53 }
 0x1e1   : > { %vm1105_vm2 = vc.u32 %v8495_v23, %v8497_v24  ;;  %v1106_v27 = vadd.s32 1, %v8498_v31  ;;  %vm3746_vm1 = vcmp.lt.s32.totalorder %v8340_v30, 2  ;;  %v3758_v18 = vsel %vm3748_vm6, %v3744_v35, 1326507024 }
 0x1e2   : > { %v8545_v3 = vshrl.u32 %v8408_v39, 5  ;;  %v3833_v20 = vshll.u32 %v12340_v21, %v8473_v15  ;;  %v1103_v1 = vmul.u32 %v1096_v54, %v1087_v58  ;;  %v3834_v63 = vshrl.u32 %v12343_v62, %v8515_v26  ;;  %v8558_v39 = vpop.permute.xlu0 %2924 }
 0x1e3   : > { %v3843_v13 = vshrl.u32 %v12339_v14, %v8515_v26  ;;  %vm3930_vm4 = vcmp.gt.s32.totalorder %v3929_v4, 0  ;;  %v1107_v0 = vsel %vm1105_vm2, %v1106_v27, %v8498_v31  ;;  %2564 = vrot.lane.b32.xlu1 %v8452_v56, %s6766_s24  ;;  %12456 = vst [vmem:[#allocation75_spill] sm:$0xff] %v8558_v39  ;;  %vm937_vm13 = vcmp.eq.s32.totalorder %v935_v57, 0 }
 0x1e4   : > { %vm940_vm14 = vcmp.eq.s32.totalorder %v935_v57, 2  ;;  %v1769_v49 = vand.u32 3, %v1768_v41  ;;  %v1108_v54 = vadd.s32 %v1107_v0, %v1103_v1  ;;  %3104 = vrot.lane.b32.xlu0 %v8282_v9, %s6769_s27  ;;  %v3837_v25 = vshrl.u32 %v12335_v11, %v8515_v26 }
 0x1e5   : > { %v3842_v28 = vshll.u32 %v12338_v48, %v8473_v15  ;;  %v939_v19 = vsel %vm937_vm13, %v8458_v53, %v938_v6  ;;  %v942_v31 = vsel %vm940_vm14, %v941_v36, %v8470_v10  ;;  %v3836_v35 = vshll.u32 %v12343_v62, %v8473_v15 }
 0x1e6   : > { %v3839_v5 = vshll.u32 %v12335_v11, %v8473_v15  ;;  %v3840_v58 = vshrl.u32 %v12338_v48, %v8515_v26  ;;  %v1109_v41 = vadd.s32 536870912, %v1108_v54  ;;  %v8574_v27 = vor.u32 %v3834_v63, %v3833_v20 }
 0x1e7   : > { %v8576_v1 = vor.u32 %v3843_v13, %v3842_v28  ;;  %v8579_v0 = vsel %vm3930_vm4, %v3929_v4, 0  ;;  %vm936_vm9 = vcmp.lt.s32.totalorder %v935_v57, 2  ;;  %2568 = vrot.lane.b32.xlu1 %v8484_v55, %s6766_s24  ;;  %vm1771_vm3 = vcmp.eq.s32.totalorder %v1769_v49, 0  ;;  %v8591_v4 = vpop.permute.xlu1 %2818  ;;  %v8595_v28 = vpop.permute.xlu0 %3004 }
 0x1e8   : > { %v943_v45 = vsel %vm936_vm9, %v939_v19, %v942_v31  ;;  %vm1774_vm5 = vcmp.eq.s32.totalorder %v1769_v49, 2  ;;  %v8583_v22 = vshrl.u32 %v1109_v41, 30  ;;  %3252 = vrot.lane.b32.xlu0 %v8234_v8, %s6770_s28  ;;  %v8587_v20 = vor.u32 %v3837_v25, %v3836_v35  ;;  %12457 = vst [vmem:[#allocation76_spill] sm:$0xff] %v8591_v4  ;;  %12458 = vst [vmem:[#allocation77_spill] sm:$0xff] %v8595_v28 }
 0x1e9   : > { %v3846_v63 = vshrl.u32 %v12344_v51, %v8515_v26  ;;  %v1773_v57 = vsel %vm1771_vm3, %v8458_v53, %v938_v6  ;;  %v1776_v13 = vsel %vm1774_vm5, %v941_v36, %v8470_v10  ;;  %v8597_v19 = vor.u32 %v3840_v58, %v3839_v5  ;;  %v12459_v58 = vld [vmem:[#allocation28_spill] sm:$0xff] }
 0x1ea   : > { %v3845_v31 = vshll.u32 %v12339_v14, %v8473_v15  ;;  %vm934_vm10 = vweird.f32 %v12374_v40  ;;  %v1111_v25 = vshll.u32 %v8583_v22, 30  ;;  %vm3851_vm2 = vcmp.lt.s32.totalorder %v8545_v3, 4 }
 0x1eb   : > { %v8605_v35 = vand.u32 31, %v8579_v0  ;;  %v944_v53 = vsel %vm934_vm10, nan, %v943_v45  ;;  %vm1770_vm4 = vcmp.lt.s32.totalorder %v1769_v49, 2  ;;  %2716 = vrot.lane.b32.xlu1 %v8452_v56, %s6767_s25  ;;  %v3673_v10 = vshll.u32 %v8512_v46, 30 }
 0x1ec   : > { %v3857_v15 = vsel %vm3851_vm2, %v8576_v1, 920167782  ;;  %v1777_v6 = vsel %vm1770_vm4, %v1773_v57, %v1776_v13  ;;  %v8615_v36 = vsub.s32 %v1108_v54, %v1111_v25  ;;  %3256 = vrot.lane.b32.xlu0 %v8282_v9, %s6770_s28  ;;  %v8623_v45 = vsel %vm3746_vm1, %v8526_v32, %v8532_v2  ;;  %v8654_v13 = vpop.permute.xlu0 %3014 }
 0x1ed   : > { %v3757_v49 = vsel %vm3745_vm12, %v8395_v34, %v8397_v43  ;;  %v3759_v5 = vsel %vm3747_vm8, %v8367_v59, %v3758_v18  ;;  %v3847_v54 = vor.u32 %v3846_v63, %v3845_v31  ;;  %vm3848_vm13 = vcmp.lt.s32.totalorder %v8545_v3, 1  ;;  %v8648_v18 = vpop.permute.xlu1 %2878  ;;  %12462 = vst [vmem:[#allocation79_spill] sm:$0xff] %v8654_v13 }
 0x1ee   : > { %vm3850_vm14 = vcmp.lt.s32.totalorder %v8545_v3, 3  ;;  %v8635_v41 = vmul.f32 %v944_v53, %v12459_v58  ;;  %v1114_v32 = vsub.s32 0, %v8615_v36  ;;  %v3856_v2 = vsel %vm3848_vm13, %v8574_v27, %v8587_v20  ;;  %12461 = vst [vmem:[#allocation78_spill] sm:$0xff] %v8648_v18 }
 0x1ef   : > { %v3858_v57 = vsel %vm3850_vm14, %v8597_v19, %v3857_v15  ;;  %v8646_v59 = vsub.s32 32, %v8605_v35  ;;  %v1778_v63 = vsel %vm934_vm10, nan, %v1777_v6  ;;  %2720 = vrot.lane.b32.xlu1 %v8484_v55, %s6767_s25  ;;  %v8658_v31 = vshrl.u32 %v12340_v21, %v8287_v12 }
 0x1f0   : > { %12460 = vst [vmem:[#allocation28_spill] sm:$0xff] %v8635_v41  ;;  %v8662_v25 = vsel %vm3746_vm1, %v3757_v49, %v3759_v5  ;;  %v12463_v53 = vor.u32 8388608, %v8357_v7  ;;  %v6323_v40 = vmin.u32 %v1114_v32, %v8615_v36  ;;  %2419 = vrot.lane.b32.xlu0 %v8635_v41, %s6765_s22  ;;  %vm3849_vm9 = vcmp.lt.s32.totalorder %v8545_v3, 2 }
 0x1f1   : > { %v8673_v6 = vmul.u32.u64.low %v8507_v47, %v8623_v45  ;;  %v8674_v4 = vmul.u32.u64.high %v8507_v47, %v8623_v45, %v8673_v6  ;;  %v3861_v12 = vsel %vm3851_vm2, %v3847_v54, 1326507024  ;;  %v8682_v7 = vsel %vm3849_vm9, %v3856_v2, %v3858_v57 }
 0x1f2   : > { %v8666_v15 = vshll.u32 %v12463_v53, 8  ;;  %v8685_v49 = vmax.f32 %v8271_v52, 0.0  ;;  %v8688_v5 = vmul.f32 %v1778_v63, %v12459_v58  ;;  %v1116_v32 = vclz %v6323_v40  ;;  %v8727_v40 = vpop.permute.xlu1 %2888 }
 0x1f3   : > { %v8691_v45 = vsub.s32 %v8345_v17, %v3673_v10  ;;  %v8695_v53 = vmul.u32.u64.low %v8507_v47, %v8662_v25  ;;  %v8696_v33 = vmul.u32.u64.high %v8507_v47, %v8662_v25, %v8695_v53  ;;  %v3946_v54 = vshrl.u32 %v12339_v14, %v8646_v59  ;;  %2950 = vrot.lane.b32.xlu1 %v8452_v56, %s6768_s26  ;;  %12467 = vst [vmem:[#allocation82_spill] sm:$0xff] %v8727_v40 }
 0x1f4   : > { %12464 = vst [vmem:[#allocation80_spill] sm:$0xff] %v8685_v49  ;;  %12465 = vst [vmem:[#allocation81_spill] sm:$0xff] %v8688_v5  ;;  %v3860_v52 = vsel %vm3848_vm13, %v8587_v20, %v8597_v19  ;;  %v3862_v17 = vsel %vm3850_vm14, %v8576_v1, %v3861_v12  ;;  %v12466_v10 = vand.u32 2147483647, %v8303_v60  ;;  %v6324_v2 = vadd.s32 4294967294, %v1116_v32  ;;  %2423 = vrot.lane.b32.xlu0 %v8688_v5, %s6765_s22  ;;  %v8729_v12 = vpop.permute.xlu0 %3037 }
 0x1f5   : > { %v8718_v57 = vmul.u32.u64.low %v8666_v15, %v8682_v7  ;;  %v8719_v63 = vmul.u32.u64.high %v8666_v15, %v8682_v7, %v8718_v57  ;;  %v8723_v25 = vshrl.u32 %v8579_v0, 5  ;;  %v3945_v1 = vshll.u32 %v12338_v48, %v8605_v35  ;;  %12468 = vst [vmem:[#allocation83_spill] sm:$0xff] %v8729_v12 }
 0x1f6   : > { %v8712_v58 = vand.u32 8388607, %v12466_v10  ;;  %v3937_v32 = vshrl.u32 %v12343_v62, %v8646_v59  ;;  %v3949_v53 = vshrl.u32 %v12344_v51, %v8646_v59  ;;  %v4025_v7 = vand.u32 2139095040, %v8685_v49 }
 0x1f7   : > { %vm6325_vm3 = vcmp.lt.s32.totalorder %v6324_v2, 0  ;;  %v3940_v0 = vshrl.u32 %v12335_v11, %v8646_v59  ;;  %v3943_v10 = vshrl.u32 %v12338_v48, %v8646_v59  ;;  %v3947_v16 = vor.u32 %v3946_v54, %v3945_v1  ;;  %2954 = vrot.lane.b32.xlu1 %v8484_v55, %s6768_s26 }
 0x1f8   : > { %v1119_v44 = vsel %vm6325_vm3, 0, %v6324_v2  ;;  %v3948_v12 = vshll.u32 %v12339_v14, %v8605_v35  ;;  %v1104_v13 = vadd.s32 %v8497_v24, %v8495_v23  ;;  %2570 = vrot.lane.b32.xlu0 %v8635_v41, %s6766_s24  ;;  %v8750_v50 = vsel %vm3849_vm9, %v3860_v52, %v3862_v17  ;;  %v8764_v17 = vpop.permute.xlu1 %2919  ;;  %v8768_v8 = vpop.permute.xlu0 %3047 }
 0x1f9   : > { %v1120_v28 = vsub.s32 32, %v1119_v44  ;;  %v1124_v39 = vsub.s32 4294967266, %v1119_v44  ;;  %v3936_v54 = vshll.u32 %v12340_v21, %v8605_v35  ;;  %v3939_v2 = vshll.u32 %v12343_v62, %v8605_v35  ;;  %12469 = vst [vmem:[#allocation84_spill] sm:$0xff] %v8764_v17  ;;  %12470 = vst [vmem:[#allocation85_spill] sm:$0xff] %v8768_v8 }
 0x1fa   : > { %v3942_v1 = vshll.u32 %v12335_v11, %v8605_v35  ;;  %v3950_v40 = vor.u32 %v3949_v53, %v3948_v12  ;;  %v1121_v23 = vshll.u32 %v8615_v36, %v1119_v44  ;;  %vm3954_vm5 = vcmp.lt.s32.totalorder %v8723_v25, 4 }
 0x1fb   : > { %v1122_v24 = vshrl.u32 %v1104_v13, %v1120_v28  ;;  %v1125_v38 = vadd.s32 127, %v1124_v39  ;;  %v8759_v9 = vor.u32 %v3937_v32, %v3936_v54  ;;  %v8761_v18 = vor.u32 %v3940_v0, %v3939_v2  ;;  %3102 = vrot.lane.b32.xlu1 %v8452_v56, %s6769_s27 }
 0x1fc   : > { %v3944_v52 = vor.u32 %v3943_v10, %v3942_v1  ;;  %v3960_v35 = vsel %vm3954_vm5, %v3947_v16, 920167782  ;;  %v4026_v44 = vshrl.u32 %v4025_v7, 23  ;;  %2574 = vrot.lane.b32.xlu0 %v8688_v5, %s6766_s24  ;;  %vm3951_vm10 = vcmp.lt.s32.totalorder %v8723_v25, 1 }
 0x1fd   : > { %v1123_v28 = vor.u32 %v1122_v24, %v1121_v23  ;;  %v1126_v39 = vshll.u32 %v1125_v38, 23  ;;  %v8776_v36 = vmul.u32.u64.low %v8666_v15, %v8750_v50  ;;  %v8777_v13 = vmul.u32.u64.high %v8666_v15, %v8750_v50, %v8776_v36 }
 0x1fe   : > { %vm3953_vm4 = vcmp.lt.s32.totalorder %v8723_v25, 3  ;;  %v8785_v12 = vsel %vm3745_vm12, %v8658_v31, %v8388_v42  ;;  %v3964_v38 = vsel %vm3954_vm5, %v3950_v40, 1326507024  ;;  %v12471_v53 = vand.u32 2147483647, %v12381_v61  ;;  %v12474_v31 = vld [vmem:[#allocation41_spill] sm:$0xff] }
 0x1ff   : > { %v1127_v32 = vor.u32 4788187, %v1126_v39  ;;  %v3927_v50 = vor.u32 8388608, %v8712_v58  ;;  %v3959_v0 = vsel %vm3951_vm10, %v8759_v9, %v8761_v18  ;;  %v3961_v42 = vsel %vm3953_vm4, %v3944_v52, %v3960_v35  ;;  %3106 = vrot.lane.b32.xlu1 %v8484_v55, %s6769_s27  ;;  %v8820_v35 = vpop.permute.xlu1 %2929 }
 0x200   : > { %vm8791_vm3 = vcmp.le.f32.partialorder %v12471_v53, 0.7853982  ;;  %v3750_v58 = vsel %vm3748_vm6, %v8397_v43, 2102212464  ;;  %v6451_v10 = vadd.s32 4294967169, %v4026_v44  ;;  %v1130_v2 = vcvt.s32.f32 %v1123_v28  ;;  %2722 = vrot.lane.b32.xlu0 %v8635_v41, %s6767_s25  ;;  %12475 = vst [vmem:[#allocation41_spill] sm:$0xff] %v8820_v35  ;;  %v8822_v43 = vpop.permute.xlu0 %3156 }
 0x201   : > { %v1239_v40 = vsel %vm8791_vm3, %v12381_v61, %v12474_v31  ;;  %v1128_v54 = vand.u32 2147483647, %v1127_v32  ;;  %v3676_v1 = vsub.s32 0, %v8691_v45  ;;  %vm3952_vm12 = vcmp.lt.s32.totalorder %v8723_v25, 2  ;;  %12476 = vst [vmem:[#allocation86_spill] sm:$0xff] %v8822_v43  ;;  %v12520_v35 = vld [vmem:[#allocation14_spill] sm:$0xff] }
 0x202   : > { %v3963_v23 = vsel %vm3951_vm10, %v8761_v18, %v3944_v52  ;;  %v3965_v24 = vsel %vm3953_vm4, %v3947_v16, %v3964_v38  ;;  %v3962_v44 = vsel %vm3952_vm12, %v3959_v0, %v3961_v42  ;;  %v1134_v39 = vsub.s32 4, %v8583_v22  ;;  %v12477_v42 = vld [vmem:[#allocation27_spill] sm:$0xff] }
 0x203   : > { %v1131_v28 = vmul.f32 %v1130_v2, %v1128_v54  ;;  %6698 = vcosq.f32 %v1239_v40  ;;  %v3751_v36 = vsel %vm3747_vm8, %v8395_v34, %v3750_v58  ;;  %v3832_v32 = vshrl.u32 %v12340_v21, %v8515_v26  ;;  %3254 = vrot.lane.b32.xlu1 %v8452_v56, %s6770_s28 }
 0x204   : > { %v8832_v53 = vshll.u32 %v3927_v50, 8  ;;  %6700 = vsinq.f32 %v1239_v40  ;;  %v3966_v16 = vsel %vm3952_vm12, %v3963_v23, %v3965_v24  ;;  %v4032_v38 = vadd.s32 1, %v6451_v10  ;;  %2726 = vrot.lane.b32.xlu0 %v8688_v5, %s6767_s25 }
 0x205   : > { %v1132_v0 = vxor.u32 2147483648, %v1131_v28  ;;  %v1237_v31 = vsub.s32 4, %v12477_v42  ;;  %v3852_v34 = vsel %vm3848_vm13, %v3832_v32, %v8574_v27  ;;  %vm1050_vm6 = vcmp.lt.s32.totalorder %v12443_v37, 0  ;;  %v8873_v32 = vpop.permute.xlu0 %3166 }
 0x206   : > { %v8845_v26 = vmul.u32.u64.low %v8832_v53, %v3962_v44  ;;  %v8846_v50 = vmul.u32.u64.high %v8832_v53, %v3962_v44, %v8845_v26  ;;  %v3853_v40 = vsel %vm3851_vm2, %v8597_v19, 2102212464  ;;  %v12478_v58 = vand.u32 2147483647, %v12443_v37  ;;  %v8866_v44 = vpop.permute.xlu1 %3009  ;;  %12482 = vst [vmem:[#allocation87_spill] sm:$0xff] %v8873_v32 }
 0x207   : > { %v1133_v54 = vsel %vm1050_vm6, %v1132_v0, %v1131_v28  ;;  %v1135_v27 = vsel %vm1050_vm6, %v1134_v39, %v8583_v22  ;;  %v3956_v2 = vsel %vm3954_vm5, %v3944_v52, 2102212464  ;;  %12481 = vst [vmem:[#allocation27_spill] sm:$0xff] %v8866_v44  ;;  %3258 = vrot.lane.b32.xlu1 %v8484_v55, %s6770_s28  ;;  %v3935_v22 = vshrl.u32 %v12340_v21, %v8646_v59 }
 0x208   : > { %vm8855_vm8 = vcmp.le.f32.partialorder %v12478_v58, 0.7853982  ;;  %v8863_v23 = vmul.u32.u64.low %v8832_v53, %v3966_v16  ;;  %v8864_v24 = vmul.u32.u64.high %v8832_v53, %v3966_v16, %v8863_v23  ;;  %vm4033_vm2 = vcmp.gt.s32.totalorder %v4032_v38, 0  ;;  %2956 = vrot.lane.b32.xlu0 %v8635_v41, %s6768_s26  ;;  %v12486_v58 = vld [vmem:[#allocation21_spill] sm:$0xff] }
 0x209   : > { %v1136_v19 = vsel %vm8855_vm8, %v12443_v37, %v1133_v54  ;;  %v1238_v52 = vsel %vm1153_vm7, %v1237_v31, %v12477_v42  ;;  %v3854_v28 = vsel %vm3850_vm14, %v8587_v20, %v3853_v40  ;;  %v3874_v39 = vadd.s32 1, %v8719_v63  ;;  %v12484_v20 = vld [vmem:[#allocation7_spill] sm:$0xff] }
 0x20a   : > { %6702 = vcosq.f32 %v1136_v19  ;;  %v1137_v16 = vsel %vm8855_vm8, 0, %v1135_v27  ;;  %vm3873_vm13 = vc.u32 %v8777_v13, %v8718_v57  ;;  %v3955_v59 = vsel %vm3951_vm10, %v3935_v22, %v8759_v9 }
 0x20b   : > { %6704 = vsinq.f32 %v1136_v19  ;;  %v3957_v0 = vsel %vm3953_vm4, %v8761_v18, %v3956_v2  ;;  %v8897_v42 = vmax.f32 %v8319_v29, 0.0  ;;  %v12485_v31 = vsub.s32 4294967266, %v12484_v20 }
 0x20c   : > { %v12487_v10 = vclz %v12486_v58  ;;  %v8908_v27 = vsel %vm4033_vm2, %v4032_v38, 0  ;;  %v1240_v9 = vsel %vm8791_vm3, 0, %v1238_v52  ;;  %v8915_v18 = vmin.u32 %v3676_v1, %v8691_v45  ;;  %2960 = vrot.lane.b32.xlu0 %v8688_v5, %s6768_s26  ;;  %v8941_v1 = vpop.permute.xlu0 %3189 }
 0x20d   : > { %12483 = vst [vmem:[#allocation88_spill] sm:$0xff] %v8897_v42  ;;  %v8901_v40 = vadd.s32 127, %v12485_v31  ;;  %v8912_v23 = vpop.eup %6698  ;;  %v8920_v29 = vsel %vm3746_vm1, %v8785_v12, %v3751_v36  ;;  %v3855_v2 = vsel %vm3849_vm9, %v3852_v34, %v3854_v28  ;;  %v1976_v19 = vadd.s32 3, %v1137_v16  ;;  %v8939_v12 = vpop.permute.xlu1 %3019  ;;  %12489 = vst [vmem:[#allocation21_spill] sm:$0xff] %v8941_v1 }
 0x20e   : > { %v8905_v54 = vadd.s32 4294967294, %v12487_v10  ;;  %v8926_v38 = vpop.eup %6700  ;;  %vm3770_vm7 = vc.u32 %v8696_v33, %v8673_v6  ;;  %v3771_v7 = vadd.s32 1, %v8674_v4  ;;  %v3875_v30 = vsel %vm3873_vm13, %v3874_v39, %v8719_v63  ;;  %12488 = vst [vmem:[#allocation7_spill] sm:$0xff] %v8939_v12 }
 0x20f   : > { %v8937_v3 = vsel %vm3952_vm12, %v3955_v59, %v3957_v0  ;;  %v3977_v36 = vadd.s32 1, %v8846_v50  ;;  %v8945_v34 = vand.u32 31, %v8908_v27  ;;  %v4128_v22 = vand.u32 2139095040, %v8897_v42 }
 0x210   : > { %v1244_v52 = vand.u32 3, %v1240_v9  ;;  %v3871_v28 = vmul.u32 %v8666_v15, %v3855_v2  ;;  %vm3976_vm1 = vc.u32 %v8864_v24, %v8845_v26  ;;  %v1250_v63 = vxor.u32 2147483648, %v8912_v23  ;;  %3108 = vrot.lane.b32.xlu0 %v8635_v41, %s6769_s27 }
 0x211   : > { %v2080_v25 = vadd.s32 3, %v1240_v9  ;;  %v3768_v39 = vmul.u32 %v8507_v47, %v8920_v29  ;;  %v1141_v59 = vand.u32 3, %v1137_v16  ;;  %v1977_v0 = vand.u32 3, %v1976_v19  ;;  %v8970_v58 = vpop.permute.xlu1 %3042 }
 0x212   : > { %v1247_v31 = vxor.u32 2147483648, %v8926_v38  ;;  %v3772_v15 = vsel %vm3770_vm7, %v3771_v7, %v8674_v4  ;;  %v8962_v10 = vadd.s32 %v3875_v30, %v3871_v28  ;;  %v3974_v9 = vmul.u32 %v8832_v53, %v8937_v3  ;;  %12490 = vst [vmem:[#allocation89_spill] sm:$0xff] %v8970_v58  ;;  %v8973_v30 = vpop.permute.xlu0 %3199 }
 0x213   : > { %v3978_v16 = vsel %vm3976_vm1, %v3977_v36, %v8846_v50  ;;  %v8968_v29 = vsub.s32 32, %v8945_v34  ;;  %v4129_v2 = vshrl.u32 %v4128_v22, 23  ;;  %vm1249_vm14 = vcmp.eq.s32.totalorder %v1244_v52, 2  ;;  %12491 = vst [vmem:[#allocation90_spill] sm:$0xff] %v8973_v30 }
 0x214   : > { %v6703_v47 = vpop.eup %6702  ;;  %vm1246_vm9 = vcmp.eq.s32.totalorder %v1244_v52, 0  ;;  %v1251_v4 = vsel %vm1249_vm14, %v1250_v63, %v8926_v38  ;;  %v2081_v7 = vand.u32 3, %v2080_v25  ;;  %vm1146_vm5 = vcmp.eq.s32.totalorder %v1141_v59, 2  ;;  %3112 = vrot.lane.b32.xlu0 %v8688_v5, %s6769_s27 }
 0x215   : > { %v6705_v19 = vpop.eup %6704  ;;  %v1147_v1 = vxor.u32 2147483648, %v6703_v47  ;;  %vm1982_vm10 = vcmp.eq.s32.totalorder %v1977_v0, 2  ;;  %v1248_v53 = vsel %vm1246_vm9, %v8912_v23, %v1247_v31  ;;  %vm1143_vm4 = vcmp.eq.s32.totalorder %v1141_v59, 0 }
 0x216   : > { %v1144_v28 = vxor.u32 2147483648, %v6705_v19  ;;  %vm1979_vm3 = vcmp.eq.s32.totalorder %v1977_v0, 0  ;;  %vm1142_vm12 = vcmp.lt.s32.totalorder %v1141_v59, 2  ;;  %vm1978_vm6 = vcmp.lt.s32.totalorder %v1977_v0, 2  ;;  %v8984_v59 = vpop.permute.xlu1 %3052  ;;  %v12493_v0 = vld [vmem:[#allocation29_spill] sm:$0xff] }
 0x217   : > { %v1148_v50 = vsel %vm1146_vm5, %v1147_v1, %v6705_v19  ;;  %v1984_v3 = vsel %vm1982_vm10, %v1147_v1, %v6705_v19  ;;  %vm6434_vm8 = vcmp.lt.s32.totalorder %v8905_v54, 0  ;;  %vm1140_vm2 = vweird.f32 %v12443_v37  ;;  %12492 = vst [vmem:[#allocation91_spill] sm:$0xff] %v8984_v59 }
 0x218   : > { %v1145_v36 = vsel %vm1143_vm4, %v6703_v47, %v1144_v28  ;;  %v1981_v22 = vsel %vm1979_vm3, %v6703_v47, %v1144_v28  ;;  %vm1245_vm13 = vcmp.lt.s32.totalorder %v1244_v52, 2  ;;  %vm2083_vm7 = vcmp.eq.s32.totalorder %v2081_v7, 0  ;;  %3260 = vrot.lane.b32.xlu0 %v8635_v41, %s6770_s28  ;;  %v8991_v52 = vpop.permute.xlu0 %3308 }
 0x219   : > { %v1149_v25 = vsel %vm1142_vm12, %v1145_v36, %v1148_v50  ;;  %v1985_v58 = vsel %vm1978_vm6, %v1981_v22, %v1984_v3  ;;  %v1252_v8 = vsel %vm1245_vm13, %v1248_v53, %v1251_v4  ;;  %vm2086_vm1 = vcmp.eq.s32.totalorder %v2081_v7, 2  ;;  %12494 = vst [vmem:[#allocation29_spill] sm:$0xff] %v8991_v52 }
 0x21a   : > { %v1150_v30 = vsel %vm1140_vm2, nan, %v1149_v25  ;;  %v6455_v1 = vadd.s32 4294967169, %v4129_v2  ;;  %v2085_v19 = vsel %vm2083_vm7, %v8912_v23, %v1247_v31  ;;  %v2088_v28 = vsel %vm2086_vm1, %v1250_v63, %v8926_v38 }
 0x21b   : > { %v8987_v47 = vmul.f32 %v1150_v30, %v12493_v0  ;;  %v8993_v50 = vadd.s32 %v3772_v15, %v3768_v39  ;;  %v1986_v53 = vsel %vm1140_vm2, nan, %v1985_v58  ;;  %vm1243_vm14 = vweird.f32 %v12381_v61 }
 0x21c   : > { %v3877_v2 = vadd.s32 536870912, %v8962_v10  ;;  %v9000_v3 = vadd.s32 %v3978_v16, %v3974_v9  ;;  %v1253_v23 = vsel %vm1243_vm14, nan, %v1252_v8  ;;  %vm2082_vm9 = vcmp.lt.s32.totalorder %v2081_v7, 2  ;;  %3264 = vrot.lane.b32.xlu0 %v8688_v5, %s6770_s28  ;;  %v12495_v7 = vld [vmem:[#allocation33_spill] sm:$0xff] }
 0x21d   : > { %2421 = vrot.lane.b32.xlu1 %v8987_v47, %s6765_s22  ;;  %v9007_v38 = vshrl.u32 %v8908_v27, 5  ;;  %v4048_v37 = vshll.u32 %v12338_v48, %v8945_v34  ;;  %v4049_v63 = vshrl.u32 %v12339_v14, %v8968_v29  ;;  %v2089_v39 = vsel %vm2082_vm9, %v2085_v19, %v2088_v28  ;;  %v12498_v19 = vld [vmem:[#allocation61_spill] sm:$0xff] }
 0x21e   : > { %v4051_v8 = vshll.u32 %v12339_v14, %v8945_v34  ;;  %v4052_v31 = vshrl.u32 %v12344_v51, %v8968_v29  ;;  %v4135_v58 = vadd.s32 1, %v6455_v1  ;;  %v9020_v27 = vmul.f32 %v1986_v53, %v12493_v0  ;;  %v9037_v1 = vpop.permute.xlu1 %3161 }
 0x21f   : > { %v4039_v15 = vshll.u32 %v12340_v21, %v8945_v34  ;;  %v4042_v9 = vshll.u32 %v12343_v62, %v8945_v34  ;;  %v4045_v16 = vshll.u32 %v12335_v11, %v8945_v34  ;;  %v9029_v30 = vmul.f32 %v1253_v23, %v12495_v7  ;;  %12496 = vst [vmem:[#allocation33_spill] sm:$0xff] %v9037_v1  ;;  %v9047_v23 = vpop.permute.xlu0 %3318 }
 0x220   : > { %v4040_v36 = vshrl.u32 %v12343_v62, %v8968_v29  ;;  %v4043_v22 = vshrl.u32 %v12335_v11, %v8968_v29  ;;  %v4046_v25 = vshrl.u32 %v12338_v48, %v8968_v29  ;;  %v2090_v0 = vsel %vm1243_vm14, nan, %v2089_v39  ;;  %12499 = vst [vmem:[#allocation61_spill] sm:$0xff] %v9047_v23 }
 0x221   : > { %2425 = vrot.lane.b32.xlu1 %v9020_v27, %s6765_s22  ;;  %v12497_v34 = vsub.s32 32, %v12484_v20  ;;  %v3482_v53 = vshll.u32 %v8901_v40, 23  ;;  %v3774_v4 = vadd.s32 536870912, %v8993_v50  ;;  %v4050_v59 = vor.u32 %v4049_v63, %v4048_v37  ;;  %2438 = vrot.lane.b32.xlu0 %v9029_v30, %s6765_s22 }
 0x222   : > { %v9052_v1 = vshrl.u32 %v3877_v2, 30  ;;  %v12500_v61 = vand.u32 2147483647, %v8685_v49  ;;  %v4053_v12 = vor.u32 %v4052_v31, %v4051_v8  ;;  %vm4057_vm5 = vcmp.lt.s32.totalorder %v9007_v38, 4 }
 0x223   : > { %v3478_v28 = vshrl.u32 %v12498_v19, %v12497_v34  ;;  %v9060_v40 = vsel %vm6434_vm8, 0, %v8905_v54  ;;  %v12501_v34 = vclz %v8915_v18  ;;  %vm4136_vm10 = vcmp.gt.s32.totalorder %v4135_v58, 0  ;;  %v9103_v32 = vpop.permute.xlu0 %3341 }
 0x224   : > { %v4029_v39 = vand.u32 8388607, %v12500_v61  ;;  %v9065_v37 = vmul.f32 %v2090_v0, %v12495_v7  ;;  %v3980_v2 = vadd.s32 536870912, %v9000_v3  ;;  %v9068_v63 = vor.u32 %v4040_v36, %v4039_v15  ;;  %v9087_v7 = vpop.permute.xlu1 %3171 }
 0x225   : > { %v6437_v19 = vadd.s32 4294967294, %v12501_v34  ;;  %v9070_v61 = vor.u32 %v4043_v22, %v4042_v9  ;;  %v9072_v8 = vor.u32 %v4046_v25, %v4045_v16  ;;  %2572 = vrot.lane.b32.xlu1 %v8987_v47, %s6766_s24  ;;  %v9076_v54 = vshrl.u32 %v3774_v4, 30  ;;  %12503 = vst [vmem:[#allocation93_spill] sm:$0xff] %v9087_v7  ;;  %v12504_v4 = vld [vmem:[#allocation60_spill] sm:$0xff]  ;;  %v12506_v22 = vld [vmem:[#allocation50_spill] sm:$0xff]  ;;  %v12508_v34 = vld [vmem:[#allocation39_spill] sm:$0xff] }
 0x226   : > { %vm4054_vm4 = vcmp.lt.s32.totalorder %v9007_v38, 1  ;;  %vm4056_vm3 = vcmp.lt.s32.totalorder %v9007_v38, 3  ;;  %v4063_v18 = vsel %vm4057_vm5, %v4050_v59, 920167782  ;;  %2442 = vrot.lane.b32.xlu0 %v9065_v37, %s6765_s22  ;;  %v3879_v31 = vshll.u32 %v9052_v1, 30  ;;  %12510 = vst [vmem:[#allocation60_spill] sm:$0xff] %v9103_v32 }
 0x227   : > { %12502 = vst [vmem:[#allocation92_spill] sm:$0xff] %v9076_v54  ;;  %v4030_v15 = vor.u32 8388608, %v4029_v39  ;;  %v4067_v9 = vsel %vm4057_vm5, %v4053_v12, 1326507024  ;;  %v4137_v16 = vsel %vm4136_vm10, %v4135_v58, 0  ;;  %v12507_v25 = vcvt.s32.f32 %v12506_v22  ;;  %v9164_v32 = vpop.permute.xlu0 %3351 }
 0x228   : > { %v12505_v36 = vand.u32 2147483647, %v12504_v4  ;;  %v12509_v44 = vshll.u32 %v12508_v34, %v12484_v20  ;;  %v9100_v52 = vor.u32 4788187, %v3482_v53  ;;  %v3583_v39 = vsub.s32 4294967266, %v9060_v40  ;;  %v12511_v4 = vld [vmem:[#allocation22_spill] sm:$0xff] }
 0x229   : > { %v9105_v12 = vshrl.u32 %v3980_v2, 30  ;;  %vm4055_vm12 = vcmp.lt.s32.totalorder %v9007_v38, 2  ;;  %v4062_v58 = vsel %vm4054_vm4, %v9068_v63, %v9070_v61  ;;  %2576 = vrot.lane.b32.xlu1 %v9020_v27, %s6766_s24  ;;  %v3776_v20 = vshll.u32 %v9076_v54, 30  ;;  %12519 = vst [vmem:[#allocation39_spill] sm:$0xff] %v9164_v32 }
 0x22a   : > { %v9093_v0 = vmul.f32 %v12507_v25, %v12505_v36  ;;  %v9098_v23 = vor.u32 %v3478_v28, %v12509_v44  ;;  %v4064_v44 = vsel %vm4056_vm3, %v9072_v8, %v4063_v18  ;;  %v4066_v28 = vsel %vm4054_vm4, %v9070_v61, %v9072_v8  ;;  %2587 = vrot.lane.b32.xlu0 %v9029_v30, %s6766_s24  ;;  %v12512_v36 = vld [vmem:[#allocation23_spill] sm:$0xff] }
 0x22b   : > { %v4068_v53 = vsel %vm4056_vm3, %v4050_v59, %v4067_v9  ;;  %v4139_v2 = vand.u32 31, %v4137_v16  ;;  %v9128_v18 = vadd.s32 %v12512_v36, %v12511_v4  ;;  %vm6438_vm6 = vcmp.lt.s32.totalorder %v6437_v19, 0  ;;  %v12513_v9 = vld [vmem:[#allocation16_spill] sm:$0xff]  ;;  %v12518_v36 = vld [vmem:[#allocation59_spill] sm:$0xff] }
 0x22c   : > { %v9131_v22 = vsub.s32 %v8962_v10, %v3879_v31  ;;  %v9133_v25 = vshll.u32 %v4030_v15, 8  ;;  %v4065_v59 = vsel %vm4055_vm12, %v4062_v58, %v4064_v44  ;;  %v12514_v7 = vand.u32 2147483647, %v12513_v9  ;;  %v9149_v15 = vpop.permute.xlu1 %3194 }
 0x22d   : > { %v3982_v10 = vshll.u32 %v9105_v12, 30  ;;  %v4069_v31 = vsel %vm4055_vm12, %v4066_v28, %v4068_v53  ;;  %12517 = vst [vmem:[#allocation50_spill] sm:$0xff] %v9149_v15  ;;  %2724 = vrot.lane.b32.xlu1 %v8987_v47, %s6767_s25  ;;  %v9159_v44 = vsel %vm6438_vm6, 0, %v6437_v19  ;;  %v9162_v4 = vsub.s32 %v8993_v50, %v3776_v20 }
 0x22e   : > { %vm9141_vm8 = vcmp.le.f32.partialorder %v12514_v7, 0.7853982  ;;  %v9157_v7 = vadd.s32 127, %v3583_v39  ;;  %v9166_v28 = vsub.s32 32, %v4139_v2  ;;  %2591 = vrot.lane.b32.xlu0 %v9065_v37, %s6766_s24  ;;  %v3882_v53 = vsub.s32 0, %v9131_v22 }
 0x22f   : > { %v1445_v58 = vsel %vm9141_vm8, %v12513_v9, %v12518_v36  ;;  %v9172_v36 = vmul.u32.u64.low %v9133_v25, %v4065_v59  ;;  %v9173_v34 = vmul.u32.u64.high %v9133_v25, %v4065_v59, %v9172_v36  ;;  %v4038_v50 = vshrl.u32 %v12340_v21, %v8968_v29 }
 0x230   : > { %v9180_v39 = vmul.u32.u64.low %v9133_v25, %v4069_v31  ;;  %v9181_v20 = vmul.u32.u64.high %v9133_v25, %v4069_v31, %v9180_v39  ;;  %6706 = vcosq.f32 %v1445_v58  ;;  %v9184_v15 = vsub.s32 %v9000_v3, %v3982_v10  ;;  %v12524_v10 = vld [vmem:[#allocation49_spill] sm:$0xff]  ;;  %v9213_v55 = vpop.permute.xlu1 %3204 }
 0x231   : > { %v4151_v32 = vshll.u32 %v12338_v48, %v4139_v2  ;;  %v12521_v17 = vand.u32 2147483647, %v12520_v35  ;;  %6708 = vsinq.f32 %v1445_v58  ;;  %2728 = vrot.lane.b32.xlu1 %v9020_v27, %s6767_s25  ;;  %v4152_v29 = vshrl.u32 %v12339_v14, %v9166_v28  ;;  %v9206_v58 = vpop.permute.xlu0 %2411  ;;  %12526 = vst [vmem:[#allocation23_spill] sm:$0xff] %v9213_v55 }
 0x232   : > { %v4154_v31 = vshll.u32 %v12339_v14, %v4139_v2  ;;  %v4155_v3 = vshrl.u32 %v12344_v51, %v9166_v28  ;;  %2739 = vrot.lane.b32.xlu0 %v9029_v30, %s6767_s25  ;;  %12525 = vst [vmem:[#allocation22_spill] sm:$0xff] %v9206_v58  ;;  %v9208_v39 = vshrl.u32 %v4137_v16, 5  ;;  %v4142_v19 = vshll.u32 %v12340_v21, %v4139_v2  ;;  %v12527_v51 = vld [vmem:[#allocation32_spill] sm:$0xff] }
 0x233   : > { %vm9189_vm2 = vcmp.le.f32.partialorder %v12521_v17, 0.7853982  ;;  %v4143_v14 = vshrl.u32 %v12343_v62, %v9166_v28  ;;  %v1443_v5 = vsub.s32 4, %v12527_v51  ;;  %v4145_v56 = vshll.u32 %v12343_v62, %v4139_v2 }
 0x234   : > { %v1342_v17 = vsel %vm9189_vm2, %v12520_v35, %v12524_v10  ;;  %v4146_v10 = vshrl.u32 %v12335_v11, %v9166_v28  ;;  %v4148_v41 = vshll.u32 %v12335_v11, %v4139_v2  ;;  %v4149_v16 = vshrl.u32 %v12338_v48, %v9166_v28 }
 0x235   : > { %v6444_v58 = vmin.u32 %v3882_v53, %v9131_v22  ;;  %v4059_v54 = vsel %vm4057_vm5, %v9072_v8, 2102212464  ;;  %v12528_v55 = vand.u32 2147483647, %v8897_v42  ;;  %6710 = vcosq.f32 %v1342_v17  ;;  %2958 = vrot.lane.b32.xlu1 %v8987_v47, %s6768_s26  ;;  %v12529_v8 = vld [vmem:[#allocation31_spill] sm:$0xff]  ;;  %v9252_v42 = vpop.permute.xlu1 %3313 }
 0x236   : > { %v3985_v62 = vsub.s32 0, %v9184_v15  ;;  %v4153_v46 = vor.u32 %v4152_v29, %v4151_v32  ;;  %v4156_v11 = vor.u32 %v4155_v3, %v4154_v31  ;;  %6712 = vsinq.f32 %v1342_v17  ;;  %2743 = vrot.lane.b32.xlu0 %v9065_v37, %s6767_s25  ;;  %v9248_v3 = vpop.permute.xlu0 %2415  ;;  %12530 = vst [vmem:[#allocation16_spill] sm:$0xff] %v9252_v42 }
 0x237   : > { %v4132_v49 = vand.u32 8388607, %v12528_v55  ;;  %v4058_v48 = vsel %vm4054_vm4, %v4038_v50, %v9068_v63  ;;  %vm4160_vm13 = vcmp.lt.s32.totalorder %v9208_v39, 4  ;;  %v1340_v55 = vsub.s32 4, %v12529_v8 }
 0x238   : > { %v1444_v2 = vsel %vm1359_vm15, %v1443_v5, %v12527_v51  ;;  %v4060_v32 = vsel %vm4056_vm3, %v9070_v61, %v4059_v54  ;;  %v9244_v53 = vor.u32 %v4143_v14, %v4142_v19  ;;  %v9246_v29 = vor.u32 %v4146_v10, %v4145_v56 }
 0x239   : > { %v4150_v31 = vor.u32 %v4149_v16, %v4148_v41  ;;  %v3779_v63 = vsub.s32 0, %v9162_v4  ;;  %v3884_v50 = vclz %v6444_v58  ;;  %v4133_v17 = vor.u32 8388608, %v4132_v49  ;;  %2962 = vrot.lane.b32.xlu1 %v9020_v27, %s6768_s26 }
 0x23a   : > { %vm4157_vm7 = vcmp.lt.s32.totalorder %v9208_v39, 1  ;;  %v9256_v5 = vpop.eup %6706  ;;  %vm4159_vm15 = vcmp.lt.s32.totalorder %v9208_v39, 3  ;;  %v4166_v56 = vsel %vm4160_vm13, %v4153_v46, 920167782  ;;  %v4170_v41 = vsel %vm4160_vm13, %v4156_v11, 1326507024  ;;  %2973 = vrot.lane.b32.xlu0 %v9029_v30, %s6768_s26  ;;  %v9286_v51 = vpop.permute.xlu0 %2562 }
 0x23b   : > { %v1446_v49 = vsel %vm9141_vm8, 0, %v1444_v2  ;;  %v6709_v61 = vpop.eup %6708  ;;  %v9268_v54 = vmin.u32 %v3985_v62, %v9184_v15  ;;  %v4061_v19 = vsel %vm4055_vm12, %v4058_v48, %v4060_v32  ;;  %v4080_v58 = vadd.s32 1, %v9173_v34  ;;  %12531 = vst [vmem:[#allocation59_spill] sm:$0xff] %v9286_v51 }
 0x23c   : > { %v1341_v14 = vsel %vm1256_vm11, %v1340_v55, %v12529_v8  ;;  %vm4079_vm1 = vc.u32 %v9181_v20, %v9172_v36  ;;  %vm4158_vm14 = vcmp.lt.s32.totalorder %v9208_v39, 2  ;;  %v4165_v43 = vsel %vm4157_vm7, %v9244_v53, %v9246_v29 }
 0x23d   : > { %v4169_v38 = vsel %vm4157_vm7, %v9246_v29, %v4150_v31  ;;  %v4167_v10 = vsel %vm4159_vm15, %v4150_v31, %v4166_v56  ;;  %v4171_v16 = vsel %vm4159_vm15, %v4153_v46, %v4170_v41  ;;  %v1450_v62 = vand.u32 3, %v1446_v49  ;;  %3110 = vrot.lane.b32.xlu1 %v8987_v47, %s6769_s27  ;;  %v9313_v41 = vpop.permute.xlu1 %3323 }
 0x23e   : > { %v2288_v11 = vadd.s32 3, %v1446_v49  ;;  %v4077_v48 = vmul.u32 %v9133_v25, %v4061_v19  ;;  %v1343_v8 = vsel %vm9189_vm2, 0, %v1341_v14  ;;  %v1453_v55 = vxor.u32 2147483648, %v6709_v61  ;;  %2977 = vrot.lane.b32.xlu0 %v9065_v37, %s6768_s26  ;;  %12532 = vst [vmem:[#allocation14_spill] sm:$0xff] %v9313_v41  ;;  %v9322_v42 = vpop.permute.xlu0 %2566 }
 0x23f   : > { %v1456_v2 = vxor.u32 2147483648, %v9256_v5  ;;  %v9300_v32 = vpop.eup %6710  ;;  %v9303_v46 = vmin.u32 %v3779_v63, %v9162_v4  ;;  %v9305_v56 = vadd.s32 4294967294, %v3884_v50  ;;  %v4081_v25 = vsel %vm4079_vm1, %v4080_v58, %v9173_v34  ;;  %12533 = vst [vmem:[#allocation49_spill] sm:$0xff] %v9322_v42 }
 0x240   : > { %v9311_v59 = vshll.u32 %v4133_v17, 8  ;;  %v6713_v49 = vpop.eup %6712  ;;  %v3987_v19 = vclz %v9268_v54  ;;  %v4141_v14 = vshrl.u32 %v12340_v21, %v9166_v28  ;;  %v4168_v63 = vsel %vm4158_vm14, %v4165_v43, %v4167_v10 }
 0x241   : > { %v4172_v50 = vsel %vm4158_vm14, %v4169_v38, %v4171_v16  ;;  %v1347_v51 = vand.u32 3, %v1343_v8  ;;  %vm1452_vm11 = vcmp.eq.s32.totalorder %v1450_v62, 0  ;;  %vm1455_vm9 = vcmp.eq.s32.totalorder %v1450_v62, 2  ;;  %3114 = vrot.lane.b32.xlu1 %v9020_v27, %s6769_s27 }
 0x242   : > { %v2289_v34 = vand.u32 3, %v2288_v11  ;;  %v9326_v17 = vadd.s32 %v4081_v25, %v4077_v48  ;;  %v2184_v54 = vadd.s32 3, %v1343_v8  ;;  %v1454_v21 = vsel %vm1452_vm11, %v9256_v5, %v1453_v55  ;;  %3125 = vrot.lane.b32.xlu0 %v9029_v30, %s6769_s27  ;;  %v9343_v8 = vpop.permute.xlu0 %2714  ;;  %v9345_v25 = vpop.permute.xlu1 %3346 }
 0x243   : > { %v1457_v28 = vsel %vm1455_vm9, %v1456_v2, %v6709_v61  ;;  %v9332_v58 = vmul.u32.u64.low %v9311_v59, %v4168_v63  ;;  %v9333_v43 = vmul.u32.u64.high %v9311_v59, %v4168_v63, %v9332_v58  ;;  %v1350_v38 = vxor.u32 2147483648, %v6713_v49  ;;  %12534 = vst [vmem:[#allocation32_spill] sm:$0xff] %v9345_v25 }
 0x244   : > { %v1353_v10 = vxor.u32 2147483648, %v9300_v32  ;;  %v4162_v16 = vsel %vm4160_vm13, %v4150_v31, 2102212464  ;;  %v9340_v11 = vmul.u32.u64.low %v9311_v59, %v4172_v50  ;;  %v9341_v48 = vmul.u32.u64.high %v9311_v59, %v4172_v50, %v9340_v11 }
 0x245   : > { %vm1451_vm5 = vcmp.lt.s32.totalorder %v1450_v62, 2  ;;  %vm1349_vm10 = vcmp.eq.s32.totalorder %v1347_v51, 0  ;;  %vm2291_vm4 = vcmp.eq.s32.totalorder %v2289_v34, 0  ;;  %vm2294_vm3 = vcmp.eq.s32.totalorder %v2289_v34, 2  ;;  %3262 = vrot.lane.b32.xlu1 %v8987_v47, %s6770_s28 }
 0x246   : > { %v1458_v41 = vsel %vm1451_vm5, %v1454_v21, %v1457_v28  ;;  %vm1352_vm12 = vcmp.eq.s32.totalorder %v1347_v51, 2  ;;  %v2185_v63 = vand.u32 3, %v2184_v54  ;;  %v2293_v31 = vsel %vm2291_vm4, %v9256_v5, %v1453_v55  ;;  %3129 = vrot.lane.b32.xlu0 %v9065_v37, %s6769_s27  ;;  %v9358_v54 = vpop.permute.xlu0 %2718 }
 0x247   : > { %v2296_v42 = vsel %vm2294_vm3, %v1456_v2, %v6709_v61  ;;  %v4083_v62 = vadd.s32 536870912, %v9326_v17  ;;  %v1351_v50 = vsel %vm1349_vm10, %v9300_v32, %v1350_v38  ;;  %v1354_v11 = vsel %vm1352_vm12, %v1353_v10, %v6713_v49 }
 0x248   : > { %vm1449_vm6 = vweird.f32 %v12513_v9  ;;  %v3781_v21 = vclz %v9303_v46  ;;  %v6449_v28 = vadd.s32 4294967294, %v3987_v19  ;;  %vm2290_vm8 = vcmp.lt.s32.totalorder %v2289_v34, 2 }
 0x249   : > { %v1459_v25 = vsel %vm1449_vm6, nan, %v1458_v41  ;;  %v4161_v5 = vsel %vm4157_vm7, %v4141_v14, %v9244_v53  ;;  %v4163_v61 = vsel %vm4159_vm15, %v9246_v29, %v4162_v16  ;;  %vm1348_vm2 = vcmp.lt.s32.totalorder %v1347_v51, 2  ;;  %3266 = vrot.lane.b32.xlu1 %v9020_v27, %s6770_s28  ;;  %v9373_v53 = vpop.permute.xlu1 %3356  ;;  %v12536_v51 = vld [vmem:[#allocation6_spill] sm:$0xff] }
 0x24a   : > { %v2297_v55 = vsel %vm2290_vm8, %v2293_v31, %v2296_v42  ;;  %vm6446_vm13 = vcmp.lt.s32.totalorder %v9305_v56, 0  ;;  %v1355_v2 = vsel %vm1348_vm2, %v1351_v50, %v1354_v11  ;;  %vm2187_vm1 = vcmp.eq.s32.totalorder %v2185_v63, 0  ;;  %3277 = vrot.lane.b32.xlu0 %v9029_v30, %s6770_s28  ;;  %12535 = vst [vmem:[#allocation31_spill] sm:$0xff] %v9373_v53  ;;  %v9385_v16 = vpop.permute.xlu0 %2948 }
 0x24b   : > { %vm2190_vm11 = vcmp.eq.s32.totalorder %v2185_v63, 2  ;;  %v9371_v46 = vshrl.u32 %v4083_v62, 30  ;;  %v2189_v41 = vsel %vm2187_vm1, %v9300_v32, %v1350_v38  ;;  %v9377_v42 = vmul.f32 %v1459_v25, %v12536_v51 }
 0x24c   : > { %v2192_v29 = vsel %vm2190_vm11, %v1353_v10, %v6713_v49  ;;  %v4164_v19 = vsel %vm4158_vm14, %v4161_v5, %v4163_v61  ;;  %v4183_v14 = vadd.s32 1, %v9333_v43  ;;  %vm1346_vm7 = vweird.f32 %v12520_v35  ;;  %v12541_v5 = vld [vmem:[#allocation34_spill] sm:$0xff] }
 0x24d   : > { %v2298_v34 = vsel %vm1449_vm6, nan, %v2297_v55  ;;  %vm6450_vm15 = vcmp.lt.s32.totalorder %v6449_v28, 0  ;;  %vm4182_vm9 = vc.u32 %v9341_v48, %v9332_v58  ;;  %v1356_v32 = vsel %vm1346_vm7, nan, %v1355_v2  ;;  %2440 = vrot.lane.b32.xlu1 %v9377_v42, %s6765_s22  ;;  %v9412_v50 = vpop.permute.xlu1 %2413  ;;  %v12543_v55 = vld [vmem:[#allocation58_spill] sm:$0xff]  ;;  %v12544_v2 = vld [vmem:[#allocation57_spill] sm:$0xff] }
 0x24e   : > { %vm2186_vm5 = vcmp.lt.s32.totalorder %v2185_v63, 2  ;;  %v12537_v39 = vand.u32 2147483647, %v9100_v52  ;;  %v12538_v49 = vcvt.s32.f32 %v9098_v23  ;;  %v3686_v9 = vsub.s32 4294967266, %v9159_v44  ;;  %3281 = vrot.lane.b32.xlu0 %v9065_v37, %s6770_s28  ;;  %12540 = vst [vmem:[#allocation6_spill] sm:$0xff] %v9412_v50 }
 0x24f   : > { %v6441_v10 = vadd.s32 4294967294, %v3781_v21  ;;  %v2193_v25 = vsel %vm2186_vm5, %v2189_v41, %v2192_v29  ;;  %v12539_v31 = vsub.s32 32, %v9060_v40  ;;  %v9406_v63 = vsel %vm6446_vm13, 0, %v9305_v56  ;;  %v9424_v56 = vpop.permute.xlu0 %2952 }
 0x250   : > { %v3487_v38 = vmul.f32 %v12538_v49, %v12537_v39  ;;  %v4180_v52 = vmul.u32 %v9311_v59, %v4164_v19  ;;  %v9410_v23 = vmul.f32 %v2298_v34, %v12536_v51  ;;  %v9414_v11 = vsel %vm6450_vm15, 0, %v6449_v28  ;;  %12542 = vst [vmem:[#allocation34_spill] sm:$0xff] %v9424_v56 }
 0x251   : > { %v3581_v62 = vshrl.u32 %v9128_v18, %v12539_v31  ;;  %v4085_v21 = vshll.u32 %v9371_v46, 30  ;;  %v4184_v18 = vsel %vm4182_vm9, %v4183_v14, %v9333_v43  ;;  %v9422_v61 = vmul.f32 %v1356_v32, %v12541_v5  ;;  %v12545_v43 = vld [vmem:[#allocation54_spill] sm:$0xff]  ;;  %v9443_v35 = vpop.permute.xlu1 %2417 }
 0x252   : > { %v3585_v59 = vshll.u32 %v9157_v7, 23  ;;  %v3666_v41 = vadd.s32 %v12544_v2, %v12543_v55  ;;  %v3682_v28 = vsub.s32 32, %v9159_v44  ;;  %v2194_v29 = vsel %vm1346_vm7, nan, %v2193_v25  ;;  %2444 = vrot.lane.b32.xlu1 %v9410_v23, %s6765_s22  ;;  %12546 = vst [vmem:[#allocation58_spill] sm:$0xff] %v9443_v35 }
 0x253   : > { %v3580_v51 = vshll.u32 %v12545_v43, %v9060_v40  ;;  %v3687_v19 = vadd.s32 127, %v3686_v9  ;;  %vm6442_vm14 = vcmp.lt.s32.totalorder %v6441_v10, 0  ;;  %v3892_v14 = vsub.s32 4294967266, %v9406_v63  ;;  %2446 = vrot.lane.b32.xlu0 %v9422_v61, %s6765_s22  ;;  %v9451_v9 = vpop.permute.xlu0 %3100 }
 0x254   : > { %v1544_v7 = vxor.u32 2147483648, %v9093_v0  ;;  %v3995_v34 = vsub.s32 4294967266, %v9414_v11  ;;  %v9441_v32 = vadd.s32 %v4184_v18, %v4180_v52  ;;  %v3488_v39 = vxor.u32 2147483648, %v3487_v38  ;;  %12547 = vst [vmem:[#allocation57_spill] sm:$0xff] %v9451_v9  ;;  %v12548_v52 = vld [vmem:[#allocation18_spill] sm:$0xff]  ;;  %v12549_v18 = vld [vmem:[#allocation25_spill] sm:$0xff] }
 0x255   : > { %v3582_v49 = vor.u32 %v3581_v62, %v3580_v51  ;;  %v9446_v25 = vsub.s32 %v9326_v17, %v4085_v21  ;;  %v9449_v40 = vmul.f32 %v2194_v29, %v12541_v5  ;;  %v3586_v31 = vor.u32 4788187, %v3585_v59 }
 0x256   : > { %v3683_v55 = vshll.u32 %v8691_v45, %v9159_v44  ;;  %v3684_v2 = vshrl.u32 %v3666_v41, %v3682_v28  ;;  %v9455_v43 = vsel %vm6442_vm14, 0, %v6441_v10  ;;  %2589 = vrot.lane.b32.xlu1 %v9377_v42, %s6766_s24  ;;  %vm1462_vm10 = vcmp.lt.s32.totalorder %v12548_v52, 0  ;;  %v9467_v10 = vpop.permute.xlu1 %2564 }
 0x257   : > { %v3688_v62 = vshll.u32 %v3687_v19, 23  ;;  %v3893_v17 = vadd.s32 127, %v3892_v14  ;;  %2450 = vrot.lane.b32.xlu0 %v9449_v40, %s6765_s22  ;;  %v1545_v21 = vsel %vm1462_vm10, %v1544_v7, %v9093_v0  ;;  %vm3406_vm4 = vcmp.lt.s32.totalorder %v12549_v18, 0  ;;  %12550 = vst [vmem:[#allocation54_spill] sm:$0xff] %v9467_v10  ;;  %v9473_v29 = vpop.permute.xlu0 %3104 }
 0x258   : > { %v3996_v45 = vadd.s32 127, %v3995_v34  ;;  %v4186_v44 = vadd.s32 536870912, %v9441_v32  ;;  %v3489_v5 = vsel %vm3406_vm4, %v3488_v39, %v3487_v38  ;;  %v3589_v59 = vcvt.s32.f32 %v3582_v49  ;;  %12551 = vst [vmem:[#allocation18_spill] sm:$0xff] %v9473_v29 }
 0x259   : > { %v3789_v41 = vsub.s32 4294967266, %v9455_v43  ;;  %v4088_v28 = vsub.s32 0, %v9446_v25  ;;  %v3587_v51 = vand.u32 2147483647, %v3586_v31  ;;  %v3685_v19 = vor.u32 %v3684_v2, %v3683_v55 }
 0x25a   : > { %v3888_v0 = vsub.s32 32, %v9406_v63  ;;  %v3991_v14 = vsub.s32 32, %v9414_v11  ;;  %2593 = vrot.lane.b32.xlu1 %v9410_v23, %s6766_s24  ;;  %v3689_v7 = vor.u32 4788187, %v3688_v62  ;;  %v3769_v38 = vadd.s32 %v8673_v6, %v8696_v33  ;;  %v9495_v33 = vpop.permute.xlu1 %2568 }
 0x25b   : > { %v3872_v34 = vadd.s32 %v8718_v57, %v8777_v13  ;;  %v3894_v39 = vshll.u32 %v3893_v17, 23  ;;  %2595 = vrot.lane.b32.xlu0 %v9422_v61, %s6766_s24  ;;  %v3975_v49 = vadd.s32 %v8845_v26, %v8864_v24  ;;  %v3997_v31 = vshll.u32 %v3996_v45, 23  ;;  %12555 = vst [vmem:[#allocation25_spill] sm:$0xff] %v9495_v33  ;;  %v9502_v24 = vpop.permute.xlu0 %3252 }
 0x25c   : > { %v9487_v55 = vshrl.u32 %v4186_v44, 30  ;;  %v12552_v2 = vand.u32 2147483647, %v12548_v52  ;;  %v3785_v6 = vsub.s32 32, %v9455_v43  ;;  %v3790_v57 = vadd.s32 127, %v3789_v41  ;;  %12556 = vst [vmem:[#allocation94_spill] sm:$0xff] %v9502_v24 }
 0x25d   : > { %v6452_v13 = vmin.u32 %v4088_v28, %v9446_v25  ;;  %v3590_v17 = vmul.f32 %v3589_v59, %v3587_v51  ;;  %v3692_v45 = vcvt.s32.f32 %v3685_v19  ;;  %v3890_v44 = vshrl.u32 %v3872_v34, %v3888_v0 }
 0x25e   : > { %vm9491_vm3 = vcmp.le.f32.partialorder %v12552_v2, 0.7853982  ;;  %v3993_v2 = vshrl.u32 %v3975_v49, %v3991_v14  ;;  %2741 = vrot.lane.b32.xlu1 %v9377_v42, %s6767_s25  ;;  %v3690_v53 = vand.u32 2147483647, %v3689_v7  ;;  %v3786_v33 = vshll.u32 %v9162_v4, %v9455_v43  ;;  %v9515_v19 = vpop.permute.xlu1 %2716 }
 0x25f   : > { %v1548_v26 = vsel %vm9491_vm3, %v12548_v52, %v1545_v21  ;;  %v3889_v41 = vshll.u32 %v9131_v22, %v9406_v63  ;;  %v3895_v28 = vor.u32 4788187, %v3894_v39  ;;  %2599 = vrot.lane.b32.xlu0 %v9449_v40, %s6766_s24  ;;  %v3992_v21 = vshll.u32 %v9184_v15, %v9414_v11  ;;  %12557 = vst [vmem:[#allocation95_spill] sm:$0xff] %v9515_v19  ;;  %v9517_v4 = vpop.permute.xlu0 %3256  ;;  %v12562_v11 = vld [vmem:[#allocation24_spill] sm:$0xff] }
 0x260   : > { %v3998_v59 = vor.u32 4788187, %v3997_v31  ;;  %v4188_v51 = vshll.u32 %v9487_v55, 30  ;;  %6714 = vcosq.f32 %v1548_v26  ;;  %v3787_v0 = vshrl.u32 %v3769_v38, %v3785_v6  ;;  %12558 = vst [vmem:[#allocation96_spill] sm:$0xff] %v9517_v4 }
 0x261   : > { %v3791_v14 = vshll.u32 %v3790_v57, 23  ;;  %v4090_v7 = vclz %v6452_v13  ;;  %6716 = vsinq.f32 %v1548_v26  ;;  %v3891_v22 = vor.u32 %v3890_v44, %v3889_v41 }
 0x262   : > { %v3994_v63 = vor.u32 %v3993_v2, %v3992_v21  ;;  %v12559_v43 = vand.u32 2147483647, %v12549_v18  ;;  %2745 = vrot.lane.b32.xlu1 %v9410_v23, %s6767_s25  ;;  %v3693_v15 = vmul.f32 %v3692_v45, %v3690_v53  ;;  %v1546_v39 = vsub.s32 4, %v12562_v11  ;;  %v12563_v53 = vld [vmem:[#allocation30_spill] sm:$0xff] }
 0x263   : > { %2747 = vrot.lane.b32.xlu0 %v9422_v61, %s6767_s25  ;;  %v3591_v49 = vxor.u32 2147483648, %v3590_v17  ;;  %v3896_v31 = vand.u32 2147483647, %v3895_v28  ;;  %v3999_v6 = vand.u32 2147483647, %v3998_v59  ;;  %v9534_v57 = vsub.s32 %v9441_v32, %v4188_v51  ;;  %v9536_v2 = vpop.permute.xlu0 %2419 }
 0x264   : > { %vm9521_vm12 = vcmp.le.f32.partialorder %v12559_v43, 0.7853982  ;;  %v3788_v13 = vor.u32 %v3787_v0, %v3786_v33  ;;  %v3792_v26 = vor.u32 4788187, %v3791_v14  ;;  %v6453_v44 = vadd.s32 4294967294, %v4090_v7  ;;  %v12565_v33 = vld [vmem:[#allocation8_spill] sm:$0xff] }
 0x265   : > { %v3492_v38 = vsel %vm9521_vm12, %v12549_v18, %v3489_v5  ;;  %vm3509_vm6 = vcmp.lt.s32.totalorder %v12563_v53, 0  ;;  %v3898_v45 = vcvt.s32.f32 %v3891_v22  ;;  %v4001_v41 = vcvt.s32.f32 %v3994_v63  ;;  %v9541_v5 = vpop.permute.xlu1 %2720 }
 0x266   : > { %6718 = vcosq.f32 %v3492_v38  ;;  %2975 = vrot.lane.b32.xlu1 %v9377_v42, %s6768_s26  ;;  %12564 = vst [vmem:[#allocation24_spill] sm:$0xff] %v9541_v5  ;;  %v3694_v28 = vxor.u32 2147483648, %v3693_v15  ;;  %v1547_v32 = vsel %vm1462_vm10, %v1546_v39, %v12562_v11  ;;  %v3490_v21 = vsub.s32 4, %v12565_v33  ;;  %v12566_v11 = vld [vmem:[#allocation2_spill] sm:$0xff]  ;;  %v12567_v39 = vld [vmem:[#allocation52_spill] sm:$0xff] }
 0x267   : > { %6720 = vsinq.f32 %v3492_v38  ;;  %2751 = vrot.lane.b32.xlu0 %v9449_v40, %s6767_s25  ;;  %v3592_v59 = vsel %vm3509_vm6, %v3591_v49, %v3590_v17  ;;  %v3899_v51 = vmul.f32 %v3898_v45, %v3896_v31  ;;  %v4002_v0 = vmul.f32 %v4001_v41, %v3999_v6  ;;  %v9552_v63 = vpop.permute.xlu0 %2423 }
 0x268   : > { %v4191_v14 = vsub.s32 0, %v9534_v57  ;;  %v3793_v7 = vand.u32 2147483647, %v3792_v26  ;;  %v3795_v22 = vcvt.s32.f32 %v3788_v13  ;;  %vm6454_vm8 = vcmp.lt.s32.totalorder %v6453_v44, 0 }
 0x269   : > { %vm3612_vm2 = vcmp.lt.s32.totalorder %v12566_v11, 0  ;;  %vm3818_vm13 = vcmp.lt.s32.totalorder %v12567_v39, 0  ;;  %v1549_v38 = vsel %vm9491_vm3, 0, %v1547_v32  ;;  %v12568_v17 = vand.u32 2147483647, %v12563_v53 }
 0x26a   : > { %v9554_v43 = vpop.eup %6714  ;;  %2979 = vrot.lane.b32.xlu1 %v9410_v23, %s6768_s26  ;;  %v9572_v6 = vsel %vm3612_vm2, %v3694_v28, %v3693_v15  ;;  %vm3921_vm11 = vcmp.lt.s32.totalorder %v8303_v60, 0  ;;  %v3491_v62 = vsel %vm3406_vm4, %v3490_v21, %v12565_v33  ;;  %v3900_v26 = vxor.u32 2147483648, %v3899_v51  ;;  %v9587_v28 = vpop.permute.xlu1 %2950 }
 0x26b   : > { %vm9562_vm1 = vcmp.le.f32.partialorder %v12568_v17, 0.7853982  ;;  %v9568_v31 = vpop.eup %6716  ;;  %2981 = vrot.lane.b32.xlu0 %v9422_v61, %s6768_s26  ;;  %v4003_v45 = vxor.u32 2147483648, %v4002_v0  ;;  %v9584_v41 = vsel %vm6454_vm8, 0, %v6453_v44  ;;  %v6456_v15 = vmin.u32 %v4191_v14, %v9534_v57  ;;  %12571 = vst [vmem:[#allocation30_spill] sm:$0xff] %v9587_v28 }
 0x26c   : > { %v3595_v13 = vsel %vm9562_vm1, %v12563_v53, %v3592_v59  ;;  %v9589_v32 = vmul.f32 %v3795_v22, %v3793_v7  ;;  %v4078_v33 = vadd.s32 %v9172_v36, %v9181_v20  ;;  %v1553_v21 = vand.u32 3, %v1549_v38  ;;  %v9593_v59 = vpop.permute.xlu0 %2570  ;;  %v12572_v36 = vld [vmem:[#allocation47_spill] sm:$0xff] }
 0x26d   : > { %v2392_v17 = vadd.s32 3, %v1549_v38  ;;  %v1556_v5 = vxor.u32 2147483648, %v9568_v31  ;;  %v1559_v19 = vxor.u32 2147483648, %v9554_v43  ;;  %v3493_v44 = vsel %vm9521_vm12, 0, %v3491_v62 }
 0x26e   : > { %6722 = vcosq.f32 %v3595_v13  ;;  %3127 = vrot.lane.b32.xlu1 %v9377_v42, %s6769_s27  ;;  %v4094_v14 = vsub.s32 32, %v9584_v41  ;;  %v4098_v7 = vsub.s32 4294967266, %v9584_v41  ;;  %v3593_v20 = vsub.s32 4, %v12572_v36 }
 0x26f   : > { %6724 = vsinq.f32 %v3595_v13  ;;  %2985 = vrot.lane.b32.xlu0 %v9449_v40, %s6768_s26  ;;  %v3901_v34 = vsel %vm3818_vm13, %v3900_v26, %v3899_v51  ;;  %v4004_v38 = vsel %vm3921_vm11, %v4003_v45, %v4002_v0  ;;  %v4193_v28 = vclz %v6456_v15  ;;  %v9626_v26 = vpop.permute.xlu1 %2954 }
 0x270   : > { %v9606_v22 = vpop.eup %6718  ;;  %vm1555_vm7 = vcmp.eq.s32.totalorder %v1553_v21, 0  ;;  %vm1558_vm15 = vcmp.eq.s32.totalorder %v1553_v21, 2  ;;  %v2393_v35 = vand.u32 3, %v2392_v17  ;;  %v3497_v13 = vand.u32 3, %v3493_v44  ;;  %v9614_v4 = vpop.permute.xlu0 %2574  ;;  %12576 = vst [vmem:[#allocation8_spill] sm:$0xff] %v9626_v26 }
 0x271   : > { %v6721_v10 = vpop.eup %6720  ;;  %v1557_v50 = vsel %vm1555_vm7, %v9554_v43, %v1556_v5  ;;  %v1560_v24 = vsel %vm1558_vm15, %v1559_v19, %v9568_v31  ;;  %v4329_v29 = vadd.s32 3, %v3493_v44  ;;  %v12573_v51 = vand.u32 2147483647, %v12567_v39 }
 0x272   : > { %3131 = vrot.lane.b32.xlu1 %v9410_v23, %s6769_s27  ;;  %v9628_v45 = vshrl.u32 %v4078_v33, %v4094_v14  ;;  %v9630_v15 = vadd.s32 127, %v4098_v7  ;;  %v3594_v17 = vsel %vm3509_vm6, %v3593_v20, %v12572_v36  ;;  %vm1554_vm5 = vcmp.lt.s32.totalorder %v1553_v21, 2 }
 0x273   : > { %vm9620_vm9 = vcmp.le.f32.partialorder %v12573_v51, 0.7853982  ;;  %3133 = vrot.lane.b32.xlu0 %v9422_v61, %s6769_s27  ;;  %v9640_v51 = vadd.s32 4294967294, %v4193_v28  ;;  %v3500_v62 = vxor.u32 2147483648, %v6721_v10  ;;  %v3503_v33 = vxor.u32 2147483648, %v9606_v22 }
 0x274   : > { %v3904_v44 = vsel %vm9620_vm9, %v12567_v39, %v3901_v34  ;;  %vm1552_vm14 = vweird.f32 %v12548_v52  ;;  %v1561_v14 = vsel %vm1554_vm5, %v1557_v50, %v1560_v24  ;;  %vm2395_vm10 = vcmp.eq.s32.totalorder %v2393_v35, 0  ;;  %v9644_v7 = vpop.permute.xlu0 %2722 }
 0x275   : > { %vm2398_vm4 = vcmp.eq.s32.totalorder %v2393_v35, 2  ;;  %vm3499_vm3 = vcmp.eq.s32.totalorder %v3497_v13, 0  ;;  %v4330_v36 = vand.u32 3, %v4329_v29  ;;  %v3596_v20 = vsel %vm9562_vm1, 0, %v3594_v17  ;;  %v9660_v17 = vpop.permute.xlu1 %3102 }
 0x276   : > { %6726 = vcosq.f32 %v3904_v44  ;;  %3279 = vrot.lane.b32.xlu1 %v9377_v42, %s6770_s28  ;;  %v2397_v28 = vsel %vm2395_vm10, %v9554_v43, %v1556_v5  ;;  %v2400_v21 = vsel %vm2398_vm4, %v1559_v19, %v9568_v31  ;;  %vm3502_vm12 = vcmp.eq.s32.totalorder %v3497_v13, 2  ;;  %12577 = vst [vmem:[#allocation2_spill] sm:$0xff] %v9660_v17  ;;  %v12581_v17 = vld [vmem:[#allocation36_spill] sm:$0xff] }
 0x277   : > { %6728 = vsinq.f32 %v3904_v44  ;;  %3137 = vrot.lane.b32.xlu0 %v9449_v40, %s6769_s27  ;;  %v1562_v29 = vsel %vm1552_vm14, nan, %v1561_v14  ;;  %v3501_v24 = vsel %vm3499_vm3, %v9606_v22, %v3500_v62  ;;  %v3504_v49 = vsel %vm3502_vm12, %v3503_v33, %v6721_v10 }
 0x278   : > { %v9654_v50 = vpop.eup %6722  ;;  %v3902_v34 = vsub.s32 4, %v9052_v1  ;;  %vm2394_vm6 = vcmp.lt.s32.totalorder %v2393_v35, 2  ;;  %vm3498_vm8 = vcmp.lt.s32.totalorder %v3497_v13, 2  ;;  %v3600_v19 = vand.u32 3, %v3596_v20  ;;  %v9662_v31 = vpop.permute.xlu0 %2726 }
 0x279   : > { %v6725_v5 = vpop.eup %6724  ;;  %v4433_v43 = vadd.s32 3, %v3596_v20  ;;  %v2401_v44 = vsel %vm2394_vm6, %v2397_v28, %v2400_v21  ;;  %vm4332_vm1 = vcmp.eq.s32.totalorder %v4330_v36, 0  ;;  %vm4335_vm7 = vcmp.eq.s32.totalorder %v4330_v36, 2 }
 0x27a   : > { %v12578_v26 = vand.u32 2147483647, %v8303_v60  ;;  %3283 = vrot.lane.b32.xlu1 %v9410_v23, %s6770_s28  ;;  %v9673_v9 = vmul.f32 %v1562_v29, %v12581_v17  ;;  %v3505_v35 = vsel %vm3498_vm8, %v3501_v24, %v3504_v49  ;;  %v4337_v13 = vsel %vm4335_vm7, %v3503_v33, %v6721_v10 }
 0x27b   : > { %3285 = vrot.lane.b32.xlu0 %v9422_v61, %s6770_s28  ;;  %v3603_v28 = vxor.u32 2147483648, %v6725_v5  ;;  %v3606_v21 = vxor.u32 2147483648, %v9654_v50  ;;  %v3903_v56 = vsel %vm3818_vm13, %v3902_v34, %v9052_v1  ;;  %vm6458_vm5 = vcmp.lt.s32.totalorder %v9640_v51, 0  ;;  %v9695_v1 = vpop.permute.xlu1 %3106 }
 0x27c   : > { %vm9666_vm15 = vcmp.le.f32.partialorder %v12578_v26, 0.7853982  ;;  %v4334_v26 = vsel %vm4332_vm1, %v9606_v22, %v3500_v62  ;;  %v2402_v10 = vsel %vm1552_vm14, nan, %v2401_v44  ;;  %vm3496_vm10 = vweird.f32 %v12549_v18  ;;  %12582 = vst [vmem:[#allocation52_spill] sm:$0xff] %v9695_v1 }
 0x27d   : > { %v4007_v20 = vsel %vm9666_vm15, %v8303_v60, %v4004_v38  ;;  %vm4331_vm4 = vcmp.lt.s32.totalorder %v4330_v36, 2  ;;  %v9689_v38 = vpop.permute.xlu0 %2956  ;;  %v3506_v22 = vsel %vm3496_vm10, nan, %v3505_v35  ;;  %vm3602_vm3 = vcmp.eq.s32.totalorder %v3600_v19, 0  ;;  %v12584_v35 = vld [vmem:[#allocation10_spill] sm:$0xff] }
 0x27e   : > { %vm3605_vm12 = vcmp.eq.s32.totalorder %v3600_v19, 2  ;;  %6730 = vcosq.f32 %v4007_v20  ;;  %2448 = vrot.lane.b32.xlu1 %v9673_v9, %s6765_s22  ;;  %v4338_v62 = vsel %vm4331_vm4, %v4334_v26, %v4337_v13  ;;  %v4434_v33 = vand.u32 3, %v4433_v43 }
 0x27f   : > { %v3905_v52 = vsel %vm9620_vm9, 0, %v3903_v56  ;;  %6732 = vsinq.f32 %v4007_v20  ;;  %3289 = vrot.lane.b32.xlu0 %v9449_v40, %s6770_s28  ;;  %v9705_v24 = vmul.f32 %v2402_v10, %v12581_v17  ;;  %v3604_v49 = vsel %vm3602_vm3, %v9654_v50, %v3603_v28 }
 0x280   : > { %v9701_v36 = vpop.eup %6726  ;;  %v3607_v34 = vsel %vm3605_vm12, %v3606_v21, %v6725_v5  ;;  %v12583_v43 = vshll.u32 %v9446_v25, %v9584_v41  ;;  %v4100_v0 = vshll.u32 %v9630_v15, 23  ;;  %v9716_v13 = vmul.f32 %v3506_v22, %v12584_v35 }
 0x281   : > { %v6729_v44 = vpop.eup %6728  ;;  %v4005_v20 = vsub.s32 4, %v9105_v12  ;;  %v9719_v26 = vpop.permute.xlu0 %2960  ;;  %v9724_v17 = vsel %vm6458_vm5, 0, %v9640_v51  ;;  %v4339_v25 = vsel %vm3496_vm10, nan, %v4338_v62  ;;  %vm3601_vm13 = vcmp.lt.s32.totalorder %v3600_v19, 2 }
 0x282   : > { %v9712_v56 = vor.u32 %v9628_v45, %v12583_v43  ;;  %12585 = vst [vmem:[#allocation47_spill] sm:$0xff] %v9716_v13  ;;  %v4745_v41 = vadd.s32 3, %v3905_v52  ;;  %2452 = vrot.lane.b32.xlu1 %v9705_v24, %s6765_s22  ;;  %v3608_v45 = vsel %vm3601_vm13, %v3604_v49, %v3607_v34  ;;  %vm4436_vm9 = vcmp.eq.s32.totalorder %v4434_v33, 0  ;;  %v9734_v62 = vpop.permute.xlu1 %3254  ;;  %s6774_s22 = smov 112  }
 0x283   : > { %vm4439_vm14 = vcmp.eq.s32.totalorder %v4434_v33, 2  ;;  %v3909_v15 = vand.u32 3, %v3905_v52  ;;  %5076 = vrot.lane.b32.xlu0 %v9716_v13, %s6771_s29  ;;  %v4438_v10 = vsel %vm4436_vm9, %v9654_v50, %v3603_v28  ;;  %v3912_v22 = vxor.u32 2147483648, %v6729_v44  ;;  %12586 = vst [vmem:[#allocation36_spill] sm:$0xff] %v9734_v62 }
 0x284   : > { %v4441_v51 = vsel %vm4439_vm14, %v3606_v21, %v6725_v5  ;;  %v3915_v18 = vxor.u32 2147483648, %v9701_v36  ;;  %v4101_v19 = vor.u32 4788187, %v4100_v0  ;;  %v9737_v43 = vmul.f32 %v4339_v25, %v12584_v35  ;;  %v12588_v21 = vld [vmem:[#allocation40_spill] sm:$0xff] }
 0x285   : > { %vm3599_vm6 = vweird.f32 %v12563_v53  ;;  %v4006_v52 = vsel %vm3921_vm11, %v4005_v20, %v9105_v12  ;;  %v9743_v49 = vpop.permute.xlu0 %3108  ;;  %v4201_v50 = vsub.s32 4294967266, %v9724_v17  ;;  %vm4435_vm8 = vcmp.lt.s32.totalorder %v4434_v33, 2 }
 0x286   : > { %12587 = vst [vmem:[#allocation10_spill] sm:$0xff] %v9737_v43  ;;  %v3609_v5 = vsel %vm3599_vm6, nan, %v3608_v45  ;;  %v4746_v28 = vand.u32 3, %v4745_v41  ;;  %2597 = vrot.lane.b32.xlu1 %v9673_v9, %s6766_s24  ;;  %vm3715_vm1 = vcmp.lt.s32.totalorder %v12588_v21, 0  ;;  %v4181_v34 = vadd.s32 %v9332_v58, %v9341_v48  ;;  %v9773_v14 = vpop.permute.xlu1 %3258 }
 0x287   : > { %v4442_v0 = vsel %vm4435_vm8, %v4438_v10, %v4441_v51  ;;  %vm3911_vm7 = vcmp.eq.s32.totalorder %v3909_v15, 0  ;;  %vm3914_vm11 = vcmp.eq.s32.totalorder %v3909_v15, 2  ;;  %5080 = vrot.lane.b32.xlu0 %v9737_v43, %s6771_s29  ;;  %v4104_v35 = vcvt.s32.f32 %v9712_v56  ;;  %v12589_v10 = vld [vmem:[#allocation37_spill] sm:$0xff] }
 0x288   : > { %v9755_v12 = vpop.eup %6730  ;;  %v3913_v33 = vsel %vm3911_vm7, %v9701_v36, %v3912_v22  ;;  %v3916_v20 = vsel %vm3914_vm11, %v3915_v18, %v6729_v44  ;;  %v4008_v25 = vsel %vm9666_vm15, 0, %v4006_v52  ;;  %v4102_v45 = vand.u32 2147483647, %v4101_v19  ;;  %12591 = vst [vmem:[#allocation37_spill] sm:$0xff] %v9773_v14 }
 0x289   : > { %v6733_v41 = vpop.eup %6732  ;;  %v4197_v58 = vsub.s32 32, %v9724_v17  ;;  %v4198_v48 = vshll.u32 %v9534_v57, %v9724_v17  ;;  %v9765_v51 = vmul.f32 %v3609_v5, %v12589_v10  ;;  %v9767_v29 = vpop.permute.xlu0 %3112  ;;  %v4202_v62 = vadd.s32 127, %v4201_v50 }
 0x28a   : > { %v4443_v56 = vsel %vm3599_vm6, nan, %v4442_v0  ;;  %vm3910_vm5 = vcmp.lt.s32.totalorder %v3909_v15, 2  ;;  %vm4748_vm10 = vcmp.eq.s32.totalorder %v4746_v28, 0  ;;  %2601 = vrot.lane.b32.xlu1 %v9705_v24, %s6766_s24  ;;  %vm4751_vm15 = vcmp.eq.s32.totalorder %v4746_v28, 2 }
 0x28b   : > { %12590 = vst [vmem:[#allocation40_spill] sm:$0xff] %v9765_v51  ;;  %v3917_v19 = vsel %vm3910_vm5, %v3913_v33, %v3916_v20  ;;  %v4012_v52 = vand.u32 3, %v4008_v25  ;;  %v4849_v57 = vadd.s32 3, %v4008_v25  ;;  %5084 = vrot.lane.b32.xlu0 %v9765_v51, %s6771_s29  ;;  %v4750_v17 = vsel %vm4748_vm10, %v9701_v36, %v3912_v22 }
 0x28c   : > { %v4753_v50 = vsel %vm4751_vm15, %v3915_v18, %v6729_v44  ;;  %v4015_v5 = vxor.u32 2147483648, %v6733_v41  ;;  %v4018_v53 = vxor.u32 2147483648, %v9755_v12  ;;  %v4199_v15 = vshrl.u32 %v4181_v34, %v4197_v58 }
 0x28d   : > { %v9780_v0 = vmul.f32 %v4443_v56, %v12589_v10  ;;  %v12593_v1 = vand.u32 2147483647, %v12566_v11  ;;  %vm3908_vm3 = vweird.f32 %v12567_v39  ;;  %v9789_v20 = vpop.permute.xlu0 %3260  ;;  %v4203_v25 = vshll.u32 %v4202_v62, 23  ;;  %v12599_v56 = vld [vmem:[#allocation46_spill] sm:$0xff] }
 0x28e   : > { %12596 = vst [vmem:[#allocation98_spill] sm:$0xff] %v9789_v20  ;;  %v3918_v44 = vsel %vm3908_vm3, nan, %v3917_v19  ;;  %vm4747_vm12 = vcmp.lt.s32.totalorder %v4746_v28, 2  ;;  %2749 = vrot.lane.b32.xlu1 %v9673_v9, %s6767_s25  ;;  %vm4014_vm13 = vcmp.eq.s32.totalorder %v4012_v52, 0  ;;  %vm4017_vm9 = vcmp.eq.s32.totalorder %v4012_v52, 2 }
 0x28f   : > { %12592 = vst [vmem:[#allocation97_spill] sm:$0xff] %v9780_v0  ;;  %vm9784_vm4 = vcmp.le.f32.partialorder %v12593_v1, 0.7853982  ;;  %v4754_v1 = vsel %vm4747_vm12, %v4750_v17, %v4753_v50  ;;  %v4850_v22 = vand.u32 3, %v4849_v57  ;;  %5088 = vrot.lane.b32.xlu0 %v9780_v0, %s6771_s29  ;;  %v12597_v18 = vxor.u32 2147483648, %v9589_v32  ;;  %v9807_v28 = vpop.permute.xlu1 %2421 }
 0x290   : > { %v3698_v36 = vsel %vm9784_vm4, %v12566_v11, %v9572_v6  ;;  %v4016_v62 = vsel %vm4014_vm13, %v9755_v12, %v4015_v5  ;;  %v4019_v34 = vsel %vm4017_vm9, %v4018_v53, %v6733_v41  ;;  %12598 = vst [vmem:[#allocation99_spill] sm:$0xff] %v9807_v28  ;;  %v4105_v58 = vmul.f32 %v4104_v35, %v4102_v45 }
 0x291   : > { %v3798_v6 = vsel %vm3715_vm1, %v12597_v18, %v9589_v32  ;;  %v4200_v10 = vor.u32 %v4199_v15, %v4198_v48  ;;  %6734 = vcosq.f32 %v3698_v36  ;;  %v9810_v19 = vmul.f32 %v3918_v44, %v12599_v56  ;;  %v9812_v57 = vpop.permute.xlu0 %3264  ;;  %v12602_v32 = vld [vmem:[#allocation73_spill] sm:$0xff] }
 0x292   : > { %12601 = vst [vmem:[#allocation100_spill] sm:$0xff] %v9812_v57  ;;  %v4204_v17 = vor.u32 4788187, %v4203_v25  ;;  %6736 = vsinq.f32 %v3698_v36  ;;  %v4755_v50 = vsel %vm3908_vm3, nan, %v4754_v1  ;;  %vm4013_vm14 = vcmp.lt.s32.totalorder %v4012_v52, 2  ;;  %2753 = vrot.lane.b32.xlu1 %v9705_v24, %s6767_s25  ;;  %v5127_v52 = vld [vmem:[%s12022_s6 + $0x10] sm:$0xff] }
 0x293   : > { %12600 = vst [vmem:[#allocation46_spill] sm:$0xff] %v9810_v19  ;;  %v3696_v18 = vsub.s32 4, %v12602_v32  ;;  %v4020_v14 = vsel %vm4013_vm14, %v4016_v62, %v4019_v34  ;;  %vm4852_vm6 = vcmp.eq.s32.totalorder %v4850_v22, 0  ;;  %vm4855_vm8 = vcmp.eq.s32.totalorder %v4850_v22, 2  ;;  %5101 = vrot.lane.b32.xlu0 %v9810_v19, %s6771_s29  ;;  %v9822_v48 = vpop.permute.xlu1 %2425 }
 0x294   : > { %v4854_v35 = vsel %vm4852_vm6, %v9755_v12, %v4015_v5  ;;  %v4857_v45 = vsel %vm4855_vm8, %v4018_v53, %v6733_v41  ;;  %12603 = vst [vmem:[#allocation73_spill] sm:$0xff] %v9822_v48  ;;  %v12604_v39 = vand.u32 2147483647, %v12588_v21  ;;  %v9831_v15 = vmul.f32 %v4755_v50, %v12599_v56 }
 0x295   : > { %vm4011_vm11 = vweird.f32 %v8303_v60  ;;  %v9834_v25 = vpop.permute.xlu0 %2438  ;;  %v4106_v36 = vxor.u32 2147483648, %v4105_v58  ;;  %vm4851_vm5 = vcmp.lt.s32.totalorder %v4850_v22, 2  ;;  %v4205_v5 = vand.u32 2147483647, %v4204_v17  ;;  %v12613_v22 = vld [vmem:[#allocation80_spill] sm:$0xff] }
 0x296   : > { %vm9826_vm7 = vcmp.le.f32.partialorder %v12604_v39, 0.7853982  ;;  %12607 = vst [vmem:[#allocation101_spill] sm:$0xff] %v9831_v15  ;;  %12608 = vst [vmem:[#allocation102_spill] sm:$0xff] %v9834_v25  ;;  %v4021_v41 = vsel %vm4011_vm11, nan, %v4020_v14  ;;  %2983 = vrot.lane.b32.xlu1 %v9673_v9, %s6768_s26  ;;  %v4207_v53 = vcvt.s32.f32 %v4200_v10  ;;  %v3697_v44 = vsel %vm3612_vm2, %v3696_v18, %v12602_v32  ;;  %v12614_v18 = vld [vmem:[#allocation92_spill] sm:$0xff] }
 0x297   : > { %v3801_v12 = vsel %vm9826_vm7, %v12588_v21, %v3798_v6  ;;  %v4858_v1 = vsel %vm4851_vm5, %v4854_v35, %v4857_v45  ;;  %5105 = vrot.lane.b32.xlu0 %v9831_v15, %s6771_s29  ;;  %v9848_v62 = vpop.permute.xlu1 %2572  ;;  %v12610_v6 = vld [vmem:[#allocation5_spill] sm:$0xff]  ;;  %vm4024_vm10 = vcmp.lt.s32.totalorder %v12613_v22, 0  ;;  %v3699_v10 = vsel %vm9784_vm4, 0, %v3697_v44 }
 0x298   : > { %12609 = vst [vmem:[#allocation103_spill] sm:$0xff] %v9848_v62  ;;  %6738 = vcosq.f32 %v3801_v12  ;;  %v9851_v34 = vmul.f32 %v4021_v41, %v12610_v6  ;;  %v4859_v56 = vsel %vm4011_vm11, nan, %v4858_v1  ;;  %v4107_v50 = vsel %vm4024_vm10, %v4106_v36, %v4105_v58 }
 0x299   : > { %v9853_v14 = vpop.permute.xlu0 %2442  ;;  %6740 = vsinq.f32 %v3801_v12  ;;  %v4208_v32 = vmul.f32 %v4207_v53, %v4205_v5  ;;  %v3799_v35 = vsub.s32 4, %v12614_v18  ;;  %v4537_v39 = vadd.s32 3, %v3699_v10 }
 0x29a   : > { %12611 = vst [vmem:[#allocation5_spill] sm:$0xff] %v9851_v34  ;;  %12612 = vst [vmem:[#allocation104_spill] sm:$0xff] %v9853_v14  ;;  %2987 = vrot.lane.b32.xlu1 %v9705_v24, %s6768_s26  ;;  %v9870_v60 = vmul.f32 %v4859_v56, %v12610_v6  ;;  %v12617_v12 = vand.u32 2147483647, %v12613_v22  ;;  %v3703_v36 = vand.u32 3, %v3699_v10  ;;  %v5125_v10 = vld [vmem:[%s12022_s6] sm:$0xff]  ;;  %vm3702_vm14 = vweird.f32 %v12566_v11 }
 0x29b   : > { %v6735_v17 = vpop.eup %6734  ;;  %5109 = vrot.lane.b32.xlu0 %v9851_v34, %s6771_s29  ;;  %v9867_v33 = vpop.permute.xlu1 %2576  ;;  %v4209_v53 = vxor.u32 2147483648, %v4208_v32  ;;  %v3800_v6 = vsel %vm3715_vm1, %v3799_v35, %v12614_v18 }
 0x29c   : > { %v6737_v45 = vpop.eup %6736  ;;  %12615 = vst [vmem:[#allocation80_spill] sm:$0xff] %v9867_v33  ;;  %12616 = vst [vmem:[#allocation92_spill] sm:$0xff] %v9870_v60  ;;  %vm9874_vm2 = vcmp.le.f32.partialorder %v12617_v12, 0.7853982  ;;  %v3709_v1 = vxor.u32 2147483648, %v6735_v17  ;;  %v4538_v12 = vand.u32 3, %v4537_v39 }
 0x29d   : > { %v9878_v58 = vpop.permute.xlu0 %2587  ;;  %v4110_v5 = vsel %vm9874_vm2, %v12613_v22, %v4107_v50  ;;  %v3706_v44 = vxor.u32 2147483648, %v6737_v45  ;;  %v12622_v50 = vld [vmem:[#allocation88_spill] sm:$0xff]  ;;  %vm3705_vm4 = vcmp.eq.s32.totalorder %v3703_v36, 0  ;;  %vm3708_vm3 = vcmp.eq.s32.totalorder %v3703_v36, 2 }
 0x29e   : > { %12620 = vst [vmem:[#allocation105_spill] sm:$0xff] %v9878_v58  ;;  %3135 = vrot.lane.b32.xlu1 %v9673_v9, %s6769_s27  ;;  %vm4127_vm15 = vcmp.lt.s32.totalorder %v12622_v50, 0  ;;  %6742 = vcosq.f32 %v4110_v5  ;;  %v3802_v18 = vsel %vm9826_vm7, 0, %v3800_v6  ;;  %v4108_v39 = vsub.s32 4, %v9371_v46 }
 0x29f   : > { %5113 = vrot.lane.b32.xlu0 %v9870_v60, %s6771_s29  ;;  %v9890_v56 = vpop.permute.xlu1 %2724  ;;  %6744 = vsinq.f32 %v4110_v5  ;;  %v4210_v25 = vsel %vm4127_vm15, %v4209_v53, %v4208_v32  ;;  %v3707_v58 = vsel %vm3705_vm4, %v6735_v17, %v3706_v44  ;;  %vm3704_vm1 = vcmp.lt.s32.totalorder %v3703_v36, 2 }
 0x2a0   : > { %12621 = vst [vmem:[#allocation106_spill] sm:$0xff] %v9890_v56  ;;  %v3710_v56 = vsel %vm3708_vm3, %v3709_v1, %v6737_v45  ;;  %vm4540_vm12 = vcmp.eq.s32.totalorder %v4538_v12, 0  ;;  %vm4543_vm13 = vcmp.eq.s32.totalorder %v4538_v12, 2  ;;  %v3806_v5 = vand.u32 3, %v3802_v18 }
 0x2a1   : > { %v9896_v14 = vpop.permute.xlu0 %2591  ;;  %v12625_v6 = vand.u32 2147483647, %v12622_v50  ;;  %v4545_v62 = vsel %vm4543_vm13, %v3709_v1, %v6737_v45  ;;  %v4641_v36 = vadd.s32 3, %v3802_v18  ;;  %v4542_v48 = vsel %vm4540_vm12, %v6735_v17, %v3706_v44 }
 0x2a2   : > { %12623 = vst [vmem:[#allocation88_spill] sm:$0xff] %v9896_v14  ;;  %3139 = vrot.lane.b32.xlu1 %v9705_v24, %s6769_s27  ;;  %v6739_v35 = vpop.eup %6738  ;;  %vm4539_vm6 = vcmp.lt.s32.totalorder %v4538_v12, 2  ;;  %vm3808_vm8 = vcmp.eq.s32.totalorder %v3806_v5, 0  ;;  %vm3811_vm7 = vcmp.eq.s32.totalorder %v3806_v5, 2  ;;  %vm3807_vm11 = vcmp.lt.s32.totalorder %v3806_v5, 2  ;;  %s6775_s27 = smov 96  }
 0x2a3   : > { %5131 = vperm.xlu0 %6668, %v5125_v10   ;;  %v6741_v33 = vpop.eup %6740  ;;  %v9905_v14 = vpop.permute.xlu1 %2728  ;;  %vm9912_vm9 = vcmp.le.f32.partialorder %v12625_v6, 0.7853982  ;;  %v3711_v10 = vsel %vm3704_vm1, %v3707_v58, %v3710_v56  ;;  %v3812_v28 = vxor.u32 2147483648, %v6739_v35  ;;  %v4109_v6 = vsel %vm4024_vm10, %v4108_v39, %v9371_v46 }
 0x2a4   : > { %12624 = vst [vmem:[#allocation107_spill] sm:$0xff] %v9905_v14  ;;  %v4213_v14 = vsel %vm9912_vm9, %v12622_v50, %v4210_v25  ;;  %v3809_v57 = vxor.u32 2147483648, %v6741_v33  ;;  %v5157_v25 = vld [vmem:[%s12023_s7] sm:$0xff]  ;;  %v3712_v58 = vsel %vm3702_vm14, nan, %v3711_v10  ;;  %v4546_v44 = vsel %vm4539_vm6, %v4542_v48, %v4545_v62  ;;  %v5159_v48 = vld [vmem:[%s12023_s7 + $0x10] sm:$0xff] }
 0x2a5   : > { %v9916_v53 = vpop.permute.xlu0 %2739  ;;  %6746 = vcosq.f32 %v4213_v14  ;;  %v4642_v46 = vand.u32 3, %v4641_v36  ;;  %v4111_v1 = vsel %vm9874_vm2, 0, %v4109_v6  ;;  %v3813_v18 = vsel %vm3811_vm7, %v3812_v28, %v6741_v33 }
 0x2a6   : > { %12628 = vst [vmem:[#allocation108_spill] sm:$0xff] %v9916_v53  ;;  %3287 = vrot.lane.b32.xlu1 %v9673_v9, %s6770_s28  ;;  %6748 = vsinq.f32 %v4213_v14  ;;  %v3810_v12 = vsel %vm3808_vm8, %v6739_v35, %v3809_v57  ;;  %v4211_v53 = vsub.s32 4, %v9487_v55  ;;  %v4547_v62 = vsel %vm3702_vm14, nan, %v4546_v44 }
 0x2a7   : > { %5141 = vperm.xlu0 %6668, %v5127_v52   ;;  %v9927_v45 = vpop.permute.xlu1 %2958  ;;  %v12631_v52 = vld [vmem:[#allocation38_spill] sm:$0xff]  ;;  %v4953_v14 = vadd.s32 3, %v4111_v1  ;;  %v3814_v36 = vsel %vm3807_vm11, %v3810_v12, %v3813_v18  ;;  %vm4644_vm5 = vcmp.eq.s32.totalorder %v4642_v46, 0  ;;  %vm4647_vm10 = vcmp.eq.s32.totalorder %v4642_v46, 2 }
 0x2a8   : > { %12629 = vst [vmem:[#allocation109_spill] sm:$0xff] %v9927_v45  ;;  %v6743_v56 = vpop.eup %6742  ;;  %v9941_v10 = vmul.f32 %v3712_v58, %v12631_v52  ;;  %v4115_v6 = vand.u32 3, %v4111_v1  ;;  %v4649_v58 = vsel %vm4647_vm10, %v3812_v28, %v6741_v33  ;;  %v9956_v20 = vmul.f32 %v4547_v62, %v12631_v52 }
 0x2a9   : > { %v9934_v17 = vpop.permute.xlu0 %2743  ;;  %v6745_v39 = vpop.eup %6744  ;;  %v4121_v45 = vxor.u32 2147483648, %v6743_v56  ;;  %vm3805_vm2 = vweird.f32 %v12588_v21  ;;  %v4212_v11 = vsel %vm4127_vm15, %v4211_v53, %v9487_v55  ;;  %vm4643_vm4 = vcmp.lt.s32.totalorder %v4642_v46, 2  ;;  %v12635_v46 = vld [vmem:[#allocation43_spill] sm:$0xff] }
 0x2aa   : > { %12630 = vst [vmem:[#allocation110_spill] sm:$0xff] %v9934_v17  ;;  %3291 = vrot.lane.b32.xlu1 %v9705_v24, %s6770_s28  ;;  %12632 = vst [vmem:[#allocation38_spill] sm:$0xff] %v9941_v10  ;;  %v3815_v44 = vsel %vm3805_vm2, nan, %v3814_v36  ;;  %vm4117_vm3 = vcmp.eq.s32.totalorder %v4115_v6, 0  ;;  %vm4120_vm1 = vcmp.eq.s32.totalorder %v4115_v6, 2  ;;  %v4214_v55 = vsel %vm9912_vm9, 0, %v4212_v11 }
 0x2ab   : > { %5163 = vperm.xlu0 %6668, %v5157_v25   ;;  %v9944_v17 = vpop.permute.xlu1 %2962  ;;  %v4646_v25 = vsel %vm4644_vm5, %v6739_v35, %v3809_v57  ;;  %12634 = vst [vmem:[#allocation112_spill] sm:$0xff] %v9956_v20  ;;  %v4954_v57 = vand.u32 3, %v4953_v14  ;;  %v4122_v12 = vsel %vm4120_vm1, %v4121_v45, %v6745_v39  ;;  %v9975_v18 = vmul.f32 %v3815_v44, %v12635_v46  ;;  %s6576_s28 = smul.u32 96, %s12949_s18 }
 0x2ac   : > { %12633 = vst [vmem:[#allocation111_spill] sm:$0xff] %v9944_v17  ;;  %v4118_v17 = vxor.u32 2147483648, %v6745_v39  ;;  %v4650_v33 = vsel %vm4643_vm4, %v4646_v25, %v4649_v58  ;;  %vm4116_vm15 = vcmp.lt.s32.totalorder %v4115_v6, 2  ;;  %v4218_v32 = vand.u32 3, %v4214_v55 }
 0x2ad   : > { %v9951_v41 = vpop.permute.xlu0 %2973  ;;  %12636 = vst [vmem:[#allocation43_spill] sm:$0xff] %v9975_v18  ;;  %vm4956_vm12 = vcmp.eq.s32.totalorder %v4954_v57, 0  ;;  %vm4959_vm13 = vcmp.eq.s32.totalorder %v4954_v57, 2  ;;  %v5057_v36 = vadd.s32 3, %v4214_v55  ;;  %vm4114_vm9 = vweird.f32 %v12613_v22  ;;  %v12638_v55 = vld [vmem:[#allocation53_spill] sm:$0xff]  ;;  %s11001_s14 = scalar_lea.vmem %s12026_s10, %s6576_s28 }
 0x2ae   : > { %5078 = vrot.lane.b32.xlu1 %v9941_v10, %s6771_s29  ;;  %v4119_v1 = vsel %vm4117_vm3, %v6743_v56, %v4118_v17  ;;  %v4958_v25 = vsel %vm4956_vm12, %v6743_v56, %v4118_v17  ;;  %v4961_v58 = vsel %vm4959_vm13, %v4121_v45, %v6745_v39  ;;  %vm4955_vm14 = vcmp.lt.s32.totalorder %v4954_v57, 2 }
 0x2af   : > { %5173 = vperm.xlu0 %6668, %v5159_v48   ;;  %v9962_v5 = vpop.permute.xlu1 %3110  ;;  %v6747_v35 = vpop.eup %6746  ;;  %v4651_v48 = vsel %vm3805_vm2, nan, %v4650_v33  ;;  %v4123_v14 = vsel %vm4116_vm15, %v4119_v1, %v4122_v12  ;;  %v4962_v17 = vsel %vm4955_vm14, %v4958_v25, %v4961_v58  ;;  %vm4220_vm6 = vcmp.eq.s32.totalorder %v4218_v32, 0 }
 0x2b0   : > { %v6749_v53 = vpop.eup %6748  ;;  %v4224_v44 = vxor.u32 2147483648, %v6747_v35  ;;  %v9988_v21 = vmul.f32 %v4651_v48, %v12635_v46  ;;  %v4124_v33 = vsel %vm4114_vm9, nan, %v4123_v14  ;;  %vm4223_vm8 = vcmp.eq.s32.totalorder %v4218_v32, 2 }
 0x2b1   : > { %v9966_v28 = vpop.permute.xlu0 %2977  ;;  %v4221_v11 = vxor.u32 2147483648, %v6749_v53  ;;  %v5058_v45 = vand.u32 3, %v5057_v36  ;;  %v2427_v12 = vlaneseq  ;;  %v10002_v46 = vmul.f32 %v4124_v33, %v12638_v55 }
 0x2b2   : > { %5082 = vrot.lane.b32.xlu1 %v9956_v20, %s6771_s29  ;;  %v4225_v39 = vsel %vm4223_vm8, %v4224_v44, %v6749_v53  ;;  %v4963_v57 = vsel %vm4114_vm9, nan, %v4962_v17  ;;  %vm4219_vm7 = vcmp.lt.s32.totalorder %v4218_v32, 2  ;;  %vm4217_vm10 = vweird.f32 %v12622_v50 }
 0x2b3   : > { %5225 = vrot.lane.b32.xlu0 %v9716_v13, %s6772_s21  ;;  %v9977_v52 = vpop.permute.xlu1 %3114  ;;  %v4222_v56 = vsel %vm4220_vm6, %v6747_v35, %v4221_v11  ;;  %12639 = vst [vmem:[#allocation53_spill] sm:$0xff] %v10002_v46  ;;  %vm5060_vm11 = vcmp.eq.s32.totalorder %v5058_v45, 0  ;;  %vm5063_vm5 = vcmp.eq.s32.totalorder %v5058_v45, 2  ;;  %v10017_v33 = vmul.f32 %v4963_v57, %v12638_v55  ;;  %v12649_v55 = vld [vmem:[#allocation69_spill] sm:$0xff]  ;;  %v12650_v57 = vld [vmem:[#allocation78_spill] sm:$0xff] }
 0x2b4   : > { %v4226_v36 = vsel %vm4219_vm7, %v4222_v56, %v4225_v39  ;;  %v5062_v25 = vsel %vm5060_vm11, %v6747_v35, %v4221_v11  ;;  %v5065_v58 = vsel %vm5063_vm5, %v4224_v44, %v6749_v53  ;;  %vm5059_vm2 = vcmp.lt.s32.totalorder %v5058_v45, 2  ;;  %v12644_v35 = vld [vmem:[#allocation26_spill] sm:$0xff]  ;;  %v12645_v53 = vld [vmem:[#allocation12_spill] sm:$0xff] }
 0x2b5   : > { %v9981_v62 = vpop.permute.xlu0 %3125  ;;  %12641 = vst [vmem:[#allocation115_spill] sm:$0xff] %v10017_v33  ;;  %v4227_v32 = vsel %vm4217_vm10, nan, %v4226_v36  ;;  %v10028_v11 = vmul.f32 %v12645_v53, %v12644_v35  ;;  %v5066_v44 = vsel %vm5059_vm2, %v5062_v25, %v5065_v58  ;;  %v12647_v56 = vld [vmem:[#allocation28_spill] sm:$0xff]  ;;  %v10042_v45 = vmul.f32 %v12650_v57, %v8987_v47  ;;  %v12653_v36 = vld [vmem:[#allocation9_spill] sm:$0xff] }
 0x2b6   : > { %5086 = vrot.lane.b32.xlu1 %v9975_v18, %s6771_s29  ;;  %v10034_v39 = vmul.f32 %v12645_v53, %v12647_v56  ;;  %v12654_v25 = vld [vmem:[#allocation68_spill] sm:$0xff]  ;;  %v12656_v35 = vld [vmem:[#allocation81_spill] sm:$0xff]  ;;  %v12658_v56 = vld [vmem:[#allocation70_spill] sm:$0xff]  ;;  %vm6099_vm11 = vcmask 7168  }
 0x2b7   : > { %5229 = vrot.lane.b32.xlu0 %v9737_v43, %s6772_s21  ;;  %v9991_v6 = vpop.permute.xlu1 %3262  ;;  %12646 = vst [vmem:[#allocation26_spill] sm:$0xff] %v10028_v11  ;;  %12652 = vst [vmem:[#allocation69_spill] sm:$0xff] %v10042_v45  ;;  %v10049_v58 = vmul.f32 %v12654_v25, %v12653_v36  ;;  %v10053_v53 = vmul.f32 %v12654_v25, %v12656_v35  ;;  %v5067_v36 = vsel %vm4217_vm10, nan, %v5066_v44  ;;  %v2537_v25 = vshrl.u32 %v2427_v12, 7  ;;  %v12667_v45 = vld [vmem:[#allocation84_spill] sm:$0xff]  ;;  %v12670_v44 = vld [vmem:[#allocation75_spill] sm:$0xff] }
 0x2b8   : > { %12648 = vst [vmem:[#allocation12_spill] sm:$0xff] %v10034_v39  ;;  %v10084_v50 = vmul.f32 %v12667_v45, %v9377_v42  ;;  %v12703_v39 = vld [vmem:[#allocation99_spill] sm:$0xff]  ;;  %v12710_v11 = vld [vmem:[#allocation96_spill] sm:$0xff] }
 0x2b9   : > { %v9995_v1 = vpop.permute.xlu0 %3129  ;;  %12655 = vst [vmem:[#allocation78_spill] sm:$0xff] %v10049_v58  ;;  %12657 = vst [vmem:[#allocation9_spill] sm:$0xff] %v10053_v53  ;;  %v12702_v58 = vld [vmem:[#allocation6_spill] sm:$0xff] }
 0x2ba   : > { %12637 = vst [vmem:[#allocation113_spill] sm:$0xff] %v9995_v1  ;;  %5090 = vrot.lane.b32.xlu1 %v9988_v21, %s6771_s29  ;;  %v10012_v1 = vand.u32 127, %v2427_v12  ;;  %v10088_v12 = vmul.f32 %v12667_v45, %v9673_v9 }
 0x2bb   : > { %5233 = vrot.lane.b32.xlu0 %v9765_v51, %s6772_s21  ;;  %v10004_v48 = vpop.permute.xlu1 %3266 }
 0x2bc   : > { %vm2429_vm4 = vcmp.lt.s32.totalorder %v10012_v1, 3  ;;  %vm2578_vm3 = vcmp.lt.s32.totalorder %v10012_v1, 2  ;;  %vm2730_vm1 = vcmp.lt.s32.totalorder %v10012_v1, 1  ;;  %vm2964_vm15 = vcmp.lt.s32.totalorder %v10012_v1, 127  ;;  %12669 = vst [vmem:[#allocation84_spill] sm:$0xff] %v10088_v12 }
 0x2bd   : > { %v10008_v14 = vpop.permute.xlu0 %3277  ;;  %vm3116_vm12 = vcmp.lt.s32.totalorder %v10012_v1, 126  ;;  %vm3268_vm13 = vcmp.lt.s32.totalorder %v10012_v1, 125  ;;  %vm5241_vm9 = vcmp.lt.s32.totalorder %v10012_v1, 32  ;;  %vm5393_vm14 = vcmp.lt.s32.totalorder %v10012_v1, 16 }
 0x2be   : > { %12640 = vst [vmem:[#allocation114_spill] sm:$0xff] %v10008_v14  ;;  %5103 = vrot.lane.b32.xlu1 %v10002_v46, %s6771_s29  ;;  %v10038_v14 = vmul.f32 %v12650_v57, %v12649_v55  ;;  %v12659_v55 = vld [vmem:[#allocation82_spill] sm:$0xff]  ;;  %vm5627_vm6 = vcmp.lt.s32.totalorder %v10012_v1, 112  ;;  %vm5779_vm8 = vcmp.lt.s32.totalorder %v10012_v1, 96  ;;  %vm5931_vm7 = vcmp.lt.s32.totalorder %v10012_v1, 80 }
 0x2bf   : > { %5237 = vrot.lane.b32.xlu0 %v9780_v0, %s6772_s21  ;;  %v10020_v22 = vpop.permute.xlu1 %2440 }
 0x2c0   : > { %12642 = vst [vmem:[#allocation116_spill] sm:$0xff] %v10020_v22  ;;  %12651 = vst [vmem:[#allocation28_spill] sm:$0xff] %v10038_v14  ;;  %v10057_v14 = vmul.f32 %v12659_v55, %v12658_v56  ;;  %v12664_v56 = vld [vmem:[#allocation72_spill] sm:$0xff] }
 0x2c1   : > { %v10024_v17 = vpop.permute.xlu0 %3281  ;;  %12668 = vst [vmem:[#allocation72_spill] sm:$0xff] %v10084_v50  ;;  %v10132_v50 = vmul.f32 %v12659_v55, %v9020_v27  ;;  %v12684_v55 = vld [vmem:[#allocation20_spill] sm:$0xff] }
 0x2c2   : > { %12643 = vst [vmem:[#allocation117_spill] sm:$0xff] %v10024_v17  ;;  %5107 = vrot.lane.b32.xlu1 %v10017_v33, %s6771_s29  ;;  %12660 = vst [vmem:[#allocation68_spill] sm:$0xff] %v10057_v14  ;;  %v12661_v17 = vld [vmem:[#allocation64_spill] sm:$0xff]  ;;  %v10078_v14 = vmul.f32 %v12664_v56, %v9422_v61  ;;  %v12673_v61 = vld [vmem:[#allocation22_spill] sm:$0xff] }
 0x2c3   : > { %5250 = vrot.lane.b32.xlu0 %v9810_v19, %s6772_s21  ;;  %v10060_v47 = vmul.f32 %v4227_v32, %v12661_v17  ;;  %v10074_v32 = vmul.f32 %v12664_v56, %v9029_v30  ;;  %v10096_v30 = vmul.f32 %v12670_v44, %v9449_v40  ;;  %v2430_v56 = vsel %vm2429_vm4, %v12673_v61, %v9536_v2  ;;  %v12674_v40 = vld [vmem:[#allocation41_spill] sm:$0xff] }
 0x2c4   : > { %v10065_v57 = vpop.permute.xlu1 %2444  ;;  %12666 = vst [vmem:[#allocation64_spill] sm:$0xff] %v10078_v14  ;;  %v2434_v42 = vsel %vm2429_vm4, %v9536_v2, %v12673_v61  ;;  %v10115_v9 = vmul.f32 %v12674_v40, %v9410_v23  ;;  %v10118_v45 = vmul.f32 %v5067_v36, %v12661_v17  ;;  %v2432_v2 = vsel %vm2429_vm4, %v9248_v3, %v9552_v63 }
 0x2c5   : > { %12662 = vst [vmem:[#allocation81_spill] sm:$0xff] %v10060_v47  ;;  %12663 = vst [vmem:[#allocation70_spill] sm:$0xff] %v10065_v57  ;;  %v10070_v35 = vpop.permute.xlu0 %2446  ;;  %v10092_v57 = vmul.f32 %v12670_v44, %v9065_v37  ;;  %v2436_v37 = vsel %vm2429_vm4, %v9552_v63, %v9248_v3  ;;  %v12677_v44 = vld [vmem:[#allocation59_spill] sm:$0xff]  ;;  %v10138_v17 = vsub.s32 0, %v2537_v25  ;;  %v10140_v36 = vsub.s32 1, %v2537_v25 }
 0x2c6   : > { %12665 = vst [vmem:[#allocation82_spill] sm:$0xff] %v10074_v32  ;;  %5111 = vrot.lane.b32.xlu1 %v10060_v47, %s6771_s29  ;;  %12672 = vst [vmem:[#allocation118_spill] sm:$0xff] %v10096_v30  ;;  %v2583_v61 = vsel %vm2578_vm3, %v9593_v59, %v12677_v44  ;;  %v2579_v23 = vsel %vm2578_vm3, %v12677_v44, %v9593_v59  ;;  %v10146_v63 = vmul.f32 %v12674_v40, %v9705_v24  ;;  %v12685_v59 = vld [vmem:[#allocation49_spill] sm:$0xff]  ;;  %v2534_v24 = vld [vmem:[%s12024_s8] sm:$0x3] }
 0x2c7   : > { %12671 = vst [vmem:[#allocation75_spill] sm:$0xff] %v10092_v57  ;;  %5254 = vrot.lane.b32.xlu0 %v9831_v15, %s6772_s21  ;;  %12675 = vst [vmem:[#allocation22_spill] sm:$0xff] %v10115_v9  ;;  %v12683_v9 = vld [vmem:[#allocation19_spill] sm:$0xff]  ;;  %v2585_v25 = vsel %vm2578_vm3, %v9614_v4, %v12685_v59  ;;  %v12689_v57 = vld [vmem:[#allocation56_spill] sm:$0xff]  ;;  %v2969_v32 = vsel %vm2964_vm15, %v9689_v38, %v9385_v16 }
 0x2c8   : > { %12676 = vst [vmem:[#allocation41_spill] sm:$0xff] %v10118_v45  ;;  %v10128_v12 = vpop.permute.xlu1 %2589  ;;  %12679 = vst [vmem:[#allocation119_spill] sm:$0xff] %v10132_v50  ;;  %v10149_v30 = vmul.f32 %v12683_v9, %v2434_v42  ;;  %v10152_v27 = vmul.f32 %v12683_v9, %v2430_v56  ;;  %v10155_v50 = vmul.f32 %v12684_v55, %v2436_v37  ;;  %v12686_v56 = vld [vmem:[#allocation3_spill] sm:$0xff] }
 0x2c9   : > { %12678 = vst [vmem:[#allocation59_spill] sm:$0xff] %v10128_v12  ;;  %12680 = vst [vmem:[#allocation120_spill] sm:$0xff] %v10138_v17  ;;  %v10142_v3 = vpop.permute.xlu0 %2450  ;;  %v10167_v42 = vmul.f32 %v12684_v55, %v2432_v2  ;;  %v10170_v40 = vmul.f32 %v12686_v56, %v2583_v61  ;;  %v2581_v37 = vsel %vm2578_vm3, %v12685_v59, %v9614_v4  ;;  %v5126_v44 = vld [vmem:[%s12022_s6 + $0x8] sm:$0xff] }
 0x2ca   : > { %12681 = vst [vmem:[#allocation121_spill] sm:$0xff] %v10140_v36  ;;  %12682 = vst [vmem:[#allocation122_spill] sm:$0xff] %v10146_v63  ;;  %5115 = vrot.lane.b32.xlu1 %v10118_v45, %s6771_s29  ;;  %v2735_v9 = vsel %vm2730_vm1, %v9644_v7, %v9343_v8  ;;  %v10186_v2 = vmul.f32 %v12686_v56, %v2579_v23  ;;  %v2731_v4 = vsel %vm2730_vm1, %v9343_v8, %v9644_v7  ;;  %v12688_v63 = vld [vmem:[#allocation44_spill] sm:$0xff]  ;;  %v12691_v45 = vld [vmem:[#allocation63_spill] sm:$0xff] }
 0x2cb   : > { %5258 = vrot.lane.b32.xlu0 %v9851_v34, %s6772_s21  ;;  %v2733_v61 = vsel %vm2730_vm1, %v9358_v54, %v9662_v31  ;;  %v2737_v55 = vsel %vm2730_vm1, %v9662_v31, %v9358_v54  ;;  %v10203_v23 = vmul.f32 %v12688_v63, %v2585_v25  ;;  %v2965_v8 = vsel %vm2964_vm15, %v9385_v16, %v9689_v38  ;;  %v6382_v54 = vld [vmem:[%s12024_s8 + $0x2] sm:$0x3]  ;;  %v5128_v38 = vld [vmem:[%s12022_s6 + $0x18] sm:$0xff] }
 0x2cc   : > { %v10200_v59 = vpop.permute.xlu1 %2593  ;;  %v10210_v7 = vrot.slane %v2534_v24, %v10138_v17  ;;  %v10213_v56 = vrot.slane %v2534_v24, %v10140_v36  ;;  %v10221_v25 = vmul.f32 %v12688_v63, %v2581_v37  ;;  %v10224_v14 = vmul.f32 %v12689_v57, %v2735_v9  ;;  %v12690_v24 = vld [vmem:[#allocation34_spill] sm:$0xff] }
 0x2cd   : > { %12687 = vst [vmem:[#allocation19_spill] sm:$0xff] %v10200_v59  ;;  %v10218_v31 = vpop.permute.xlu0 %2595  ;;  %v2967_v59 = vsel %vm2964_vm15, %v12690_v24, %v9719_v26  ;;  %v10235_v34 = vmul.f32 %v12689_v57, %v2731_v4  ;;  %v10238_v63 = vmul.f32 %v12691_v45, %v2737_v55  ;;  %v10241_v37 = vmul.f32 %v12691_v45, %v2733_v61  ;;  %v12692_v57 = vld [vmem:[#allocation77_spill] sm:$0xff]  ;;  %v6491_v55 = vld [vmem:[%s12022_s6 + $0x20] sm:$0xff] }
 0x2ce   : > { %5136 = vperm.xlu1 %6669, %v5126_v44   ;;  %v2971_v16 = vsel %vm2964_vm15, %v9719_v26, %v12690_v24  ;;  %v10253_v9 = vmul.f32 %v12692_v57, %v2965_v8  ;;  %v12693_v44 = vld [vmem:[#allocation57_spill] sm:$0xff]  ;;  %v10262_v61 = vrot.slane %v6382_v54, %v10138_v17  ;;  %v10265_v26 = vrot.slane %v6382_v54, %v10140_v36  ;;  %v6391_v8 = vld [vmem:[%s12024_s8 + $0x4] sm:$0x3] }
 0x2cf   : > { %5262 = vrot.lane.b32.xlu0 %v9870_v60, %s6772_s21  ;;  %v3117_v45 = vsel %vm3116_vm12, %v12693_v44, %v9743_v49  ;;  %v10274_v24 = vmul.f32 %v12692_v57, %v2969_v32  ;;  %v12696_v60 = vld [vmem:[#allocation79_spill] sm:$0xff]  ;;  %v3121_v54 = vsel %vm3116_vm12, %v9743_v49, %v12693_v44  ;;  %v12701_v57 = vld [vmem:[#allocation94_spill] sm:$0xff] }
 0x2d0   : > { %v10259_v4 = vpop.permute.xlu1 %2741  ;;  %v10277_v12 = vmul.f32 %v12696_v60, %v2967_v59  ;;  %v10290_v53 = vmul.f32 %v12696_v60, %v2971_v16  ;;  %v12700_v59 = vld [vmem:[#allocation98_spill] sm:$0xff]  ;;  %v2435_v60 = vsel %vm2429_vm4, %v12703_v39, %v12702_v58 }
 0x2d1   : > { %12694 = vst [vmem:[#allocation20_spill] sm:$0xff] %v10259_v4  ;;  %12695 = vst [vmem:[#allocation49_spill] sm:$0xff] %v10274_v24  ;;  %v12698_v4 = vld [vmem:[#allocation18_spill] sm:$0xff]  ;;  %v10287_v22 = vpop.permute.xlu0 %2599  ;;  %v3269_v49 = vsel %vm3268_vm13, %v12701_v57, %v12700_v59  ;;  %v3273_v44 = vsel %vm3268_vm13, %v12700_v59, %v12701_v57  ;;  %v12707_v57 = vld [vmem:[#allocation87_spill] sm:$0xff] }
 0x2d2   : > { %12697 = vst [vmem:[#allocation3_spill] sm:$0xff] %v10277_v12  ;;  %v3119_v15 = vsel %vm3116_vm12, %v12698_v4, %v9767_v29  ;;  %12699 = vst [vmem:[#allocation44_spill] sm:$0xff] %v10290_v53  ;;  %v3123_v32 = vsel %vm3116_vm12, %v9767_v29, %v12698_v4  ;;  %5146 = vperm.xlu1 %6669, %v5128_v38   ;;  %v12704_v16 = vld [vmem:[#allocation86_spill] sm:$0xff]  ;;  %v5158_v29 = vld [vmem:[%s12023_s7 + $0x8] sm:$0xff]  ;;  %v10315_v4 = vrot.slane %v6391_v8, %v10138_v17 }
 0x2d3   : > { %v10309_v47 = vmul.f32 %v12704_v16, %v3117_v45  ;;  %5281 = vperm.xlu0 %6668, %v6491_v55   ;;  %v10318_v53 = vrot.slane %v6391_v8, %v10140_v36  ;;  %v6408_v38 = vld [vmem:[%s12024_s8 + $0x8] sm:$0x3]  ;;  %v2431_v45 = vsel %vm2429_vm4, %v12702_v58, %v12703_v39  ;;  %v10328_v59 = vmul.f32 %v12704_v16, %v3121_v54  ;;  %v6493_v24 = vld [vmem:[%s12022_s6 + $0x30] sm:$0xff]  ;;  %v12713_v39 = vld [vmem:[#allocation29_spill] sm:$0xff] }
 0x2d4   : > { %v10331_v55 = vmul.f32 %v12707_v57, %v3119_v15  ;;  %v10337_v12 = vpop.permute.xlu1 %2745  ;;  %v10343_v19 = vmul.f32 %v12707_v57, %v3123_v32  ;;  %v10346_v58 = vmul.f32 %v12713_v39, %v3269_v49  ;;  %v10349_v15 = vmul.f32 %v12713_v39, %v3273_v44  ;;  %v12718_v57 = vld [vmem:[#allocation58_spill] sm:$0xff]  ;;  %v12719_v49 = vld [vmem:[#allocation73_spill] sm:$0xff] }
 0x2d5   : > { %12705 = vst [vmem:[#allocation56_spill] sm:$0xff] %v10309_v47  ;;  %12706 = vst [vmem:[#allocation34_spill] sm:$0xff] %v10328_v59  ;;  %v12709_v47 = vld [vmem:[#allocation100_spill] sm:$0xff]  ;;  %v10355_v16 = vpop.permute.xlu0 %2747  ;;  %v2437_v44 = vsel %vm2429_vm4, %v12719_v49, %v12718_v57  ;;  %v10368_v39 = vrot.slane %v6408_v38, %v10138_v17 }
 0x2d6   : > { %12708 = vst [vmem:[#allocation63_spill] sm:$0xff] %v10331_v55  ;;  %v3271_v8 = vsel %vm3268_vm13, %v12710_v11, %v12709_v47  ;;  %12711 = vst [vmem:[#allocation77_spill] sm:$0xff] %v10337_v12  ;;  %v3275_v54 = vsel %vm3268_vm13, %v12709_v47, %v12710_v11  ;;  %v6417_v12 = vld [vmem:[%s12024_s8 + $0xa] sm:$0x3]  ;;  %v12716_v55 = vld [vmem:[#allocation42_spill] sm:$0xff]  ;;  %5168 = vperm.xlu1 %6669, %v5158_v29   ;;  %v10371_v11 = vrot.slane %v6408_v38, %v10140_v36 }
 0x2d7   : > { %12712 = vst [vmem:[#allocation57_spill] sm:$0xff] %v10343_v19  ;;  %12714 = vst [vmem:[#allocation79_spill] sm:$0xff] %v10346_v58  ;;  %v10361_v32 = vmul.f32 %v12716_v55, %v2435_v60  ;;  %v10374_v47 = vmul.f32 %v12716_v55, %v2431_v45  ;;  %v2433_v60 = vsel %vm2429_vm4, %v12718_v57, %v12719_v49  ;;  %v12723_v58 = vld [vmem:[#allocation103_spill] sm:$0xff]  ;;  %v12724_v29 = vld [vmem:[#allocation61_spill] sm:$0xff]  ;;  %5291 = vperm.xlu0 %6668, %v6493_v24  }
 0x2d8   : > { %12715 = vst [vmem:[#allocation18_spill] sm:$0xff] %v10349_v15  ;;  %12720 = vst [vmem:[#allocation94_spill] sm:$0xff] %v10371_v11  ;;  %v12722_v15 = vld [vmem:[#allocation54_spill] sm:$0xff]  ;;  %v10385_v19 = vmul.f32 %v12724_v29, %v3271_v8  ;;  %v5160_v38 = vld [vmem:[%s12023_s7 + $0x18] sm:$0xff]  ;;  %v10395_v55 = vmul.f32 %v12724_v29, %v3275_v54  ;;  %v10397_v57 = vpop.permute.xlu1 %2975  ;;  %v10403_v49 = vrot.slane %v6417_v12, %v10138_v17 }
 0x2d9   : > { %12717 = vst [vmem:[#allocation98_spill] sm:$0xff] %v10361_v32  ;;  %12721 = vst [vmem:[#allocation6_spill] sm:$0xff] %v10374_v47  ;;  %v2584_v32 = vsel %vm2578_vm3, %v12723_v58, %v12722_v15  ;;  %v2580_v45 = vsel %vm2578_vm3, %v12722_v15, %v12723_v58  ;;  %v6495_v8 = vld [vmem:[%s12023_s7 + $0x20] sm:$0xff]  ;;  %v12730_v24 = vld [vmem:[#allocation13_spill] sm:$0xff] }
 0x2da   : > { %12725 = vst [vmem:[#allocation99_spill] sm:$0xff] %v10385_v19  ;;  %12726 = vst [vmem:[#allocation86_spill] sm:$0xff] %v10395_v55  ;;  %v10406_v19 = vrot.slane %v6417_v12, %v10140_v36  ;;  %v10409_v47 = vmul.f32 %v12730_v24, %v2437_v44  ;;  %v12732_v11 = vld [vmem:[#allocation80_spill] sm:$0xff]  ;;  %v12733_v58 = vld [vmem:[#allocation25_spill] sm:$0xff]  ;;  %v2752_v12 = vpop.permute.xlu0 %2751  ;;  %v10424_v36 = vmul.f32 %v12730_v24, %v2433_v60  ;;  %5178 = vperm.xlu1 %6669, %v5160_v38  }
 0x2db   : > { %12727 = vst [vmem:[#allocation87_spill] sm:$0xff] %v10397_v57  ;;  %12728 = vst [vmem:[#allocation100_spill] sm:$0xff] %v10403_v49  ;;  %v2582_v15 = vsel %vm2578_vm3, %v12733_v58, %v12732_v11  ;;  %v2586_v54 = vsel %vm2578_vm3, %v12732_v11, %v12733_v58  ;;  %v12734_v29 = vld [vmem:[#allocation95_spill] sm:$0xff]  ;;  %v12735_v55 = vld [vmem:[#allocation106_spill] sm:$0xff]  ;;  %5314 = vperm.xlu0 %6668, %v6495_v8  }
 0x2dc   : > { %12729 = vst [vmem:[#allocation96_spill] sm:$0xff] %v10406_v19  ;;  %12731 = vst [vmem:[#allocation29_spill] sm:$0xff] %v10409_v47  ;;  %v2736_v17 = vsel %vm2730_vm1, %v12735_v55, %v12734_v29  ;;  %v12737_v44 = vld [vmem:[#allocation62_spill] sm:$0xff]  ;;  %v2732_v47 = vsel %vm2730_vm1, %v12734_v29, %v12735_v55  ;;  %v12739_v19 = vld [vmem:[#allocation24_spill] sm:$0xff]  ;;  %v10465_v59 = vpop.permute.xlu1 %2979 }
 0x2dd   : > { %12736 = vst [vmem:[#allocation42_spill] sm:$0xff] %v10424_v36  ;;  %v10427_v57 = vmul.f32 %v12737_v44, %v2584_v32  ;;  %v12740_v49 = vld [vmem:[#allocation107_spill] sm:$0xff]  ;;  %v10438_v58 = vmul.f32 %v12737_v44, %v2580_v45  ;;  %v12742_v60 = vld [vmem:[#allocation109_spill] sm:$0xff]  ;;  %v12743_v24 = vld [vmem:[#allocation30_spill] sm:$0xff] }
 0x2de   : > { %v2738_v11 = vsel %vm2730_vm1, %v12740_v49, %v12739_v19  ;;  %v2734_v32 = vsel %vm2730_vm1, %v12739_v19, %v12740_v49  ;;  %v2966_v36 = vsel %vm2964_vm15, %v12743_v24, %v12742_v60  ;;  %v2970_v55 = vsel %vm2964_vm15, %v12742_v60, %v12743_v24  ;;  %v12744_v38 = vld [vmem:[#allocation65_spill] sm:$0xff]  ;;  %v12748_v19 = vld [vmem:[#allocation111_spill] sm:$0xff]  ;;  %v12749_v49 = vld [vmem:[#allocation8_spill] sm:$0xff]  ;;  %12750 = vst [vmem:[#allocation61_spill] sm:$0xff] %v10465_v59  ;;  %v10484_v59 = vpop.permute.xlu0 %2981 }
 0x2df   : > { %12738 = vst [vmem:[#allocation58_spill] sm:$0xff] %v10427_v57  ;;  %12741 = vst [vmem:[#allocation73_spill] sm:$0xff] %v10438_v58  ;;  %v10453_v29 = vmul.f32 %v12744_v38, %v2586_v54  ;;  %v10456_v45 = vmul.f32 %v12744_v38, %v2582_v15  ;;  %v12746_v44 = vld [vmem:[#allocation17_spill] sm:$0xff]  ;;  %v2968_v57 = vsel %vm2964_vm15, %v12749_v49, %v12748_v19  ;;  %v6497_v8 = vld [vmem:[%s12023_s7 + $0x30] sm:$0xff]  ;;  %5227 = vrot.lane.b32.xlu1 %v9941_v10, %s6772_s21 }
 0x2e0   : > { %v10459_v58 = vmul.f32 %v12746_v44, %v2736_v17  ;;  %v10471_v54 = vmul.f32 %v12746_v44, %v2732_v47  ;;  %v12752_v60 = vld [vmem:[#allocation71_spill] sm:$0xff]  ;;  %v2972_v17 = vsel %vm2964_vm15, %v12748_v19, %v12749_v49  ;;  %v12754_v24 = vld [vmem:[#allocation2_spill] sm:$0xff]  ;;  %v12758_v19 = vld [vmem:[#allocation105_spill] sm:$0xff]  ;;  %5324 = vperm.xlu0 %6668, %v6497_v8  }
 0x2e1   : > { %12745 = vst [vmem:[#allocation54_spill] sm:$0xff] %v10456_v45  ;;  %v10474_v15 = vmul.f32 %v12752_v60, %v2738_v11  ;;  %v3118_v38 = vsel %vm3116_vm12, %v12754_v24, %v9962_v5  ;;  %v12755_v47 = vld [vmem:[#allocation27_spill] sm:$0xff]  ;;  %v2607_v49 = vsel %vm2578_vm3, %v10218_v31, %v12758_v19  ;;  %v12761_v45 = vld [vmem:[#allocation102_spill] sm:$0xff] }
 0x2e2   : > { %12747 = vst [vmem:[#allocation103_spill] sm:$0xff] %v10459_v58  ;;  %12751 = vst [vmem:[#allocation13_spill] sm:$0xff] %v10471_v54  ;;  %v10487_v58 = vmul.f32 %v12752_v60, %v2734_v32  ;;  %v10490_v44 = vmul.f32 %v12755_v47, %v2966_v36  ;;  %v10493_v11 = vmul.f32 %v12755_v47, %v2970_v55  ;;  %v12762_v55 = vld [vmem:[#allocation88_spill] sm:$0xff] }
 0x2e3   : > { %12753 = vst [vmem:[#allocation80_spill] sm:$0xff] %v10474_v15  ;;  %v12759_v15 = vld [vmem:[#allocation7_spill] sm:$0xff]  ;;  %v2458_v36 = vsel %vm2429_vm4, %v10070_v35, %v12761_v45  ;;  %v2603_v32 = vsel %vm2578_vm3, %v12758_v19, %v10218_v31  ;;  %v2609_v60 = vsel %vm2578_vm3, %v10287_v22, %v12762_v55  ;;  %v2605_v31 = vsel %vm2578_vm3, %v12762_v55, %v10287_v22  ;;  %v10545_v19 = vpop.permute.xlu0 %2985  ;;  %v12769_v22 = vld [vmem:[#allocation4_spill] sm:$0xff] }
 0x2e4   : > { %12756 = vst [vmem:[#allocation25_spill] sm:$0xff] %v10490_v44  ;;  %12757 = vst [vmem:[#allocation95_spill] sm:$0xff] %v10493_v11  ;;  %v10502_v54 = vmul.f32 %v12759_v15, %v2968_v57  ;;  %v10517_v47 = vmul.f32 %v12759_v15, %v2972_v17  ;;  %v3122_v57 = vsel %vm3116_vm12, %v9962_v5, %v12754_v24  ;;  %v10526_v11 = vpop.permute.xlu1 %3127  ;;  %v12767_v15 = vld [vmem:[#allocation104_spill] sm:$0xff]  ;;  %v12768_v24 = vld [vmem:[#allocation45_spill] sm:$0xff]  ;;  %5231 = vrot.lane.b32.xlu1 %v9956_v20, %s6772_s21 }
 0x2e5   : > { %12766 = vst [vmem:[#allocation107_spill] sm:$0xff] %v10526_v11  ;;  %v2454_v8 = vsel %vm2429_vm4, %v12761_v45, %v10070_v35  ;;  %v2456_v5 = vsel %vm2429_vm4, %v12767_v15, %v10142_v3  ;;  %v2460_v17 = vsel %vm2429_vm4, %v10142_v3, %v12767_v15  ;;  %v2518_v55 = vmul.f32 %v12769_v22, %v2458_v36  ;;  %v12770_v45 = vld [vmem:[#allocation51_spill] sm:$0xff]  ;;  %v12772_v15 = vld [vmem:[#allocation110_spill] sm:$0xff]  ;;  %v12776_v20 = vld [vmem:[#allocation52_spill] sm:$0xff] }
 0x2e6   : > { %12760 = vst [vmem:[#allocation106_spill] sm:$0xff] %v10502_v54  ;;  %12763 = vst [vmem:[#allocation62_spill] sm:$0xff] %v10517_v47  ;;  %v12764_v54 = vld [vmem:[#allocation33_spill] sm:$0xff]  ;;  %v2670_v35 = vmul.f32 %v12768_v24, %v2603_v32  ;;  %v12771_v47 = vld [vmem:[#allocation108_spill] sm:$0xff]  ;;  %v2674_v3 = vmul.f32 %v12770_v45, %v2605_v31  ;;  %v2757_v36 = vsel %vm2730_vm1, %v12772_v15, %v2752_v12  ;;  %5377 = vrot.lane.b32.xlu0 %v9716_v13, %s6773_s15 }
 0x2e7   : > { %v10524_v10 = vmul.f32 %v12764_v54, %v3118_v38  ;;  %v2669_v38 = vmul.f32 %v12768_v24, %v2607_v49  ;;  %v2759_v11 = vsel %vm2730_vm1, %v10355_v16, %v12771_v47  ;;  %v2755_v49 = vsel %vm2730_vm1, %v12771_v47, %v10355_v16  ;;  %v12775_v16 = vld [vmem:[#allocation35_spill] sm:$0xff] }
 0x2e8   : > { %v2761_v32 = vsel %vm2730_vm1, %v2752_v12, %v12772_v15  ;;  %v10572_v31 = vpop.permute.xlu1 %3131  ;;  %v2519_v24 = vmul.f32 %v12769_v22, %v2454_v8  ;;  %v2522_v47 = vmul.f32 %v12775_v16, %v2460_v17  ;;  %v3120_v12 = vsel %vm3116_vm12, %v12776_v20, %v9977_v52  ;;  %v12778_v8 = vld [vmem:[#allocation36_spill] sm:$0xff]  ;;  %5235 = vrot.lane.b32.xlu1 %v9975_v18, %s6772_s21  ;;  %v12779_v22 = vld [vmem:[#allocation67_spill] sm:$0xff] }
 0x2e9   : > { %12765 = vst [vmem:[#allocation24_spill] sm:$0xff] %v10524_v10  ;;  %v2673_v10 = vmul.f32 %v12770_v45, %v2609_v60  ;;  %v10570_v60 = vmul.f32 %v12764_v54, %v3122_v57  ;;  %12774 = vst [vmem:[#allocation30_spill] sm:$0xff] %v10572_v31  ;;  %v2523_v45 = vmul.f32 %v12775_v16, %v2456_v5  ;;  %v12777_v57 = vld [vmem:[#allocation11_spill] sm:$0xff]  ;;  %v3134_v31 = vpop.permute.xlu0 %3133 }
 0x2ea   : > { %v3124_v15 = vsel %vm3116_vm12, %v9977_v52, %v12776_v20  ;;  %v2677_v54 = vadd.f32 %v2669_v38, %v10170_v40  ;;  %v2821_v13 = vmul.f32 %v12777_v57, %v2759_v11  ;;  %v3270_v5 = vsel %vm3268_vm13, %v12778_v8, %v9991_v6  ;;  %5381 = vrot.lane.b32.xlu0 %v9737_v43, %s6773_s15  ;;  %v12780_v38 = vld [vmem:[#allocation93_spill] sm:$0xff] }
 0x2eb   : > { %12773 = vst [vmem:[#allocation109_spill] sm:$0xff] %v10570_v60  ;;  %v2822_v17 = vmul.f32 %v12777_v57, %v2755_v49  ;;  %v2825_v16 = vmul.f32 %v12779_v22, %v2761_v32  ;;  %v2826_v60 = vmul.f32 %v12779_v22, %v2757_v36  ;;  %v2526_v20 = vadd.f32 %v2518_v55, %v10149_v30 }
 0x2ec   : > { %v2678_v52 = vadd.f32 %v2670_v35, %v10186_v2  ;;  %v2681_v40 = vadd.f32 %v2673_v10, %v10203_v23  ;;  %v2682_v11 = vadd.f32 %v2674_v3, %v10221_v25  ;;  %v10603_v44 = vmul.f32 %v12780_v38, %v3120_v12  ;;  %v10605_v18 = vpop.permute.xlu1 %3279  ;;  %v12781_v35 = vld [vmem:[#allocation16_spill] sm:$0xff]  ;;  %5239 = vrot.lane.b32.xlu1 %v9988_v21, %s6772_s21 }
 0x2ed   : > { %v2527_v49 = vadd.f32 %v2519_v24, %v10152_v27  ;;  %v2530_v36 = vadd.f32 %v2522_v47, %v10155_v50  ;;  %v2531_v30 = vadd.f32 %v2523_v45, %v10167_v42  ;;  %v10611_v2 = vmul.f32 %v12780_v38, %v3124_v15  ;;  %v3138_v55 = vpop.permute.xlu0 %3137 }
 0x2ee   : > { %v3274_v10 = vsel %vm3268_vm13, %v9991_v6, %v12778_v8  ;;  %v2698_v23 = vmul.f32 %v10262_v61, %v2677_v54  ;;  %v2829_v25 = vadd.f32 %v2821_v13, %v10224_v14  ;;  %v10620_v3 = vmul.f32 %v12781_v35, %v3270_v5  ;;  %5385 = vrot.lane.b32.xlu0 %v9765_v51, %s6773_s15 }
 0x2ef   : > { %v2830_v50 = vadd.f32 %v2822_v17, %v10235_v34  ;;  %v2833_v27 = vadd.f32 %v2825_v16, %v10238_v63  ;;  %v2834_v42 = vadd.f32 %v2826_v60, %v10241_v37  ;;  %v2546_v32 = vmul.f32 %v10210_v7, %v2526_v20  ;;  %v12782_v16 = vld [vmem:[#allocation83_spill] sm:$0xff] }
 0x2f0   : > { %v2699_v6 = vmul.f32 %v10265_v26, %v2678_v52  ;;  %v2702_v24 = vmul.f32 %v10262_v61, %v2681_v40  ;;  %v2703_v13 = vmul.f32 %v10265_v26, %v2682_v11  ;;  %v10633_v14 = vpop.permute.xlu1 %3283  ;;  %v2547_v47 = vmul.f32 %v10213_v56, %v2527_v49  ;;  %5252 = vrot.lane.b32.xlu1 %v10002_v46, %s6772_s21  ;;  %v12783_v11 = vld [vmem:[#allocation85_spill] sm:$0xff] }
 0x2f1   : > { %v2550_v34 = vmul.f32 %v10210_v7, %v2530_v36  ;;  %v2551_v63 = vmul.f32 %v10213_v56, %v2531_v30  ;;  %v2989_v37 = vsel %vm2964_vm15, %v9951_v41, %v10484_v59  ;;  %v2706_v60 = vadd.f32 %v2698_v23, %v2546_v32  ;;  %v10651_v54 = vpop.permute.xlu0 %3285 }
 0x2f2   : > { %v2850_v45 = vmul.f32 %v10315_v4, %v2829_v25  ;;  %v2993_v12 = vsel %vm2964_vm15, %v10484_v59, %v9951_v41  ;;  %v2991_v15 = vsel %vm2964_vm15, %v9966_v28, %v10545_v19  ;;  %v2851_v57 = vmul.f32 %v10318_v53, %v2830_v50  ;;  %5389 = vrot.lane.b32.xlu0 %v9780_v0, %s6773_s15  ;;  %v12785_v25 = vld [vmem:[#allocation113_spill] sm:$0xff] }
 0x2f3   : > { %v2854_v8 = vmul.f32 %v10315_v4, %v2833_v27  ;;  %v2855_v5 = vmul.f32 %v10318_v53, %v2834_v42  ;;  %v2995_v41 = vsel %vm2964_vm15, %v10545_v19, %v9966_v28  ;;  %v2707_v59 = vadd.f32 %v2699_v6, %v2547_v47  ;;  %v12784_v19 = vld [vmem:[#allocation37_spill] sm:$0xff] }
 0x2f4   : > { %v2710_v17 = vadd.f32 %v2702_v24, %v2550_v34  ;;  %v2711_v22 = vadd.f32 %v2703_v13, %v2551_v63  ;;  %v3055_v20 = vmul.f32 %v12782_v16, %v2989_v37  ;;  %v2449_v52 = vpop.permute.xlu1 %2448  ;;  %v3056_v40 = vmul.f32 %v12782_v16, %v2993_v12  ;;  %5256 = vrot.lane.b32.xlu1 %v10017_v33, %s6772_s21  ;;  %v12786_v24 = vld [vmem:[#allocation21_spill] sm:$0xff]  ;;  %v12787_v63 = vld [vmem:[#allocation46_spill] sm:$0xff]  ;;  %v12789_v12 = vld [vmem:[#allocation3_spill] sm:$0xff] }
 0x2f5   : > { %v3059_v38 = vmul.f32 %v12783_v11, %v2991_v15  ;;  %v3141_v49 = vsel %vm3116_vm12, %v9981_v62, %v3134_v31  ;;  %v3145_v28 = vsel %vm3116_vm12, %v3134_v31, %v9981_v62  ;;  %v3272_v36 = vsel %vm3268_vm13, %v12784_v19, %v10004_v48  ;;  %v10681_v27 = vpop.permute.xlu0 %3289  ;;  %v12798_v16 = vld [vmem:[#allocation12_spill] sm:$0xff] }
 0x2f6   : > { %v2858_v30 = vadd.f32 %v2850_v45, %v2706_v60  ;;  %v3060_v23 = vmul.f32 %v12783_v11, %v2995_v41  ;;  %v3143_v50 = vsel %vm3116_vm12, %v12785_v25, %v3138_v55  ;;  %v3276_v42 = vsel %vm3268_vm13, %v10004_v48, %v12784_v19  ;;  %5402 = vrot.lane.b32.xlu0 %v12787_v63, %s6773_s15  ;;  %v12788_v60 = vld [vmem:[#allocation49_spill] sm:$0xff]  ;;  %v12801_v19 = vld [vmem:[#allocation116_spill] sm:$0xff] }
 0x2f7   : > { %v2859_v62 = vadd.f32 %v2851_v57, %v2707_v59  ;;  %v2862_v31 = vadd.f32 %v2854_v8, %v2710_v17  ;;  %v2863_v32 = vadd.f32 %v2855_v5, %v2711_v22  ;;  %v3063_v6 = vadd.f32 %v3055_v20, %v10253_v9  ;;  %v12790_v9 = vld [vmem:[#allocation90_spill] sm:$0xff]  ;;  %v12795_v17 = vld [vmem:[#allocation44_spill] sm:$0xff] }
 0x2f8   : > { %v3207_v13 = vmul.f32 %v12786_v24, %v3141_v49  ;;  %v3208_v47 = vmul.f32 %v12786_v24, %v3145_v28  ;;  %v3147_v34 = vsel %vm3116_vm12, %v3138_v55, %v12785_v25  ;;  %v10698_v48 = vmul.f32 %v12781_v35, %v3274_v10  ;;  %v2453_v37 = vpop.permute.xlu1 %2452  ;;  %v12791_v8 = vld [vmem:[#allocation14_spill] sm:$0xff]  ;;  %v12797_v35 = vld [vmem:[#allocation81_spill] sm:$0xff] }
 0x2f9   : > { %v3064_v45 = vadd.f32 %v3056_v40, %v12788_v60  ;;  %v3067_v15 = vadd.f32 %v3059_v38, %v12789_v12  ;;  %v3211_v57 = vmul.f32 %v12790_v9, %v3143_v50  ;;  %v10704_v5 = vmul.f32 %v12791_v8, %v3272_v36  ;;  %v12794_v55 = vld [vmem:[#allocation26_spill] sm:$0xff]  ;;  %v10713_v10 = vpop.permute.xlu0 %5076  ;;  %5260 = vrot.lane.b32.xlu1 %v12797_v35, %s6772_s21  ;;  %v12800_v38 = vld [vmem:[#allocation9_spill] sm:$0xff] }
 0x2fa   : > { %v10707_v41 = vmul.f32 %v12791_v8, %v3276_v42  ;;  %v10710_v59 = vadd.f32 %v12794_v55, %v2858_v30  ;;  %v3068_v22 = vadd.f32 %v3060_v23, %v12795_v17  ;;  %12796 = vst [vmem:[#allocation111_spill] sm:$0xff] %v10713_v10  ;;  %v10718_v20 = vadd.f32 %v12798_v16, %v2859_v62  ;;  %v12799_v40 = vld [vmem:[#allocation78_spill] sm:$0xff]  ;;  %v12802_v23 = vld [vmem:[#allocation56_spill] sm:$0xff]  ;;  %v12804_v62 = vld [vmem:[#allocation101_spill] sm:$0xff] }
 0x2fb   : > { %12792 = vst [vmem:[#allocation65_spill] sm:$0xff] %v10704_v5  ;;  %v10721_v11 = vadd.f32 %v12799_v40, %v2862_v31  ;;  %v10724_v49 = vadd.f32 %v12800_v38, %v2863_v32  ;;  %v3212_v28 = vmul.f32 %v12790_v9, %v3147_v34  ;;  %v2459_v36 = vsel %vm2429_vm4, %v2449_v52, %v12801_v19  ;;  %v12803_v50 = vld [vmem:[#allocation34_spill] sm:$0xff]  ;;  %v12807_v9 = vld [vmem:[#allocation59_spill] sm:$0xff]  ;;  %v12811_v40 = vld [vmem:[#allocation41_spill] sm:$0xff] }
 0x2fc   : > { %12793 = vst [vmem:[#allocation17_spill] sm:$0xff] %v10707_v41  ;;  %v10731_v30 = vmul.f32 %v10368_v39, %v3063_v6  ;;  %v3215_v25 = vadd.f32 %v3207_v13, %v12802_v23  ;;  %v3216_v42 = vadd.f32 %v3208_v47, %v12803_v50  ;;  %5406 = vrot.lane.b32.xlu0 %v12804_v62, %s6773_s15  ;;  %v2598_v32 = vpop.permute.xlu1 %2597  ;;  %v12805_v24 = vld [vmem:[#allocation94_spill] sm:$0xff]  ;;  %v12806_v6 = vld [vmem:[#allocation63_spill] sm:$0xff]  ;;  %v12812_v38 = vld [vmem:[#allocation57_spill] sm:$0xff] }
 0x2fd   : > { %v2455_v31 = vsel %vm2429_vm4, %v12801_v19, %v2449_v52  ;;  %v10741_v34 = vmul.f32 %v12805_v24, %v3064_v45  ;;  %v10744_v60 = vmul.f32 %v10368_v39, %v3067_v15  ;;  %v3219_v12 = vadd.f32 %v3211_v57, %v12806_v6  ;;  %v12808_v52 = vld [vmem:[#allocation114_spill] sm:$0xff]  ;;  %v12809_v15 = vld [vmem:[#allocation48_spill] sm:$0xff]  ;;  %5264 = vrot.lane.b32.xlu1 %v12811_v40, %s6772_s21  ;;  %v10766_v23 = vpop.permute.xlu0 %5080  ;;  %v6492_v50 = vld [vmem:[%s12022_s6 + $0x28] sm:$0xff]  ;;  %s6776_s21 = smov 80  }
 0x2fe   : > { %v2604_v13 = vsel %vm2578_vm3, %v12807_v9, %v2598_v32  ;;  %v2608_v47 = vsel %vm2578_vm3, %v2598_v32, %v12807_v9  ;;  %v10754_v8 = vmul.f32 %v12805_v24, %v3068_v22  ;;  %v3293_v45 = vsel %vm3268_vm13, %v12808_v52, %v10651_v54  ;;  %v12810_v17 = vld [vmem:[#allocation66_spill] sm:$0xff]  ;;  %12813 = vst [vmem:[#allocation8_spill] sm:$0xff] %v10766_v23  ;;  %v12814_v32 = vld [vmem:[#allocation100_spill] sm:$0xff]  ;;  %v12821_v62 = vld [vmem:[#allocation19_spill] sm:$0xff] }
 0x2ff   : > { %v2520_v55 = vmul.f32 %v12809_v15, %v2459_v36  ;;  %v2671_v57 = vmul.f32 %v12810_v17, %v2608_v47  ;;  %v2672_v16 = vmul.f32 %v12810_v17, %v2604_v13  ;;  %v3220_v19 = vadd.f32 %v3212_v28, %v12812_v38  ;;  %v12815_v36 = vld [vmem:[#allocation96_spill] sm:$0xff]  ;;  %v12816_v28 = vld [vmem:[#allocation5_spill] sm:$0xff]  ;;  %v12817_v47 = vld [vmem:[#allocation70_spill] sm:$0xff] }
 0x300   : > { %v2521_v22 = vmul.f32 %v12809_v15, %v2455_v31  ;;  %v10773_v6 = vmul.f32 %v12814_v32, %v3215_v25  ;;  %v10776_v9 = vmul.f32 %v12815_v36, %v3216_v42  ;;  %v3297_v13 = vsel %vm3268_vm13, %v10651_v54, %v12808_v52  ;;  %5410 = vrot.lane.b32.xlu0 %v12816_v28, %s6773_s15  ;;  %v12818_v15 = vld [vmem:[#allocation58_spill] sm:$0xff]  ;;  %v2602_v38 = vpop.permute.xlu1 %2601  ;;  %v12819_v42 = vld [vmem:[#allocation60_spill] sm:$0xff]  ;;  %v12820_v54 = vld [vmem:[#allocation73_spill] sm:$0xff] }
 0x301   : > { %v2461_v31 = vsel %vm2429_vm4, %v2453_v37, %v12817_v47  ;;  %v2679_v17 = vadd.f32 %v2671_v57, %v12818_v15  ;;  %v10789_v25 = vmul.f32 %v12814_v32, %v3219_v12  ;;  %v3359_v23 = vmul.f32 %v12819_v42, %v3293_v45  ;;  %v12822_v15 = vld [vmem:[#allocation98_spill] sm:$0xff]  ;;  %v12823_v12 = vld [vmem:[#allocation15_spill] sm:$0xff]  ;;  %5286 = vperm.xlu1 %6669, %v6492_v50  }
 0x302   : > { %v2457_v10 = vsel %vm2429_vm4, %v12817_v47, %v2453_v37  ;;  %v2680_v52 = vadd.f32 %v2672_v16, %v12820_v54  ;;  %v2606_v28 = vsel %vm2578_vm3, %v12821_v62, %v2602_v38  ;;  %v2610_v57 = vsel %vm2578_vm3, %v2602_v38, %v12821_v62  ;;  %v12824_v47 = vld [vmem:[#allocation6_spill] sm:$0xff]  ;;  %v12825_v54 = vld [vmem:[#allocation55_spill] sm:$0xff]  ;;  %v6494_v62 = vld [vmem:[%s12022_s6 + $0x38] sm:$0xff] }
 0x303   : > { %v2528_v63 = vadd.f32 %v2520_v55, %v12822_v15  ;;  %v2675_v0 = vmul.f32 %v12823_v12, %v2610_v57  ;;  %v10805_v45 = vmul.f32 %v12815_v36, %v3220_v19  ;;  %v3360_v37 = vmul.f32 %v12819_v42, %v3297_v13  ;;  %v12826_v55 = vld [vmem:[#allocation117_spill] sm:$0xff]  ;;  %v12827_v19 = vld [vmem:[#allocation92_spill] sm:$0xff]  ;;  %v10829_v57 = vpop.permute.xlu0 %5084  ;;  %v6500_v15 = vld [vmem:[%s12022_s6 + $0x40] sm:$0xff] }
 0x304   : > { %v2529_v16 = vadd.f32 %v2521_v22, %v12824_v47  ;;  %v2524_v51 = vmul.f32 %v12825_v54, %v2461_v31  ;;  %v2676_v40 = vmul.f32 %v12823_v12, %v2606_v28  ;;  %v3295_v50 = vsel %vm3268_vm13, %v12826_v55, %v10681_v27  ;;  %5414 = vrot.lane.b32.xlu0 %v12827_v19, %s6773_s15  ;;  %v2750_v38 = vpop.permute.xlu1 %2749  ;;  %v12828_v31 = vld [vmem:[#allocation79_spill] sm:$0xff]  ;;  %v12834_v35 = vld [vmem:[#allocation54_spill] sm:$0xff] }
 0x305   : > { %v2525_v13 = vmul.f32 %v12825_v54, %v2457_v10  ;;  %v2700_v22 = vmul.f32 %v10262_v61, %v2679_v17  ;;  %v10823_v42 = vadd.f32 %v3359_v23, %v12828_v31  ;;  %v3299_v28 = vsel %vm3268_vm13, %v10681_v27, %v12826_v55  ;;  %12829 = vst [vmem:[#allocation71_spill] sm:$0xff] %v10829_v57  ;;  %v12830_v17 = vld [vmem:[#allocation20_spill] sm:$0xff]  ;;  %v12831_v54 = vld [vmem:[#allocation74_spill] sm:$0xff]  ;;  %v12832_v57 = vld [vmem:[#allocation39_spill] sm:$0xff] }
 0x306   : > { %v2701_v12 = vmul.f32 %v10265_v26, %v2680_v52  ;;  %v2683_v10 = vadd.f32 %v2675_v0, %v10453_v29  ;;  %v2756_v23 = vsel %vm2730_vm1, %v12830_v17, %v2750_v38  ;;  %v2760_v47 = vsel %vm2730_vm1, %v2750_v38, %v12830_v17  ;;  %5296 = vperm.xlu1 %6669, %v6494_v62   ;;  %v6684_v0 = vld [vmem:[%s12017_s1 + $0x40] sm:$0xff]   ;;  %v12833_v52 = vld [vmem:[#allocation29_spill] sm:$0xff] }
 0x307   : > { %v2548_v27 = vmul.f32 %v10210_v7, %v2528_v63  ;;  %v2823_v55 = vmul.f32 %v12831_v54, %v2760_v47  ;;  %v2824_v31 = vmul.f32 %v12831_v54, %v2756_v23  ;;  %v3363_v19 = vmul.f32 %v12832_v57, %v3295_v50  ;;  %v6496_v63 = vld [vmem:[%s12023_s7 + $0x28] sm:$0xff]  ;;  %v12835_v62 = vld [vmem:[#allocation42_spill] sm:$0xff]  ;;  %v12837_v54 = vld [vmem:[#allocation13_spill] sm:$0xff]  ;;  %6308 = vmatmul.mubr.msk.bf16.gmra.mrb[12].mxu1 %vm495_vm0, %v6684_v0 }
 0x308   : > { %v2549_v29 = vmul.f32 %v10213_v56, %v2529_v16  ;;  %v2532_v43 = vadd.f32 %v2524_v51, %v12833_v52  ;;  %v2684_v33 = vadd.f32 %v2676_v40, %v12834_v35  ;;  %v3364_v38 = vmul.f32 %v12832_v57, %v3299_v28  ;;  %5433 = vperm.xlu0 %6668, %v6500_v15   ;;  %v12836_v23 = vld [vmem:[#allocation103_spill] sm:$0xff]  ;;  %v2754_v5 = vpop.permute.xlu1 %2753  ;;  %v6502_v51 = vld [vmem:[%s12022_s6 + $0x50] sm:$0xff]  ;;  %v12838_v16 = vld [vmem:[#allocation77_spill] sm:$0xff] }
 0x309   : > { %v2533_v17 = vadd.f32 %v2525_v13, %v12835_v62  ;;  %v2708_v50 = vadd.f32 %v2700_v22, %v2548_v27  ;;  %v2831_v47 = vadd.f32 %v2823_v55, %v12836_v23  ;;  %v2832_v41 = vadd.f32 %v2824_v31, %v12837_v54  ;;  %v12840_v27 = vld [vmem:[#allocation76_spill] sm:$0xff]  ;;  %v12841_v0 = vld [vmem:[#allocation18_spill] sm:$0xff]  ;;  %v12842_v52 = vld [vmem:[#allocation99_spill] sm:$0xff] }
 0x30a   : > { %v2709_v35 = vadd.f32 %v2701_v12, %v2549_v29  ;;  %v2704_v40 = vmul.f32 %v10262_v61, %v2683_v10  ;;  %v2758_v28 = vsel %vm2730_vm1, %v12838_v16, %v2754_v5  ;;  %v2762_v13 = vsel %vm2730_vm1, %v2754_v5, %v12838_v16  ;;  %5319 = vperm.xlu1 %6669, %v6496_v63   ;;  %v10875_v61 = vpop.permute.xlu0 %5088  ;;  %v6498_v5 = vld [vmem:[%s12023_s7 + $0x38] sm:$0xff]  ;;  %v12843_v63 = vld [vmem:[#allocation80_spill] sm:$0xff]  ;;  %v12846_v16 = vld [vmem:[#allocation82_spill] sm:$0xff] }
 0x30b   : > { %v12839_v22 = vmov 0   ;;  %v2852_v57 = vmul.f32 %v10315_v4, %v2831_v47  ;;  %v2853_v15 = vmul.f32 %v10318_v53, %v2832_v41  ;;  %v2827_v55 = vmul.f32 %v12840_v27, %v2762_v13  ;;  %v12848_v13 = vld [vmem:[#allocation28_spill] sm:$0xff] }
 0x30c   : > { %648 = vmatprep.mubr.bf16.mxu1 %v12839_v22  ;;  %v2828_v12 = vmul.f32 %v12840_v27, %v2758_v28  ;;  %v2552_v10 = vmul.f32 %v10210_v7, %v2532_v43  ;;  %v2705_v31 = vmul.f32 %v10265_v26, %v2684_v33  ;;  %v10883_v29 = vadd.f32 %v3360_v37, %v12841_v0  ;;  %v2984_v43 = vpop.permute.xlu1 %2983  ;;  %v6504_v33 = vld [vmem:[%s12023_s7 + $0x40] sm:$0xff]  ;;  %v12844_v26 = vld [vmem:[#allocation87_spill] sm:$0xff] }
 0x30d   : > { %v10886_v41 = vadd.f32 %v3363_v19, %v12842_v52  ;;  %5443 = vperm.xlu0 %6668, %v6502_v51   ;;  %v2860_v62 = vadd.f32 %v2852_v57, %v2708_v50  ;;  %v2861_v23 = vadd.f32 %v2853_v15, %v2709_v35  ;;  %v2835_v47 = vadd.f32 %v2827_v55, %v12843_v63  ;;  %v12845_v50 = vld [vmem:[#allocation86_spill] sm:$0xff]  ;;  %v12849_v15 = vld [vmem:[#allocation89_spill] sm:$0xff] }
 0x30e   : > { %v2836_v54 = vadd.f32 %v2828_v12, %v10487_v58  ;;  %v2553_v7 = vmul.f32 %v10213_v56, %v2533_v17  ;;  %v2990_v37 = vsel %vm2964_vm15, %v12844_v26, %v2984_v43  ;;  %v2994_v19 = vsel %vm2964_vm15, %v2984_v43, %v12844_v26  ;;  %5329 = vperm.xlu1 %6669, %v6498_v5   ;;  %v12847_v56 = vld [vmem:[#allocation64_spill] sm:$0xff]  ;;  %v10913_v5 = vpop.permute.xlu0 %5101 }
 0x30f   : > { %v10901_v51 = vadd.f32 %v3364_v38, %v12845_v50  ;;  %v2712_v35 = vadd.f32 %v2704_v40, %v2552_v10  ;;  %v2856_v58 = vmul.f32 %v10315_v4, %v2835_v47  ;;  %v2940_v28 = vadd.f32 %v12846_v16, %v10710_v59  ;;  %v12850_v40 = vld [vmem:[#allocation69_spill] sm:$0xff]  ;;  %v6506_v59 = vld [vmem:[%s12023_s7 + $0x50] sm:$0xff]  ;;  %v12857_v50 = vld [vmem:[#allocation91_spill] sm:$0xff] }
 0x310   : > { %v2941_v17 = vadd.f32 %v12847_v56, %v10718_v20  ;;  %v2901_v22 = vadd.f32 %v12848_v13, %v2860_v62  ;;  %v2857_v57 = vmul.f32 %v10318_v53, %v2836_v54  ;;  %v3057_v27 = vmul.f32 %v12849_v15, %v2990_v37  ;;  %v2988_v10 = vpop.permute.xlu1 %2987  ;;  %v12851_v20 = vld [vmem:[#allocation75_spill] sm:$0xff]  ;;  %v12852_v53 = vld [vmem:[#allocation25_spill] sm:$0xff]  ;;  %v12859_v56 = vld [vmem:[#allocation68_spill] sm:$0xff] }
 0x311   : > { %v3058_v55 = vmul.f32 %v12849_v15, %v2994_v19  ;;  %5466 = vperm.xlu0 %6668, %v6504_v33   ;;  %v2713_v38 = vadd.f32 %v2705_v31, %v2553_v7  ;;  %v2902_v12 = vadd.f32 %v12850_v40, %v2861_v23  ;;  %v2864_v4 = vadd.f32 %v2856_v58, %v2712_v35  ;;  %v12853_v62 = vld [vmem:[#allocation61_spill] sm:$0xff]  ;;  %v12854_v23 = vld [vmem:[#allocation118_spill] sm:$0xff]  ;;  %v12855_v54 = vld [vmem:[#allocation95_spill] sm:$0xff] }
 0x312   : > { %v2944_v0 = vadd.f32 %v12851_v20, %v10721_v11  ;;  %v3065_v52 = vadd.f32 %v3057_v27, %v12852_v53  ;;  %v2992_v63 = vsel %vm2964_vm15, %v12853_v62, %v2988_v10  ;;  %v2996_v31 = vsel %vm2964_vm15, %v2988_v10, %v12853_v62  ;;  %v12856_v33 = vld [vmem:[#allocation38_spill] sm:$0xff]  ;;  %v6685_v11 = vld [vmem:[%s12017_s1 + $0x48] sm:$0xff]   ;;  %v12863_v40 = vld [vmem:[#allocation121_spill] sm:$0xff]  ;;  %v10972_v53 = vpop.permute.xlu0 %5105 }
 0x313   : > { %v2945_v47 = vadd.f32 %v12854_v23, %v10724_v49  ;;  %v3066_v43 = vadd.f32 %v3058_v55, %v12855_v54  ;;  %5379 = vrot.lane.b32.xlu1 %v12856_v33, %s6773_s15  ;;  %v3092_v7 = vadd.f32 %v10731_v30, %v2940_v28  ;;  %v3093_v26 = vadd.f32 %v10741_v34, %v2941_v17  ;;  %v12858_v49 = vld [vmem:[#allocation72_spill] sm:$0xff]  ;;  %v6509_v34 = vld [vmem:[%s12022_s6 + $0x60] sm:$0xff] }
 0x314   : > { %v3096_v37 = vadd.f32 %v10744_v60, %v2944_v0  ;;  %v10938_v19 = vadd.f32 %v2857_v57, %v2713_v38  ;;  %v3061_v35 = vmul.f32 %v12857_v50, %v2992_v63  ;;  %v2942_v58 = vadd.f32 %v12858_v49, %v2901_v22  ;;  %v3136_v28 = vpop.permute.xlu1 %3135  ;;  %6309 = vmatmul.mubr.msk.bf16.gmra.mrb[16].mxu1 %vm495_vm0, %v6685_v11  ;;  %v6426_v60 = vld [vmem:[%s12024_s8 + $0xc] sm:$0x3]  ;;  %v12860_v17 = vld [vmem:[#allocation84_spill] sm:$0xff]  ;;  %v12866_v62 = vld [vmem:[#allocation106_spill] sm:$0xff] }
 0x315   : > { %5476 = vperm.xlu0 %6668, %v6506_v59   ;;  %v3097_v16 = vadd.f32 %v10754_v8, %v2945_v47  ;;  %v2905_v13 = vadd.f32 %v12859_v56, %v2864_v4  ;;  %v3086_v15 = vmul.f32 %v10368_v39, %v3065_v52  ;;  %v3062_v30 = vmul.f32 %v12857_v50, %v2996_v31  ;;  %v12861_v8 = vld [vmem:[#allocation107_spill] sm:$0xff]  ;;  %v12862_v55 = vld [vmem:[#allocation120_spill] sm:$0xff]  ;;  %v12864_v59 = vld [vmem:[#allocation50_spill] sm:$0xff] }
 0x316   : > { %v2943_v22 = vadd.f32 %v12860_v17, %v2902_v12  ;;  %v3142_v57 = vsel %vm3116_vm12, %v12861_v8, %v3136_v28  ;;  %v3146_v27 = vsel %vm3116_vm12, %v3136_v28, %v12861_v8  ;;  %v10961_v38 = vrot.slane %v6426_v60, %v12862_v55  ;;  %v12865_v0 = vld [vmem:[#allocation112_spill] sm:$0xff]  ;;  %v12867_v54 = vld [vmem:[#allocation62_spill] sm:$0xff]  ;;  %v12869_v49 = vld [vmem:[#allocation109_spill] sm:$0xff] }
 0x317   : > { %v10964_v4 = vrot.slane %v6426_v60, %v12863_v40  ;;  %v3087_v10 = vmul.f32 %v12805_v24, %v3066_v43  ;;  %v3209_v20 = vmul.f32 %v12864_v59, %v3142_v57  ;;  %v3210_v12 = vmul.f32 %v12864_v59, %v3146_v27  ;;  %5383 = vrot.lane.b32.xlu1 %v12865_v0, %s6773_s15  ;;  %v12868_v11 = vld [vmem:[#allocation24_spill] sm:$0xff]  ;;  %v12875_v8 = vld [vmem:[#allocation43_spill] sm:$0xff] }
 0x318   : > { %v3244_v52 = vadd.f32 %v10773_v6, %v3092_v7  ;;  %v3069_v63 = vadd.f32 %v3061_v35, %v12866_v62  ;;  %v3388_v31 = vmul.f32 %v10961_v38, %v10823_v42  ;;  %v3245_v23 = vadd.f32 %v10776_v9, %v3093_v26  ;;  %v3140_v28 = vpop.permute.xlu1 %3139  ;;  %v6511_v6 = vld [vmem:[%s12022_s6 + $0x70] sm:$0xff]  ;;  %v12870_v7 = vld [vmem:[#allocation22_spill] sm:$0xff] }
 0x319   : > { %5536 = vperm.xlu0 %6668, %v6509_v34   ;;  %v3389_v47 = vmul.f32 %v10964_v4, %v10883_v29  ;;  %v3070_v43 = vadd.f32 %v3062_v30, %v12867_v54  ;;  %v3217_v50 = vadd.f32 %v3209_v20, %v12868_v11  ;;  %v3218_v56 = vadd.f32 %v3210_v12, %v12869_v49  ;;  %v12871_v34 = vld [vmem:[#allocation30_spill] sm:$0xff] }
 0x31a   : > { %v2946_v35 = vadd.f32 %v12870_v7, %v2905_v13  ;;  %v3144_v9 = vsel %vm3116_vm12, %v12871_v34, %v3140_v28  ;;  %v3148_v42 = vsel %vm3116_vm12, %v3140_v28, %v12871_v34  ;;  %v10994_v29 = vadd.f32 %v3388_v31, %v3244_v52  ;;  %v12874_v13 = vld [vmem:[#allocation23_spill] sm:$0xff] }
 0x31b   : > { %v10996_v26 = vadd.f32 %v3389_v47, %v3245_v23  ;;  %v3238_v30 = vmul.f32 %v12814_v32, %v3217_v50  ;;  %v3213_v60 = vmul.f32 %v12874_v13, %v3144_v9  ;;  %v3214_v17 = vmul.f32 %v12874_v13, %v3148_v42  ;;  %5387 = vrot.lane.b32.xlu1 %v12875_v8, %s6773_s15  ;;  %v11016_v23 = vpop.permute.xlu0 %5109  ;;  %v12879_v50 = vld [vmem:[#allocation119_spill] sm:$0xff]  ;;  %v12882_v13 = vld [vmem:[#allocation65_spill] sm:$0xff] }
 0x31c   : > { %12872 = vst [vmem:[#allocation2_spill] sm:$0xff] %v10994_v29  ;;  %v3094_v57 = vadd.f32 %v3086_v15, %v2942_v58  ;;  %v3239_v27 = vmul.f32 %v12815_v36, %v3218_v56  ;;  %v3248_v20 = vadd.f32 %v10789_v25, %v3096_v37  ;;  %v3392_v12 = vmul.f32 %v10961_v38, %v10886_v41  ;;  %v3288_v31 = vpop.permute.xlu1 %3287  ;;  %v6513_v58 = vld [vmem:[%s12023_s7 + $0x60] sm:$0xff] }
 0x31d   : > { %12873 = vst [vmem:[#allocation27_spill] sm:$0xff] %v10996_v26  ;;  %5546 = vperm.xlu0 %6668, %v6511_v6   ;;  %v6560_v59 = vpack.c.bf16 %v10996_v26, %v10994_v29  ;;  %v3221_v52 = vadd.f32 %v3213_v60, %v10603_v44  ;;  %v3222_v62 = vadd.f32 %v3214_v17, %v10611_v2  ;;  %v12881_v6 = vld [vmem:[#allocation31_spill] sm:$0xff]  ;;  %v12883_v17 = vld [vmem:[#allocation17_spill] sm:$0xff]  ;;  %vm5092_vm0 = vcmp.lt.s32.totalorder %v10012_v1, 48 }
 0x31e   : > { %v3095_v15 = vadd.f32 %v3087_v10, %v2943_v22  ;;  %v3249_v47 = vadd.f32 %v10805_v45, %v3097_v16  ;;  %v3294_v25 = vsel %vm3268_vm13, %v10605_v18, %v3288_v31  ;;  %v3298_v44 = vsel %vm3268_vm13, %v3288_v31, %v10605_v18  ;;  %v12877_v10 = vld [vmem:[#allocation32_spill] sm:$0xff] }
 0x31f   : > { %6176 = vst [vmem:[%s11001_s14] sm:$0xff] %v6560_v59  ;;  %v11029_v2 = vadd.f32 %v3392_v12, %v3248_v20  ;;  %v3393_v41 = vmul.f32 %v10964_v4, %v10901_v51  ;;  %v3090_v37 = vmul.f32 %v10368_v39, %v3069_v63  ;;  %v3091_v22 = vmul.f32 %v12805_v24, %v3070_v43  ;;  %v6515_v43 = vld [vmem:[%s12023_s7 + $0x70] sm:$0xff] }
 0x320   : > { %v3361_v45 = vmul.f32 %v12877_v10, %v3294_v25  ;;  %v3362_v16 = vmul.f32 %v12877_v10, %v3298_v44  ;;  %5391 = vrot.lane.b32.xlu1 %v9988_v21, %s6773_s15  ;;  %v3246_v54 = vadd.f32 %v3238_v30, %v3094_v57  ;;  %v3247_v18 = vadd.f32 %v3239_v27, %v3095_v15  ;;  %v3292_v63 = vpop.permute.xlu1 %3291  ;;  %v12894_v10 = vld [vmem:[#allocation41_spill] sm:$0xff] }
 0x321   : > { %12876 = vst [vmem:[#allocation105_spill] sm:$0xff] %v11029_v2  ;;  %5577 = vperm.xlu0 %6668, %v6513_v58   ;;  %v11039_v11 = vadd.f32 %v3393_v41, %v3249_v47  ;;  %v2906_v49 = vadd.f32 %v12879_v50, %v10938_v19  ;;  %v3242_v51 = vmul.f32 %v12814_v32, %v3221_v52  ;;  %v12880_v19 = vld [vmem:[#allocation122_spill] sm:$0xff]  ;;  %v12887_v52 = vld [vmem:[#allocation115_spill] sm:$0xff] }
 0x322   : > { %v3369_v39 = vadd.f32 %v3361_v45, %v10620_v3  ;;  %v3370_v24 = vadd.f32 %v3362_v16, %v10698_v48  ;;  %v3243_v56 = vmul.f32 %v12815_v36, %v3222_v62  ;;  %v3296_v28 = vsel %vm3268_vm13, %v10633_v14, %v3292_v63  ;;  %v11063_v36 = vpop.permute.xlu0 %5113  ;;  %v12888_v47 = vld [vmem:[#allocation47_spill] sm:$0xff] }
 0x323   : > { %12878 = vst [vmem:[#allocation7_spill] sm:$0xff] %v11039_v11  ;;  %v3300_v32 = vsel %vm3268_vm13, %v3292_v63, %v10633_v14  ;;  %v6562_v3 = vpack.c.bf16 %v11039_v11, %v11029_v2  ;;  %v2947_v48 = vadd.f32 %v12880_v19, %v2906_v49  ;;  %v3365_v7 = vmul.f32 %v12881_v6, %v3296_v28  ;;  %v6503_v49 = vld [vmem:[%s12022_s6 + $0x58] sm:$0xff]  ;;  %v6505_v63 = vld [vmem:[%s12023_s7 + $0x48] sm:$0xff] }
 0x324   : > { %v3366_v34 = vmul.f32 %v12881_v6, %v3300_v32  ;;  %5404 = vrot.lane.b32.xlu1 %v10002_v46, %s6773_s15  ;;  %v3390_v9 = vmul.f32 %v10961_v38, %v3369_v39  ;;  %v3391_v42 = vmul.f32 %v10964_v4, %v3370_v24  ;;  %v3098_v14 = vadd.f32 %v3090_v37, %v2946_v35  ;;  %v11070_v27 = vpop.permute.xlu1 %5078  ;;  %v12892_v37 = vld [vmem:[#allocation81_spill] sm:$0xff]  ;;  %v6518_v2 = vld [vmem:[%s12022_s6 + $0x88] sm:$0xff] }
 0x325   : > { %5587 = vperm.xlu0 %6668, %v6515_v43   ;;  %6178 = vst [vmem:[%s11001_s14 + $0x10] sm:$0xff] %v6562_v3  ;;  %v3099_v30 = vadd.f32 %v3091_v22, %v2947_v48  ;;  %v3373_v60 = vadd.f32 %v3365_v7, %v12882_v13  ;;  %12884 = vst [vmem:[#allocation102_spill] sm:$0xff] %v11070_v27  ;;  %v12898_v43 = vld [vmem:[#allocation46_spill] sm:$0xff]  ;;  %v6507_v32 = vld [vmem:[%s12023_s7 + $0x58] sm:$0xff] }
 0x326   : > { %v3374_v57 = vadd.f32 %v3366_v34, %v12883_v17  ;;  %v11072_v59 = vadd.f32 %v3390_v9, %v3246_v54  ;;  %v11074_v20 = vadd.f32 %v3391_v42, %v3247_v18  ;;  %v3250_v12 = vadd.f32 %v3242_v51, %v3098_v14  ;;  %v11078_v62 = vpop.permute.xlu0 %5131  ;;  %v6501_v54 = vld [vmem:[%s12022_s6 + $0x48] sm:$0xff]  ;;  %v12895_v18 = vld [vmem:[#allocation40_spill] sm:$0xff]  ;;  %v12896_v51 = vld [vmem:[#allocation97_spill] sm:$0xff] }
 0x327   : > { %v3394_v31 = vmul.f32 %v10961_v38, %v3373_v60  ;;  %v3251_v58 = vadd.f32 %v3243_v56, %v3099_v30  ;;  %v12899_v3 = vld [vmem:[#allocation101_spill] sm:$0xff]  ;;  %v6510_v48 = vld [vmem:[%s12022_s6 + $0x68] sm:$0xff]  ;;  %v12902_v42 = vld [vmem:[#allocation92_spill] sm:$0xff] }
 0x328   : > { %12885 = vst [vmem:[#allocation88_spill] sm:$0xff] %v11072_v59  ;;  %12886 = vst [vmem:[#allocation33_spill] sm:$0xff] %v11074_v20  ;;  %5408 = vrot.lane.b32.xlu1 %v12887_v52, %s6773_s15  ;;  %v6561_v35 = vpack.c.bf16 %v11074_v20, %v11072_v59  ;;  %v3395_v15 = vmul.f32 %v10964_v4, %v3374_v57  ;;  %v11091_v41 = vpop.permute.xlu1 %5082  ;;  %v12893_v4 = vld [vmem:[#allocation10_spill] sm:$0xff]  ;;  %v12900_v6 = vld [vmem:[#allocation5_spill] sm:$0xff] }
 0x329   : > { %5611 = vrot.lane.b32.xlu0 %v12888_v47, %s6774_s22  ;;  %v11087_v25 = vadd.f32 %v3394_v31, %v3250_v12  ;;  %12891 = vst [vmem:[#allocation4_spill] sm:$0xff] %v11091_v41  ;;  %v6512_v9 = vld [vmem:[%s12022_s6 + $0x78] sm:$0xff]  ;;  %v6517_v14 = vld [vmem:[%s12022_s6 + $0x80] sm:$0xff]  ;;  %v6514_v60 = vld [vmem:[%s12023_s7 + $0x68] sm:$0xff] }
 0x32a   : > { %6177 = vst [vmem:[%s11001_s14 + $0x8] sm:$0xff] %v6561_v35  ;;  %v11089_v44 = vadd.f32 %v3395_v15, %v3251_v58  ;;  %v11095_v22 = vpop.permute.xlu0 %5141  ;;  %v6519_v17 = vld [vmem:[%s12022_s6 + $0x90] sm:$0xff]  ;;  %v6516_v12 = vld [vmem:[%s12023_s7 + $0x78] sm:$0xff]  ;;  %v6521_v35 = vld [vmem:[%s12023_s7 + $0x80] sm:$0xff] }
 0x32b   : > { %12889 = vst [vmem:[#allocation104_spill] sm:$0xff] %v11087_v25  ;;  %v6523_v15 = vld [vmem:[%s12023_s7 + $0x90] sm:$0xff]  ;;  %v6539_v59 = vld [vmem:[%s12023_s7 + $0xc0] sm:$0xff] }
 0x32c   : > { %12890 = vst [vmem:[#allocation45_spill] sm:$0xff] %v11089_v44  ;;  %5412 = vrot.lane.b32.xlu1 %v12892_v37, %s6773_s15  ;;  %v6563_v38 = vpack.c.bf16 %v11089_v44, %v11087_v25  ;;  %v11106_v16 = vpop.permute.xlu1 %5086  ;;  %v6537_v25 = vld [vmem:[%s12022_s6 + $0xd0] sm:$0xff] }
 0x32d   : > { %5615 = vrot.lane.b32.xlu0 %v12893_v4, %s6774_s22 }
 0x32e   : > { %6179 = vst [vmem:[%s11001_s14 + $0x18] sm:$0xff] %v6563_v38  ;;  %v11104_v45 = vpop.permute.xlu0 %5163 }
 0x330   : > { %5416 = vrot.lane.b32.xlu1 %v12894_v10, %s6773_s15  ;;  %v11120_v39 = vpop.permute.xlu1 %5090 }
 0x331   : > { %5619 = vrot.lane.b32.xlu0 %v12895_v18, %s6774_s22  ;;  %12897 = vst [vmem:[#allocation51_spill] sm:$0xff] %v11120_v39 }
 0x332   : > { %v11113_v50 = vpop.permute.xlu0 %5173 }
 0x334   : > { %5438 = vperm.xlu1 %6669, %v6501_v54   ;;  %v11131_v28 = vpop.permute.xlu1 %5103 }
 0x335   : > { %5623 = vrot.lane.b32.xlu0 %v12896_v51, %s6774_s22 }
 0x336   : > { %v11122_v24 = vpop.permute.xlu0 %5225 }
 0x338   : > { %5448 = vperm.xlu1 %6669, %v6503_v49   ;;  %v11145_v7 = vpop.permute.xlu1 %5107  ;;  %v6526_v49 = vld [vmem:[%s12022_s6 + $0xa0] sm:$0xff] }
 0x339   : > { %5636 = vrot.lane.b32.xlu0 %v12898_v43, %s6774_s22  ;;  %12901 = vst [vmem:[#allocation108_spill] sm:$0xff] %v11145_v7  ;;  %v12917_v7 = vld [vmem:[#allocation111_spill] sm:$0xff] }
 0x33a   : > { %v11129_v56 = vpop.permute.xlu0 %5229 }
 0x33c   : > { %5471 = vperm.xlu1 %6669, %v6505_v63   ;;  %v11159_v13 = vpop.permute.xlu1 %5111 }
 0x33d   : > { %5640 = vrot.lane.b32.xlu0 %v12899_v3, %s6774_s22 }
 0x33e   : > { %v11138_v19 = vpop.permute.xlu0 %5233 }
 0x340   : > { %5481 = vperm.xlu1 %6669, %v6507_v32   ;;  %v11175_v31 = vpop.permute.xlu1 %5115 }
 0x341   : > { %5644 = vrot.lane.b32.xlu0 %v12900_v6, %s6774_s22  ;;  %12903 = vst [vmem:[#allocation110_spill] sm:$0xff] %v11175_v31 }
 0x342   : > { %v11147_v34 = vpop.permute.xlu0 %5237 }
 0x344   : > { %5541 = vperm.xlu1 %6669, %v6510_v48   ;;  %v6528_v48 = vld [vmem:[%s12022_s6 + $0xb0] sm:$0xff] }
 0x345   : > { %5648 = vrot.lane.b32.xlu0 %v12902_v42, %s6774_s22 }
 0x346   : > { %v11157_v30 = vpop.permute.xlu0 %5250 }
 0x348   : > { %5551 = vperm.xlu1 %6669, %v6512_v9  }
 0x349   : > { %5667 = vperm.xlu0 %6668, %v6517_v14  }
 0x34a   : > { %v11167_v57 = vpop.permute.xlu0 %5254 }
 0x34c   : > { %5582 = vperm.xlu1 %6669, %v6514_v60   ;;  %v6530_v60 = vld [vmem:[%s12023_s7 + $0xa0] sm:$0xff] }
 0x34d   : > { %5677 = vperm.xlu0 %6668, %v6519_v17   ;;  %v11182_v38 = vpop.permute.xlu1 %5136 }
 0x34e   : > { %v11177_v58 = vpop.permute.xlu0 %5258  ;;  %12904 = vst [vmem:[#allocation35_spill] sm:$0xff] %v11182_v38 }
 0x350   : > { %5592 = vperm.xlu1 %6669, %v6516_v12  }
 0x351   : > { %5700 = vperm.xlu0 %6668, %v6521_v35   ;;  %v11191_v63 = vpop.permute.xlu1 %5146  ;;  %v6532_v35 = vld [vmem:[%s12023_s7 + $0xb0] sm:$0xff] }
 0x352   : > { %v11186_v54 = vpop.permute.xlu0 %5262  ;;  %12905 = vst [vmem:[#allocation52_spill] sm:$0xff] %v11191_v63 }
 0x354   : > { %5613 = vrot.lane.b32.xlu1 %v12856_v33, %s6774_s22 }
 0x355   : > { %5710 = vperm.xlu0 %6668, %v6523_v15   ;;  %v11200_v9 = vpop.permute.xlu1 %5168 }
 0x356   : > { %v11195_v32 = vpop.permute.xlu0 %5281 }
 0x358   : > { %5617 = vrot.lane.b32.xlu1 %v12865_v0, %s6774_s22 }
 0x359   : > { %5819 = vperm.xlu0 %6668, %v6526_v49   ;;  %v11209_v17 = vpop.permute.xlu1 %5178 }
 0x35a   : > { %v11204_v14 = vpop.permute.xlu0 %5291  ;;  %12906 = vst [vmem:[#allocation11_spill] sm:$0xff] %v11209_v17 }
 0x35c   : > { %5621 = vrot.lane.b32.xlu1 %v12875_v8, %s6774_s22 }
 0x35d   : > { %5829 = vperm.xlu0 %6668, %v6528_v48   ;;  %v11218_v15 = vpop.permute.xlu1 %5227  ;;  %v6535_v48 = vld [vmem:[%s12022_s6 + $0xc0] sm:$0xff] }
 0x35e   : > { %v11213_v12 = vpop.permute.xlu0 %5314  ;;  %12907 = vst [vmem:[#allocation36_spill] sm:$0xff] %v11218_v15 }
 0x360   : > { %5625 = vrot.lane.b32.xlu1 %v9988_v21, %s6774_s22 }
 0x361   : > { %5852 = vperm.xlu0 %6668, %v6530_v60   ;;  %v11227_v44 = vpop.permute.xlu1 %5231 }
 0x362   : > { %v11222_v49 = vpop.permute.xlu0 %5324  ;;  %12908 = vst [vmem:[#allocation67_spill] sm:$0xff] %v11227_v44 }
 0x364   : > { %5638 = vrot.lane.b32.xlu1 %v10002_v46, %s6774_s22 }
 0x365   : > { %5862 = vperm.xlu0 %6668, %v6532_v35   ;;  %v11236_v20 = vpop.permute.xlu1 %5235 }
 0x366   : > { %v11231_v60 = vpop.permute.xlu0 %5377  ;;  %12909 = vst [vmem:[#allocation93_spill] sm:$0xff] %v11236_v20  ;;  %v12916_v20 = vld [vmem:[#allocation71_spill] sm:$0xff] }
 0x367   : > { %v5093_v31 = vsel %vm5092_vm0, %v12917_v7, %v12916_v20 }
 0x368   : > { %5642 = vrot.lane.b32.xlu1 %v12887_v52, %s6774_s22  ;;  %v5117_v52 = vsel %vm5092_vm0, %v10913_v5, %v11016_v23 }
 0x369   : > { %5971 = vperm.xlu0 %6668, %v6535_v48   ;;  %v11245_v11 = vpop.permute.xlu1 %5239  ;;  %v5182_v63 = vmul.f32 %v11104_v45, %v5117_v52  ;;  %v6529_v52 = vld [vmem:[%s12022_s6 + $0xb8] sm:$0xff] }
 0x36a   : > { %v11240_v35 = vpop.permute.xlu0 %5381  ;;  %12910 = vst [vmem:[#allocation16_spill] sm:$0xff] %v11245_v11 }
 0x36c   : > { %5646 = vrot.lane.b32.xlu1 %v12892_v37, %s6774_s22 }
 0x36d   : > { %5981 = vperm.xlu0 %6668, %v6537_v25   ;;  %v6541_v25 = vld [vmem:[%s12023_s7 + $0xd0] sm:$0xff]  ;;  %v11257_v26 = vpop.permute.xlu1 %5252 }
 0x36e   : > { %v11249_v48 = vpop.permute.xlu0 %5385  ;;  %12911 = vst [vmem:[#allocation83_spill] sm:$0xff] %v11257_v26 }
 0x370   : > { %5650 = vrot.lane.b32.xlu1 %v12894_v10, %s6774_s22  ;;  %v6520_v10 = vld [vmem:[%s12022_s6 + $0x98] sm:$0xff] }
 0x371   : > { %6004 = vperm.xlu0 %6668, %v6539_v59   ;;  %v11264_v37 = vpop.permute.xlu1 %5256  ;;  %v6522_v59 = vld [vmem:[%s12023_s7 + $0x88] sm:$0xff] }
 0x372   : > { %v11259_v29 = vpop.permute.xlu0 %5389  ;;  %12912 = vst [vmem:[#allocation85_spill] sm:$0xff] %v11264_v37  ;;  %v5197_v37 = vld [vmem:[%s12025_s9] sm:$0x3] }
 0x374   : > { %5672 = vperm.xlu1 %6669, %v6518_v2  }
 0x375   : > { %6014 = vperm.xlu0 %6668, %v6541_v25   ;;  %v11273_v2 = vpop.permute.xlu1 %5260  ;;  %v6524_v25 = vld [vmem:[%s12023_s7 + $0x98] sm:$0xff] }
 0x376   : > { %v11266_v44 = vpop.permute.xlu0 %5402  ;;  %12913 = vst [vmem:[#allocation37_spill] sm:$0xff] %v11273_v2 }
 0x378   : > { %5682 = vperm.xlu1 %6669, %v6520_v10  }
 0x379   : > { %5763 = vrot.lane.b32.xlu0 %v12888_v47, %s6775_s27  ;;  %v11282_v10 = vpop.permute.xlu1 %5264 }
 0x37a   : > { %v11275_v11 = vpop.permute.xlu0 %5406  ;;  %12914 = vst [vmem:[#allocation113_spill] sm:$0xff] %v11282_v10 }
 0x37c   : > { %5705 = vperm.xlu1 %6669, %v6522_v59   ;;  %v6527_v59 = vld [vmem:[%s12022_s6 + $0xa8] sm:$0xff] }
 0x37d   : > { %5767 = vrot.lane.b32.xlu0 %v12893_v4, %s6775_s27 }
 0x37e   : > { %v11284_v17 = vpop.permute.xlu0 %5410 }
 0x380   : > { %5715 = vperm.xlu1 %6669, %v6524_v25   ;;  %v5121_v25 = vsel %vm5092_vm0, %v11016_v23, %v10913_v5  ;;  %v11305_v15 = vpop.permute.xlu1 %5286  ;;  %v5097_v5 = vsel %vm5092_vm0, %v12916_v20, %v12917_v7  ;;  %v12918_v20 = vld [vmem:[#allocation8_spill] sm:$0xff] }
 0x381   : > { %5771 = vrot.lane.b32.xlu0 %v12895_v18, %s6775_s27  ;;  %v5181_v10 = vmul.f32 %v11104_v45, %v5121_v25  ;;  %12915 = vst [vmem:[#allocation21_spill] sm:$0xff] %v11305_v15  ;;  %v5149_v46 = vmul.f32 %v11078_v62, %v5097_v5  ;;  %v5150_v25 = vmul.f32 %v11078_v62, %v5093_v31  ;;  %v6499_v45 = vld [vmem:[%s12025_s9 + $0x2] sm:$0x3] }
 0x382   : > { %v11315_v23 = vpop.permute.xlu0 %5414  ;;  %v5095_v7 = vsel %vm5092_vm0, %v12918_v20, %v10875_v61  ;;  %v11335_v62 = vrot.slane %v5197_v37, %v12863_v40  ;;  %v5119_v31 = vsel %vm5092_vm0, %v10972_v53, %v11063_v36  ;;  %v5123_v5 = vsel %vm5092_vm0, %v11063_v36, %v10972_v53  ;;  %v6531_v36 = vld [vmem:[%s12023_s7 + $0xa8] sm:$0xff] }
 0x383   : > { %v5189_v15 = vadd.f32 %v5181_v10, %v5149_v46  ;;  %v5190_v26 = vadd.f32 %v5182_v63, %v5150_v25  ;;  %v5185_v41 = vmul.f32 %v11113_v50, %v5123_v5  ;;  %v5186_v39 = vmul.f32 %v11113_v50, %v5119_v31  ;;  %v6508_v31 = vld [vmem:[%s12025_s9 + $0x4] sm:$0x3] }
 0x384   : > { %5824 = vperm.xlu1 %6669, %v6527_v59   ;;  %v11332_v59 = vrot.slane %v5197_v37, %v12862_v55  ;;  %v5099_v37 = vsel %vm5092_vm0, %v10875_v61, %v12918_v20  ;;  %v11355_v38 = vrot.slane %v6499_v45, %v12862_v55  ;;  %v5266_v46 = vsel %vm5241_vm9, %v11157_v30, %v11177_v58 }
 0x385   : > { %5775 = vrot.lane.b32.xlu0 %v12896_v51, %s6775_s27  ;;  %v11346_v2 = vpop.permute.xlu1 %5296  ;;  %v5270_v53 = vsel %vm5241_vm9, %v11177_v58, %v11157_v30  ;;  %v11366_v61 = vrot.slane %v6499_v45, %v12863_v40  ;;  %v5153_v50 = vmul.f32 %v11095_v22, %v5099_v37  ;;  %v5154_v63 = vmul.f32 %v11095_v22, %v5095_v7 }
 0x386   : > { %v5332_v10 = vmul.f32 %v11213_v12, %v5270_v53  ;;  %v5333_v30 = vmul.f32 %v11213_v12, %v5266_v46  ;;  %v5209_v58 = vmul.f32 %v11332_v59, %v5189_v15  ;;  %v5210_v25 = vmul.f32 %v11335_v62, %v5190_v26 }
 0x387   : > { %v5434_v27 = vpop.permute.xlu0 %5433  ;;  %v5246_v45 = vsel %vm5241_vm9, %v11138_v19, %v11122_v24  ;;  %v5193_v22 = vadd.f32 %v5185_v41, %v5153_v50  ;;  %v5194_v7 = vadd.f32 %v5186_v39, %v5154_v63  ;;  %v5244_v5 = vsel %vm5241_vm9, %v11129_v56, %v11147_v34 }
 0x388   : > { %5834 = vperm.xlu1 %6669, %v6529_v52   ;;  %v5242_v52 = vsel %vm5241_vm9, %v11122_v24, %v11138_v19  ;;  %v5299_v12 = vmul.f32 %v11195_v32, %v5246_v45  ;;  %v5248_v41 = vsel %vm5241_vm9, %v11147_v34, %v11129_v56  ;;  %v5268_v39 = vsel %vm5241_vm9, %v11167_v57, %v11186_v54  ;;  %v6533_v19 = vld [vmem:[%s12023_s7 + $0xb8] sm:$0xff] }
 0x389   : > { %5788 = vrot.lane.b32.xlu0 %v12898_v43, %s6775_s27  ;;  %v11388_v20 = vpop.permute.xlu1 %5319  ;;  %v5300_v15 = vmul.f32 %v11195_v32, %v5242_v52  ;;  %v5272_v24 = vsel %vm5241_vm9, %v11186_v54, %v11167_v57  ;;  %v5337_v34 = vmul.f32 %v11222_v49, %v5268_v39  ;;  %v5303_v46 = vmul.f32 %v11204_v14, %v5248_v41 }
 0x38a   : > { %v5340_v32 = vadd.f32 %v5332_v10, %v5299_v12  ;;  %v5336_v56 = vmul.f32 %v11222_v49, %v5272_v24  ;;  %v5304_v53 = vmul.f32 %v11204_v14, %v5244_v5  ;;  %v11423_v57 = vrot.slane %v6508_v31, %v12862_v55 }
 0x38b   : > { %v5341_v37 = vadd.f32 %v5333_v30, %v5300_v15  ;;  %v11426_v54 = vrot.slane %v6508_v31, %v12863_v40  ;;  %v5418_v50 = vsel %vm5393_vm14, %v11266_v44, %v11284_v17  ;;  %v5422_v49 = vsel %vm5393_vm14, %v11284_v17, %v11266_v44  ;;  %v6536_v30 = vld [vmem:[%s12022_s6 + $0xc8] sm:$0xff] }
 0x38c   : > { %5857 = vperm.xlu1 %6669, %v6531_v36   ;;  %v5444_v26 = vpop.permute.xlu0 %5443  ;;  %v5394_v14 = vsel %vm5393_vm14, %v11231_v60, %v11249_v48  ;;  %v5398_v63 = vsel %vm5393_vm14, %v11249_v48, %v11231_v60  ;;  %v5361_v44 = vmul.f32 %v11355_v38, %v5340_v32  ;;  %v5344_v31 = vadd.f32 %v5336_v56, %v5303_v46 }
 0x38d   : > { %5792 = vrot.lane.b32.xlu0 %v12899_v3, %s6775_s27  ;;  %v11420_v36 = vpop.permute.xlu1 %5329  ;;  %v5451_v52 = vmul.f32 %v5434_v27, %v5398_v63  ;;  %v5452_v45 = vmul.f32 %v5434_v27, %v5394_v14  ;;  %v5362_v17 = vmul.f32 %v11366_v61, %v5341_v37  ;;  %v5345_v5 = vadd.f32 %v5337_v34, %v5304_v53 }
 0x38e   : > { %v5396_v60 = vsel %vm5393_vm14, %v11240_v35, %v11259_v29  ;;  %v5400_v27 = vsel %vm5393_vm14, %v11259_v29, %v11240_v35  ;;  %v5420_v24 = vsel %vm5393_vm14, %v11275_v11, %v11315_v23  ;;  %v6538_v29 = vld [vmem:[%s12022_s6 + $0xd8] sm:$0xff] }
 0x38f   : > { %v5455_v32 = vmul.f32 %v5444_v26, %v5400_v27  ;;  %v5456_v37 = vmul.f32 %v5444_v26, %v5396_v60 }
 0x390   : > { %5867 = vperm.xlu1 %6669, %v6533_v19   ;;  %v5467_v10 = vpop.permute.xlu0 %5466  ;;  %v5424_v19 = vsel %vm5393_vm14, %v11315_v23, %v11275_v11  ;;  %v5365_v11 = vmul.f32 %v11355_v38, %v5344_v31  ;;  %v5366_v23 = vmul.f32 %v11366_v61, %v5345_v5 }
 0x391   : > { %v5484_v12 = vmul.f32 %v5467_v10, %v5422_v49  ;;  %v5485_v15 = vmul.f32 %v5467_v10, %v5418_v50  ;;  %5796 = vrot.lane.b32.xlu0 %v12900_v6, %s6775_s27  ;;  %v11451_v41 = vpop.permute.xlu1 %5379  ;;  %v5369_v50 = vadd.f32 %v5361_v44, %v5209_v58  ;;  %v5370_v49 = vadd.f32 %v5362_v17, %v5210_v25  ;;  %v6540_v58 = vld [vmem:[%s12023_s7 + $0xc8] sm:$0xff] }
 0x392   : > { %v5213_v10 = vmul.f32 %v11332_v59, %v5193_v22 }
 0x393   : > { %v5492_v48 = vadd.f32 %v5484_v12, %v5451_v52  ;;  %v5493_v39 = vadd.f32 %v5485_v15, %v5452_v45 }
 0x394   : > { %5976 = vperm.xlu1 %6669, %v6536_v30   ;;  %v5477_v56 = vpop.permute.xlu0 %5476  ;;  %v5214_v30 = vmul.f32 %v11335_v62, %v5194_v7  ;;  %v5373_v5 = vadd.f32 %v5365_v11, %v5213_v10 }
 0x395   : > { %v5513_v35 = vmul.f32 %v11423_v57, %v5492_v48  ;;  %v5514_v34 = vmul.f32 %v11426_v54, %v5493_v39  ;;  %v5488_v46 = vmul.f32 %v5477_v56, %v5424_v19  ;;  %v5489_v53 = vmul.f32 %v5477_v56, %v5420_v24  ;;  %5800 = vrot.lane.b32.xlu0 %v12902_v42, %s6775_s27  ;;  %v11478_v26 = vpop.permute.xlu1 %5383  ;;  %v6542_v48 = vld [vmem:[%s12023_s7 + $0xd8] sm:$0xff] }
 0x396   : > { %v5374_v60 = vadd.f32 %v5366_v23, %v5214_v30 }
 0x397   : > { %v5496_v14 = vadd.f32 %v5488_v46, %v5455_v32  ;;  %v5497_v63 = vadd.f32 %v5489_v53, %v5456_v37  ;;  %v5521_v52 = vadd.f32 %v5513_v35, %v5369_v50  ;;  %v5522_v45 = vadd.f32 %v5514_v34, %v5370_v49 }
 0x398   : > { %5986 = vperm.xlu1 %6669, %v6538_v29   ;;  %v5537_v12 = vpop.permute.xlu0 %5536 }
 0x399   : > { %v5517_v25 = vmul.f32 %v11423_v57, %v5496_v14  ;;  %v5518_v15 = vmul.f32 %v11426_v54, %v5497_v63  ;;  %v5554_v44 = vmul.f32 %v5537_v12, %v12888_v47  ;;  %v5555_v17 = vmul.f32 %v5537_v12, %v12895_v18  ;;  %5915 = vrot.lane.b32.xlu0 %v12888_v47, %s6776_s21  ;;  %v11491_v22 = vpop.permute.xlu1 %5387 }
 0x39b   : > { %v5562_v7 = vadd.f32 %v5554_v44, %v5521_v52  ;;  %v5563_v31 = vadd.f32 %v5555_v17, %v5522_v45  ;;  %v5525_v39 = vadd.f32 %v5517_v25, %v5373_v5  ;;  %v5526_v24 = vadd.f32 %v5518_v15, %v5374_v60  ;;  %v12919_v17 = vld [vmem:[#allocation102_spill] sm:$0xff] }
 0x39c   : > { %6009 = vperm.xlu1 %6669, %v6540_v58   ;;  %v5547_v27 = vpop.permute.xlu0 %5546  ;;  %v5122_v45 = vsel %vm5092_vm0, %v11159_v13, %v11131_v28 }
 0x39d   : > { %v5558_v19 = vmul.f32 %v5547_v27, %v12893_v4  ;;  %v5559_v32 = vmul.f32 %v5547_v27, %v12896_v51  ;;  %5919 = vrot.lane.b32.xlu0 %v12893_v4, %s6776_s21  ;;  %v11500_v47 = vpop.permute.xlu1 %5391  ;;  %v5183_v58 = vmul.f32 %v11200_v9, %v5122_v45  ;;  %v12921_v27 = vld [vmem:[#allocation51_spill] sm:$0xff]  ;;  %v12929_v45 = vld [vmem:[#allocation36_spill] sm:$0xff] }
 0x39f   : > { %v5566_v37 = vadd.f32 %v5558_v19, %v5525_v39  ;;  %v5567_v56 = vadd.f32 %v5559_v32, %v5526_v24 }
 0x3a0   : > { %6019 = vperm.xlu1 %6669, %v6542_v48   ;;  %v5578_v29 = vpop.permute.xlu0 %5577  ;;  %v12922_v48 = vld [vmem:[#allocation4_spill] sm:$0xff] }
 0x3a1   : > { %v5595_v35 = vmul.f32 %v5578_v29, %v12898_v43  ;;  %v5596_v34 = vmul.f32 %v5578_v29, %v12900_v6  ;;  %5923 = vrot.lane.b32.xlu0 %v12895_v18, %s6776_s21  ;;  %v5405_v46 = vpop.permute.xlu1 %5404  ;;  %v5100_v39 = vsel %vm5092_vm0, %v12921_v27, %v12922_v48 }
 0x3a3   : > { %v11506_v53 = vadd.f32 %v5595_v35, %v5562_v7  ;;  %v11508_v50 = vadd.f32 %v5596_v34, %v5563_v31  ;;  %v12920_v31 = vld [vmem:[#allocation35_spill] sm:$0xff]  ;;  %v12925_v35 = vld [vmem:[#allocation53_spill] sm:$0xff] }
 0x3a4   : > { %5765 = vrot.lane.b32.xlu1 %v12856_v33, %s6775_s27  ;;  %v5588_v4 = vpop.permute.xlu0 %5587 }
 0x3a5   : > { %v5599_v49 = vmul.f32 %v5588_v4, %v12899_v3  ;;  %v5600_v11 = vmul.f32 %v5588_v4, %v12902_v42  ;;  %5927 = vrot.lane.b32.xlu0 %v12896_v51, %s6776_s21  ;;  %v5409_v23 = vpop.permute.xlu1 %5408 }
 0x3a7   : > { %v11516_v14 = vadd.f32 %v5599_v49, %v5566_v37  ;;  %v11518_v18 = vadd.f32 %v5600_v11, %v5567_v56  ;;  %v12923_v37 = vld [vmem:[#allocation37_spill] sm:$0xff]  ;;  %v12924_v56 = vld [vmem:[#allocation83_spill] sm:$0xff] }
 0x3a8   : > { %5769 = vrot.lane.b32.xlu1 %v12865_v0, %s6775_s27  ;;  %v5612_v63 = vpop.permute.xlu0 %5611  ;;  %v5271_v29 = vsel %vm5241_vm9, %v12923_v37, %v12924_v56 }
 0x3a9   : > { %5940 = vrot.lane.b32.xlu0 %v12898_v43, %s6776_s21  ;;  %v5413_v10 = vpop.permute.xlu1 %5412  ;;  %v5118_v43 = vsel %vm5092_vm0, %v11131_v28, %v11159_v13  ;;  %v5094_v28 = vsel %vm5092_vm0, %v12919_v17, %v11106_v16  ;;  %v5098_v13 = vsel %vm5092_vm0, %v11106_v16, %v12919_v17  ;;  %v5096_v16 = vsel %vm5092_vm0, %v12922_v48, %v12921_v27  ;;  %v12933_v27 = vld [vmem:[#allocation85_spill] sm:$0xff] }
 0x3aa   : > { %v11526_v30 = vsel %vm5393_vm14, %v5405_v46, %v5413_v10  ;;  %v11530_v51 = vsel %vm5393_vm14, %v5413_v10, %v5405_v46  ;;  %v5184_v25 = vmul.f32 %v11200_v9, %v5118_v43  ;;  %v5151_v5 = vmul.f32 %v12920_v31, %v5098_v13  ;;  %v12928_v43 = vld [vmem:[#allocation93_spill] sm:$0xff] }
 0x3ab   : > { %v5152_v60 = vmul.f32 %v12920_v31, %v5094_v28  ;;  %v5334_v46 = vmul.f32 %v11388_v20, %v5271_v29  ;;  %v12935_v29 = vld [vmem:[#allocation11_spill] sm:$0xff] }
 0x3ac   : > { %5773 = vrot.lane.b32.xlu1 %v12875_v8, %s6775_s27  ;;  %v5616_v52 = vpop.permute.xlu0 %5615  ;;  %v5191_v19 = vadd.f32 %v5183_v58, %v5151_v5 }
 0x3ad   : > { %5944 = vrot.lane.b32.xlu0 %v12899_v3, %s6776_s21  ;;  %v5417_v12 = vpop.permute.xlu1 %5416  ;;  %v5192_v32 = vadd.f32 %v5184_v25, %v5152_v60  ;;  %v12932_v60 = vld [vmem:[#allocation113_spill] sm:$0xff] }
 0x3ae   : > { %v11549_v3 = vsel %vm5393_vm14, %v5409_v23, %v5417_v12  ;;  %v11553_v15 = vsel %vm5393_vm14, %v5417_v12, %v5409_v23  ;;  %v12926_v23 = vld [vmem:[#allocation110_spill] sm:$0xff]  ;;  %v5243_v12 = vsel %vm5241_vm9, %v12929_v45, %v12928_v43  ;;  %v5211_v31 = vmul.f32 %v11332_v59, %v5191_v19 }
 0x3af   : > { %v5212_v5 = vmul.f32 %v11335_v62, %v5192_v32  ;;  %v5269_v48 = vsel %vm5241_vm9, %v12933_v27, %v12932_v60 }
 0x3b0   : > { %5777 = vrot.lane.b32.xlu1 %v9988_v21, %s6775_s27  ;;  %v5620_v44 = vpop.permute.xlu0 %5619  ;;  %v5339_v32 = vmul.f32 %v11420_v36, %v5269_v48 }
 0x3b1   : > { %v11567_v9 = vsel %vm5627_vm6, %v5612_v63, %v5620_v44  ;;  %v11571_v7 = vsel %vm5627_vm6, %v5620_v44, %v5612_v63  ;;  %5948 = vrot.lane.b32.xlu0 %v12900_v6, %s6776_s21  ;;  %v5267_v6 = vsel %vm5241_vm9, %v12924_v56, %v12923_v37  ;;  %v12927_v63 = vld [vmem:[#allocation108_spill] sm:$0xff]  ;;  %v12931_v44 = vld [vmem:[#allocation21_spill] sm:$0xff] }
 0x3b2   : > { %v5335_v4 = vmul.f32 %v11388_v20, %v5267_v6  ;;  %v5120_v10 = vsel %vm5092_vm0, %v12927_v63, %v12926_v23  ;;  %v5124_v20 = vsel %vm5092_vm0, %v12926_v23, %v12927_v63  ;;  %v5302_v28 = vmul.f32 %v12931_v44, %v5243_v12  ;;  %v12936_v63 = vld [vmem:[#allocation16_spill] sm:$0xff] }
 0x3b3   : > { %v5439_v24 = vpop.permute.xlu1 %5438  ;;  %v5188_v23 = vmul.f32 %v12935_v29, %v5120_v10  ;;  %v5399_v10 = vsel %vm5393_vm14, %v11491_v22, %v11451_v41 }
 0x3b4   : > { %5790 = vrot.lane.b32.xlu1 %v12925_v35, %s6775_s27  ;;  %v5624_v34 = vpop.permute.xlu0 %5623  ;;  %v5343_v6 = vadd.f32 %v5335_v4, %v5302_v28  ;;  %v12938_v28 = vld [vmem:[#allocation81_spill] sm:$0xff] }
 0x3b5   : > { %v11599_v49 = vsel %vm5627_vm6, %v5616_v52, %v5624_v34  ;;  %v11603_v11 = vsel %vm5627_vm6, %v5624_v34, %v5616_v52  ;;  %5952 = vrot.lane.b32.xlu0 %v12902_v42, %s6776_s21  ;;  %v5247_v42 = vsel %vm5241_vm9, %v12928_v43, %v12929_v45  ;;  %v12930_v52 = vld [vmem:[#allocation52_spill] sm:$0xff]  ;;  %v5187_v34 = vmul.f32 %v12935_v29, %v5124_v20  ;;  %v12937_v43 = vld [vmem:[#allocation67_spill] sm:$0xff] }
 0x3b6   : > { %v5155_v58 = vmul.f32 %v12930_v52, %v5100_v39  ;;  %v5156_v25 = vmul.f32 %v12930_v52, %v5096_v16  ;;  %v5301_v17 = vmul.f32 %v12931_v44, %v5247_v42  ;;  %v5273_v39 = vsel %vm5241_vm9, %v12932_v60, %v12933_v27  ;;  %v12934_v16 = vld [vmem:[#allocation115_spill] sm:$0xff] }
 0x3b7   : > { %v5449_v13 = vpop.permute.xlu1 %5448  ;;  %v5338_v19 = vmul.f32 %v11420_v36, %v5273_v39  ;;  %v5245_v45 = vsel %vm5241_vm9, %v12937_v43, %v12936_v63  ;;  %v5249_v12 = vsel %vm5241_vm9, %v12936_v63, %v12937_v43  ;;  %v5395_v36 = vsel %vm5393_vm14, %v11451_v41, %v11491_v22 }
 0x3b8   : > { %5794 = vrot.lane.b32.xlu1 %v12934_v16, %s6775_s27  ;;  %v5637_v37 = vpop.permute.xlu0 %5636  ;;  %v5342_v56 = vadd.f32 %v5334_v46, %v5301_v17  ;;  %v5305_v46 = vmul.f32 %v11346_v2, %v5249_v12  ;;  %v5306_v4 = vmul.f32 %v11346_v2, %v5245_v45  ;;  %v5453_v42 = vmul.f32 %v5439_v24, %v5399_v10  ;;  %v12939_v12 = vld [vmem:[#allocation41_spill] sm:$0xff] }
 0x3b9   : > { %v5454_v52 = vmul.f32 %v5439_v24, %v5395_v36  ;;  %v5364_v27 = vmul.f32 %v11366_v61, %v5343_v6  ;;  %v5397_v41 = vsel %vm5393_vm14, %v11478_v26, %v11500_v47  ;;  %v5401_v22 = vsel %vm5393_vm14, %v11500_v47, %v11478_v26 }
 0x3ba   : > { %v5363_v60 = vmul.f32 %v11355_v38, %v5342_v56  ;;  %v5346_v48 = vadd.f32 %v5338_v19, %v5305_v46  ;;  %v5347_v39 = vadd.f32 %v5339_v32, %v5306_v4  ;;  %v5195_v24 = vadd.f32 %v5187_v34, %v5155_v58 }
 0x3bb   : > { %v5472_v20 = vpop.permute.xlu1 %5471  ;;  %v5196_v29 = vadd.f32 %v5188_v23, %v5156_v25  ;;  %v5457_v63 = vmul.f32 %v5449_v13, %v5401_v22  ;;  %v5458_v56 = vmul.f32 %v5449_v13, %v5397_v41  ;;  %v5372_v47 = vadd.f32 %v5364_v27, %v5212_v5 }
 0x3bc   : > { %v5486_v44 = vmul.f32 %v5472_v20, %v11530_v51  ;;  %v5487_v17 = vmul.f32 %v5472_v20, %v11526_v30  ;;  %5798 = vrot.lane.b32.xlu1 %v12938_v28, %s6775_s27  ;;  %v5641_v2 = vpop.permute.xlu0 %5640  ;;  %v5371_v26 = vadd.f32 %v5363_v60, %v5211_v31  ;;  %v5367_v13 = vmul.f32 %v11355_v38, %v5346_v48 }
 0x3bd   : > { %v5368_v34 = vmul.f32 %v11366_v61, %v5347_v39  ;;  %v5216_v4 = vmul.f32 %v11335_v62, %v5196_v29 }
 0x3be   : > { %v5494_v30 = vadd.f32 %v5486_v44, %v5453_v42  ;;  %v5495_v51 = vadd.f32 %v5487_v17, %v5454_v52 }
 0x3bf   : > { %v5482_v43 = vpop.permute.xlu1 %5481 }
 0x3c0   : > { %v5515_v6 = vmul.f32 %v11423_v57, %v5494_v30  ;;  %v5516_v19 = vmul.f32 %v11426_v54, %v5495_v51  ;;  %v5490_v32 = vmul.f32 %v5482_v43, %v11553_v15  ;;  %v5491_v45 = vmul.f32 %v5482_v43, %v11549_v3  ;;  %5802 = vrot.lane.b32.xlu1 %v12939_v12, %s6775_s27  ;;  %v5645_v46 = vpop.permute.xlu0 %5644 }
 0x3c1   : > { %v5652_v58 = vsel %vm5627_vm6, %v5637_v37, %v5645_v46  ;;  %v5656_v25 = vsel %vm5627_vm6, %v5645_v46, %v5637_v37  ;;  %v5215_v3 = vmul.f32 %v11332_v59, %v5195_v24 }
 0x3c2   : > { %v5498_v23 = vadd.f32 %v5490_v32, %v5457_v63  ;;  %v5499_v15 = vadd.f32 %v5491_v45, %v5458_v56  ;;  %v5523_v36 = vadd.f32 %v5515_v6, %v5371_v26  ;;  %v5524_v10 = vadd.f32 %v5516_v19, %v5372_v47 }
 0x3c3   : > { %v5542_v31 = vpop.permute.xlu1 %5541  ;;  %v5375_v44 = vadd.f32 %v5367_v13, %v5215_v3 }
 0x3c4   : > { %v5519_v5 = vmul.f32 %v11423_v57, %v5498_v23  ;;  %v5520_v20 = vmul.f32 %v11426_v54, %v5499_v15  ;;  %v5556_v42 = vmul.f32 %v5542_v31, %v12856_v33  ;;  %v5557_v37 = vmul.f32 %v5542_v31, %v12875_v8  ;;  %5917 = vrot.lane.b32.xlu1 %v12856_v33, %s6776_s21  ;;  %v5649_v38 = vpop.permute.xlu0 %5648 }
 0x3c5   : > { %v5654_v59 = vsel %vm5627_vm6, %v5641_v2, %v5649_v38  ;;  %v5658_v62 = vsel %vm5627_vm6, %v5649_v38, %v5641_v2  ;;  %v5376_v57 = vadd.f32 %v5368_v34, %v5216_v4 }
 0x3c6   : > { %v5564_v61 = vadd.f32 %v5556_v42, %v5523_v36  ;;  %v5565_v52 = vadd.f32 %v5557_v37, %v5524_v10  ;;  %v5527_v54 = vadd.f32 %v5519_v5, %v5375_v44 }
 0x3c7   : > { %v5552_v17 = vpop.permute.xlu1 %5551  ;;  %v5528_v60 = vadd.f32 %v5520_v20, %v5376_v57 }
 0x3c8   : > { %v5560_v27 = vmul.f32 %v5552_v17, %v12865_v0  ;;  %v5561_v48 = vmul.f32 %v5552_v17, %v9988_v21  ;;  %5921 = vrot.lane.b32.xlu1 %v12865_v0, %s6776_s21  ;;  %v5668_v33 = vpop.permute.xlu0 %5667 }
 0x3c9   : > { %v5685_v39 = vmul.f32 %v5668_v33, %v11567_v9  ;;  %v5686_v41 = vmul.f32 %v5668_v33, %v11571_v7  ;;  %v6525_v7 = vld [vmem:[%s12025_s9 + $0x8] sm:$0x3] }
 0x3ca   : > { %v5568_v2 = vadd.f32 %v5560_v27, %v5527_v54  ;;  %v5569_v22 = vadd.f32 %v5561_v48, %v5528_v60 }
 0x3cb   : > { %v5583_v30 = vpop.permute.xlu1 %5582 }
 0x3cc   : > { %v5597_v51 = vmul.f32 %v5583_v30, %v12925_v35  ;;  %v5598_v24 = vmul.f32 %v5583_v30, %v12938_v28  ;;  %5925 = vrot.lane.b32.xlu1 %v12875_v8, %s6776_s21  ;;  %v5678_v29 = vpop.permute.xlu0 %5677 }
 0x3cd   : > { %v5689_v63 = vmul.f32 %v5678_v29, %v11599_v49  ;;  %v5690_v0 = vmul.f32 %v5678_v29, %v11603_v11  ;;  %v11723_v49 = vrot.slane %v6525_v7, %v12862_v55  ;;  %v11726_v11 = vrot.slane %v6525_v7, %v12863_v40 }
 0x3ce   : > { %v11711_v56 = vadd.f32 %v5597_v51, %v5564_v61  ;;  %v11713_v9 = vadd.f32 %v5598_v24, %v5565_v52 }
 0x3cf   : > { %v5593_v43 = vpop.permute.xlu1 %5592 }
 0x3d0   : > { %v5601_v6 = vmul.f32 %v5593_v43, %v12934_v16  ;;  %v5602_v19 = vmul.f32 %v5593_v43, %v12939_v12  ;;  %5929 = vrot.lane.b32.xlu1 %v9988_v21, %s6776_s21  ;;  %v5701_v8 = vpop.permute.xlu0 %5700 }
 0x3d1   : > { %v5718_v32 = vmul.f32 %v5701_v8, %v5652_v58  ;;  %v5719_v45 = vmul.f32 %v5701_v8, %v5656_v25 }
 0x3d2   : > { %v11728_v46 = vadd.f32 %v5601_v6, %v5568_v2  ;;  %v11730_v26 = vadd.f32 %v5602_v19, %v5569_v22 }
 0x3d3   : > { %v5614_v47 = vpop.permute.xlu1 %5613  ;;  %v5726_v13 = vadd.f32 %v5718_v32, %v5685_v39  ;;  %v5727_v34 = vadd.f32 %v5719_v45, %v5686_v41 }
 0x3d4   : > { %5942 = vrot.lane.b32.xlu1 %v12925_v35, %s6776_s21  ;;  %v5711_v21 = vpop.permute.xlu0 %5710 }
 0x3d5   : > { %v5747_v23 = vmul.f32 %v11723_v49, %v5726_v13  ;;  %v5748_v15 = vmul.f32 %v11726_v11, %v5727_v34  ;;  %v5722_v3 = vmul.f32 %v5711_v21, %v5654_v59  ;;  %v5723_v4 = vmul.f32 %v5711_v21, %v5658_v62 }
 0x3d7   : > { %v5618_v36 = vpop.permute.xlu1 %5617  ;;  %v11737_v58 = vadd.f32 %v5747_v23, %v11506_v53  ;;  %v11740_v25 = vadd.f32 %v5748_v15, %v11508_v50  ;;  %v5730_v10 = vadd.f32 %v5722_v3, %v5689_v63  ;;  %v5731_v31 = vadd.f32 %v5723_v4, %v5690_v0 }
 0x3d8   : > { %5946 = vrot.lane.b32.xlu1 %v12934_v16, %s6776_s21  ;;  %v11744_v35 = vpop.permute.xlu0 %5819 }
 0x3d9   : > { %v5751_v5 = vmul.f32 %v11723_v49, %v5730_v10  ;;  %v5752_v20 = vmul.f32 %v11726_v11, %v5731_v31 }
 0x3da   : > { %v11770_v61 = vpop.f32.mrb[12].mxu1 }
 0x3db   : > { %v5622_v42 = vpop.permute.xlu1 %5621  ;;  %v11749_v37 = vadd.f32 %v5751_v5, %v11516_v14  ;;  %v11752_v53 = vadd.f32 %v5752_v20, %v11518_v18  ;;  %v11772_v52 = vpop.f32.mrb[13].mxu1 }
 0x3dc   : > { %v5629_v50 = vsel %vm5627_vm6, %v5614_v47, %v5622_v42  ;;  %v5633_v16 = vsel %vm5627_vm6, %v5622_v42, %v5614_v47  ;;  %5950 = vrot.lane.b32.xlu1 %v12938_v28, %s6776_s21  ;;  %v11760_v38 = vpop.permute.xlu0 %5829  ;;  %v6568_v44 = vpack.c.bf16 %v11772_v52, %v11770_v61  ;;  %v11776_v57 = vpop.f32.mrb[14].mxu1 }
 0x3dd   : > { %v11781_v60 = vpop.f32.mrb[15].mxu1 }
 0x3de   : > { %6184 = vst [vmem:[%s11001_s14 + $0x40] sm:$0xff] %v6568_v44  ;;  %v6569_v27 = vpack.c.bf16 %v11781_v60, %v11776_v57 }
 0x3df   : > { %v5626_v59 = vpop.permute.xlu1 %5625 }
 0x3e0   : > { %v5631_v14 = vsel %vm5627_vm6, %v5618_v36, %v5626_v59  ;;  %v5635_v18 = vsel %vm5627_vm6, %v5626_v59, %v5618_v36  ;;  %5954 = vrot.lane.b32.xlu1 %v12939_v12, %s6776_s21  ;;  %v11768_v62 = vpop.permute.xlu0 %5852  ;;  %6185 = vst [vmem:[%s11001_s14 + $0x48] sm:$0xff] %v6569_v27 }
 0x3e3   : > { %v5639_v28 = vpop.permute.xlu1 %5638 }
 0x3e4   : > { %v11778_v17 = vpop.permute.xlu0 %5862 }
 0x3e7   : > { %v5643_v54 = vpop.permute.xlu1 %5642  ;;  %v11787_v48 = vpop.f32.mrb[16].mxu1 }
 0x3e8   : > { %v11783_v12 = vpop.permute.xlu0 %5971  ;;  %v11789_v33 = vpop.f32.mrb[17].mxu1 }
 0x3e9   : > { %v6570_v41 = vpack.c.bf16 %v11789_v33, %v11787_v48  ;;  %v11794_v2 = vpop.f32.mrb[18].mxu1 }
 0x3ea   : > { %v11802_v24 = vpop.f32.mrb[19].mxu1 }
 0x3eb   : > { %v5647_v39 = vpop.permute.xlu1 %5646  ;;  %6186 = vst [vmem:[%s11001_s14 + $0x50] sm:$0xff] %v6570_v41  ;;  %v6571_v29 = vpack.c.bf16 %v11802_v24, %v11794_v2 }
 0x3ec   : > { %v5653_v22 = vsel %vm5627_vm6, %v5639_v28, %v5647_v39  ;;  %v5657_v30 = vsel %vm5627_vm6, %v5647_v39, %v5639_v28  ;;  %v11800_v51 = vpop.permute.xlu0 %5981 }
 0x3ed   : > { %6187 = vst [vmem:[%s11001_s14 + $0x58] sm:$0xff] %v6571_v29 }
 0x3ef   : > { %v5651_v63 = vpop.permute.xlu1 %5650 }
 0x3f0   : > { %v5655_v0 = vsel %vm5627_vm6, %v5643_v54, %v5651_v63  ;;  %v5659_v7 = vsel %vm5627_vm6, %v5651_v63, %v5643_v54  ;;  %v11811_v43 = vpop.permute.xlu0 %6004 }
 0x3f3   : > { %v5673_v6 = vpop.permute.xlu1 %5672 }
 0x3f4   : > { %v5687_v19 = vmul.f32 %v5673_v6, %v5629_v50  ;;  %v5688_v8 = vmul.f32 %v5673_v6, %v5633_v16  ;;  %v11814_v32 = vpop.permute.xlu0 %6014 }
 0x3f7   : > { %v5683_v45 = vpop.permute.xlu1 %5682 }
 0x3f8   : > { %v5691_v47 = vmul.f32 %v5683_v45, %v5631_v14  ;;  %v5692_v13 = vmul.f32 %v5683_v45, %v5635_v18  ;;  %v5764_v34 = vpop.permute.xlu0 %5763 }
 0x3fb   : > { %v5706_v21 = vpop.permute.xlu1 %5705 }
 0x3fc   : > { %v5720_v23 = vmul.f32 %v5706_v21, %v5653_v22  ;;  %v5721_v15 = vmul.f32 %v5706_v21, %v5657_v30  ;;  %v5768_v3 = vpop.permute.xlu0 %5767 }
 0x3fe   : > { %v5728_v4 = vadd.f32 %v5720_v23, %v5687_v19  ;;  %v5729_v36 = vadd.f32 %v5721_v15, %v5688_v8 }
 0x3ff   : > { %v5716_v10 = vpop.permute.xlu1 %5715 }
 0x400   : > { %v5749_v31 = vmul.f32 %v11723_v49, %v5728_v4  ;;  %v5750_v5 = vmul.f32 %v11726_v11, %v5729_v36  ;;  %v5724_v20 = vmul.f32 %v5716_v10, %v5655_v0  ;;  %v5725_v42 = vmul.f32 %v5716_v10, %v5659_v7  ;;  %v5772_v50 = vpop.permute.xlu0 %5771 }
 0x402   : > { %v11819_v16 = vadd.f32 %v5749_v31, %v11711_v56  ;;  %v11822_v59 = vadd.f32 %v5750_v5, %v11713_v9  ;;  %v5732_v14 = vadd.f32 %v5724_v20, %v5691_v47  ;;  %v5733_v18 = vadd.f32 %v5725_v42, %v5692_v13 }
 0x403   : > { %v11824_v28 = vpop.permute.xlu1 %5824 }
 0x404   : > { %v5753_v44 = vmul.f32 %v11723_v49, %v5732_v14  ;;  %v5754_v54 = vmul.f32 %v11726_v11, %v5733_v18  ;;  %v5776_v27 = vpop.permute.xlu0 %5775  ;;  %v6534_v49 = vld [vmem:[%s12025_s9 + $0xa] sm:$0x3]  ;;  %v5780_v11 = vsel %vm5779_vm8, %v5764_v34, %v5772_v50 }
 0x405   : > { %v11849_v29 = vrot.slane %v6534_v49, %v12862_v55  ;;  %v11852_v63 = vrot.slane %v6534_v49, %v12863_v40  ;;  %v5837_v7 = vmul.f32 %v11744_v35, %v5780_v11  ;;  %v5782_v45 = vsel %vm5779_vm8, %v5768_v3, %v5776_v27 }
 0x406   : > { %v11829_v39 = vadd.f32 %v5753_v44, %v11728_v46  ;;  %v11832_v41 = vadd.f32 %v5754_v54, %v11730_v26  ;;  %v5784_v46 = vsel %vm5779_vm8, %v5772_v50, %v5764_v34  ;;  %v5786_v47 = vsel %vm5779_vm8, %v5776_v27, %v5768_v3 }
 0x407   : > { %v11834_v56 = vpop.permute.xlu1 %5834  ;;  %v5838_v6 = vmul.f32 %v11744_v35, %v5784_v46  ;;  %v5841_v4 = vmul.f32 %v11760_v38, %v5782_v45  ;;  %v5842_v36 = vmul.f32 %v11760_v38, %v5786_v47 }
 0x408   : > { %v5789_v22 = vpop.permute.xlu0 %5788 }
 0x40b   : > { %v11836_v9 = vpop.permute.xlu1 %5857 }
 0x40c   : > { %v5793_v30 = vpop.permute.xlu0 %5792 }
 0x40f   : > { %v11846_v26 = vpop.permute.xlu1 %5867 }
 0x410   : > { %v5797_v0 = vpop.permute.xlu0 %5796 }
 0x411   : > { %v5804_v19 = vsel %vm5779_vm8, %v5789_v22, %v5797_v0  ;;  %v5808_v8 = vsel %vm5779_vm8, %v5797_v0, %v5789_v22 }
 0x412   : > { %v5870_v13 = vmul.f32 %v11768_v62, %v5804_v19  ;;  %v5871_v34 = vmul.f32 %v11768_v62, %v5808_v8  ;;  %v6543_v8 = vld [vmem:[%s12025_s9 + $0xc] sm:$0x3] }
 0x413   : > { %v11866_v21 = vpop.permute.xlu1 %5976  ;;  %v11899_v47 = vrot.slane %v6543_v8, %v12862_v55 }
 0x414   : > { %v5878_v23 = vadd.f32 %v5870_v13, %v5837_v7  ;;  %v5879_v35 = vadd.f32 %v5871_v34, %v5838_v6  ;;  %v5801_v15 = vpop.permute.xlu0 %5800  ;;  %v11902_v13 = vrot.slane %v6543_v8, %v12863_v40 }
 0x415   : > { %v5806_v10 = vsel %vm5779_vm8, %v5793_v30, %v5801_v15  ;;  %v5810_v31 = vsel %vm5779_vm8, %v5801_v15, %v5793_v30 }
 0x416   : > { %v5899_v3 = vmul.f32 %v11849_v29, %v5878_v23  ;;  %v5900_v5 = vmul.f32 %v11852_v63, %v5879_v35  ;;  %v5874_v62 = vmul.f32 %v11778_v17, %v5806_v10  ;;  %v5875_v20 = vmul.f32 %v11778_v17, %v5810_v31 }
 0x417   : > { %v11878_v42 = vpop.permute.xlu1 %5986 }
 0x418   : > { %v5882_v50 = vadd.f32 %v5874_v62, %v5841_v4  ;;  %v5883_v14 = vadd.f32 %v5875_v20, %v5842_v36  ;;  %v5916_v18 = vpop.permute.xlu0 %5915  ;;  %v5907_v38 = vadd.f32 %v5899_v3, %v11737_v58  ;;  %v5908_v44 = vadd.f32 %v5900_v5, %v11740_v25 }
 0x41a   : > { %v5903_v54 = vmul.f32 %v11849_v29, %v5882_v50  ;;  %v5904_v27 = vmul.f32 %v11852_v63, %v5883_v14 }
 0x41b   : > { %v11884_v22 = vpop.permute.xlu1 %6009 }
 0x41c   : > { %v5920_v30 = vpop.permute.xlu0 %5919  ;;  %v5911_v49 = vadd.f32 %v5903_v54, %v11749_v37  ;;  %v5912_v17 = vadd.f32 %v5904_v27, %v11752_v53 }
 0x41f   : > { %v11888_v11 = vpop.permute.xlu1 %6019 }
 0x420   : > { %v5924_v46 = vpop.permute.xlu0 %5923 }
 0x421   : > { %v5932_v37 = vsel %vm5931_vm7, %v5916_v18, %v5924_v46  ;;  %v5936_v53 = vsel %vm5931_vm7, %v5924_v46, %v5916_v18 }
 0x422   : > { %v5989_v23 = vmul.f32 %v11783_v12, %v5932_v37  ;;  %v5990_v36 = vmul.f32 %v11783_v12, %v5936_v53 }
 0x423   : > { %v5766_v0 = vpop.permute.xlu1 %5765 }
 0x424   : > { %v5928_v7 = vpop.permute.xlu0 %5927 }
 0x425   : > { %v5934_v35 = vsel %vm5931_vm7, %v5920_v30, %v5928_v7  ;;  %v5938_v55 = vsel %vm5931_vm7, %v5928_v7, %v5920_v30 }
 0x426   : > { %v5993_v3 = vmul.f32 %v11800_v51, %v5934_v35  ;;  %v5994_v14 = vmul.f32 %v11800_v51, %v5938_v55 }
 0x427   : > { %v5770_v6 = vpop.permute.xlu1 %5769 }
 0x428   : > { %v5941_v58 = vpop.permute.xlu0 %5940 }
 0x42b   : > { %v5774_v19 = vpop.permute.xlu1 %5773 }
 0x42c   : > { %v5945_v25 = vpop.permute.xlu0 %5944  ;;  %v5781_v50 = vsel %vm5779_vm8, %v5766_v0, %v5774_v19  ;;  %v5785_v46 = vsel %vm5779_vm8, %v5774_v19, %v5766_v0 }
 0x42d   : > { %v5839_v53 = vmul.f32 %v11824_v28, %v5781_v50 }
 0x42f   : > { %v5778_v45 = vpop.permute.xlu1 %5777 }
 0x430   : > { %v5949_v34 = vpop.permute.xlu0 %5948  ;;  %v5783_v0 = vsel %vm5779_vm8, %v5770_v6, %v5778_v45 }
 0x431   : > { %v5956_v15 = vsel %vm5931_vm7, %v5941_v58, %v5949_v34  ;;  %v5960_v4 = vsel %vm5931_vm7, %v5949_v34, %v5941_v58 }
 0x432   : > { %v6022_v40 = vmul.f32 %v11811_v43, %v5956_v15  ;;  %v6023_v10 = vmul.f32 %v11811_v43, %v5960_v4 }
 0x433   : > { %v5791_v31 = vpop.permute.xlu1 %5790 }
 0x434   : > { %v6030_v5 = vadd.f32 %v6022_v40, %v5989_v23  ;;  %v6031_v62 = vadd.f32 %v6023_v10, %v5990_v36  ;;  %v5953_v20 = vpop.permute.xlu0 %5952  ;;  %v12941_v23 = vld [vmem:[#allocation27_spill] sm:$0xff] }
 0x435   : > { %v5958_v12 = vsel %vm5931_vm7, %v5945_v25, %v5953_v20  ;;  %v5962_v18 = vsel %vm5931_vm7, %v5953_v20, %v5945_v25  ;;  %v12940_v25 = vld [vmem:[#allocation2_spill] sm:$0xff] }
 0x436   : > { %v6051_v54 = vmul.f32 %v11899_v47, %v6030_v5  ;;  %v6052_v43 = vmul.f32 %v11902_v13, %v6031_v62  ;;  %v6026_v27 = vmul.f32 %v11814_v32, %v5958_v12  ;;  %v6027_v30 = vmul.f32 %v11814_v32, %v5962_v18  ;;  %v12942_v12 = vld [vmem:[#allocation105_spill] sm:$0xff]  ;;  %v12943_v18 = vld [vmem:[#allocation7_spill] sm:$0xff] }
 0x437   : > { %v5795_v7 = vpop.permute.xlu1 %5794  ;;  %v5840_v32 = vmul.f32 %v11824_v28, %v5785_v46 }
 0x438   : > { %v6059_v58 = vadd.f32 %v6051_v54, %v5907_v38  ;;  %v6060_v51 = vadd.f32 %v6052_v43, %v5908_v44  ;;  %v6034_v8 = vadd.f32 %v6026_v27, %v5993_v3  ;;  %v6035_v37 = vadd.f32 %v6027_v30, %v5994_v14 }
 0x439   : > { %v5787_v38 = vsel %vm5779_vm8, %v5778_v45, %v5770_v6  ;;  %v5843_v45 = vmul.f32 %v11834_v56, %v5783_v0 }
 0x43a   : > { %v6067_v34 = vadd.f32 %v6059_v58, %v12940_v25  ;;  %v6068_v35 = vadd.f32 %v6060_v51, %v12941_v23  ;;  %v6564_v15 = vpack.c.bf16 %v6060_v51, %v6059_v58  ;;  %v6055_v4 = vmul.f32 %v11899_v47, %v6034_v8 }
 0x43b   : > { %v5799_v44 = vpop.permute.xlu1 %5798  ;;  %v6056_v19 = vmul.f32 %v11902_v13, %v6035_v37 }
 0x43c   : > { %v5805_v36 = vsel %vm5779_vm8, %v5791_v31, %v5799_v44  ;;  %v5809_v55 = vsel %vm5779_vm8, %v5799_v44, %v5791_v31  ;;  %v6075_v40 = vadd.f32 %v6067_v34, %v11770_v61  ;;  %v6076_v10 = vadd.f32 %v6068_v35, %v11772_v52  ;;  %6180 = vst [vmem:[%s11001_s14 + $0x20] sm:$0xff] %v6564_v15 }
 0x43d   : > { %v5872_v28 = vmul.f32 %v11836_v9, %v5805_v36  ;;  %v5873_v3 = vmul.f32 %v11836_v9, %v5809_v55  ;;  %v6063_v5 = vadd.f32 %v6055_v4, %v5911_v49  ;;  %v6064_v6 = vadd.f32 %v6056_v19, %v5912_v17 }
 0x43e   : > { %v6083_v62 = vadd.f32 %v6076_v10, %v6075_v40  ;;  %v5844_v52 = vmul.f32 %v11834_v56, %v5787_v38 }
 0x43f   : > { %v5880_v20 = vadd.f32 %v5872_v28, %v5839_v53  ;;  %v5881_v50 = vadd.f32 %v5873_v3, %v5840_v32  ;;  %v5803_v14 = vpop.permute.xlu1 %5802  ;;  %v6071_v31 = vadd.f32 %v6063_v5, %v12942_v12  ;;  %v6072_v61 = vadd.f32 %v6064_v6, %v12943_v18 }
 0x440   : > { %v5807_v54 = vsel %vm5779_vm8, %v5795_v7, %v5803_v14  ;;  %v5811_v9 = vsel %vm5779_vm8, %v5803_v14, %v5795_v7  ;;  %v6566_v49 = vpack.c.bf16 %v6064_v6, %v6063_v5  ;;  %6084 = vadd.xlane.f32.xlu0 %v6083_v62 }
 0x441   : > { %v5901_v17 = vmul.f32 %v11849_v29, %v5880_v20  ;;  %v5902_v43 = vmul.f32 %v11852_v63, %v5881_v50  ;;  %v5876_v27 = vmul.f32 %v11846_v26, %v5807_v54  ;;  %v5877_v30 = vmul.f32 %v11846_v26, %v5811_v9 }
 0x442   : > { %v6079_v46 = vadd.f32 %v6071_v31, %v11787_v48  ;;  %v6080_v56 = vadd.f32 %v6072_v61, %v11789_v33  ;;  %6182 = vst [vmem:[%s11001_s14 + $0x30] sm:$0xff] %v6566_v49  ;;  %v12945_v31 = vld [vmem:[#allocation33_spill] sm:$0xff] }
 0x443   : > { %v5884_v58 = vadd.f32 %v5876_v27, %v5843_v45  ;;  %v5885_v51 = vadd.f32 %v5877_v30, %v5844_v52  ;;  %v5918_v8 = vpop.permute.xlu1 %5917  ;;  %v5909_v7 = vadd.f32 %v5901_v17, %v11819_v16  ;;  %v5910_v37 = vadd.f32 %v5902_v43, %v11822_v59  ;;  %v12946_v43 = vld [vmem:[#allocation104_spill] sm:$0xff]  ;;  %v12947_v30 = vld [vmem:[#allocation45_spill] sm:$0xff] }
 0x444   : > { %v6089_v53 = vadd.f32 %v6080_v56, %v6079_v46 }
 0x445   : > { %v5905_v25 = vmul.f32 %v11849_v29, %v5884_v58  ;;  %v5906_v34 = vmul.f32 %v11852_v63, %v5885_v51 }
 0x446   : > { %6090 = vadd.xlane.f32.xlu0 %v6089_v53 }
 0x447   : > { %v5922_v23 = vpop.permute.xlu1 %5921  ;;  %v5913_v26 = vadd.f32 %v5905_v25, %v11829_v39  ;;  %v5914_v48 = vadd.f32 %v5906_v34, %v11832_v41 }
 0x44b   : > { %v5926_v33 = vpop.permute.xlu1 %5925 }
 0x44c   : > { %v5933_v16 = vsel %vm5931_vm7, %v5918_v8, %v5926_v33  ;;  %v5937_v59 = vsel %vm5931_vm7, %v5926_v33, %v5918_v8 }
 0x44d   : > { %v5991_v29 = vmul.f32 %v11866_v21, %v5933_v16  ;;  %v5992_v63 = vmul.f32 %v11866_v21, %v5937_v59 }
 0x44f   : > { %v5930_v35 = vpop.permute.xlu1 %5929 }
 0x450   : > { %v5935_v0 = vsel %vm5931_vm7, %v5922_v23, %v5930_v35  ;;  %v5939_v38 = vsel %vm5931_vm7, %v5930_v35, %v5922_v23 }
 0x451   : > { %v5995_v21 = vmul.f32 %v11878_v42, %v5935_v0  ;;  %v5996_v10 = vmul.f32 %v11878_v42, %v5939_v38  ;;  %v12944_v42 = vld [vmem:[#allocation88_spill] sm:$0xff] }
 0x453   : > { %v5943_v15 = vpop.permute.xlu1 %5942 }
 0x457   : > { %v5947_v4 = vpop.permute.xlu1 %5946 }
 0x45b   : > { %v5951_v32 = vpop.permute.xlu1 %5950 }
 0x45c   : > { %v5957_v39 = vsel %vm5931_vm7, %v5943_v15, %v5951_v32  ;;  %v5961_v41 = vsel %vm5931_vm7, %v5951_v32, %v5943_v15 }
 0x45d   : > { %v6024_v44 = vmul.f32 %v11884_v22, %v5957_v39  ;;  %v6025_v19 = vmul.f32 %v11884_v22, %v5961_v41 }
 0x45f   : > { %v6032_v36 = vadd.f32 %v6024_v44, %v5991_v29  ;;  %v6033_v55 = vadd.f32 %v6025_v19, %v5992_v63  ;;  %v5955_v40 = vpop.permute.xlu1 %5954 }
 0x460   : > { %v5959_v28 = vsel %vm5931_vm7, %v5947_v4, %v5955_v40  ;;  %v5963_v3 = vsel %vm5931_vm7, %v5955_v40, %v5947_v4 }
 0x461   : > { %v6053_v5 = vmul.f32 %v11899_v47, %v6032_v36  ;;  %v6054_v6 = vmul.f32 %v11902_v13, %v6033_v55  ;;  %v6028_v22 = vmul.f32 %v11888_v11, %v5959_v28  ;;  %v6029_v45 = vmul.f32 %v11888_v11, %v5963_v3 }
 0x463   : > { %v6061_v62 = vadd.f32 %v6053_v5, %v5909_v7  ;;  %v6062_v20 = vadd.f32 %v6054_v6, %v5910_v37  ;;  %v6036_v50 = vadd.f32 %v6028_v22, %v5995_v21  ;;  %v6037_v14 = vadd.f32 %v6029_v45, %v5996_v10 }
 0x465   : > { %v6069_v12 = vadd.f32 %v6061_v62, %v12944_v42  ;;  %v6070_v18 = vadd.f32 %v6062_v20, %v12945_v31  ;;  %v6565_v1 = vpack.c.bf16 %v6062_v20, %v6061_v62  ;;  %v6057_v61 = vmul.f32 %v11899_v47, %v6036_v50 }
 0x466   : > { %v6058_v52 = vmul.f32 %v11902_v13, %v6037_v14 }
 0x467   : > { %v6077_v54 = vadd.f32 %v6069_v12, %v11776_v57  ;;  %v6078_v9 = vadd.f32 %v6070_v18, %v11781_v60  ;;  %6181 = vst [vmem:[%s11001_s14 + $0x28] sm:$0xff] %v6565_v1  ;;  %v6065_v11 = vadd.f32 %v6057_v61, %v5913_v26 }
 0x468   : > { %v6066_v49 = vadd.f32 %v6058_v52, %v5914_v48 }
 0x469   : > { %v6086_v17 = vadd.f32 %v6078_v9, %v6077_v54  ;;  %v6073_v27 = vadd.f32 %v6065_v11, %v12946_v43 }
 0x46a   : > { %v6074_v46 = vadd.f32 %v6066_v49, %v12947_v30  ;;  %v6567_v56 = vpack.c.bf16 %v6066_v49, %v6065_v11 }
 0x46b   : > { %v6081_v58 = vadd.f32 %v6073_v27, %v11794_v2  ;;  %6087 = vadd.xlane.f32.xlu1 %v6086_v17 }
 0x46c   : > { %v6082_v47 = vadd.f32 %v6074_v46, %v11802_v24  ;;  %6183 = vst [vmem:[%s11001_s14 + $0x38] sm:$0xff] %v6567_v56 }
 0x46e   : > { %v6092_v13 = vadd.f32 %v6082_v47, %v6081_v58 }
 0x470   : > { %6093 = vadd.xlane.f32.xlu0 %v6092_v13 }
 0x4cd   : > { %v6085_v57 = vpop.xlane.xlu0 %6084 }
 0x4ce   : > { %v6095_v60 = vmul.f32 0.00390625, %v6085_v57 }
 0x4d0   : > { %6100 = vst.msk [vmem:[%s399_s12] sm:$0xff] %vm6099_vm11, %v6095_v60 }
 0x4d3   : > { %v6091_v51 = vpop.xlane.xlu0 %6090 }
 0x4d4   : > { %v6097_v8 = vmul.f32 0.00390625, %v6091_v51 }
 0x4d6   : > { %6102 = vst.msk [vmem:[%s399_s12 + $0x10] sm:$0xff] %vm6099_vm11, %v6097_v8 }
 0x4f8   : > { %v6088_v7 = vpop.xlane.xlu1 %6087 }
 0x4f9   : > { %v6096_v2 = vmul.f32 0.00390625, %v6088_v7 }
 0x4fb   : > { %6101 = vst.msk [vmem:[%s399_s12 + $0x8] sm:$0xff] %vm6099_vm11, %v6096_v2 }
 0x4fd   : > { %v6094_v37 = vpop.xlane.xlu0 %6093 }
 0x4fe   : > { %v6098_v24 = vmul.f32 0.00390625, %v6094_v37 }
 0x500   : > { %6103 = vst.msk [vmem:[%s399_s12 + $0x18] sm:$0xff] %vm6099_vm11, %v6098_v24 }
 0x501 PF: > { %s22_s17 = sadd.s32 1, %s6756_s17  }
 0x502   : > { %p19_p4 = scmp.ge.s32.totalorder %s22_s17, 4  }
 0x504   :  { %21 = sbr.rel (!%p19_p4) target bundleno = 1 (0x1), region = 136 }

</bundles_post_ra>
